<compile_context>
chip_gen: v7x
topology: tpu7x:2x2x1
jax: 0.10.0
libtpu: 0.0.40
codegen_flags: <defaults>
</compile_context>

<pallas_src>
import jax
import jax.numpy as jnp
from jax import lax
from jax.experimental import pallas as pl
from jax.experimental.pallas import tpu as pltpu

HIDDEN = 150        # hidden_layer_size in the PyTorch module
HIDDEN_PAD = 256    # per-gate padded width (multiple of 128)


def _lstm_cell(gates, c, hp):
    """PyTorch LSTMCell gate math; gate order [i, f, g, o] along the 4*hp axis."""
    i_g = jax.nn.sigmoid(gates[:, 0 * hp:1 * hp])
    f_g = jax.nn.sigmoid(gates[:, 1 * hp:2 * hp])
    g_g = jnp.tanh(gates[:, 2 * hp:3 * hp])
    o_g = jax.nn.sigmoid(gates[:, 3 * hp:4 * hp])
    c_new = f_g * c + i_g * g_g
    h_new = o_g * jnp.tanh(c_new)
    return h_new, c_new


def _lstm_kernel(x_ref, w_ih_ref, w_hh_ref, b_ref, w_comb_ref, bias_fut_ref,
                 w_lin_ref, b_lin_ref, out_ref, h_scratch):
    """Runs the whole T + future recurrence inside one kernel invocation.

    x_ref      : (T, B, 1)      raw inputs, time-major
    w_ih_ref   : (1, 4*HP)      input->gates weights (padded)
    w_hh_ref   : (HP, 4*HP)     recurrent weights (padded)
    b_ref      : (1, 4*HP)      b_ih + b_hh (padded)
    w_comb_ref : (HP, 4*HP)     w_hh + w_lin ⊗ w_ih (phase-2 head fold)
    bias_fut_ref:(1, 4*HP)      b + b_lin * w_ih   (phase-2 head fold)
    w_lin_ref  : (1, HP)        Linear(HP -> 1) weights as a row (padded)
    b_lin_ref  : (1, 1)         Linear bias
    out_ref    : (n_steps, B)   predictions, time-major (wrapper transposes)
    h_scratch  : (n_steps, B, HP) VMEM — h_t per step (consumed only in epilogue)
    """
    T = x_ref.shape[0]
    n_steps, B = out_ref.shape
    HP = w_hh_ref.shape[0]
    future = n_steps - T

    # Small loop-invariant operands hoisted out of the time loops.
    # (w_hh / w_comb stay in VMEM and are read at the dot site — far larger
    #  than the vreg file, hoisting their load would just force spills.)
    w_ih = w_ih_ref[...]        # (1, 4*HP), zero in padded lanes
    bias = b_ref[...]           # (1, 4*HP), zero in padded lanes

    # ---- phase 1: consume the input sequence --------------------------------
    # Per-step serial chain: h @ w_hh  ->  gate nonlinearities.  The x-side
    # contribution is h-independent (overlaps with the matmul) and the only
    # per-step store is a sublane-row write of h_t with no in-loop consumer.
    def body_in(t, carry):
        h, c = carry
        x_t = x_ref[t]                                             # (B, 1)
        gates = (x_t * w_ih + bias
                 + jnp.dot(h, w_hh_ref[...],
                           preferred_element_type=jnp.float32))    # (B, 4*HP)
        h, c = _lstm_cell(gates, c, HP)
        h_scratch[t] = h
        return h, c

    init = (jnp.zeros((B, HP), jnp.float32),   # h_0
            jnp.zeros((B, HP), jnp.float32))   # c_0
    h, c = lax.fori_loop(0, T, body_in, init,
                         unroll=(True if T <= 16 else 4))

    # ---- phase 2: autoregressive "future" steps ------------------------------
    # Head folded into w_comb / bias_fut => no dependence on the previous
    # prediction; per-step cost is matmul + gate nonlinearities only.
    if future > 0:
        bias_fut = bias_fut_ref[...]           # (1, 4*HP)

        def body_fut(j, carry):
            h, c = carry
            gates = bias_fut + jnp.dot(h, w_comb_ref[...],
                                       preferred_element_type=jnp.float32)
            h, c = _lstm_cell(gates, c, HP)
            h_scratch[T + j] = h
            return h, c

        lax.fori_loop(0, future, body_fut, (h, c),
                      unroll=(True if future <= 16 else 4))

    # ---- epilogue: all heads in one dense pass, one lane-dense store --------
    # Linear(HP -> 1) as a batched VPU multiply + lane reduction over the
    # whole (n_steps, B, HP) h history (padded lanes of h and w_lin are 0,
    # so the reduction is exact).
    h_all = h_scratch[...]                                 # (n_steps, B, HP)
    w_lin = w_lin_ref[...]                                 # (1, HP)
    preds = jnp.sum(h_all * w_lin[None, :, :], axis=-1) + b_lin_ref[...]
    out_ref[...] = preds                                   # (n_steps, B)


def _pad_gate_cols(a, h, hp):
    """(rows, 4*h) -> (rows, 4*hp): zero-pad each gate block to width hp."""
    rows = a.shape[0]
    a4 = a.reshape(rows, 4, h)
    a4 = jnp.pad(a4, ((0, 0), (0, 0), (0, hp - h)))
    return a4.reshape(rows, 4 * hp)


def lstm_predictor_forward(x, params, future=0):
    """x: (B, T) float32. Returns (B, T + future) float32."""
    B, T = x.shape
    H, HP = HIDDEN, HIDDEN_PAD
    n_steps = T + future
    x = x.astype(jnp.float32)

    # ---- pad weights so every gate block is 128-lane aligned ----------------
    w_ih_p = _pad_gate_cols(params["w_ih"], H, HP)                   # (1, 4HP)
    w_hh_p = _pad_gate_cols(params["w_hh"], H, HP)                   # (H, 4HP)
    w_hh_p = jnp.pad(w_hh_p, ((0, HP - H), (0, 0)))                  # (HP, 4HP)
    b_p = _pad_gate_cols(params["b"], H, HP)                         # (1, 4HP)
    w_lin_col = jnp.pad(params["w_lin"].astype(jnp.float32),
                        ((0, HP - H), (0, 0)))                       # (HP, 1)
    w_lin_row = w_lin_col.T                                          # (1, HP)
    b_lin = params["b_lin"].astype(jnp.float32)                      # (1, 1)

    # ---- phase-2 head fold (rank-1 update + bias) ----------------------------
    # In the autoregressive phase x_t = h_{t-1} @ w_lin + b_lin, so
    #   gates = h @ (w_hh + w_lin ⊗ w_ih) + (b + b_lin * w_ih).
    # Padded rows/cols of the rank-1 term are zero, so padding stays inert.
    w_comb_p = w_hh_p + w_lin_col @ w_ih_p                           # (HP, 4HP)
    bias_fut_p = b_p + b_lin[0, 0] * w_ih_p                          # (1, 4HP)

    # Raw input, time-major: per-step read is a sublane-indexed row.
    x_tm = x.T[:, :, None]                                           # (T, B, 1)

    full = lambda shape: pl.BlockSpec(shape, lambda i, s=shape: (0,) * len(s))

    out_tm = pl.pallas_call(
        _lstm_kernel,
        out_shape=jax.ShapeDtypeStruct((n_steps, B), jnp.float32),
        grid_spec=pltpu.PrefetchScalarGridSpec(
            num_scalar_prefetch=0,
            grid=(1,),                       # recurrence lives inside the kernel
            in_specs=[
                full((T, B, 1)),             # x (raw, time-major)
                full((1, 4 * HP)),           # w_ih (padded)
                full((HP, 4 * HP)),          # w_hh (padded)
                full((1, 4 * HP)),           # b    (padded)
                full((HP, 4 * HP)),          # w_comb  (phase-2 fold)
                full((1, 4 * HP)),           # bias_fut (phase-2 fold)
                full((1, HP)),               # w_lin (padded, row layout)
                full((1, 1)),                # b_lin
            ],
            out_specs=full((n_steps, B)),    # time-major, single dense store
            scratch_shapes=[
                pltpu.VMEM((n_steps, B, HP), jnp.float32),   # h_t history
            ],
        ),
        compiler_params=pltpu.CompilerParams(
            dimension_semantics=("arbitrary",)),
    )(x_tm, w_ih_p, w_hh_p, b_p, w_comb_p, bias_fut_p, w_lin_row, b_lin)

    return out_tm.T                                                  # (B, n_steps)


def init_params(key):
    """Deterministic init matching PyTorch shapes: LSTMCell(1, H), Linear(H, 1)."""
    H = HIDDEN
    k = jax.random.split(key, 6)
    bound = 1.0 / jnp.sqrt(jnp.float32(H))
    u = lambda kk, shape: jax.random.uniform(kk, shape, jnp.float32, -bound, bound)
    w_ih = u(k[0], (4 * H, 1))     # PyTorch weight_ih
    w_hh = u(k[1], (4 * H, H))     # PyTorch weight_hh
    b_ih = u(k[2], (4 * H,))
    b_hh = u(k[3], (4 * H,))
    w_l = u(k[4], (1, H))          # PyTorch linear.weight
    b_l = u(k[5], (1,))
    return {
        "w_ih": w_ih.T,                       # (1, 4H)
        "w_hh": w_hh.T,                       # (H, 4H)
        "b": (b_ih + b_hh).reshape(1, 4 * H),
        "w_lin": w_l.T,                       # (H, 1)
        "b_lin": b_l.reshape(1, 1),
    }


def _reference_forward(x, params, future=0):
    """Pure-JAX reference of the PyTorch forward (float32, unpadded)."""
    B, T = x.shape
    H = HIDDEN
    h = jnp.zeros((B, H), jnp.float32)
    c = jnp.zeros((B, H), jnp.float32)
    outs = []
    out = jnp.zeros((B, 1), jnp.float32)
    for t in range(T + future):
        x_t = x[:, t:t + 1] if t < T else out
        gates = x_t @ params["w_ih"] + h @ params["w_hh"] + params["b"]
        i_g = jax.nn.sigmoid(gates[:, 0 * H:1 * H])
        f_g = jax.nn.sigmoid(gates[:, 1 * H:2 * H])
        g_g = jnp.tanh(gates[:, 2 * H:3 * H])
        o_g = jax.nn.sigmoid(gates[:, 3 * H:4 * H])
        c = f_g * c + i_g * g_g
        h = o_g * jnp.tanh(c)
        out = h @ params["w_lin"] + params["b_lin"]
        outs.append(out)
    return jnp.concatenate(outs, axis=1)  # (B, T + future)


if __name__ == "__main__":
    key = jax.random.PRNGKey(0)
    pkey, xkey = jax.random.split(key)
    params = init_params(pkey)

    B, T, FUTURE = 2, 8, 2
    x = jax.random.normal(xkey, (B, T), jnp.float32)

    out = lstm_predictor_forward(x, params, future=FUTURE)
    out = jax.block_until_ready(out)

    ref = _reference_forward(x, params, future=FUTURE)
    assert out.shape == (B, T + FUTURE)
    assert jnp.allclose(out, ref, atol=1e-4, rtol=1e-4), (
        f"max abs err {jnp.max(jnp.abs(out - ref))}")

    print("KERNEL_OK")
</pallas_src>

<mosaic_0001>
module attributes {stable_mosaic.version = 11 : i64} {
  func.func @_lstm_kernel(%arg0: i32, %arg1: memref<8x2x1xf32, #tpu.memory_space<vmem>>, %arg2: memref<1x1024xf32, #tpu.memory_space<vmem>>, %arg3: memref<256x1024xf32, #tpu.memory_space<vmem>>, %arg4: memref<1x1024xf32, #tpu.memory_space<vmem>>, %arg5: memref<256x1024xf32, #tpu.memory_space<vmem>>, %arg6: memref<1x1024xf32, #tpu.memory_space<vmem>>, %arg7: memref<1x256xf32, #tpu.memory_space<vmem>>, %arg8: memref<1x1xf32, #tpu.memory_space<vmem>>, %arg9: memref<10x2xf32, #tpu.memory_space<vmem>>, %arg10: memref<10x2x256xf32, #tpu.memory_space<vmem>>) attributes {dimension_semantics = [#tpu.dimension_semantics<arbitrary>], iteration_bounds = array<i64: 1>, scalar_prefetch = 0 : i64, scratch_operands = 1 : i64, tpu.core_type = #tpu.core_type<tc>, window_params = [{pipeline_mode = #tpu.pipeline_mode<synchronous>, transform_indices = @transform_0, window_bounds = array<i64: 8, 2, 1>}, {pipeline_mode = #tpu.pipeline_mode<synchronous>, transform_indices = @transform_1, window_bounds = array<i64: 1, 1024>}, {pipeline_mode = #tpu.pipeline_mode<synchronous>, transform_indices = @transform_2, window_bounds = array<i64: 256, 1024>}, {pipeline_mode = #tpu.pipeline_mode<synchronous>, transform_indices = @transform_3, window_bounds = array<i64: 1, 1024>}, {pipeline_mode = #tpu.pipeline_mode<synchronous>, transform_indices = @transform_4, window_bounds = array<i64: 256, 1024>}, {pipeline_mode = #tpu.pipeline_mode<synchronous>, transform_indices = @transform_5, window_bounds = array<i64: 1, 1024>}, {pipeline_mode = #tpu.pipeline_mode<synchronous>, transform_indices = @transform_6, window_bounds = array<i64: 1, 256>}, {pipeline_mode = #tpu.pipeline_mode<synchronous>, transform_indices = @transform_7, window_bounds = array<i64: 1, 1>}, {pipeline_mode = #tpu.pipeline_mode<synchronous>, transform_indices = @transform_8, window_bounds = array<i64: 10, 2>}]} {
    %c0 = arith.constant 0 : index
    %c0_0 = arith.constant 0 : index
    %0 = vector.load %arg2[%c0, %c0_0] : memref<1x1024xf32, #tpu.memory_space<vmem>>, vector<1x1024xf32>
    %c0_1 = arith.constant 0 : index
    %c0_2 = arith.constant 0 : index
    %1 = vector.load %arg4[%c0_1, %c0_2] : memref<1x1024xf32, #tpu.memory_space<vmem>>, vector<1x1024xf32>
    %cst = arith.constant 0.000000e+00 : f32
    %2 = vector.broadcast %cst : f32 to vector<2x256xf32>
    %cst_3 = arith.constant 0.000000e+00 : f32
    %3 = vector.broadcast %cst_3 : f32 to vector<2x256xf32>
    %c0_i32 = arith.constant 0 : i32
    %4 = arith.index_cast %c0_i32 : i32 to index
    %c0_4 = arith.constant 0 : index
    %c0_5 = arith.constant 0 : index
    %5 = vector.load %arg1[%4, %c0_4, %c0_5] : memref<8x2x1xf32, #tpu.memory_space<vmem>>, vector<1x2x1xf32>
    %6 = vector.shape_cast %5 : vector<1x2x1xf32> to vector<2x1xf32>
    %7 = vector.broadcast %6 : vector<2x1xf32> to vector<2x1024xf32>
    %8 = vector.broadcast %0 : vector<1x1024xf32> to vector<2x1024xf32>
    %9 = arith.mulf %7, %8 : vector<2x1024xf32>
    %10 = vector.broadcast %1 : vector<1x1024xf32> to vector<2x1024xf32>
    %11 = arith.addf %9, %10 : vector<2x1024xf32>
    %c0_6 = arith.constant 0 : index
    %c0_7 = arith.constant 0 : index
    %12 = vector.load %arg3[%c0_6, %c0_7] : memref<256x1024xf32, #tpu.memory_space<vmem>>, vector<256x1024xf32>
    %cst_8 = arith.constant dense<0.000000e+00> : vector<2x1024xf32>
    %13 = tpu.matmul %2, %12, %cst_8 {dimension_numbers = #tpu.dot_dimension_numbers<[1], [0], [0], [1], [0, 0, 1, 1], [], []>} : vector<2x256xf32>, vector<256x1024xf32>, vector<2x1024xf32> -> vector<2x1024xf32>
    %14 = arith.addf %11, %13 : vector<2x1024xf32>
    %15 = vector.extract_strided_slice %14 {offsets = [0, 0], sizes = [2, 256], strides = [1, 1]} : vector<2x1024xf32> to vector<2x256xf32>
    %16 = arith.negf %15 : vector<2x256xf32>
    %17 = math.exp %16 : vector<2x256xf32>
    %cst_9 = arith.constant 1.000000e+00 : f32
    %18 = vector.broadcast %cst_9 : f32 to vector<2x256xf32>
    %19 = arith.addf %18, %17 : vector<2x256xf32>
    %20 = arith.divf %18, %19 : vector<2x256xf32>
    %21 = vector.extract_strided_slice %14 {offsets = [0, 256], sizes = [2, 256], strides = [1, 1]} : vector<2x1024xf32> to vector<2x256xf32>
    %22 = arith.negf %21 : vector<2x256xf32>
    %23 = math.exp %22 : vector<2x256xf32>
    %cst_10 = arith.constant 1.000000e+00 : f32
    %24 = vector.broadcast %cst_10 : f32 to vector<2x256xf32>
    %25 = arith.addf %24, %23 : vector<2x256xf32>
    %26 = arith.divf %24, %25 : vector<2x256xf32>
    %27 = vector.extract_strided_slice %14 {offsets = [0, 512], sizes = [2, 256], strides = [1, 1]} : vector<2x1024xf32> to vector<2x256xf32>
    %28 = math.tanh %27 : vector<2x256xf32>
    %29 = vector.extract_strided_slice %14 {offsets = [0, 768], sizes = [2, 256], strides = [1, 1]} : vector<2x1024xf32> to vector<2x256xf32>
    %30 = arith.negf %29 : vector<2x256xf32>
    %31 = math.exp %30 : vector<2x256xf32>
    %cst_11 = arith.constant 1.000000e+00 : f32
    %32 = vector.broadcast %cst_11 : f32 to vector<2x256xf32>
    %33 = arith.addf %32, %31 : vector<2x256xf32>
    %34 = arith.divf %32, %33 : vector<2x256xf32>
    %35 = arith.mulf %26, %3 : vector<2x256xf32>
    %36 = arith.mulf %20, %28 : vector<2x256xf32>
    %37 = arith.addf %35, %36 : vector<2x256xf32>
    %38 = math.tanh %37 : vector<2x256xf32>
    %39 = arith.mulf %34, %38 : vector<2x256xf32>
    %40 = arith.index_cast %c0_i32 : i32 to index
    %c0_12 = arith.constant 0 : index
    %c0_13 = arith.constant 0 : index
    %41 = vector.load %arg10[%40, %c0_12, %c0_13] : memref<10x2x256xf32, #tpu.memory_space<vmem>>, vector<1x2x256xf32>
    %42 = vector.shape_cast %41 : vector<1x2x256xf32> to vector<2x256xf32>
    %43 = vector.shape_cast %39 : vector<2x256xf32> to vector<1x2x256xf32>
    tpu.vector_store %arg10[%40, %c0_12, %c0_13], %43 {strides = array<i32>} : memref<10x2x256xf32, #tpu.memory_space<vmem>>, vector<1x2x256xf32>,
    %c1_i32 = arith.constant 1 : i32
    %44 = arith.index_cast %c1_i32 : i32 to index
    %c0_14 = arith.constant 0 : index
    %c0_15 = arith.constant 0 : index
    %45 = vector.load %arg1[%44, %c0_14, %c0_15] : memref<8x2x1xf32, #tpu.memory_space<vmem>>, vector<1x2x1xf32>
    %46 = vector.shape_cast %45 : vector<1x2x1xf32> to vector<2x1xf32>
    %47 = vector.broadcast %46 : vector<2x1xf32> to vector<2x1024xf32>
    %48 = vector.broadcast %0 : vector<1x1024xf32> to vector<2x1024xf32>
    %49 = arith.mulf %47, %48 : vector<2x1024xf32>
    %50 = vector.broadcast %1 : vector<1x1024xf32> to vector<2x1024xf32>
    %51 = arith.addf %49, %50 : vector<2x1024xf32>
    %c0_16 = arith.constant 0 : index
    %c0_17 = arith.constant 0 : index
    %52 = vector.load %arg3[%c0_16, %c0_17] : memref<256x1024xf32, #tpu.memory_space<vmem>>, vector<256x1024xf32>
    %cst_18 = arith.constant dense<0.000000e+00> : vector<2x1024xf32>
    %53 = tpu.matmul %39, %52, %cst_18 {dimension_numbers = #tpu.dot_dimension_numbers<[1], [0], [0], [1], [0, 0, 1, 1], [], []>} : vector<2x256xf32>, vector<256x1024xf32>, vector<2x1024xf32> -> vector<2x1024xf32>
    %54 = arith.addf %51, %53 : vector<2x1024xf32>
    %55 = vector.extract_strided_slice %54 {offsets = [0, 0], sizes = [2, 256], strides = [1, 1]} : vector<2x1024xf32> to vector<2x256xf32>
    %56 = arith.negf %55 : vector<2x256xf32>
    %57 = math.exp %56 : vector<2x256xf32>
    %cst_19 = arith.constant 1.000000e+00 : f32
    %58 = vector.broadcast %cst_19 : f32 to vector<2x256xf32>
    %59 = arith.addf %58, %57 : vector<2x256xf32>
    %60 = arith.divf %58, %59 : vector<2x256xf32>
    %61 = vector.extract_strided_slice %54 {offsets = [0, 256], sizes = [2, 256], strides = [1, 1]} : vector<2x1024xf32> to vector<2x256xf32>
    %62 = arith.negf %61 : vector<2x256xf32>
    %63 = math.exp %62 : vector<2x256xf32>
    %cst_20 = arith.constant 1.000000e+00 : f32
    %64 = vector.broadcast %cst_20 : f32 to vector<2x256xf32>
    %65 = arith.addf %64, %63 : vector<2x256xf32>
    %66 = arith.divf %64, %65 : vector<2x256xf32>
    %67 = vector.extract_strided_slice %54 {offsets = [0, 512], sizes = [2, 256], strides = [1, 1]} : vector<2x1024xf32> to vector<2x256xf32>
    %68 = math.tanh %67 : vector<2x256xf32>
    %69 = vector.extract_strided_slice %54 {offsets = [0, 768], sizes = [2, 256], strides = [1, 1]} : vector<2x1024xf32> to vector<2x256xf32>
    %70 = arith.negf %69 : vector<2x256xf32>
    %71 = math.exp %70 : vector<2x256xf32>
    %cst_21 = arith.constant 1.000000e+00 : f32
    %72 = vector.broadcast %cst_21 : f32 to vector<2x256xf32>
    %73 = arith.addf %72, %71 : vector<2x256xf32>
    %74 = arith.divf %72, %73 : vector<2x256xf32>
    %75 = arith.mulf %66, %37 : vector<2x256xf32>
    %76 = arith.mulf %60, %68 : vector<2x256xf32>
    %77 = arith.addf %75, %76 : vector<2x256xf32>
    %78 = math.tanh %77 : vector<2x256xf32>
    %79 = arith.mulf %74, %78 : vector<2x256xf32>
    %80 = arith.index_cast %c1_i32 : i32 to index
    %c0_22 = arith.constant 0 : index
    %c0_23 = arith.constant 0 : index
    %81 = vector.load %arg10[%80, %c0_22, %c0_23] : memref<10x2x256xf32, #tpu.memory_space<vmem>>, vector<1x2x256xf32>
    %82 = vector.shape_cast %81 : vector<1x2x256xf32> to vector<2x256xf32>
    %83 = vector.shape_cast %79 : vector<2x256xf32> to vector<1x2x256xf32>
    tpu.vector_store %arg10[%80, %c0_22, %c0_23], %83 {strides = array<i32>} : memref<10x2x256xf32, #tpu.memory_space<vmem>>, vector<1x2x256xf32>,
    %c2_i32 = arith.constant 2 : i32
    %84 = arith.index_cast %c2_i32 : i32 to index
    %c0_24 = arith.constant 0 : index
    %c0_25 = arith.constant 0 : index
    %85 = vector.load %arg1[%84, %c0_24, %c0_25] : memref<8x2x1xf32, #tpu.memory_space<vmem>>, vector<1x2x1xf32>
    %86 = vector.shape_cast %85 : vector<1x2x1xf32> to vector<2x1xf32>
    %87 = vector.broadcast %86 : vector<2x1xf32> to vector<2x1024xf32>
    %88 = vector.broadcast %0 : vector<1x1024xf32> to vector<2x1024xf32>
    %89 = arith.mulf %87, %88 : vector<2x1024xf32>
    %90 = vector.broadcast %1 : vector<1x1024xf32> to vector<2x1024xf32>
    %91 = arith.addf %89, %90 : vector<2x1024xf32>
    %c0_26 = arith.constant 0 : index
    %c0_27 = arith.constant 0 : index
    %92 = vector.load %arg3[%c0_26, %c0_27] : memref<256x1024xf32, #tpu.memory_space<vmem>>, vector<256x1024xf32>
    %cst_28 = arith.constant dense<0.000000e+00> : vector<2x1024xf32>
    %93 = tpu.matmul %79, %92, %cst_28 {dimension_numbers = #tpu.dot_dimension_numbers<[1], [0], [0], [1], [0, 0, 1, 1], [], []>} : vector<2x256xf32>, vector<256x1024xf32>, vector<2x1024xf32> -> vector<2x1024xf32>
    %94 = arith.addf %91, %93 : vector<2x1024xf32>
    %95 = vector.extract_strided_slice %94 {offsets = [0, 0], sizes = [2, 256], strides = [1, 1]} : vector<2x1024xf32> to vector<2x256xf32>
    %96 = arith.negf %95 : vector<2x256xf32>
    %97 = math.exp %96 : vector<2x256xf32>
    %cst_29 = arith.constant 1.000000e+00 : f32
    %98 = vector.broadcast %cst_29 : f32 to vector<2x256xf32>
    %99 = arith.addf %98, %97 : vector<2x256xf32>
    %100 = arith.divf %98, %99 : vector<2x256xf32>
    %101 = vector.extract_strided_slice %94 {offsets = [0, 256], sizes = [2, 256], strides = [1, 1]} : vector<2x1024xf32> to vector<2x256xf32>
    %102 = arith.negf %101 : vector<2x256xf32>
    %103 = math.exp %102 : vector<2x256xf32>
    %cst_30 = arith.constant 1.000000e+00 : f32
    %104 = vector.broadcast %cst_30 : f32 to vector<2x256xf32>
    %105 = arith.addf %104, %103 : vector<2x256xf32>
    %106 = arith.divf %104, %105 : vector<2x256xf32>
    %107 = vector.extract_strided_slice %94 {offsets = [0, 512], sizes = [2, 256], strides = [1, 1]} : vector<2x1024xf32> to vector<2x256xf32>
    %108 = math.tanh %107 : vector<2x256xf32>
    %109 = vector.extract_strided_slice %94 {offsets = [0, 768], sizes = [2, 256], strides = [1, 1]} : vector<2x1024xf32> to vector<2x256xf32>
    %110 = arith.negf %109 : vector<2x256xf32>
    %111 = math.exp %110 : vector<2x256xf32>
    %cst_31 = arith.constant 1.000000e+00 : f32
    %112 = vector.broadcast %cst_31 : f32 to vector<2x256xf32>
    %113 = arith.addf %112, %111 : vector<2x256xf32>
    %114 = arith.divf %112, %113 : vector<2x256xf32>
    %115 = arith.mulf %106, %77 : vector<2x256xf32>
    %116 = arith.mulf %100, %108 : vector<2x256xf32>
    %117 = arith.addf %115, %116 : vector<2x256xf32>
    %118 = math.tanh %117 : vector<2x256xf32>
    %119 = arith.mulf %114, %118 : vector<2x256xf32>
    %120 = arith.index_cast %c2_i32 : i32 to index
    %c0_32 = arith.constant 0 : index
    %c0_33 = arith.constant 0 : index
    %121 = vector.load %arg10[%120, %c0_32, %c0_33] : memref<10x2x256xf32, #tpu.memory_space<vmem>>, vector<1x2x256xf32>
    %122 = vector.shape_cast %121 : vector<1x2x256xf32> to vector<2x256xf32>
    %123 = vector.shape_cast %119 : vector<2x256xf32> to vector<1x2x256xf32>
    tpu.vector_store %arg10[%120, %c0_32, %c0_33], %123 {strides = array<i32>} : memref<10x2x256xf32, #tpu.memory_space<vmem>>, vector<1x2x256xf32>,
    %c3_i32 = arith.constant 3 : i32
    %124 = arith.index_cast %c3_i32 : i32 to index
    %c0_34 = arith.constant 0 : index
    %c0_35 = arith.constant 0 : index
    %125 = vector.load %arg1[%124, %c0_34, %c0_35] : memref<8x2x1xf32, #tpu.memory_space<vmem>>, vector<1x2x1xf32>
    %126 = vector.shape_cast %125 : vector<1x2x1xf32> to vector<2x1xf32>
    %127 = vector.broadcast %126 : vector<2x1xf32> to vector<2x1024xf32>
    %128 = vector.broadcast %0 : vector<1x1024xf32> to vector<2x1024xf32>
    %129 = arith.mulf %127, %128 : vector<2x1024xf32>
    %130 = vector.broadcast %1 : vector<1x1024xf32> to vector<2x1024xf32>
    %131 = arith.addf %129, %130 : vector<2x1024xf32>
    %c0_36 = arith.constant 0 : index
    %c0_37 = arith.constant 0 : index
    %132 = vector.load %arg3[%c0_36, %c0_37] : memref<256x1024xf32, #tpu.memory_space<vmem>>, vector<256x1024xf32>
    %cst_38 = arith.constant dense<0.000000e+00> : vector<2x1024xf32>
    %133 = tpu.matmul %119, %132, %cst_38 {dimension_numbers = #tpu.dot_dimension_numbers<[1], [0], [0], [1], [0, 0, 1, 1], [], []>} : vector<2x256xf32>, vector<256x1024xf32>, vector<2x1024xf32> -> vector<2x1024xf32>
    %134 = arith.addf %131, %133 : vector<2x1024xf32>
    %135 = vector.extract_strided_slice %134 {offsets = [0, 0], sizes = [2, 256], strides = [1, 1]} : vector<2x1024xf32> to vector<2x256xf32>
    %136 = arith.negf %135 : vector<2x256xf32>
    %137 = math.exp %136 : vector<2x256xf32>
    %cst_39 = arith.constant 1.000000e+00 : f32
    %138 = vector.broadcast %cst_39 : f32 to vector<2x256xf32>
    %139 = arith.addf %138, %137 : vector<2x256xf32>
    %140 = arith.divf %138, %139 : vector<2x256xf32>
    %141 = vector.extract_strided_slice %134 {offsets = [0, 256], sizes = [2, 256], strides = [1, 1]} : vector<2x1024xf32> to vector<2x256xf32>
    %142 = arith.negf %141 : vector<2x256xf32>
    %143 = math.exp %142 : vector<2x256xf32>
    %cst_40 = arith.constant 1.000000e+00 : f32
    %144 = vector.broadcast %cst_40 : f32 to vector<2x256xf32>
    %145 = arith.addf %144, %143 : vector<2x256xf32>
    %146 = arith.divf %144, %145 : vector<2x256xf32>
    %147 = vector.extract_strided_slice %134 {offsets = [0, 512], sizes = [2, 256], strides = [1, 1]} : vector<2x1024xf32> to vector<2x256xf32>
    %148 = math.tanh %147 : vector<2x256xf32>
    %149 = vector.extract_strided_slice %134 {offsets = [0, 768], sizes = [2, 256], strides = [1, 1]} : vector<2x1024xf32> to vector<2x256xf32>
    %150 = arith.negf %149 : vector<2x256xf32>
    %151 = math.exp %150 : vector<2x256xf32>
    %cst_41 = arith.constant 1.000000e+00 : f32
    %152 = vector.broadcast %cst_41 : f32 to vector<2x256xf32>
    %153 = arith.addf %152, %151 : vector<2x256xf32>
    %154 = arith.divf %152, %153 : vector<2x256xf32>
    %155 = arith.mulf %146, %117 : vector<2x256xf32>
    %156 = arith.mulf %140, %148 : vector<2x256xf32>
    %157 = arith.addf %155, %156 : vector<2x256xf32>
    %158 = math.tanh %157 : vector<2x256xf32>
    %159 = arith.mulf %154, %158 : vector<2x256xf32>
    %160 = arith.index_cast %c3_i32 : i32 to index
    %c0_42 = arith.constant 0 : index
    %c0_43 = arith.constant 0 : index
    %161 = vector.load %arg10[%160, %c0_42, %c0_43] : memref<10x2x256xf32, #tpu.memory_space<vmem>>, vector<1x2x256xf32>
    %162 = vector.shape_cast %161 : vector<1x2x256xf32> to vector<2x256xf32>
    %163 = vector.shape_cast %159 : vector<2x256xf32> to vector<1x2x256xf32>
    tpu.vector_store %arg10[%160, %c0_42, %c0_43], %163 {strides = array<i32>} : memref<10x2x256xf32, #tpu.memory_space<vmem>>, vector<1x2x256xf32>,
    %c4_i32 = arith.constant 4 : i32
    %164 = arith.index_cast %c4_i32 : i32 to index
    %c0_44 = arith.constant 0 : index
    %c0_45 = arith.constant 0 : index
    %165 = vector.load %arg1[%164, %c0_44, %c0_45] : memref<8x2x1xf32, #tpu.memory_space<vmem>>, vector<1x2x1xf32>
    %166 = vector.shape_cast %165 : vector<1x2x1xf32> to vector<2x1xf32>
    %167 = vector.broadcast %166 : vector<2x1xf32> to vector<2x1024xf32>
    %168 = vector.broadcast %0 : vector<1x1024xf32> to vector<2x1024xf32>
    %169 = arith.mulf %167, %168 : vector<2x1024xf32>
    %170 = vector.broadcast %1 : vector<1x1024xf32> to vector<2x1024xf32>
    %171 = arith.addf %169, %170 : vector<2x1024xf32>
    %c0_46 = arith.constant 0 : index
    %c0_47 = arith.constant 0 : index
    %172 = vector.load %arg3[%c0_46, %c0_47] : memref<256x1024xf32, #tpu.memory_space<vmem>>, vector<256x1024xf32>
    %cst_48 = arith.constant dense<0.000000e+00> : vector<2x1024xf32>
    %173 = tpu.matmul %159, %172, %cst_48 {dimension_numbers = #tpu.dot_dimension_numbers<[1], [0], [0], [1], [0, 0, 1, 1], [], []>} : vector<2x256xf32>, vector<256x1024xf32>, vector<2x1024xf32> -> vector<2x1024xf32>
    %174 = arith.addf %171, %173 : vector<2x1024xf32>
    %175 = vector.extract_strided_slice %174 {offsets = [0, 0], sizes = [2, 256], strides = [1, 1]} : vector<2x1024xf32> to vector<2x256xf32>
    %176 = arith.negf %175 : vector<2x256xf32>
    %177 = math.exp %176 : vector<2x256xf32>
    %cst_49 = arith.constant 1.000000e+00 : f32
    %178 = vector.broadcast %cst_49 : f32 to vector<2x256xf32>
    %179 = arith.addf %178, %177 : vector<2x256xf32>
    %180 = arith.divf %178, %179 : vector<2x256xf32>
    %181 = vector.extract_strided_slice %174 {offsets = [0, 256], sizes = [2, 256], strides = [1, 1]} : vector<2x1024xf32> to vector<2x256xf32>
    %182 = arith.negf %181 : vector<2x256xf32>
    %183 = math.exp %182 : vector<2x256xf32>
    %cst_50 = arith.constant 1.000000e+00 : f32
    %184 = vector.broadcast %cst_50 : f32 to vector<2x256xf32>
    %185 = arith.addf %184, %183 : vector<2x256xf32>
    %186 = arith.divf %184, %185 : vector<2x256xf32>
    %187 = vector.extract_strided_slice %174 {offsets = [0, 512], sizes = [2, 256], strides = [1, 1]} : vector<2x1024xf32> to vector<2x256xf32>
    %188 = math.tanh %187 : vector<2x256xf32>
    %189 = vector.extract_strided_slice %174 {offsets = [0, 768], sizes = [2, 256], strides = [1, 1]} : vector<2x1024xf32> to vector<2x256xf32>
    %190 = arith.negf %189 : vector<2x256xf32>
    %191 = math.exp %190 : vector<2x256xf32>
    %cst_51 = arith.constant 1.000000e+00 : f32
    %192 = vector.broadcast %cst_51 : f32 to vector<2x256xf32>
    %193 = arith.addf %192, %191 : vector<2x256xf32>
    %194 = arith.divf %192, %193 : vector<2x256xf32>
    %195 = arith.mulf %186, %157 : vector<2x256xf32>
    %196 = arith.mulf %180, %188 : vector<2x256xf32>
    %197 = arith.addf %195, %196 : vector<2x256xf32>
    %198 = math.tanh %197 : vector<2x256xf32>
    %199 = arith.mulf %194, %198 : vector<2x256xf32>
    %200 = arith.index_cast %c4_i32 : i32 to index
    %c0_52 = arith.constant 0 : index
    %c0_53 = arith.constant 0 : index
    %201 = vector.load %arg10[%200, %c0_52, %c0_53] : memref<10x2x256xf32, #tpu.memory_space<vmem>>, vector<1x2x256xf32>
    %202 = vector.shape_cast %201 : vector<1x2x256xf32> to vector<2x256xf32>
    %203 = vector.shape_cast %199 : vector<2x256xf32> to vector<1x2x256xf32>
    tpu.vector_store %arg10[%200, %c0_52, %c0_53], %203 {strides = array<i32>} : memref<10x2x256xf32, #tpu.memory_space<vmem>>, vector<1x2x256xf32>,
    %c5_i32 = arith.constant 5 : i32
    %204 = arith.index_cast %c5_i32 : i32 to index
    %c0_54 = arith.constant 0 : index
    %c0_55 = arith.constant 0 : index
    %205 = vector.load %arg1[%204, %c0_54, %c0_55] : memref<8x2x1xf32, #tpu.memory_space<vmem>>, vector<1x2x1xf32>
    %206 = vector.shape_cast %205 : vector<1x2x1xf32> to vector<2x1xf32>
    %207 = vector.broadcast %206 : vector<2x1xf32> to vector<2x1024xf32>
    %208 = vector.broadcast %0 : vector<1x1024xf32> to vector<2x1024xf32>
    %209 = arith.mulf %207, %208 : vector<2x1024xf32>
    %210 = vector.broadcast %1 : vector<1x1024xf32> to vector<2x1024xf32>
    %211 = arith.addf %209, %210 : vector<2x1024xf32>
    %c0_56 = arith.constant 0 : index
    %c0_57 = arith.constant 0 : index
    %212 = vector.load %arg3[%c0_56, %c0_57] : memref<256x1024xf32, #tpu.memory_space<vmem>>, vector<256x1024xf32>
    %cst_58 = arith.constant dense<0.000000e+00> : vector<2x1024xf32>
    %213 = tpu.matmul %199, %212, %cst_58 {dimension_numbers = #tpu.dot_dimension_numbers<[1], [0], [0], [1], [0, 0, 1, 1], [], []>} : vector<2x256xf32>, vector<256x1024xf32>, vector<2x1024xf32> -> vector<2x1024xf32>
    %214 = arith.addf %211, %213 : vector<2x1024xf32>
    %215 = vector.extract_strided_slice %214 {offsets = [0, 0], sizes = [2, 256], strides = [1, 1]} : vector<2x1024xf32> to vector<2x256xf32>
    %216 = arith.negf %215 : vector<2x256xf32>
    %217 = math.exp %216 : vector<2x256xf32>
    %cst_59 = arith.constant 1.000000e+00 : f32
    %218 = vector.broadcast %cst_59 : f32 to vector<2x256xf32>
    %219 = arith.addf %218, %217 : vector<2x256xf32>
    %220 = arith.divf %218, %219 : vector<2x256xf32>
    %221 = vector.extract_strided_slice %214 {offsets = [0, 256], sizes = [2, 256], strides = [1, 1]} : vector<2x1024xf32> to vector<2x256xf32>
    %222 = arith.negf %221 : vector<2x256xf32>
    %223 = math.exp %222 : vector<2x256xf32>
    %cst_60 = arith.constant 1.000000e+00 : f32
    %224 = vector.broadcast %cst_60 : f32 to vector<2x256xf32>
    %225 = arith.addf %224, %223 : vector<2x256xf32>
    %226 = arith.divf %224, %225 : vector<2x256xf32>
    %227 = vector.extract_strided_slice %214 {offsets = [0, 512], sizes = [2, 256], strides = [1, 1]} : vector<2x1024xf32> to vector<2x256xf32>
    %228 = math.tanh %227 : vector<2x256xf32>
    %229 = vector.extract_strided_slice %214 {offsets = [0, 768], sizes = [2, 256], strides = [1, 1]} : vector<2x1024xf32> to vector<2x256xf32>
    %230 = arith.negf %229 : vector<2x256xf32>
    %231 = math.exp %230 : vector<2x256xf32>
    %cst_61 = arith.constant 1.000000e+00 : f32
    %232 = vector.broadcast %cst_61 : f32 to vector<2x256xf32>
    %233 = arith.addf %232, %231 : vector<2x256xf32>
    %234 = arith.divf %232, %233 : vector<2x256xf32>
    %235 = arith.mulf %226, %197 : vector<2x256xf32>
    %236 = arith.mulf %220, %228 : vector<2x256xf32>
    %237 = arith.addf %235, %236 : vector<2x256xf32>
    %238 = math.tanh %237 : vector<2x256xf32>
    %239 = arith.mulf %234, %238 : vector<2x256xf32>
    %240 = arith.index_cast %c5_i32 : i32 to index
    %c0_62 = arith.constant 0 : index
    %c0_63 = arith.constant 0 : index
    %241 = vector.load %arg10[%240, %c0_62, %c0_63] : memref<10x2x256xf32, #tpu.memory_space<vmem>>, vector<1x2x256xf32>
    %242 = vector.shape_cast %241 : vector<1x2x256xf32> to vector<2x256xf32>
    %243 = vector.shape_cast %239 : vector<2x256xf32> to vector<1x2x256xf32>
    tpu.vector_store %arg10[%240, %c0_62, %c0_63], %243 {strides = array<i32>} : memref<10x2x256xf32, #tpu.memory_space<vmem>>, vector<1x2x256xf32>,
    %c6_i32 = arith.constant 6 : i32
    %244 = arith.index_cast %c6_i32 : i32 to index
    %c0_64 = arith.constant 0 : index
    %c0_65 = arith.constant 0 : index
    %245 = vector.load %arg1[%244, %c0_64, %c0_65] : memref<8x2x1xf32, #tpu.memory_space<vmem>>, vector<1x2x1xf32>
    %246 = vector.shape_cast %245 : vector<1x2x1xf32> to vector<2x1xf32>
    %247 = vector.broadcast %246 : vector<2x1xf32> to vector<2x1024xf32>
    %248 = vector.broadcast %0 : vector<1x1024xf32> to vector<2x1024xf32>
    %249 = arith.mulf %247, %248 : vector<2x1024xf32>
    %250 = vector.broadcast %1 : vector<1x1024xf32> to vector<2x1024xf32>
    %251 = arith.addf %249, %250 : vector<2x1024xf32>
    %c0_66 = arith.constant 0 : index
    %c0_67 = arith.constant 0 : index
    %252 = vector.load %arg3[%c0_66, %c0_67] : memref<256x1024xf32, #tpu.memory_space<vmem>>, vector<256x1024xf32>
    %cst_68 = arith.constant dense<0.000000e+00> : vector<2x1024xf32>
    %253 = tpu.matmul %239, %252, %cst_68 {dimension_numbers = #tpu.dot_dimension_numbers<[1], [0], [0], [1], [0, 0, 1, 1], [], []>} : vector<2x256xf32>, vector<256x1024xf32>, vector<2x1024xf32> -> vector<2x1024xf32>
    %254 = arith.addf %251, %253 : vector<2x1024xf32>
    %255 = vector.extract_strided_slice %254 {offsets = [0, 0], sizes = [2, 256], strides = [1, 1]} : vector<2x1024xf32> to vector<2x256xf32>
    %256 = arith.negf %255 : vector<2x256xf32>
    %257 = math.exp %256 : vector<2x256xf32>
    %cst_69 = arith.constant 1.000000e+00 : f32
    %258 = vector.broadcast %cst_69 : f32 to vector<2x256xf32>
    %259 = arith.addf %258, %257 : vector<2x256xf32>
    %260 = arith.divf %258, %259 : vector<2x256xf32>
    %261 = vector.extract_strided_slice %254 {offsets = [0, 256], sizes = [2, 256], strides = [1, 1]} : vector<2x1024xf32> to vector<2x256xf32>
    %262 = arith.negf %261 : vector<2x256xf32>
    %263 = math.exp %262 : vector<2x256xf32>
    %cst_70 = arith.constant 1.000000e+00 : f32
    %264 = vector.broadcast %cst_70 : f32 to vector<2x256xf32>
    %265 = arith.addf %264, %263 : vector<2x256xf32>
    %266 = arith.divf %264, %265 : vector<2x256xf32>
    %267 = vector.extract_strided_slice %254 {offsets = [0, 512], sizes = [2, 256], strides = [1, 1]} : vector<2x1024xf32> to vector<2x256xf32>
    %268 = math.tanh %267 : vector<2x256xf32>
    %269 = vector.extract_strided_slice %254 {offsets = [0, 768], sizes = [2, 256], strides = [1, 1]} : vector<2x1024xf32> to vector<2x256xf32>
    %270 = arith.negf %269 : vector<2x256xf32>
    %271 = math.exp %270 : vector<2x256xf32>
    %cst_71 = arith.constant 1.000000e+00 : f32
    %272 = vector.broadcast %cst_71 : f32 to vector<2x256xf32>
    %273 = arith.addf %272, %271 : vector<2x256xf32>
    %274 = arith.divf %272, %273 : vector<2x256xf32>
    %275 = arith.mulf %266, %237 : vector<2x256xf32>
    %276 = arith.mulf %260, %268 : vector<2x256xf32>
    %277 = arith.addf %275, %276 : vector<2x256xf32>
    %278 = math.tanh %277 : vector<2x256xf32>
    %279 = arith.mulf %274, %278 : vector<2x256xf32>
    %280 = arith.index_cast %c6_i32 : i32 to index
    %c0_72 = arith.constant 0 : index
    %c0_73 = arith.constant 0 : index
    %281 = vector.load %arg10[%280, %c0_72, %c0_73] : memref<10x2x256xf32, #tpu.memory_space<vmem>>, vector<1x2x256xf32>
    %282 = vector.shape_cast %281 : vector<1x2x256xf32> to vector<2x256xf32>
    %283 = vector.shape_cast %279 : vector<2x256xf32> to vector<1x2x256xf32>
    tpu.vector_store %arg10[%280, %c0_72, %c0_73], %283 {strides = array<i32>} : memref<10x2x256xf32, #tpu.memory_space<vmem>>, vector<1x2x256xf32>,
    %c7_i32 = arith.constant 7 : i32
    %284 = arith.index_cast %c7_i32 : i32 to index
    %c0_74 = arith.constant 0 : index
    %c0_75 = arith.constant 0 : index
    %285 = vector.load %arg1[%284, %c0_74, %c0_75] : memref<8x2x1xf32, #tpu.memory_space<vmem>>, vector<1x2x1xf32>
    %286 = vector.shape_cast %285 : vector<1x2x1xf32> to vector<2x1xf32>
    %287 = vector.broadcast %286 : vector<2x1xf32> to vector<2x1024xf32>
    %288 = vector.broadcast %0 : vector<1x1024xf32> to vector<2x1024xf32>
    %289 = arith.mulf %287, %288 : vector<2x1024xf32>
    %290 = vector.broadcast %1 : vector<1x1024xf32> to vector<2x1024xf32>
    %291 = arith.addf %289, %290 : vector<2x1024xf32>
    %c0_76 = arith.constant 0 : index
    %c0_77 = arith.constant 0 : index
    %292 = vector.load %arg3[%c0_76, %c0_77] : memref<256x1024xf32, #tpu.memory_space<vmem>>, vector<256x1024xf32>
    %cst_78 = arith.constant dense<0.000000e+00> : vector<2x1024xf32>
    %293 = tpu.matmul %279, %292, %cst_78 {dimension_numbers = #tpu.dot_dimension_numbers<[1], [0], [0], [1], [0, 0, 1, 1], [], []>} : vector<2x256xf32>, vector<256x1024xf32>, vector<2x1024xf32> -> vector<2x1024xf32>
    %294 = arith.addf %291, %293 : vector<2x1024xf32>
    %295 = vector.extract_strided_slice %294 {offsets = [0, 0], sizes = [2, 256], strides = [1, 1]} : vector<2x1024xf32> to vector<2x256xf32>
    %296 = arith.negf %295 : vector<2x256xf32>
    %297 = math.exp %296 : vector<2x256xf32>
    %cst_79 = arith.constant 1.000000e+00 : f32
    %298 = vector.broadcast %cst_79 : f32 to vector<2x256xf32>
    %299 = arith.addf %298, %297 : vector<2x256xf32>
    %300 = arith.divf %298, %299 : vector<2x256xf32>
    %301 = vector.extract_strided_slice %294 {offsets = [0, 256], sizes = [2, 256], strides = [1, 1]} : vector<2x1024xf32> to vector<2x256xf32>
    %302 = arith.negf %301 : vector<2x256xf32>
    %303 = math.exp %302 : vector<2x256xf32>
    %cst_80 = arith.constant 1.000000e+00 : f32
    %304 = vector.broadcast %cst_80 : f32 to vector<2x256xf32>
    %305 = arith.addf %304, %303 : vector<2x256xf32>
    %306 = arith.divf %304, %305 : vector<2x256xf32>
    %307 = vector.extract_strided_slice %294 {offsets = [0, 512], sizes = [2, 256], strides = [1, 1]} : vector<2x1024xf32> to vector<2x256xf32>
    %308 = math.tanh %307 : vector<2x256xf32>
    %309 = vector.extract_strided_slice %294 {offsets = [0, 768], sizes = [2, 256], strides = [1, 1]} : vector<2x1024xf32> to vector<2x256xf32>
    %310 = arith.negf %309 : vector<2x256xf32>
    %311 = math.exp %310 : vector<2x256xf32>
    %cst_81 = arith.constant 1.000000e+00 : f32
    %312 = vector.broadcast %cst_81 : f32 to vector<2x256xf32>
    %313 = arith.addf %312, %311 : vector<2x256xf32>
    %314 = arith.divf %312, %313 : vector<2x256xf32>
    %315 = arith.mulf %306, %277 : vector<2x256xf32>
    %316 = arith.mulf %300, %308 : vector<2x256xf32>
    %317 = arith.addf %315, %316 : vector<2x256xf32>
    %318 = math.tanh %317 : vector<2x256xf32>
    %319 = arith.mulf %314, %318 : vector<2x256xf32>
    %320 = arith.index_cast %c7_i32 : i32 to index
    %c0_82 = arith.constant 0 : index
    %c0_83 = arith.constant 0 : index
    %321 = vector.load %arg10[%320, %c0_82, %c0_83] : memref<10x2x256xf32, #tpu.memory_space<vmem>>, vector<1x2x256xf32>
    %322 = vector.shape_cast %321 : vector<1x2x256xf32> to vector<2x256xf32>
    %323 = vector.shape_cast %319 : vector<2x256xf32> to vector<1x2x256xf32>
    tpu.vector_store %arg10[%320, %c0_82, %c0_83], %323 {strides = array<i32>} : memref<10x2x256xf32, #tpu.memory_space<vmem>>, vector<1x2x256xf32>,
    %c8_i32 = arith.constant 8 : i32
    %c0_84 = arith.constant 0 : index
    %c0_85 = arith.constant 0 : index
    %324 = vector.load %arg6[%c0_84, %c0_85] : memref<1x1024xf32, #tpu.memory_space<vmem>>, vector<1x1024xf32>
    %c0_i32_86 = arith.constant 0 : i32
    %c0_87 = arith.constant 0 : index
    %c0_88 = arith.constant 0 : index
    %325 = vector.load %arg5[%c0_87, %c0_88] : memref<256x1024xf32, #tpu.memory_space<vmem>>, vector<256x1024xf32>
    %cst_89 = arith.constant dense<0.000000e+00> : vector<2x1024xf32>
    %326 = tpu.matmul %319, %325, %cst_89 {dimension_numbers = #tpu.dot_dimension_numbers<[1], [0], [0], [1], [0, 0, 1, 1], [], []>} : vector<2x256xf32>, vector<256x1024xf32>, vector<2x1024xf32> -> vector<2x1024xf32>
    %327 = vector.broadcast %324 : vector<1x1024xf32> to vector<2x1024xf32>
    %328 = arith.addf %327, %326 : vector<2x1024xf32>
    %329 = vector.extract_strided_slice %328 {offsets = [0, 0], sizes = [2, 256], strides = [1, 1]} : vector<2x1024xf32> to vector<2x256xf32>
    %330 = arith.negf %329 : vector<2x256xf32>
    %331 = math.exp %330 : vector<2x256xf32>
    %cst_90 = arith.constant 1.000000e+00 : f32
    %332 = vector.broadcast %cst_90 : f32 to vector<2x256xf32>
    %333 = arith.addf %332, %331 : vector<2x256xf32>
    %334 = arith.divf %332, %333 : vector<2x256xf32>
    %335 = vector.extract_strided_slice %328 {offsets = [0, 256], sizes = [2, 256], strides = [1, 1]} : vector<2x1024xf32> to vector<2x256xf32>
    %336 = arith.negf %335 : vector<2x256xf32>
    %337 = math.exp %336 : vector<2x256xf32>
    %cst_91 = arith.constant 1.000000e+00 : f32
    %338 = vector.broadcast %cst_91 : f32 to vector<2x256xf32>
    %339 = arith.addf %338, %337 : vector<2x256xf32>
    %340 = arith.divf %338, %339 : vector<2x256xf32>
    %341 = vector.extract_strided_slice %328 {offsets = [0, 512], sizes = [2, 256], strides = [1, 1]} : vector<2x1024xf32> to vector<2x256xf32>
    %342 = math.tanh %341 : vector<2x256xf32>
    %343 = vector.extract_strided_slice %328 {offsets = [0, 768], sizes = [2, 256], strides = [1, 1]} : vector<2x1024xf32> to vector<2x256xf32>
    %344 = arith.negf %343 : vector<2x256xf32>
    %345 = math.exp %344 : vector<2x256xf32>
    %cst_92 = arith.constant 1.000000e+00 : f32
    %346 = vector.broadcast %cst_92 : f32 to vector<2x256xf32>
    %347 = arith.addf %346, %345 : vector<2x256xf32>
    %348 = arith.divf %346, %347 : vector<2x256xf32>
    %349 = arith.mulf %340, %317 : vector<2x256xf32>
    %350 = arith.mulf %334, %342 : vector<2x256xf32>
    %351 = arith.addf %349, %350 : vector<2x256xf32>
    %352 = math.tanh %351 : vector<2x256xf32>
    %353 = arith.mulf %348, %352 : vector<2x256xf32>
    %c8_i32_93 = arith.constant 8 : i32
    %354 = arith.addi %c8_i32_93, %c0_i32_86 : i32
    %355 = arith.index_cast %354 : i32 to index
    %c0_94 = arith.constant 0 : index
    %c0_95 = arith.constant 0 : index
    %356 = vector.load %arg10[%355, %c0_94, %c0_95] : memref<10x2x256xf32, #tpu.memory_space<vmem>>, vector<1x2x256xf32>
    %357 = vector.shape_cast %356 : vector<1x2x256xf32> to vector<2x256xf32>
    %358 = vector.shape_cast %353 : vector<2x256xf32> to vector<1x2x256xf32>
    tpu.vector_store %arg10[%355, %c0_94, %c0_95], %358 {strides = array<i32>} : memref<10x2x256xf32, #tpu.memory_space<vmem>>, vector<1x2x256xf32>,
    %c1_i32_96 = arith.constant 1 : i32
    %c0_97 = arith.constant 0 : index
    %c0_98 = arith.constant 0 : index
    %359 = vector.load %arg5[%c0_97, %c0_98] : memref<256x1024xf32, #tpu.memory_space<vmem>>, vector<256x1024xf32>
    %cst_99 = arith.constant dense<0.000000e+00> : vector<2x1024xf32>
    %360 = tpu.matmul %353, %359, %cst_99 {dimension_numbers = #tpu.dot_dimension_numbers<[1], [0], [0], [1], [0, 0, 1, 1], [], []>} : vector<2x256xf32>, vector<256x1024xf32>, vector<2x1024xf32> -> vector<2x1024xf32>
    %361 = vector.broadcast %324 : vector<1x1024xf32> to vector<2x1024xf32>
    %362 = arith.addf %361, %360 : vector<2x1024xf32>
    %363 = vector.extract_strided_slice %362 {offsets = [0, 0], sizes = [2, 256], strides = [1, 1]} : vector<2x1024xf32> to vector<2x256xf32>
    %364 = arith.negf %363 : vector<2x256xf32>
    %365 = math.exp %364 : vector<2x256xf32>
    %cst_100 = arith.constant 1.000000e+00 : f32
    %366 = vector.broadcast %cst_100 : f32 to vector<2x256xf32>
    %367 = arith.addf %366, %365 : vector<2x256xf32>
    %368 = arith.divf %366, %367 : vector<2x256xf32>
    %369 = vector.extract_strided_slice %362 {offsets = [0, 256], sizes = [2, 256], strides = [1, 1]} : vector<2x1024xf32> to vector<2x256xf32>
    %370 = arith.negf %369 : vector<2x256xf32>
    %371 = math.exp %370 : vector<2x256xf32>
    %cst_101 = arith.constant 1.000000e+00 : f32
    %372 = vector.broadcast %cst_101 : f32 to vector<2x256xf32>
    %373 = arith.addf %372, %371 : vector<2x256xf32>
    %374 = arith.divf %372, %373 : vector<2x256xf32>
    %375 = vector.extract_strided_slice %362 {offsets = [0, 512], sizes = [2, 256], strides = [1, 1]} : vector<2x1024xf32> to vector<2x256xf32>
    %376 = math.tanh %375 : vector<2x256xf32>
    %377 = vector.extract_strided_slice %362 {offsets = [0, 768], sizes = [2, 256], strides = [1, 1]} : vector<2x1024xf32> to vector<2x256xf32>
    %378 = arith.negf %377 : vector<2x256xf32>
    %379 = math.exp %378 : vector<2x256xf32>
    %cst_102 = arith.constant 1.000000e+00 : f32
    %380 = vector.broadcast %cst_102 : f32 to vector<2x256xf32>
    %381 = arith.addf %380, %379 : vector<2x256xf32>
    %382 = arith.divf %380, %381 : vector<2x256xf32>
    %383 = arith.mulf %374, %351 : vector<2x256xf32>
    %384 = arith.mulf %368, %376 : vector<2x256xf32>
    %385 = arith.addf %383, %384 : vector<2x256xf32>
    %386 = math.tanh %385 : vector<2x256xf32>
    %387 = arith.mulf %382, %386 : vector<2x256xf32>
    %c8_i32_103 = arith.constant 8 : i32
    %388 = arith.addi %c8_i32_103, %c1_i32_96 : i32
    %389 = arith.index_cast %388 : i32 to index
    %c0_104 = arith.constant 0 : index
    %c0_105 = arith.constant 0 : index
    %390 = vector.load %arg10[%389, %c0_104, %c0_105] : memref<10x2x256xf32, #tpu.memory_space<vmem>>, vector<1x2x256xf32>
    %391 = vector.shape_cast %390 : vector<1x2x256xf32> to vector<2x256xf32>
    %392 = vector.shape_cast %387 : vector<2x256xf32> to vector<1x2x256xf32>
    tpu.vector_store %arg10[%389, %c0_104, %c0_105], %392 {strides = array<i32>} : memref<10x2x256xf32, #tpu.memory_space<vmem>>, vector<1x2x256xf32>,
    %c2_i32_106 = arith.constant 2 : i32
    %c0_107 = arith.constant 0 : index
    %c0_108 = arith.constant 0 : index
    %c0_109 = arith.constant 0 : index
    %393 = vector.load %arg10[%c0_107, %c0_108, %c0_109] : memref<10x2x256xf32, #tpu.memory_space<vmem>>, vector<10x2x256xf32>
    %c0_110 = arith.constant 0 : index
    %c0_111 = arith.constant 0 : index
    %394 = vector.load %arg7[%c0_110, %c0_111] : memref<1x256xf32, #tpu.memory_space<vmem>>, vector<1x256xf32>
    %395 = vector.shape_cast %394 : vector<1x256xf32> to vector<1x1x256xf32>
    %396 = vector.broadcast %395 : vector<1x1x256xf32> to vector<10x2x256xf32>
    %397 = arith.mulf %393, %396 : vector<10x2x256xf32>
    %cst_112 = arith.constant dense<0.000000e+00> : vector<10x2xf32>
    %398 = vector.multi_reduction <add>, %397, %cst_112 [2] : vector<10x2x256xf32> to vector<10x2xf32>
    %c0_113 = arith.constant 0 : index
    %c0_114 = arith.constant 0 : index
    %399 = vector.load %arg8[%c0_113, %c0_114] : memref<1x1xf32, #tpu.memory_space<vmem>>, vector<1x1xf32>
    %400 = vector.broadcast %399 : vector<1x1xf32> to vector<10x2xf32>
    %401 = arith.addf %398, %400 : vector<10x2xf32>
    %c0_115 = arith.constant 0 : index
    %c0_116 = arith.constant 0 : index
    %402 = vector.load %arg9[%c0_115, %c0_116] : memref<10x2xf32, #tpu.memory_space<vmem>>, vector<10x2xf32>
    tpu.vector_store %arg9[%c0_115, %c0_116], %401 {strides = array<i32>} : memref<10x2xf32, #tpu.memory_space<vmem>>, vector<10x2xf32>,
    return
  }
  func.func @transform_0(%arg0: i32) -> (i32, i32, i32) {
    %c0_i32 = arith.constant 0 : i32
    %c0_i32_0 = arith.constant 0 : i32
    %c0_i32_1 = arith.constant 0 : i32
    %c0_i32_2 = arith.constant 0 : i32
    return %c0_i32, %c0_i32_0, %c0_i32_1 : i32, i32, i32
  }
  func.func @transform_1(%arg0: i32) -> (i32, i32) {
    %c0_i32 = arith.constant 0 : i32
    %c0_i32_0 = arith.constant 0 : i32
    %c0_i32_1 = arith.constant 0 : i32
    return %c0_i32, %c0_i32_0 : i32, i32
  }
  func.func @transform_2(%arg0: i32) -> (i32, i32) {
    %c0_i32 = arith.constant 0 : i32
    %c0_i32_0 = arith.constant 0 : i32
    %c0_i32_1 = arith.constant 0 : i32
    return %c0_i32, %c0_i32_0 : i32, i32
  }
  func.func @transform_3(%arg0: i32) -> (i32, i32) {
    %c0_i32 = arith.constant 0 : i32
    %c0_i32_0 = arith.constant 0 : i32
    %c0_i32_1 = arith.constant 0 : i32
    return %c0_i32, %c0_i32_0 : i32, i32
  }
  func.func @transform_4(%arg0: i32) -> (i32, i32) {
    %c0_i32 = arith.constant 0 : i32
    %c0_i32_0 = arith.constant 0 : i32
    %c0_i32_1 = arith.constant 0 : i32
    return %c0_i32, %c0_i32_0 : i32, i32
  }
  func.func @transform_5(%arg0: i32) -> (i32, i32) {
    %c0_i32 = arith.constant 0 : i32
    %c0_i32_0 = arith.constant 0 : i32
    %c0_i32_1 = arith.constant 0 : i32
    return %c0_i32, %c0_i32_0 : i32, i32
  }
  func.func @transform_6(%arg0: i32) -> (i32, i32) {
    %c0_i32 = arith.constant 0 : i32
    %c0_i32_0 = arith.constant 0 : i32
    %c0_i32_1 = arith.constant 0 : i32
    return %c0_i32, %c0_i32_0 : i32, i32
  }
  func.func @transform_7(%arg0: i32) -> (i32, i32) {
    %c0_i32 = arith.constant 0 : i32
    %c0_i32_0 = arith.constant 0 : i32
    %c0_i32_1 = arith.constant 0 : i32
    return %c0_i32, %c0_i32_0 : i32, i32
  }
  func.func @transform_8(%arg0: i32) -> (i32, i32) {
    %c0_i32 = arith.constant 0 : i32
    %c0_i32_0 = arith.constant 0 : i32
    %c0_i32_1 = arith.constant 0 : i32
    return %c0_i32, %c0_i32_0 : i32, i32
  }
}

</mosaic_0001>

<bundles_post_ra>
// kernel: tpu_custom_call.1
= control target key start
LH: loop header
LB: loop body
LE: loop exit
PB: predicated region body
PF: predicated region fallthrough
CT: control target
= control target key end

     0   :  { %s10357_s0 = inlined_call_operand.vmem [shape: f32[8,2,1], index: 0, kind: input, shape index: {}]   ;;  %s10358_s1 = inlined_call_operand.vmem [shape: f32[1,1024], index: 1, kind: input, shape index: {}]   ;;  %s10359_s2 = inlined_call_operand.hbm [shape: f32[256,1024], index: 2, kind: input, shape index: {}]   ;;  %s10360_s3 = inlined_call_operand.vmem [shape: f32[1,1024], index: 3, kind: input, shape index: {}]   ;;  %s10361_s4 = inlined_call_operand.hbm [shape: f32[256,1024], index: 4, kind: input, shape index: {}]   ;;  %s10362_s5 = inlined_call_operand.vmem [shape: f32[1,1024], index: 5, kind: input, shape index: {}]   ;;  %s10363_s6 = inlined_call_operand.vmem [shape: f32[1,256], index: 6, kind: input, shape index: {}]   ;;  %s10364_s7 = inlined_call_operand.<no memory space> [shape: f32[1,1], index: 7, kind: input, shape index: {}]   ;;  %s10365_s8 = inlined_call_operand.vmem [shape: f32[10,2], index: 8, kind: output, shape index: {}]  }
   0x1   :  { %v13_v0 = vstv %s10364_s7 }
   0x2   :  { %14 = vst [vmem:[#allocation3] sm:$0x1] %v13_v0 }
   0x3   :  { %15 = vsyncpa [#allocation5], 0 }
   0x4   :  { %16 = vsyncpa [#allocation7], 0  ;;  %s9771_s29 = smov [#allocation4]   ;;  %s9723_s11 = scalar_lea.hbm %s10359_s2, 32768 }
   0x5   :  { %s26_s30 = sshll.u32 %s9771_s29, 4  ;;  %p9724_p0 = scmp.ne.s32.totalorder %s10359_s2, %s9723_s11  ;;  %s27_s30 = int_to_ptr.vmem [resolvable:$true] %s26_s30 }
   0x6   :  { %p9727_p1 = scmp.lt.u32.totalorder %s9723_s11, %s10359_s2 }
   0x8   :  { %p9729_p2 = pnand %p9727_p1, %p9724_p0 }
   0xa   :  { %9732 = shalt.err (!%p9729_p2)
}
   0xb   :  { %s9733_s7 = scalar_lea.vmem %s27_s30, 32768  ;;  %p9738_p4 = scmp.lt.s32.totalorder %s27_s30, %s27_s30 }
   0xc   :  { %p9734_p3 = scmp.ne.s32.totalorder %s27_s30, %s9733_s7  ;;  %p9739_p5 = scmp.lt.s32.totalorder %s9733_s7, %s9733_s7 }
   0xe   :  { %p9740_p6 = por %p9739_p5, %p9738_p4 }
  0x10   :  { %p9741_p7 = pnand %p9740_p6, %p9734_p3 }
  0x12   :  { %9744 = shalt.err (!%p9741_p7)
}
  0x13   :  { %s9772_s16 = smov 1024   ;;  %s9773_s17 = smov 64  }
  0x14   :  { %32 = dma.hbm_to_vmem [thread:$0]  %s10359_s2, 32768, %s27_s30, [#allocation5], %s9772_s16, %s9772_s16, %s9773_s17  }
  0x15   :  { %s9774_s20 = smov [#allocation6]   ;;  %s9745_s24 = scalar_lea.hbm %s10361_s4, 32768 }
  0x16   :  { %s40_s21 = sshll.u32 %s9774_s20, 4  ;;  %p9746_p8 = scmp.ne.s32.totalorder %s10361_s4, %s9745_s24  ;;  %s41_s21 = int_to_ptr.vmem [resolvable:$true] %s40_s21 }
  0x17   :  { %p9749_p9 = scmp.lt.u32.totalorder %s9745_s24, %s10361_s4 }
  0x19   :  { %p9751_p10 = pnand %p9749_p9, %p9746_p8 }
  0x1b   :  { %9754 = shalt.err (!%p9751_p10)
}
  0x1c   :  { %s9755_s29 = scalar_lea.vmem %s41_s21, 32768  ;;  %p9760_p12 = scmp.lt.s32.totalorder %s41_s21, %s41_s21 }
  0x1d   :  { %p9756_p11 = scmp.ne.s32.totalorder %s41_s21, %s9755_s29  ;;  %p9761_p13 = scmp.lt.s32.totalorder %s9755_s29, %s9755_s29 }
  0x1f   :  { %p9762_p0 = por %p9761_p13, %p9760_p12 }
  0x21   :  { %p9763_p1 = pnand %p9762_p0, %p9756_p11 }
  0x23   :  { %9766 = shalt.err (!%p9763_p1)
}
  0x24   :  { %46 = dma.hbm_to_vmem [thread:$0]  %s10361_s4, 32768, %s41_s21, [#allocation7], %s9772_s16, %s9772_s16, %s9773_s17  }
  0x25   :  { %9767 = dma.done.wait [#allocation5], 32768  }
  0x26   :  { %9768 = vsyncadd [#allocation5], 4294934528 }
  0x27   :  { %9769 = dma.done.wait [#allocation7], 32768  }
  0x28   :  { %9770 = vsyncadd [#allocation7], 4294934528  ;;  %v9775_v1 = vmov 0.0   ;;  %v166_v2 = vld [vmem:[#allocation4 + $0x8] sm:$0xff]  ;;  %v168_v4 = vld [vmem:[#allocation4 + $0x18] sm:$0xff]  ;;  %v9776_v27 = vmov 0  }
  0x29   :  { %485 = vmatprep.mubr.f32.mxu0 %v9775_v1  ;;  %556 = vmatprep.mubr.f32.mxu1 %v9775_v1  ;;  %v174_v3 = vld [vmem:[#allocation4 + $0x48] sm:$0xff]  ;;  %v176_v6 = vld [vmem:[#allocation4 + $0x58] sm:$0xff]  ;;  %v165_v7 = vld [vmem:[#allocation4] sm:$0xff]  ;;  %vm6606_vm0 = vcmask 1041408   ;;  %vm6729_vm1 = vcmask 1041409   ;;  %vm6731_vm2 = vcmask 1042434  }
  0x2a   :  { %v6834_v5 = vpack.c.bf16 %v174_v3, %v166_v2  ;;  %v173_v8 = vld [vmem:[#allocation4 + $0x40] sm:$0xff]  ;;  %v6898_v9 = vpack.c.bf16 %v176_v6, %v168_v4  ;;  %v167_v11 = vld [vmem:[#allocation4 + $0x10] sm:$0xff]  ;;  %v182_v13 = vld [vmem:[#allocation4 + $0x88] sm:$0xff]  ;;  %9401 = vset.pattern.permute.xlu0 %v9776_v27  ;;  %9402 = vset.pattern.permute.xlu1 %v9776_v27  ;;  %vm6733_vm3 = vcmask 1043459   ;;  %vm6735_vm4 = vcmask 1044484  }
  0x2b   :  { %v6836_v10 = vpack.c.bf16 %v173_v8, %v165_v7  ;;  %v175_v12 = vld [vmem:[#allocation4 + $0x50] sm:$0xff]  ;;  %v190_v15 = vld [vmem:[#allocation4 + $0xc8] sm:$0xff]  ;;  %v184_v16 = vld [vmem:[#allocation4 + $0x98] sm:$0xff]  ;;  %vm6737_vm5 = vcmask 1045509   ;;  %vm6739_vm6 = vcmask 1046534   ;;  %vm6741_vm7 = vcmask 1047559  }
  0x2c   :  { %6835 = vmatprep.subr.bf16.mxu0 %v6834_v5  ;;  %v6900_v14 = vpack.c.bf16 %v175_v12, %v167_v11  ;;  %v192_v17 = vld [vmem:[#allocation4 + $0xd8] sm:$0xff]  ;;  %6899 = vmatprep.subr.bf16.mxu1 %v6898_v9  ;;  %v6838_v18 = vpack.c.bf16 %v190_v15, %v182_v13  ;;  %v181_v20 = vld [vmem:[#allocation4 + $0x80] sm:$0xff]  ;;  %v183_v22 = vld [vmem:[#allocation4 + $0x90] sm:$0xff]  ;;  %vm6746_vm8 = vcmask 15360   ;;  %vm6748_vm9 = vcmask 9216  }
  0x2d   :  { %6837 = vmatpush1.bf16.msra.mxu0 %v6836_v10  ;;  %v6902_v19 = vpack.c.bf16 %v192_v17, %v184_v16  ;;  %v189_v21 = vld [vmem:[#allocation4 + $0xc0] sm:$0xff]  ;;  %v191_v24 = vld [vmem:[#allocation4 + $0xd0] sm:$0xff]  ;;  %v198_v25 = vld [vmem:[#allocation4 + $0x108] sm:$0xff] }
  0x2e   :  { %6901 = vmatpush1.bf16.msra.mxu1 %v6900_v14  ;;  %v6840_v23 = vpack.c.bf16 %v189_v21, %v181_v20  ;;  %v206_v26 = vld [vmem:[#allocation4 + $0x148] sm:$0xff]  ;;  %6839 = vmatprep.subr.bf16.mxu0 %v6838_v18  ;;  %v6904_v28 = vpack.c.bf16 %v191_v24, %v183_v22  ;;  %v200_v30 = vld [vmem:[#allocation4 + $0x118] sm:$0xff]  ;;  %v197_v32 = vld [vmem:[#allocation4 + $0x100] sm:$0xff] }
  0x2f   :  { %6903 = vmatprep.subr.bf16.mxu1 %v6902_v19  ;;  %v6842_v29 = vpack.c.bf16 %v206_v26, %v198_v25  ;;  %v208_v31 = vld [vmem:[#allocation4 + $0x158] sm:$0xff]  ;;  %v205_v34 = vld [vmem:[#allocation4 + $0x140] sm:$0xff]  ;;  %v199_v35 = vld [vmem:[#allocation4 + $0x110] sm:$0xff] }
  0x30   :  { %v6906_v33 = vpack.c.bf16 %v208_v31, %v200_v30  ;;  %v207_v36 = vld [vmem:[#allocation4 + $0x150] sm:$0xff]  ;;  %v6844_v37 = vpack.c.bf16 %v205_v34, %v197_v32  ;;  %v214_v38 = vld [vmem:[#allocation4 + $0x188] sm:$0xff]  ;;  %v216_v40 = vld [vmem:[#allocation4 + $0x198] sm:$0xff] }
  0x31   :  { %6841 = vmatpush1.bf16.msra.mxu0 %v6840_v23  ;;  %v222_v39 = vld [vmem:[#allocation4 + $0x1c8] sm:$0xff]  ;;  %v6908_v41 = vpack.c.bf16 %v207_v36, %v199_v35  ;;  %v224_v43 = vld [vmem:[#allocation4 + $0x1d8] sm:$0xff]  ;;  %v213_v44 = vld [vmem:[#allocation4 + $0x180] sm:$0xff] }
  0x32   :  { %6905 = vmatpush1.bf16.msra.mxu1 %v6904_v28  ;;  %6843 = vmatprep.subr.bf16.mxu0 %v6842_v29  ;;  %v6846_v42 = vpack.c.bf16 %v222_v39, %v214_v38  ;;  %v221_v45 = vld [vmem:[#allocation4 + $0x1c0] sm:$0xff]  ;;  %v6910_v46 = vpack.c.bf16 %v224_v43, %v216_v40  ;;  %v215_v47 = vld [vmem:[#allocation4 + $0x190] sm:$0xff]  ;;  %v230_v49 = vld [vmem:[#allocation4 + $0x208] sm:$0xff] }
  0x33   :  { %6907 = vmatprep.subr.bf16.mxu1 %v6906_v33  ;;  %v223_v48 = vld [vmem:[#allocation4 + $0x1d0] sm:$0xff]  ;;  %v238_v50 = vld [vmem:[#allocation4 + $0x248] sm:$0xff]  ;;  %v232_v51 = vld [vmem:[#allocation4 + $0x218] sm:$0xff]  ;;  %v6848_v53 = vpack.c.bf16 %v221_v45, %v213_v44 }
  0x34   :  { %v240_v52 = vld [vmem:[#allocation4 + $0x258] sm:$0xff]  ;;  %v6912_v54 = vpack.c.bf16 %v223_v48, %v215_v47  ;;  %v6850_v55 = vpack.c.bf16 %v238_v50, %v230_v49  ;;  %v229_v56 = vld [vmem:[#allocation4 + $0x200] sm:$0xff]  ;;  %v231_v58 = vld [vmem:[#allocation4 + $0x210] sm:$0xff] }
  0x35   :  { %6845 = vmatpush1.bf16.msra.mxu0 %v6844_v37  ;;  %v237_v57 = vld [vmem:[#allocation4 + $0x240] sm:$0xff]  ;;  %v6914_v59 = vpack.c.bf16 %v240_v52, %v232_v51  ;;  %v239_v60 = vld [vmem:[#allocation4 + $0x250] sm:$0xff]  ;;  %v246_v61 = vld [vmem:[#allocation4 + $0x288] sm:$0xff] }
  0x36   :  { %6909 = vmatpush1.bf16.msra.mxu1 %v6908_v41  ;;  %6847 = vmatprep.subr.bf16.mxu0 %v6846_v42  ;;  %v254_v62 = vld [vmem:[#allocation4 + $0x2c8] sm:$0xff]  ;;  %v248_v63 = vld [vmem:[#allocation4 + $0x298] sm:$0xff]  ;;  %v6852_v2 = vpack.c.bf16 %v237_v57, %v229_v56  ;;  %v6916_v3 = vpack.c.bf16 %v239_v60, %v231_v58  ;;  %v245_v5 = vld [vmem:[#allocation4 + $0x280] sm:$0xff] }
  0x37   :  { %6911 = vmatprep.subr.bf16.mxu1 %v6910_v46  ;;  %v256_v0 = vld [vmem:[#allocation4 + $0x2d8] sm:$0xff]  ;;  %v6854_v4 = vpack.c.bf16 %v254_v62, %v246_v61  ;;  %v253_v6 = vld [vmem:[#allocation4 + $0x2c0] sm:$0xff]  ;;  %v247_v7 = vld [vmem:[#allocation4 + $0x290] sm:$0xff] }
  0x38   :  { %v6918_v8 = vpack.c.bf16 %v256_v0, %v248_v63  ;;  %v255_v9 = vld [vmem:[#allocation4 + $0x2d0] sm:$0xff]  ;;  %v262_v10 = vld [vmem:[#allocation4 + $0x308] sm:$0xff]  ;;  %v264_v12 = vld [vmem:[#allocation4 + $0x318] sm:$0xff]  ;;  %v6856_v14 = vpack.c.bf16 %v253_v6, %v245_v5 }
  0x39   :  { %6849 = vmatpush1.bf16.msra.mxu0 %v6848_v53  ;;  %v270_v11 = vld [vmem:[#allocation4 + $0x348] sm:$0xff]  ;;  %v272_v13 = vld [vmem:[#allocation4 + $0x358] sm:$0xff]  ;;  %v6920_v15 = vpack.c.bf16 %v255_v9, %v247_v7  ;;  %v261_v17 = vld [vmem:[#allocation4 + $0x300] sm:$0xff] }
  0x3a   :  { %6913 = vmatpush1.bf16.msra.mxu1 %v6912_v54  ;;  %6851 = vmatprep.subr.bf16.mxu0 %v6850_v55  ;;  %v6858_v16 = vpack.c.bf16 %v270_v11, %v262_v10  ;;  %v269_v18 = vld [vmem:[#allocation4 + $0x340] sm:$0xff]  ;;  %v263_v19 = vld [vmem:[#allocation4 + $0x310] sm:$0xff]  ;;  %v6922_v20 = vpack.c.bf16 %v272_v13, %v264_v12  ;;  %v278_v22 = vld [vmem:[#allocation4 + $0x388] sm:$0xff] }
  0x3b   :  { %6915 = vmatprep.subr.bf16.mxu1 %v6914_v59  ;;  %v271_v21 = vld [vmem:[#allocation4 + $0x350] sm:$0xff]  ;;  %v286_v23 = vld [vmem:[#allocation4 + $0x3c8] sm:$0xff]  ;;  %v280_v24 = vld [vmem:[#allocation4 + $0x398] sm:$0xff]  ;;  %v6860_v26 = vpack.c.bf16 %v269_v18, %v261_v17 }
  0x3c   :  { %v288_v25 = vld [vmem:[#allocation4 + $0x3d8] sm:$0xff]  ;;  %v6924_v27 = vpack.c.bf16 %v271_v21, %v263_v19  ;;  %v6862_v28 = vpack.c.bf16 %v286_v23, %v278_v22  ;;  %v277_v29 = vld [vmem:[#allocation4 + $0x380] sm:$0xff]  ;;  %v279_v31 = vld [vmem:[#allocation4 + $0x390] sm:$0xff] }
  0x3d   :  { %6853 = vmatpush1.bf16.msra.mxu0 %v6852_v2  ;;  %v285_v30 = vld [vmem:[#allocation4 + $0x3c0] sm:$0xff]  ;;  %v6926_v32 = vpack.c.bf16 %v288_v25, %v280_v24  ;;  %v287_v33 = vld [vmem:[#allocation4 + $0x3d0] sm:$0xff]  ;;  %v294_v34 = vld [vmem:[#allocation4 + $0x408] sm:$0xff] }
  0x3e   :  { %6917 = vmatpush1.bf16.msra.mxu1 %v6916_v3  ;;  %6855 = vmatprep.subr.bf16.mxu0 %v6854_v4  ;;  %v302_v35 = vld [vmem:[#allocation4 + $0x448] sm:$0xff]  ;;  %v296_v36 = vld [vmem:[#allocation4 + $0x418] sm:$0xff]  ;;  %v6864_v38 = vpack.c.bf16 %v285_v30, %v277_v29  ;;  %v6928_v39 = vpack.c.bf16 %v287_v33, %v279_v31  ;;  %v293_v41 = vld [vmem:[#allocation4 + $0x400] sm:$0xff] }
  0x3f   :  { %6919 = vmatprep.subr.bf16.mxu1 %v6918_v8  ;;  %v304_v37 = vld [vmem:[#allocation4 + $0x458] sm:$0xff]  ;;  %v6866_v40 = vpack.c.bf16 %v302_v35, %v294_v34  ;;  %v301_v42 = vld [vmem:[#allocation4 + $0x440] sm:$0xff]  ;;  %v295_v43 = vld [vmem:[#allocation4 + $0x410] sm:$0xff] }
  0x40   :  { %v6930_v44 = vpack.c.bf16 %v304_v37, %v296_v36  ;;  %v303_v45 = vld [vmem:[#allocation4 + $0x450] sm:$0xff]  ;;  %v310_v46 = vld [vmem:[#allocation4 + $0x488] sm:$0xff]  ;;  %v312_v48 = vld [vmem:[#allocation4 + $0x498] sm:$0xff]  ;;  %v6868_v50 = vpack.c.bf16 %v301_v42, %v293_v41 }
  0x41   :  { %6857 = vmatpush1.bf16.msra.mxu0 %v6856_v14  ;;  %v318_v47 = vld [vmem:[#allocation4 + $0x4c8] sm:$0xff]  ;;  %v320_v49 = vld [vmem:[#allocation4 + $0x4d8] sm:$0xff]  ;;  %v6932_v51 = vpack.c.bf16 %v303_v45, %v295_v43  ;;  %v309_v53 = vld [vmem:[#allocation4 + $0x480] sm:$0xff] }
  0x42   :  { %6921 = vmatpush1.bf16.msra.mxu1 %v6920_v15  ;;  %6859 = vmatprep.subr.bf16.mxu0 %v6858_v16  ;;  %v6870_v52 = vpack.c.bf16 %v318_v47, %v310_v46  ;;  %v317_v54 = vld [vmem:[#allocation4 + $0x4c0] sm:$0xff]  ;;  %v311_v55 = vld [vmem:[#allocation4 + $0x490] sm:$0xff]  ;;  %v6934_v56 = vpack.c.bf16 %v320_v49, %v312_v48  ;;  %v326_v58 = vld [vmem:[#allocation4 + $0x508] sm:$0xff] }
  0x43   :  { %6923 = vmatprep.subr.bf16.mxu1 %v6922_v20  ;;  %v319_v57 = vld [vmem:[#allocation4 + $0x4d0] sm:$0xff]  ;;  %v334_v59 = vld [vmem:[#allocation4 + $0x548] sm:$0xff]  ;;  %v328_v60 = vld [vmem:[#allocation4 + $0x518] sm:$0xff]  ;;  %v6872_v62 = vpack.c.bf16 %v317_v54, %v309_v53 }
  0x44   :  { %v336_v61 = vld [vmem:[#allocation4 + $0x558] sm:$0xff]  ;;  %v6936_v63 = vpack.c.bf16 %v319_v57, %v311_v55  ;;  %v6874_v0 = vpack.c.bf16 %v334_v59, %v326_v58  ;;  %v325_v2 = vld [vmem:[#allocation4 + $0x500] sm:$0xff]  ;;  %v327_v4 = vld [vmem:[#allocation4 + $0x510] sm:$0xff] }
  0x45   :  { %6861 = vmatpush1.bf16.msra.mxu0 %v6860_v26  ;;  %v333_v3 = vld [vmem:[#allocation4 + $0x540] sm:$0xff]  ;;  %v6938_v5 = vpack.c.bf16 %v336_v61, %v328_v60  ;;  %v335_v6 = vld [vmem:[#allocation4 + $0x550] sm:$0xff]  ;;  %v342_v7 = vld [vmem:[#allocation4 + $0x588] sm:$0xff] }
  0x46   :  { %6925 = vmatpush1.bf16.msra.mxu1 %v6924_v27  ;;  %6863 = vmatprep.subr.bf16.mxu0 %v6862_v28  ;;  %v350_v8 = vld [vmem:[#allocation4 + $0x5c8] sm:$0xff]  ;;  %v344_v9 = vld [vmem:[#allocation4 + $0x598] sm:$0xff]  ;;  %v6876_v11 = vpack.c.bf16 %v333_v3, %v325_v2  ;;  %v6940_v12 = vpack.c.bf16 %v335_v6, %v327_v4  ;;  %v341_v14 = vld [vmem:[#allocation4 + $0x580] sm:$0xff] }
  0x47   :  { %6927 = vmatprep.subr.bf16.mxu1 %v6926_v32  ;;  %v352_v10 = vld [vmem:[#allocation4 + $0x5d8] sm:$0xff]  ;;  %v6878_v13 = vpack.c.bf16 %v350_v8, %v342_v7  ;;  %v349_v15 = vld [vmem:[#allocation4 + $0x5c0] sm:$0xff]  ;;  %v343_v16 = vld [vmem:[#allocation4 + $0x590] sm:$0xff] }
  0x48   :  { %v6942_v17 = vpack.c.bf16 %v352_v10, %v344_v9  ;;  %v351_v18 = vld [vmem:[#allocation4 + $0x5d0] sm:$0xff]  ;;  %v358_v19 = vld [vmem:[#allocation4 + $0x608] sm:$0xff]  ;;  %v360_v21 = vld [vmem:[#allocation4 + $0x618] sm:$0xff]  ;;  %v6880_v23 = vpack.c.bf16 %v349_v15, %v341_v14 }
  0x49   :  { %6865 = vmatpush1.bf16.msra.mxu0 %v6864_v38  ;;  %v366_v20 = vld [vmem:[#allocation4 + $0x648] sm:$0xff]  ;;  %v368_v22 = vld [vmem:[#allocation4 + $0x658] sm:$0xff]  ;;  %v6944_v24 = vpack.c.bf16 %v351_v18, %v343_v16  ;;  %v357_v26 = vld [vmem:[#allocation4 + $0x600] sm:$0xff] }
  0x4a   :  { %6929 = vmatpush1.bf16.msra.mxu1 %v6928_v39  ;;  %6867 = vmatprep.subr.bf16.mxu0 %v6866_v40  ;;  %v6882_v25 = vpack.c.bf16 %v366_v20, %v358_v19  ;;  %v365_v27 = vld [vmem:[#allocation4 + $0x640] sm:$0xff]  ;;  %v359_v28 = vld [vmem:[#allocation4 + $0x610] sm:$0xff]  ;;  %v6946_v29 = vpack.c.bf16 %v368_v22, %v360_v21  ;;  %v374_v31 = vld [vmem:[#allocation4 + $0x688] sm:$0xff] }
  0x4b   :  { %6931 = vmatprep.subr.bf16.mxu1 %v6930_v44  ;;  %v367_v30 = vld [vmem:[#allocation4 + $0x650] sm:$0xff]  ;;  %v382_v32 = vld [vmem:[#allocation4 + $0x6c8] sm:$0xff]  ;;  %v376_v33 = vld [vmem:[#allocation4 + $0x698] sm:$0xff]  ;;  %v6884_v35 = vpack.c.bf16 %v365_v27, %v357_v26 }
  0x4c   :  { %v384_v34 = vld [vmem:[#allocation4 + $0x6d8] sm:$0xff]  ;;  %v6948_v36 = vpack.c.bf16 %v367_v30, %v359_v28  ;;  %v6886_v37 = vpack.c.bf16 %v382_v32, %v374_v31  ;;  %v373_v38 = vld [vmem:[#allocation4 + $0x680] sm:$0xff]  ;;  %v375_v40 = vld [vmem:[#allocation4 + $0x690] sm:$0xff] }
  0x4d   :  { %6869 = vmatpush1.bf16.msra.mxu0 %v6868_v50  ;;  %v381_v39 = vld [vmem:[#allocation4 + $0x6c0] sm:$0xff]  ;;  %v6950_v41 = vpack.c.bf16 %v384_v34, %v376_v33  ;;  %v383_v42 = vld [vmem:[#allocation4 + $0x6d0] sm:$0xff]  ;;  %v390_v43 = vld [vmem:[#allocation4 + $0x708] sm:$0xff] }
  0x4e   :  { %6933 = vmatpush1.bf16.msra.mxu1 %v6932_v51  ;;  %6871 = vmatprep.subr.bf16.mxu0 %v6870_v52  ;;  %v398_v44 = vld [vmem:[#allocation4 + $0x748] sm:$0xff]  ;;  %v392_v45 = vld [vmem:[#allocation4 + $0x718] sm:$0xff]  ;;  %v6888_v47 = vpack.c.bf16 %v381_v39, %v373_v38  ;;  %v6952_v48 = vpack.c.bf16 %v383_v42, %v375_v40  ;;  %v389_v50 = vld [vmem:[#allocation4 + $0x700] sm:$0xff] }
  0x4f   :  { %6935 = vmatprep.subr.bf16.mxu1 %v6934_v56  ;;  %v400_v46 = vld [vmem:[#allocation4 + $0x758] sm:$0xff]  ;;  %v6890_v49 = vpack.c.bf16 %v398_v44, %v390_v43  ;;  %v397_v51 = vld [vmem:[#allocation4 + $0x740] sm:$0xff]  ;;  %v391_v52 = vld [vmem:[#allocation4 + $0x710] sm:$0xff] }
  0x50   :  { %v6954_v53 = vpack.c.bf16 %v400_v46, %v392_v45  ;;  %v399_v54 = vld [vmem:[#allocation4 + $0x750] sm:$0xff]  ;;  %v406_v55 = vld [vmem:[#allocation4 + $0x788] sm:$0xff]  ;;  %v408_v57 = vld [vmem:[#allocation4 + $0x798] sm:$0xff]  ;;  %v6892_v59 = vpack.c.bf16 %v397_v51, %v389_v50 }
  0x51   :  { %6873 = vmatpush1.bf16.msra.mxu0 %v6872_v62  ;;  %v414_v56 = vld [vmem:[#allocation4 + $0x7c8] sm:$0xff]  ;;  %v416_v58 = vld [vmem:[#allocation4 + $0x7d8] sm:$0xff]  ;;  %v6956_v60 = vpack.c.bf16 %v399_v54, %v391_v52  ;;  %v405_v62 = vld [vmem:[#allocation4 + $0x780] sm:$0xff] }
  0x52   :  { %6937 = vmatpush1.bf16.msra.mxu1 %v6936_v63  ;;  %6875 = vmatprep.subr.bf16.mxu0 %v6874_v0  ;;  %v6894_v61 = vpack.c.bf16 %v414_v56, %v406_v55  ;;  %v413_v63 = vld [vmem:[#allocation4 + $0x7c0] sm:$0xff]  ;;  %v407_v0 = vld [vmem:[#allocation4 + $0x790] sm:$0xff]  ;;  %v6958_v2 = vpack.c.bf16 %v416_v58, %v408_v57  ;;  %v170_v4 = vld [vmem:[#allocation4 + $0x28] sm:$0xff] }
  0x53   :  { %6939 = vmatprep.subr.bf16.mxu1 %v6938_v5  ;;  %v415_v3 = vld [vmem:[#allocation4 + $0x7d0] sm:$0xff]  ;;  %v178_v5 = vld [vmem:[#allocation4 + $0x68] sm:$0xff]  ;;  %v172_v6 = vld [vmem:[#allocation4 + $0x38] sm:$0xff]  ;;  %v6896_v8 = vpack.c.bf16 %v413_v63, %v405_v62 }
  0x54   :  { %v180_v7 = vld [vmem:[#allocation4 + $0x78] sm:$0xff]  ;;  %v6960_v9 = vpack.c.bf16 %v415_v3, %v407_v0  ;;  %v6962_v10 = vpack.c.bf16 %v178_v5, %v170_v4  ;;  %v179_v15 = vld [vmem:[#allocation4 + $0x70] sm:$0xff]  ;;  %v186_v16 = vld [vmem:[#allocation4 + $0xa8] sm:$0xff] }
  0x55   :  { %6877 = vmatpush1.bf16.msra.mxu0 %v6876_v11  ;;  %v169_v11 = vld [vmem:[#allocation4 + $0x20] sm:$0xff]  ;;  %v7026_v14 = vpack.c.bf16 %v180_v7, %v172_v6  ;;  %v188_v18 = vld [vmem:[#allocation4 + $0xb8] sm:$0xff]  ;;  %v195_v27 = vld [vmem:[#allocation4 + $0xf0] sm:$0xff] }
  0x56   :  { %6941 = vmatpush1.bf16.msra.mxu1 %v6940_v12  ;;  %6879 = vmatprep.subr.bf16.mxu0 %v6878_v13  ;;  %v177_v12 = vld [vmem:[#allocation4 + $0x60] sm:$0xff]  ;;  %v171_v13 = vld [vmem:[#allocation4 + $0x30] sm:$0xff]  ;;  %v196_v19 = vld [vmem:[#allocation4 + $0xf8] sm:$0xff] }
  0x57   :  { %6943 = vmatprep.subr.bf16.mxu1 %v6942_v17  ;;  %v194_v17 = vld [vmem:[#allocation4 + $0xe8] sm:$0xff]  ;;  %v6964_v20 = vpack.c.bf16 %v177_v12, %v169_v11  ;;  %v7028_v21 = vpack.c.bf16 %v179_v15, %v171_v13  ;;  %v7030_v26 = vpack.c.bf16 %v196_v19, %v188_v18  ;;  %v204_v30 = vld [vmem:[#allocation4 + $0x138] sm:$0xff]  ;;  %v211_v39 = vld [vmem:[#allocation4 + $0x170] sm:$0xff] }
  0x58   :  { %v6966_v22 = vpack.c.bf16 %v194_v17, %v186_v16  ;;  %v202_v28 = vld [vmem:[#allocation4 + $0x128] sm:$0xff]  ;;  %v212_v31 = vld [vmem:[#allocation4 + $0x178] sm:$0xff]  ;;  %v227_v51 = vld [vmem:[#allocation4 + $0x1f0] sm:$0xff] }
  0x59   :  { %6881 = vmatpush1.bf16.msra.mxu0 %v6880_v23  ;;  %v185_v23 = vld [vmem:[#allocation4 + $0xa0] sm:$0xff]  ;;  %v7034_v38 = vpack.c.bf16 %v212_v31, %v204_v30  ;;  %v218_v40 = vld [vmem:[#allocation4 + $0x1a8] sm:$0xff]  ;;  %v220_v42 = vld [vmem:[#allocation4 + $0x1b8] sm:$0xff] }
  0x5a   :  { %6945 = vmatpush1.bf16.msra.mxu1 %v6944_v24  ;;  %6883 = vmatprep.subr.bf16.mxu0 %v6882_v25  ;;  %v193_v24 = vld [vmem:[#allocation4 + $0xe0] sm:$0xff]  ;;  %v187_v25 = vld [vmem:[#allocation4 + $0xb0] sm:$0xff]  ;;  %v228_v43 = vld [vmem:[#allocation4 + $0x1f8] sm:$0xff] }
  0x5b   :  { %6947 = vmatprep.subr.bf16.mxu1 %v6946_v29  ;;  %v210_v29 = vld [vmem:[#allocation4 + $0x168] sm:$0xff]  ;;  %v6968_v32 = vpack.c.bf16 %v193_v24, %v185_v23  ;;  %v7032_v33 = vpack.c.bf16 %v195_v27, %v187_v25  ;;  %v7038_v50 = vpack.c.bf16 %v228_v43, %v220_v42  ;;  %v236_v54 = vld [vmem:[#allocation4 + $0x238] sm:$0xff]  ;;  %v243_v63 = vld [vmem:[#allocation4 + $0x270] sm:$0xff] }
  0x5c   :  { %v6970_v34 = vpack.c.bf16 %v210_v29, %v202_v28  ;;  %v234_v52 = vld [vmem:[#allocation4 + $0x228] sm:$0xff]  ;;  %v244_v55 = vld [vmem:[#allocation4 + $0x278] sm:$0xff]  ;;  %v259_v12 = vld [vmem:[#allocation4 + $0x2f0] sm:$0xff] }
  0x5d   :  { %6885 = vmatpush1.bf16.msra.mxu0 %v6884_v35  ;;  %v201_v35 = vld [vmem:[#allocation4 + $0x120] sm:$0xff]  ;;  %v7042_v62 = vpack.c.bf16 %v244_v55, %v236_v54  ;;  %v250_v0 = vld [vmem:[#allocation4 + $0x2a8] sm:$0xff]  ;;  %v252_v3 = vld [vmem:[#allocation4 + $0x2b8] sm:$0xff] }
  0x5e   :  { %6949 = vmatpush1.bf16.msra.mxu1 %v6948_v36  ;;  %6887 = vmatprep.subr.bf16.mxu0 %v6886_v37  ;;  %v209_v36 = vld [vmem:[#allocation4 + $0x160] sm:$0xff]  ;;  %v203_v37 = vld [vmem:[#allocation4 + $0x130] sm:$0xff]  ;;  %v260_v4 = vld [vmem:[#allocation4 + $0x2f8] sm:$0xff] }
  0x5f   :  { %6951 = vmatprep.subr.bf16.mxu1 %v6950_v41  ;;  %v226_v41 = vld [vmem:[#allocation4 + $0x1e8] sm:$0xff]  ;;  %v6972_v44 = vpack.c.bf16 %v209_v36, %v201_v35  ;;  %v7036_v45 = vpack.c.bf16 %v211_v39, %v203_v37  ;;  %v7046_v11 = vpack.c.bf16 %v260_v4, %v252_v3  ;;  %v268_v15 = vld [vmem:[#allocation4 + $0x338] sm:$0xff]  ;;  %v265_v18 = vld [vmem:[#allocation4 + $0x320] sm:$0xff] }
  0x60   :  { %v6974_v46 = vpack.c.bf16 %v226_v41, %v218_v40  ;;  %v266_v13 = vld [vmem:[#allocation4 + $0x328] sm:$0xff]  ;;  %v276_v16 = vld [vmem:[#allocation4 + $0x378] sm:$0xff]  ;;  %v275_v25 = vld [vmem:[#allocation4 + $0x370] sm:$0xff] }
  0x61   :  { %6889 = vmatpush1.bf16.msra.mxu0 %v6888_v47  ;;  %v217_v47 = vld [vmem:[#allocation4 + $0x1a0] sm:$0xff]  ;;  %v61_v23 = vld [vmem:[%s10357_s0] sm:$0x3]  ;;  %v7050_v24 = vpack.c.bf16 %v276_v16, %v268_v15  ;;  %v290_v27 = vld [vmem:[#allocation4 + $0x3e8] sm:$0xff] }
  0x62   :  { %6953 = vmatpush1.bf16.msra.mxu1 %v6952_v48  ;;  %6891 = vmatprep.subr.bf16.mxu0 %v6890_v49  ;;  %v225_v48 = vld [vmem:[#allocation4 + $0x1e0] sm:$0xff]  ;;  %v219_v49 = vld [vmem:[#allocation4 + $0x1b0] sm:$0xff]  ;;  %v284_v28 = vld [vmem:[#allocation4 + $0x3b8] sm:$0xff] }
  0x63   :  { %6955 = vmatprep.subr.bf16.mxu1 %v6954_v53  ;;  %v242_v53 = vld [vmem:[#allocation4 + $0x268] sm:$0xff]  ;;  %v6976_v56 = vpack.c.bf16 %v225_v48, %v217_v47  ;;  %v7040_v57 = vpack.c.bf16 %v227_v51, %v219_v49  ;;  %64 = vperm.xlu0 %9401, %v61_v23   ;;  %v292_v29 = vld [vmem:[#allocation4 + $0x3f8] sm:$0xff]  ;;  %v289_v35 = vld [vmem:[#allocation4 + $0x3e0] sm:$0xff] }
  0x64   :  { %v6978_v58 = vpack.c.bf16 %v242_v53, %v234_v52  ;;  %v6763_v30 = vld [vmem:[%s10357_s0 + $0x2] sm:$0x3]  ;;  %v283_v36 = vld [vmem:[#allocation4 + $0x3b0] sm:$0xff]  ;;  %v7054_v37 = vpack.c.bf16 %v292_v29, %v284_v28  ;;  %v298_v39 = vld [vmem:[#allocation4 + $0x428] sm:$0xff] }
  0x65   :  { %6893 = vmatpush1.bf16.msra.mxu0 %v6892_v59  ;;  %v233_v59 = vld [vmem:[#allocation4 + $0x220] sm:$0xff]  ;;  %v306_v40 = vld [vmem:[#allocation4 + $0x468] sm:$0xff]  ;;  %v300_v41 = vld [vmem:[#allocation4 + $0x438] sm:$0xff] }
  0x66   :  { %6957 = vmatpush1.bf16.msra.mxu1 %v6956_v60  ;;  %6895 = vmatprep.subr.bf16.mxu0 %v6894_v61  ;;  %v241_v60 = vld [vmem:[#allocation4 + $0x260] sm:$0xff]  ;;  %v235_v61 = vld [vmem:[#allocation4 + $0x230] sm:$0xff]  ;;  %v308_v42 = vld [vmem:[#allocation4 + $0x478] sm:$0xff] }
  0x67   :  { %6959 = vmatprep.subr.bf16.mxu1 %v6958_v2  ;;  %v258_v2 = vld [vmem:[#allocation4 + $0x2e8] sm:$0xff]  ;;  %v6980_v5 = vpack.c.bf16 %v241_v60, %v233_v59  ;;  %v7044_v6 = vpack.c.bf16 %v243_v63, %v235_v61  ;;  %777 = vperm.xlu0 %9401, %v6763_v30   ;;  %v6787_v43 = vld [vmem:[%s10357_s0 + $0x8] sm:$0x3]  ;;  %v299_v49 = vld [vmem:[#allocation4 + $0x430] sm:$0xff] }
  0x68   :  { %v6982_v7 = vpack.c.bf16 %v258_v2, %v250_v0  ;;  %v297_v47 = vld [vmem:[#allocation4 + $0x420] sm:$0xff]  ;;  %v307_v51 = vld [vmem:[#allocation4 + $0x470] sm:$0xff]  ;;  %v314_v52 = vld [vmem:[#allocation4 + $0x4a8] sm:$0xff] }
  0x69   :  { %6897 = vmatpush1.bf16.msra.mxu0 %v6896_v8  ;;  %v249_v8 = vld [vmem:[#allocation4 + $0x2a0] sm:$0xff]  ;;  %v322_v53 = vld [vmem:[#allocation4 + $0x4e8] sm:$0xff]  ;;  %v316_v54 = vld [vmem:[#allocation4 + $0x4b8] sm:$0xff] }
  0x6a   :  { %6961 = vmatpush1.bf16.msra.mxu1 %v6960_v9  ;;  %6963 = vmatprep.subr.bf16.mxu0 %v6962_v10  ;;  %v257_v9 = vld [vmem:[#allocation4 + $0x2e0] sm:$0xff]  ;;  %v251_v10 = vld [vmem:[#allocation4 + $0x2b0] sm:$0xff]  ;;  %v324_v55 = vld [vmem:[#allocation4 + $0x4f8] sm:$0xff]  ;;  %v6998_v59 = vpack.c.bf16 %v322_v53, %v314_v52 }
  0x6b   :  { %7027 = vmatprep.subr.bf16.mxu1 %v7026_v14  ;;  %v274_v14 = vld [vmem:[#allocation4 + $0x368] sm:$0xff]  ;;  %v6984_v17 = vpack.c.bf16 %v257_v9, %v249_v8  ;;  %v7048_v19 = vpack.c.bf16 %v259_v12, %v251_v10  ;;  %v305_v48 = vld [vmem:[#allocation4 + $0x460] sm:$0xff]  ;;  %2673 = vperm.xlu0 %9401, %v6787_v43   ;;  %v7062_v63 = vpack.c.bf16 %v324_v55, %v316_v54  ;;  %v323_v0 = vld [vmem:[#allocation4 + $0x4f0] sm:$0xff] }
  0x6c   :  { %486 = vmatmul.mubr.f32.vlgmr.msra.gmra.mrb[0].mxu0 %v9775_v1  ;;  %v313_v60 = vld [vmem:[#allocation4 + $0x4a0] sm:$0xff]  ;;  %v330_v2 = vld [vmem:[#allocation4 + $0x528] sm:$0xff]  ;;  %v332_v4 = vld [vmem:[#allocation4 + $0x538] sm:$0xff] }
  0x6d   :  { %557 = vmatmul.mubr.f32.vlgmr.msra.gmra.mrb[0].mxu1 %v9775_v1  ;;  %6965 = vmatpush1.bf16.msra.mxu0 %v6964_v20  ;;  %v6986_v20 = vpack.c.bf16 %v274_v14, %v266_v13  ;;  %v321_v61 = vld [vmem:[#allocation4 + $0x4e0] sm:$0xff]  ;;  %v338_v3 = vld [vmem:[#allocation4 + $0x568] sm:$0xff]  ;;  %v339_v13 = vld [vmem:[#allocation4 + $0x570] sm:$0xff] }
  0x6e   :  { %7029 = vmatpush1.bf16.msra.mxu1 %v7028_v21  ;;  %6967 = vmatprep.subr.bf16.mxu0 %v6966_v22  ;;  %v273_v21 = vld [vmem:[#allocation4 + $0x360] sm:$0xff]  ;;  %v267_v22 = vld [vmem:[#allocation4 + $0x330] sm:$0xff]  ;;  %v7002_v8 = vpack.c.bf16 %v338_v3, %v330_v2  ;;  %v346_v14 = vld [vmem:[#allocation4 + $0x5a8] sm:$0xff] }
  0x6f   :  { %7031 = vmatprep.subr.bf16.mxu1 %v7030_v26  ;;  %627 = vmatprep.mubr.f32.mxu0 %v9775_v1  ;;  %v282_v26 = vld [vmem:[#allocation4 + $0x3a8] sm:$0xff]  ;;  %v6988_v31 = vpack.c.bf16 %v273_v21, %v265_v18  ;;  %v329_v9 = vld [vmem:[#allocation4 + $0x520] sm:$0xff]  ;;  %v348_v16 = vld [vmem:[#allocation4 + $0x5b8] sm:$0xff] }
  0x70   :  { %698 = vmatprep.mubr.f32.mxu1 %v9775_v1  ;;  %v337_v10 = vld [vmem:[#allocation4 + $0x560] sm:$0xff]  ;;  %v354_v15 = vld [vmem:[#allocation4 + $0x5e8] sm:$0xff]  ;;  %v347_v23 = vld [vmem:[#allocation4 + $0x5b0] sm:$0xff] }
  0x71   :  { %6969 = vmatpush1.bf16.msra.mxu0 %v6968_v32  ;;  %v7052_v32 = vpack.c.bf16 %v275_v25, %v267_v22  ;;  %v7004_v18 = vpack.c.bf16 %v337_v10, %v329_v9  ;;  %v345_v21 = vld [vmem:[#allocation4 + $0x5a0] sm:$0xff]  ;;  %v355_v25 = vld [vmem:[#allocation4 + $0x5f0] sm:$0xff]  ;;  %v364_v28 = vld [vmem:[#allocation4 + $0x638] sm:$0xff] }
  0x72   :  { %7033 = vmatpush1.bf16.msra.mxu1 %v7032_v33  ;;  %6971 = vmatprep.subr.bf16.mxu0 %v6970_v34  ;;  %v6990_v33 = vpack.c.bf16 %v290_v27, %v282_v26  ;;  %v281_v34 = vld [vmem:[#allocation4 + $0x3a0] sm:$0xff]  ;;  %v362_v26 = vld [vmem:[#allocation4 + $0x628] sm:$0xff]  ;;  %v372_v29 = vld [vmem:[#allocation4 + $0x678] sm:$0xff] }
  0x73   :  { %7035 = vmatprep.subr.bf16.mxu1 %v7034_v38  ;;  %v291_v38 = vld [vmem:[#allocation4 + $0x3f0] sm:$0xff]  ;;  %v353_v22 = vld [vmem:[#allocation4 + $0x5e0] sm:$0xff]  ;;  %v370_v27 = vld [vmem:[#allocation4 + $0x668] sm:$0xff] }
  0x74   :  { %v7008_v30 = vpack.c.bf16 %v353_v22, %v345_v21  ;;  %v396_v52 = vld [vmem:[#allocation4 + $0x738] sm:$0xff]  ;;  %v411_v9 = vld [vmem:[#allocation4 + $0x7b0] sm:$0xff] }
  0x75   :  { %6973 = vmatpush1.bf16.msra.mxu0 %v6972_v44  ;;  %v6992_v44 = vpack.c.bf16 %v289_v35, %v281_v34  ;;  %v369_v34 = vld [vmem:[#allocation4 + $0x660] sm:$0xff]  ;;  %v363_v35 = vld [vmem:[#allocation4 + $0x630] sm:$0xff]  ;;  %v404_v53 = vld [vmem:[#allocation4 + $0x778] sm:$0xff] }
  0x76   :  { %7037 = vmatpush1.bf16.msra.mxu1 %v7036_v45  ;;  %6975 = vmatprep.subr.bf16.mxu0 %v6974_v46  ;;  %v7056_v45 = vpack.c.bf16 %v291_v38, %v283_v36  ;;  %v6994_v46 = vpack.c.bf16 %v306_v40, %v298_v39  ;;  %v7074_v36 = vpack.c.bf16 %v372_v29, %v364_v28  ;;  %v378_v38 = vld [vmem:[#allocation4 + $0x6a8] sm:$0xff]  ;;  %v380_v40 = vld [vmem:[#allocation4 + $0x6b8] sm:$0xff]  ;;  %v419_v10 = vld [vmem:[#allocation4 + $0x7f0] sm:$0xff] }
  0x77   :  { %7039 = vmatprep.subr.bf16.mxu1 %v7038_v50  ;;  %v7058_v50 = vpack.c.bf16 %v308_v42, %v300_v41  ;;  %v386_v39 = vld [vmem:[#allocation4 + $0x6e8] sm:$0xff]  ;;  %v388_v41 = vld [vmem:[#allocation4 + $0x6f8] sm:$0xff]  ;;  %v798_v22 = vld [vmem:[#allocation4 + $0x10] sm:$0xff] }
  0x78   :  { %v420_v2 = vld [vmem:[#allocation4 + $0x7f8] sm:$0xff] }
  0x79   :  { %6977 = vmatpush1.bf16.msra.mxu0 %v6976_v56  ;;  %v6803_v56 = vld [vmem:[%s10357_s0 + $0xc] sm:$0x3]  ;;  %v823_v28 = vld [vmem:[#allocation4 + $0xd8] sm:$0xff] }
  0x7a   :  { %7041 = vmatpush1.bf16.msra.mxu1 %v7040_v57  ;;  %6979 = vmatprep.subr.bf16.mxu0 %v6978_v58  ;;  %v6996_v57 = vpack.c.bf16 %v305_v48, %v297_v47  ;;  %v7060_v58 = vpack.c.bf16 %v307_v51, %v299_v49  ;;  %v379_v47 = vld [vmem:[#allocation4 + $0x6b0] sm:$0xff]  ;;  %v7078_v48 = vpack.c.bf16 %v388_v41, %v380_v40  ;;  %v402_v51 = vld [vmem:[#allocation4 + $0x768] sm:$0xff]  ;;  %v839_v40 = vld [vmem:[#allocation4 + $0x158] sm:$0xff] }
  0x7b   :  { %7043 = vmatprep.subr.bf16.mxu1 %v7042_v62  ;;  %v315_v62 = vld [vmem:[#allocation4 + $0x4b0] sm:$0xff]  ;;  %3937 = vperm.xlu0 %9401, %v6803_v56   ;;  %v828_v41 = vld [vmem:[#allocation4 + $0x100] sm:$0xff] }
  0x7c   :  { %v387_v49 = vld [vmem:[#allocation4 + $0x6f0] sm:$0xff] }
  0x7d   :  { %6981 = vmatpush1.bf16.msra.mxu0 %v6980_v5  ;;  %v340_v5 = vld [vmem:[#allocation4 + $0x578] sm:$0xff]  ;;  %v7080_v55 = vpack.c.bf16 %v387_v49, %v379_v47  ;;  %v845_v47 = vld [vmem:[#allocation4 + $0x188] sm:$0xff] }
  0x7e   :  { %7045 = vmatpush1.bf16.msra.mxu1 %v7044_v6  ;;  %6983 = vmatprep.subr.bf16.mxu0 %v6982_v7  ;;  %v7000_v6 = vpack.c.bf16 %v321_v61, %v313_v60  ;;  %v7064_v7 = vpack.c.bf16 %v323_v0, %v315_v62  ;;  %v7066_v12 = vpack.c.bf16 %v340_v5, %v332_v4  ;;  %v403_v61 = vld [vmem:[#allocation4 + $0x770] sm:$0xff]  ;;  %v410_v62 = vld [vmem:[#allocation4 + $0x7a8] sm:$0xff]  ;;  %v412_v0 = vld [vmem:[#allocation4 + $0x7b8] sm:$0xff] }
  0x7f   :  { %7047 = vmatprep.subr.bf16.mxu1 %v7046_v11  ;;  %v331_v11 = vld [vmem:[#allocation4 + $0x530] sm:$0xff]  ;;  %v7082_v60 = vpack.c.bf16 %v404_v53, %v396_v52  ;;  %v847_v49 = vld [vmem:[#allocation4 + $0x198] sm:$0xff]  ;;  %v844_v53 = vld [vmem:[#allocation4 + $0x180] sm:$0xff] }
  0x80   :  { %v855_v52 = vld [vmem:[#allocation4 + $0x1d8] sm:$0xff] }
  0x81   :  { %6985 = vmatpush1.bf16.msra.mxu0 %v6984_v17  ;;  %v356_v17 = vld [vmem:[#allocation4 + $0x5f8] sm:$0xff] }
  0x82   :  { %7049 = vmatpush1.bf16.msra.mxu1 %v7048_v19  ;;  %6987 = vmatprep.subr.bf16.mxu0 %v6986_v20  ;;  %v7068_v19 = vpack.c.bf16 %v339_v13, %v331_v11  ;;  %v7006_v20 = vpack.c.bf16 %v354_v15, %v346_v14  ;;  %v797_v13 = vld [vmem:[#allocation4 + $0x8] sm:$0xff]  ;;  %v799_v15 = vld [vmem:[#allocation4 + $0x18] sm:$0xff] }
  0x83   :  { %7051 = vmatprep.subr.bf16.mxu1 %v7050_v24  ;;  %v7070_v24 = vpack.c.bf16 %v356_v17, %v348_v16  ;;  %v805_v14 = vld [vmem:[#allocation4 + $0x48] sm:$0xff]  ;;  %v807_v17 = vld [vmem:[#allocation4 + $0x58] sm:$0xff] }
  0x84   :  { %v7090_v16 = vpack.c.bf16 %v805_v14, %v797_v13  ;;  %v876_v14 = vld [vmem:[#allocation4 + $0x280] sm:$0xff] }
  0x85   :  { %6989 = vmatpush1.bf16.msra.mxu0 %v6988_v31  ;;  %v7072_v31 = vpack.c.bf16 %v355_v25, %v347_v23  ;;  %v806_v23 = vld [vmem:[#allocation4 + $0x50] sm:$0xff] }
  0x86   :  { %7053 = vmatpush1.bf16.msra.mxu1 %v7052_v32  ;;  %6991 = vmatprep.subr.bf16.mxu0 %v6990_v33  ;;  %v7010_v32 = vpack.c.bf16 %v370_v27, %v362_v26  ;;  %v361_v33 = vld [vmem:[#allocation4 + $0x620] sm:$0xff]  ;;  %v7156_v25 = vpack.c.bf16 %v806_v23, %v798_v22  ;;  %v821_v26 = vld [vmem:[#allocation4 + $0xc8] sm:$0xff]  ;;  %v815_v27 = vld [vmem:[#allocation4 + $0x98] sm:$0xff] }
  0x87   :  { %7055 = vmatprep.subr.bf16.mxu1 %v7054_v37  ;;  %v371_v37 = vld [vmem:[#allocation4 + $0x670] sm:$0xff]  ;;  %v7012_v42 = vpack.c.bf16 %v369_v34, %v361_v33  ;;  %v7158_v29 = vpack.c.bf16 %v823_v28, %v815_v27  ;;  %v903_v22 = vld [vmem:[#allocation4 + $0x358] sm:$0xff]  ;;  %v900_v27 = vld [vmem:[#allocation4 + $0x340] sm:$0xff] }
  0x88   :  { %v7076_v43 = vpack.c.bf16 %v371_v37, %v363_v35  ;;  %v822_v34 = vld [vmem:[#allocation4 + $0xd0] sm:$0xff]  ;;  %v829_v35 = vld [vmem:[#allocation4 + $0x108] sm:$0xff] }
  0x89   :  { %6993 = vmatpush1.bf16.msra.mxu0 %v6992_v44  ;;  %v7014_v44 = vpack.c.bf16 %v386_v39, %v378_v38  ;;  %v831_v39 = vld [vmem:[#allocation4 + $0x118] sm:$0xff]  ;;  %v894_v28 = vld [vmem:[#allocation4 + $0x310] sm:$0xff] }
  0x8a   :  { %7057 = vmatpush1.bf16.msra.mxu1 %v7056_v45  ;;  %6995 = vmatprep.subr.bf16.mxu0 %v6994_v46  ;;  %v377_v45 = vld [vmem:[#allocation4 + $0x6a0] sm:$0xff] }
  0x8b   :  { %7059 = vmatprep.subr.bf16.mxu1 %v7058_v50  ;;  %v385_v46 = vld [vmem:[#allocation4 + $0x6e0] sm:$0xff]  ;;  %v394_v50 = vld [vmem:[#allocation4 + $0x728] sm:$0xff] }
  0x8c   :  { %v7016_v54 = vpack.c.bf16 %v385_v46, %v377_v45  ;;  %v7018_v56 = vpack.c.bf16 %v402_v51, %v394_v50  ;;  %v838_v45 = vld [vmem:[#allocation4 + $0x150] sm:$0xff] }
  0x8d   :  { %6997 = vmatpush1.bf16.msra.mxu0 %v6996_v57  ;;  %v393_v57 = vld [vmem:[#allocation4 + $0x720] sm:$0xff] }
  0x8e   :  { %7061 = vmatpush1.bf16.msra.mxu1 %v7060_v58  ;;  %6999 = vmatprep.subr.bf16.mxu0 %v6998_v59  ;;  %v401_v58 = vld [vmem:[#allocation4 + $0x760] sm:$0xff]  ;;  %v395_v59 = vld [vmem:[#allocation4 + $0x730] sm:$0xff] }
  0x8f   :  { %7063 = vmatprep.subr.bf16.mxu1 %v7062_v63  ;;  %v418_v63 = vld [vmem:[#allocation4 + $0x7e8] sm:$0xff]  ;;  %v7020_v3 = vpack.c.bf16 %v401_v58, %v393_v57  ;;  %v7084_v4 = vpack.c.bf16 %v403_v61, %v395_v59  ;;  %v854_v57 = vld [vmem:[#allocation4 + $0x1d0] sm:$0xff]  ;;  %v871_v61 = vld [vmem:[#allocation4 + $0x258] sm:$0xff] }
  0x90   :  { %v7022_v5 = vpack.c.bf16 %v418_v63, %v410_v62  ;;  %v861_v58 = vld [vmem:[#allocation4 + $0x208] sm:$0xff] }
  0x91   :  { %7001 = vmatpush1.bf16.msra.mxu0 %v7000_v6  ;;  %v409_v6 = vld [vmem:[#allocation4 + $0x7a0] sm:$0xff]  ;;  %v869_v59 = vld [vmem:[#allocation4 + $0x248] sm:$0xff] }
  0x92   :  { %7065 = vmatpush1.bf16.msra.mxu1 %v7064_v7  ;;  %7003 = vmatprep.subr.bf16.mxu0 %v7002_v8  ;;  %v417_v7 = vld [vmem:[#allocation4 + $0x7e0] sm:$0xff]  ;;  %v7086_v8 = vpack.c.bf16 %v420_v2, %v412_v0  ;;  %v7106_v0 = vpack.c.bf16 %v869_v59, %v861_v58 }
  0x93   :  { %7067 = vmatprep.subr.bf16.mxu1 %v7066_v12  ;;  %v7024_v11 = vpack.c.bf16 %v417_v7, %v409_v6  ;;  %v7088_v12 = vpack.c.bf16 %v419_v10, %v411_v9  ;;  %v860_v2 = vld [vmem:[#allocation4 + $0x200] sm:$0xff]  ;;  %v870_v6 = vld [vmem:[#allocation4 + $0x250] sm:$0xff]  ;;  %v877_v7 = vld [vmem:[#allocation4 + $0x288] sm:$0xff] }
  0x94   :  { %v879_v9 = vld [vmem:[#allocation4 + $0x298] sm:$0xff] }
  0x95   :  { %7005 = vmatpush1.bf16.msra.mxu0 %v7004_v18  ;;  %v796_v18 = vld [vmem:[#allocation4] sm:$0xff]  ;;  %v887_v10 = vld [vmem:[#allocation4 + $0x2d8] sm:$0xff] }
  0x96   :  { %7069 = vmatpush1.bf16.msra.mxu1 %v7068_v19  ;;  %7007 = vmatprep.subr.bf16.mxu0 %v7006_v20  ;;  %v804_v19 = vld [vmem:[#allocation4 + $0x40] sm:$0xff]  ;;  %v7154_v20 = vpack.c.bf16 %v807_v17, %v799_v15  ;;  %v7174_v17 = vpack.c.bf16 %v887_v10, %v879_v9  ;;  %v967_v9 = vld [vmem:[#allocation4 + $0x558] sm:$0xff] }
  0x97   :  { %7071 = vmatprep.subr.bf16.mxu1 %v7070_v24  ;;  %v7092_v21 = vpack.c.bf16 %v804_v19, %v796_v18  ;;  %v813_v24 = vld [vmem:[#allocation4 + $0x88] sm:$0xff]  ;;  %v884_v15 = vld [vmem:[#allocation4 + $0x2c0] sm:$0xff]  ;;  %v886_v18 = vld [vmem:[#allocation4 + $0x2d0] sm:$0xff] }
  0x98   :  { %v893_v19 = vld [vmem:[#allocation4 + $0x308] sm:$0xff]  ;;  %v7112_v23 = vpack.c.bf16 %v884_v15, %v876_v14  ;;  %v956_v10 = vld [vmem:[#allocation4 + $0x500] sm:$0xff]  ;;  %v966_v14 = vld [vmem:[#allocation4 + $0x550] sm:$0xff] }
  0x99   :  { %7009 = vmatpush1.bf16.msra.mxu0 %v7008_v30  ;;  %v812_v30 = vld [vmem:[#allocation4 + $0x80] sm:$0xff] }
  0x9a   :  { %7073 = vmatpush1.bf16.msra.mxu1 %v7072_v31  ;;  %7011 = vmatprep.subr.bf16.mxu0 %v7010_v32  ;;  %v820_v31 = vld [vmem:[#allocation4 + $0xc0] sm:$0xff]  ;;  %v814_v32 = vld [vmem:[#allocation4 + $0x90] sm:$0xff] }
  0x9b   :  { %7075 = vmatprep.subr.bf16.mxu1 %v7074_v36  ;;  %v7096_v33 = vpack.c.bf16 %v820_v31, %v812_v30  ;;  %v837_v36 = vld [vmem:[#allocation4 + $0x148] sm:$0xff]  ;;  %v7160_v37 = vpack.c.bf16 %v822_v34, %v814_v32  ;;  %v911_v32 = vld [vmem:[#allocation4 + $0x398] sm:$0xff] }
  0x9c   :  { %v7098_v38 = vpack.c.bf16 %v837_v36, %v829_v35  ;;  %v909_v30 = vld [vmem:[#allocation4 + $0x388] sm:$0xff] }
  0x9d   :  { %7013 = vmatpush1.bf16.msra.mxu0 %v7012_v42  ;;  %v7162_v42 = vpack.c.bf16 %v839_v40, %v831_v39  ;;  %v917_v31 = vld [vmem:[#allocation4 + $0x3c8] sm:$0xff]  ;;  %v910_v40 = vld [vmem:[#allocation4 + $0x390] sm:$0xff] }
  0x9e   :  { %7077 = vmatpush1.bf16.msra.mxu1 %v7076_v43  ;;  %7015 = vmatprep.subr.bf16.mxu0 %v7014_v44  ;;  %v836_v43 = vld [vmem:[#allocation4 + $0x140] sm:$0xff]  ;;  %v830_v44 = vld [vmem:[#allocation4 + $0x110] sm:$0xff]  ;;  %v7118_v36 = vpack.c.bf16 %v917_v31, %v909_v30  ;;  %v991_v30 = vld [vmem:[#allocation4 + $0x618] sm:$0xff] }
  0x9f   :  { %7079 = vmatprep.subr.bf16.mxu1 %v7078_v48  ;;  %v7100_v46 = vpack.c.bf16 %v836_v43, %v828_v41  ;;  %v853_v48 = vld [vmem:[#allocation4 + $0x1c8] sm:$0xff]  ;;  %v7164_v50 = vpack.c.bf16 %v838_v45, %v830_v44  ;;  %v918_v41 = vld [vmem:[#allocation4 + $0x3d0] sm:$0xff] }
  0xa0   :  { %v7102_v51 = vpack.c.bf16 %v853_v48, %v845_v47  ;;  %v7184_v43 = vpack.c.bf16 %v918_v41, %v910_v40  ;;  %v925_v44 = vld [vmem:[#allocation4 + $0x408] sm:$0xff]  ;;  %v935_v47 = vld [vmem:[#allocation4 + $0x458] sm:$0xff]  ;;  %v924_v48 = vld [vmem:[#allocation4 + $0x400] sm:$0xff] }
  0xa1   :  { %7017 = vmatpush1.bf16.msra.mxu0 %v7016_v54  ;;  %v852_v54 = vld [vmem:[#allocation4 + $0x1c0] sm:$0xff]  ;;  %v933_v45 = vld [vmem:[#allocation4 + $0x448] sm:$0xff] }
  0xa2   :  { %7081 = vmatpush1.bf16.msra.mxu1 %v7080_v55  ;;  %7019 = vmatprep.subr.bf16.mxu0 %v7018_v56  ;;  %v7166_v55 = vpack.c.bf16 %v855_v52, %v847_v49  ;;  %v846_v56 = vld [vmem:[#allocation4 + $0x190] sm:$0xff]  ;;  %v7104_v62 = vpack.c.bf16 %v852_v54, %v844_v53  ;;  %v7122_v49 = vpack.c.bf16 %v933_v45, %v925_v44  ;;  %v941_v54 = vld [vmem:[#allocation4 + $0x488] sm:$0xff]  ;;  %v1015_v44 = vld [vmem:[#allocation4 + $0x6d8] sm:$0xff] }
  0xa3   :  { %7083 = vmatprep.subr.bf16.mxu1 %v7082_v60  ;;  %v863_v60 = vld [vmem:[#allocation4 + $0x218] sm:$0xff]  ;;  %v7168_v63 = vpack.c.bf16 %v854_v57, %v846_v56  ;;  %v926_v52 = vld [vmem:[#allocation4 + $0x410] sm:$0xff]  ;;  %v1005_v40 = vld [vmem:[#allocation4 + $0x688] sm:$0xff] }
  0xa4   :  { %v934_v53 = vld [vmem:[#allocation4 + $0x450] sm:$0xff]  ;;  %v943_v56 = vld [vmem:[#allocation4 + $0x498] sm:$0xff]  ;;  %v1013_v41 = vld [vmem:[#allocation4 + $0x6c8] sm:$0xff] }
  0xa5   :  { %7021 = vmatpush1.bf16.msra.mxu0 %v7020_v3  ;;  %v868_v3 = vld [vmem:[#allocation4 + $0x240] sm:$0xff]  ;;  %v7188_v58 = vpack.c.bf16 %v934_v53, %v926_v52  ;;  %v1029_v53 = vld [vmem:[#allocation4 + $0x748] sm:$0xff] }
  0xa6   :  { %7085 = vmatpush1.bf16.msra.mxu1 %v7084_v4  ;;  %7023 = vmatprep.subr.bf16.mxu0 %v7022_v5  ;;  %v862_v4 = vld [vmem:[#allocation4 + $0x210] sm:$0xff]  ;;  %v7170_v5 = vpack.c.bf16 %v871_v61, %v863_v60  ;;  %v951_v60 = vld [vmem:[#allocation4 + $0x4d8] sm:$0xff]  ;;  %v940_v61 = vld [vmem:[#allocation4 + $0x480] sm:$0xff] }
  0xa7   :  { %7087 = vmatprep.subr.bf16.mxu1 %v7086_v8  ;;  %v885_v8 = vld [vmem:[#allocation4 + $0x2c8] sm:$0xff]  ;;  %v1004_v45 = vld [vmem:[#allocation4 + $0x680] sm:$0xff] }
  0xa8   :  { %v7110_v13 = vpack.c.bf16 %v885_v8, %v877_v7  ;;  %v959_v7 = vld [vmem:[#allocation4 + $0x518] sm:$0xff] }
  0xa9   :  { %7025 = vmatpush1.bf16.msra.mxu0 %v7024_v11  ;;  %v7108_v11 = vpack.c.bf16 %v868_v3, %v860_v2  ;;  %v950_v2 = vld [vmem:[#allocation4 + $0x4d0] sm:$0xff] }
  0xaa   :  { %7089 = vmatpush1.bf16.msra.mxu1 %v7088_v12  ;;  %7091 = vmatprep.subr.bf16.mxu0 %v7090_v16  ;;  %v7172_v12 = vpack.c.bf16 %v870_v6, %v862_v4  ;;  %v878_v16 = vld [vmem:[#allocation4 + $0x290] sm:$0xff]  ;;  %v965_v6 = vld [vmem:[#allocation4 + $0x548] sm:$0xff] }
  0xab   :  { %7155 = vmatprep.subr.bf16.mxu1 %v7154_v20  ;;  %v901_v20 = vld [vmem:[#allocation4 + $0x348] sm:$0xff] }
  0xac   :  { %628 = vmatmul.mubr.f32.vlgmr.msra.gmra.mrb[2].mxu0 %v9775_v1 }
  0xad   :  { %699 = vmatmul.mubr.f32.vlgmr.msra.gmra.mrb[2].mxu1 %v9775_v1  ;;  %7093 = vmatpush1.bf16.msra.mxu0 %v7092_v21  ;;  %v7094_v1 = vpack.c.bf16 %v821_v26, %v813_v24  ;;  %v895_v21 = vld [vmem:[#allocation4 + $0x318] sm:$0xff]  ;;  %v7176_v24 = vpack.c.bf16 %v886_v18, %v878_v16  ;;  %v892_v26 = vld [vmem:[#allocation4 + $0x300] sm:$0xff]  ;;  %v981_v18 = vld [vmem:[#allocation4 + $0x5c8] sm:$0xff] }
  0xae   :  { %7157 = vmatpush1.bf16.msra.mxu1 %v7156_v25  ;;  %v7114_v25 = vpack.c.bf16 %v901_v20, %v893_v19  ;;  %v7116_v34 = vpack.c.bf16 %v900_v27, %v892_v26  ;;  %v975_v19 = vld [vmem:[#allocation4 + $0x598] sm:$0xff]  ;;  %v982_v26 = vld [vmem:[#allocation4 + $0x5d0] sm:$0xff] }
  0xaf   :  { %7095 = vmatprep.subr.bf16.mxu0 %v7094_v1  ;;  %7159 = vmatprep.subr.bf16.mxu1 %v7158_v29  ;;  %v7178_v1 = vpack.c.bf16 %v903_v22, %v895_v21  ;;  %v902_v29 = vld [vmem:[#allocation4 + $0x350] sm:$0xff]  ;;  %v983_v21 = vld [vmem:[#allocation4 + $0x5d8] sm:$0xff]  ;;  %v972_v22 = vld [vmem:[#allocation4 + $0x580] sm:$0xff] }
  0xb0   :  { %v7180_v35 = vpack.c.bf16 %v902_v29, %v894_v28  ;;  %v997_v29 = vld [vmem:[#allocation4 + $0x648] sm:$0xff] }
  0xb1   :  { %7097 = vmatpush1.bf16.msra.mxu0 %v7096_v33  ;;  %v919_v33 = vld [vmem:[#allocation4 + $0x3d8] sm:$0xff] }
  0xb2   :  { %7161 = vmatpush1.bf16.msra.mxu1 %v7160_v37  ;;  %7099 = vmatprep.subr.bf16.mxu0 %v7098_v38  ;;  %v908_v37 = vld [vmem:[#allocation4 + $0x380] sm:$0xff]  ;;  %v7182_v39 = vpack.c.bf16 %v919_v33, %v911_v32  ;;  %v999_v32 = vld [vmem:[#allocation4 + $0x658] sm:$0xff] }
  0xb3   :  { %7163 = vmatprep.subr.bf16.mxu1 %v7162_v42  ;;  %v916_v38 = vld [vmem:[#allocation4 + $0x3c0] sm:$0xff] }
  0xb4   :  { %v7120_v42 = vpack.c.bf16 %v916_v38, %v908_v37  ;;  %v988_v33 = vld [vmem:[#allocation4 + $0x600] sm:$0xff]  ;;  %v998_v37 = vld [vmem:[#allocation4 + $0x650] sm:$0xff] }
  0xb5   :  { %7101 = vmatpush1.bf16.msra.mxu0 %v7100_v46  ;;  %v927_v46 = vld [vmem:[#allocation4 + $0x418] sm:$0xff] }
  0xb6   :  { %7165 = vmatpush1.bf16.msra.mxu1 %v7164_v50  ;;  %7103 = vmatprep.subr.bf16.mxu0 %v7102_v51  ;;  %v7186_v50 = vpack.c.bf16 %v935_v47, %v927_v46  ;;  %v932_v51 = vld [vmem:[#allocation4 + $0x440] sm:$0xff] }
  0xb7   :  { %7167 = vmatprep.subr.bf16.mxu1 %v7166_v55  ;;  %v949_v55 = vld [vmem:[#allocation4 + $0x4c8] sm:$0xff]  ;;  %v7124_v57 = vpack.c.bf16 %v932_v51, %v924_v48  ;;  %v1012_v46 = vld [vmem:[#allocation4 + $0x6c0] sm:$0xff]  ;;  %v1006_v48 = vld [vmem:[#allocation4 + $0x690] sm:$0xff] }
  0xb8   :  { %v7126_v59 = vpack.c.bf16 %v949_v55, %v941_v54  ;;  %v7144_v51 = vpack.c.bf16 %v1012_v46, %v1004_v45  ;;  %v1023_v54 = vld [vmem:[#allocation4 + $0x718] sm:$0xff] }
  0xb9   :  { %7105 = vmatpush1.bf16.msra.mxu0 %v7104_v62  ;;  %v948_v62 = vld [vmem:[#allocation4 + $0x4c0] sm:$0xff]  ;;  %v1031_v55 = vld [vmem:[#allocation4 + $0x758] sm:$0xff] }
  0xba   :  { %7169 = vmatpush1.bf16.msra.mxu1 %v7168_v63  ;;  %7107 = vmatprep.subr.bf16.mxu0 %v7106_v0  ;;  %v7190_v63 = vpack.c.bf16 %v951_v60, %v943_v56  ;;  %v942_v0 = vld [vmem:[#allocation4 + $0x490] sm:$0xff]  ;;  %v7128_v3 = vpack.c.bf16 %v948_v62, %v940_v61  ;;  %v1037_v62 = vld [vmem:[#allocation4 + $0x788] sm:$0xff] }
  0xbb   :  { %7171 = vmatprep.subr.bf16.mxu1 %v7170_v5  ;;  %v7192_v4 = vpack.c.bf16 %v950_v2, %v942_v0  ;;  %v957_v5 = vld [vmem:[#allocation4 + $0x508] sm:$0xff]  ;;  %v1022_v60 = vld [vmem:[#allocation4 + $0x710] sm:$0xff]  ;;  %v1039_v0 = vld [vmem:[#allocation4 + $0x798] sm:$0xff] }
  0xbc   :  { %v7130_v8 = vpack.c.bf16 %v965_v6, %v957_v5  ;;  %v1030_v61 = vld [vmem:[#allocation4 + $0x750] sm:$0xff]  ;;  %v1047_v2 = vld [vmem:[#allocation4 + $0x7d8] sm:$0xff]  ;;  %v1036_v5 = vld [vmem:[#allocation4 + $0x780] sm:$0xff] }
  0xbd   :  { %7109 = vmatpush1.bf16.msra.mxu0 %v7108_v11  ;;  %v964_v11 = vld [vmem:[#allocation4 + $0x540] sm:$0xff] }
  0xbe   :  { %7173 = vmatpush1.bf16.msra.mxu1 %v7172_v12  ;;  %7111 = vmatprep.subr.bf16.mxu0 %v7110_v13  ;;  %v7194_v12 = vpack.c.bf16 %v967_v9, %v959_v7  ;;  %v958_v13 = vld [vmem:[#allocation4 + $0x510] sm:$0xff]  ;;  %v7132_v15 = vpack.c.bf16 %v964_v11, %v956_v10  ;;  %v7214_v7 = vpack.c.bf16 %v1047_v2, %v1039_v0 }
  0xbf   :  { %7175 = vmatprep.subr.bf16.mxu1 %v7174_v17  ;;  %v7196_v16 = vpack.c.bf16 %v966_v14, %v958_v13  ;;  %v973_v17 = vld [vmem:[#allocation4 + $0x588] sm:$0xff]  ;;  %v1038_v9 = vld [vmem:[#allocation4 + $0x790] sm:$0xff] }
  0xc0   :  { %v7134_v20 = vpack.c.bf16 %v981_v18, %v973_v17  ;;  %v1046_v10 = vld [vmem:[#allocation4 + $0x7d0] sm:$0xff]  ;;  %v801_v13 = vld [vmem:[#allocation4 + $0x28] sm:$0xff]  ;;  %v811_v17 = vld [vmem:[#allocation4 + $0x78] sm:$0xff] }
  0xc1   :  { %7113 = vmatpush1.bf16.msra.mxu0 %v7112_v23  ;;  %v980_v23 = vld [vmem:[#allocation4 + $0x5c0] sm:$0xff]  ;;  %v809_v14 = vld [vmem:[#allocation4 + $0x68] sm:$0xff] }
  0xc2   :  { %7177 = vmatpush1.bf16.msra.mxu1 %v7176_v24  ;;  %7115 = vmatprep.subr.bf16.mxu0 %v7114_v25  ;;  %v7198_v24 = vpack.c.bf16 %v983_v21, %v975_v19  ;;  %v974_v25 = vld [vmem:[#allocation4 + $0x590] sm:$0xff]  ;;  %v7136_v27 = vpack.c.bf16 %v980_v23, %v972_v22  ;;  %v68_v23 = vlaneseq }
  0xc3   :  { %7179 = vmatprep.subr.bf16.mxu1 %v7178_v1  ;;  %v7200_v28 = vpack.c.bf16 %v982_v26, %v974_v25  ;;  %v989_v1 = vld [vmem:[#allocation4 + $0x608] sm:$0xff]  ;;  %v59_v26 = vld [vmem:[%s10358_s1] sm:$0xff] }
  0xc4   :  { %v7138_v31 = vpack.c.bf16 %v997_v29, %v989_v1 }
  0xc5   :  { %7117 = vmatpush1.bf16.msra.mxu0 %v7116_v34  ;;  %v996_v34 = vld [vmem:[#allocation4 + $0x640] sm:$0xff] }
  0xc6   :  { %7181 = vmatpush1.bf16.msra.mxu1 %v7180_v35  ;;  %7119 = vmatprep.subr.bf16.mxu0 %v7118_v36  ;;  %v7202_v35 = vpack.c.bf16 %v999_v32, %v991_v30  ;;  %v990_v36 = vld [vmem:[#allocation4 + $0x610] sm:$0xff]  ;;  %v7140_v38 = vpack.c.bf16 %v996_v34, %v988_v33 }
  0xc7   :  { %7183 = vmatprep.subr.bf16.mxu1 %v7182_v39  ;;  %v7204_v39 = vpack.c.bf16 %v998_v37, %v990_v36 }
  0xc9   :  { %7121 = vmatpush1.bf16.msra.mxu0 %v7120_v42  ;;  %v1007_v42 = vld [vmem:[#allocation4 + $0x698] sm:$0xff] }
  0xca   :  { %7185 = vmatpush1.bf16.msra.mxu1 %v7184_v43  ;;  %7123 = vmatprep.subr.bf16.mxu0 %v7122_v49  ;;  %v7142_v43 = vpack.c.bf16 %v1013_v41, %v1005_v40  ;;  %v7206_v47 = vpack.c.bf16 %v1015_v44, %v1007_v42  ;;  %v1014_v49 = vld [vmem:[#allocation4 + $0x6d0] sm:$0xff] }
  0xcb   :  { %7187 = vmatprep.subr.bf16.mxu1 %v7186_v50  ;;  %v1021_v50 = vld [vmem:[#allocation4 + $0x708] sm:$0xff]  ;;  %v7208_v52 = vpack.c.bf16 %v1014_v49, %v1006_v48 }
  0xcc   :  { %v7146_v56 = vpack.c.bf16 %v1029_v53, %v1021_v50 }
  0xcd   :  { %7125 = vmatpush1.bf16.msra.mxu0 %v7124_v57  ;;  %v7210_v57 = vpack.c.bf16 %v1031_v55, %v1023_v54 }
  0xce   :  { %7189 = vmatpush1.bf16.msra.mxu1 %v7188_v58  ;;  %7127 = vmatprep.subr.bf16.mxu0 %v7126_v59  ;;  %v1020_v58 = vld [vmem:[#allocation4 + $0x700] sm:$0xff] }
  0xcf   :  { %7191 = vmatprep.subr.bf16.mxu1 %v7190_v63  ;;  %v1028_v59 = vld [vmem:[#allocation4 + $0x740] sm:$0xff]  ;;  %v1045_v63 = vld [vmem:[#allocation4 + $0x7c8] sm:$0xff] }
  0xd0   :  { %v7150_v6 = vpack.c.bf16 %v1045_v63, %v1037_v62 }
  0xd1   :  { %7129 = vmatpush1.bf16.msra.mxu0 %v7128_v3  ;;  %v7148_v3 = vpack.c.bf16 %v1028_v59, %v1020_v58 }
  0xd2   :  { %7193 = vmatpush1.bf16.msra.mxu1 %v7192_v4  ;;  %7131 = vmatprep.subr.bf16.mxu0 %v7130_v8  ;;  %v7212_v4 = vpack.c.bf16 %v1030_v61, %v1022_v60  ;;  %v1044_v8 = vld [vmem:[#allocation4 + $0x7c0] sm:$0xff] }
  0xd3   :  { %7195 = vmatprep.subr.bf16.mxu1 %v7194_v12  ;;  %v7152_v11 = vpack.c.bf16 %v1044_v8, %v1036_v5  ;;  %v7216_v12 = vpack.c.bf16 %v1046_v10, %v1038_v9 }
  0xd5   :  { %7133 = vmatpush1.bf16.msra.mxu0 %v7132_v15  ;;  %v803_v15 = vld [vmem:[#allocation4 + $0x38] sm:$0xff] }
  0xd6   :  { %7197 = vmatpush1.bf16.msra.mxu1 %v7196_v16  ;;  %7135 = vmatprep.subr.bf16.mxu0 %v7134_v20  ;;  %v7218_v16 = vpack.c.bf16 %v809_v14, %v801_v13  ;;  %v7282_v18 = vpack.c.bf16 %v811_v17, %v803_v15 }
  0xd7   :  { %7199 = vmatprep.subr.bf16.mxu1 %v7198_v24  ;;  %v9871_v24 = vshrl.u32 %v68_v23, 7 }
  0xd9   :  { %7137 = vmatpush1.bf16.msra.mxu0 %v7136_v27  ;;  %v9874_v25 = vsub.s32 0, %v9871_v24  ;;  %v9880_v27 = vsub.s32 2, %v9871_v24  ;;  %v9886_v1 = vsub.s32 3, %v9871_v24  ;;  %v9924_v55 = vsub.s32 4, %v9871_v24 }
  0xda   :  { %7201 = vmatpush1.bf16.msra.mxu1 %v7200_v28  ;;  %7139 = vmatprep.subr.bf16.mxu0 %v7138_v31  ;;  %v9883_v28 = vsub.s32 1, %v9871_v24  ;;  %v60_v31 = vld [vmem:[%s10360_s3] sm:$0xff]  ;;  %v9933_v58 = vsub.s32 7, %v9871_v24 }
  0xdb   :  { %7203 = vmatprep.subr.bf16.mxu1 %v7202_v35  ;;  %v9889_v29 = vrot.slane %v59_v26, %v9874_v25  ;;  %v9895_v32 = vrot.slane %v59_v26, %v9880_v27  ;;  %v9901_v34 = vrot.slane %v59_v26, %v9886_v1  ;;  %v9905_v36 = vrot.slane %v60_v31, %v9874_v25 }
  0xdc   :  { %v9898_v33 = vrot.slane %v59_v26, %v9883_v28  ;;  %v9913_v40 = vrot.slane %v60_v31, %v9883_v28  ;;  %v9917_v42 = vrot.slane %v60_v31, %v9886_v1  ;;  %v9936_v59 = vrot.slane %v59_v26, %v9924_v55 }
  0xdd   :  { %7141 = vmatpush1.bf16.msra.mxu0 %v7140_v38  ;;  %v9909_v38 = vrot.slane %v60_v31, %v9880_v27  ;;  %v9945_v0 = vrot.slane %v59_v26, %v9933_v58  ;;  %v9961_v14 = vrot.slane %v60_v31, %v9933_v58 }
  0xde   :  { %7205 = vmatpush1.bf16.msra.mxu1 %v7204_v39  ;;  %7143 = vmatprep.subr.bf16.mxu0 %v7142_v43 }
  0xdf   :  { %7207 = vmatprep.subr.bf16.mxu1 %v7206_v47 }
  0xe1   :  { %7145 = vmatpush1.bf16.msra.mxu0 %v7144_v51 }
  0xe2   :  { %7209 = vmatpush1.bf16.msra.mxu1 %v7208_v52  ;;  %7147 = vmatprep.subr.bf16.mxu0 %v7146_v56  ;;  %v65_v30 = vpop.permute.xlu0 %64  ;;  %v9927_v56 = vsub.s32 6, %v9871_v24 }
  0xe3   :  { %7211 = vmatprep.subr.bf16.mxu1 %v7210_v57  ;;  %v108_v35 = vmul.f32 %v9889_v29, %v65_v30  ;;  %v110_v37 = vmul.f32 %v9895_v32, %v65_v30  ;;  %v109_v39 = vmul.f32 %v9898_v33, %v65_v30  ;;  %v111_v41 = vmul.f32 %v9901_v34, %v65_v30 }
  0xe4   :  { %v9930_v57 = vsub.s32 5, %v9871_v24  ;;  %v9939_v61 = vrot.slane %v59_v26, %v9927_v56  ;;  %v112_v5 = vmul.f32 %v9936_v59, %v65_v30  ;;  %v115_v13 = vmul.f32 %v9945_v0, %v65_v30 }
  0xe5   :  { %7149 = vmatpush1.bf16.msra.mxu0 %v7148_v3  ;;  %v157_v43 = vadd.f32 %v9905_v36, %v108_v35  ;;  %v159_v44 = vadd.f32 %v9909_v38, %v110_v37  ;;  %v158_v45 = vadd.f32 %v9913_v40, %v109_v39  ;;  %v160_v46 = vadd.f32 %v9917_v42, %v111_v41 }
  0xe6   :  { %7213 = vmatpush1.bf16.msra.mxu1 %v7212_v4  ;;  %7151 = vmatprep.subr.bf16.mxu0 %v7150_v6  ;;  %v9942_v62 = vrot.slane %v59_v26, %v9930_v57  ;;  %v9949_v6 = vrot.slane %v60_v31, %v9924_v55  ;;  %v114_v9 = vmul.f32 %v9939_v61, %v65_v30 }
  0xe7   :  { %7215 = vmatprep.subr.bf16.mxu1 %v7214_v7  ;;  %v9952_v7 = vrot.slane %v60_v31, %v9927_v56  ;;  %v164_v26 = vadd.f32 %v9961_v14, %v115_v13  ;;  %v808_v13 = vld [vmem:[#allocation4 + $0x60] sm:$0xff] }
  0xe8   :  { %v113_v10 = vmul.f32 %v9942_v62, %v65_v30 }
  0xe9   :  { %7153 = vmatpush1.bf16.msra.mxu0 %v7152_v11  ;;  %v9957_v11 = vrot.slane %v60_v31, %v9930_v57 }
  0xea   :  { %7217 = vmatpush1.bf16.msra.mxu1 %v7216_v12  ;;  %7219 = vmatprep.subr.bf16.mxu0 %v7218_v16  ;;  %v161_v16 = vadd.f32 %v9949_v6, %v112_v5  ;;  %v6467_v5 = vld [vmem:[%s10363_s6] sm:$0x3] }
  0xeb   :  { %7283 = vmatprep.subr.bf16.mxu1 %v7282_v18  ;;  %v163_v18 = vadd.f32 %v9952_v7, %v114_v9 }
 0x13f   :  { %v487_v19 = vpop.f32.mrb[0].mxu0 }
 0x140   :  { %v558_v20 = vpop.f32.mrb[0].mxu1  ;;  %v489_v21 = vpop.f32.mrb[1].mxu0  ;;  %v705_v47 = vadd.f32 %v487_v19, %v157_v43  ;;  %v162_v19 = vadd.f32 %v9957_v11, %v113_v10  ;;  %v800_v10 = vld [vmem:[#allocation4 + $0x20] sm:$0xff] }
 0x141   :  { %v560_v22 = vpop.f32.mrb[1].mxu1  ;;  %v707_v48 = vadd.f32 %v558_v20, %v159_v44  ;;  %v706_v49 = vadd.f32 %v489_v21, %v158_v45 }
 0x142   :  { %v708_v50 = vadd.f32 %v560_v22, %v160_v46  ;;  %v6756_v51 = vmul.f32 -1.442695, %v705_v47 }
 0x143   :  { %v6758_v52 = vmul.f32 -1.442695, %v707_v48  ;;  %v6757_v53 = vmul.f32 -1.442695, %v706_v49 }
 0x144   :  { %v6759_v54 = vmul.f32 -1.442695, %v708_v50  ;;  %9403 = vpow2.f32 %v6756_v51 }
 0x145   :  { %9405 = vpow2.f32 %v6758_v52 }
 0x146   :  { %9407 = vpow2.f32 %v6757_v53 }
 0x147   :  { %9409 = vpow2.f32 %v6759_v54 }
 0x14e   :  { %v9404_v60 = vpop.eup %9403 }
 0x14f   :  { %v9406_v63 = vpop.eup %9405  ;;  %v719_v4 = vadd.f32 1.0, %v9404_v60 }
 0x150   :  { %v9408_v2 = vpop.eup %9407  ;;  %v731_v8 = vadd.f32 1.0, %v9406_v63 }
 0x151   :  { %v9410_v3 = vpop.eup %9409  ;;  %v720_v12 = vadd.f32 1.0, %v9408_v2  ;;  %9411 = vrcp.f32 %v719_v4 }
 0x152   :  { %v732_v15 = vadd.f32 1.0, %v9410_v3  ;;  %9413 = vrcp.f32 %v731_v8  ;;  %v9777_v8 = vmov 1983009808  }
 0x153   :  { %9415 = vrcp.f32 %v720_v12  ;;  %v6479_v9 = vunpack.c.l.s4 %v9777_v8  ;;  %v840_v8 = vld [vmem:[#allocation4 + $0x160] sm:$0xff] }
 0x154   :  { %9417 = vrcp.f32 %v732_v15  ;;  %v802_v15 = vld [vmem:[#allocation4 + $0x30] sm:$0xff] }
 0x15b   :  { %v9412_v43 = vpop.eup %9411 }
 0x15c   :  { %v9414_v44 = vpop.eup %9413 }
 0x15d   :  { %v9416_v45 = vpop.eup %9415  ;;  %v751_v49 = vmul.f32 0.0, %v9414_v44  ;;  %v824_v44 = vld [vmem:[#allocation4 + $0xe0] sm:$0xff] }
 0x15e   :  { %v9418_v46 = vpop.eup %9417 }
 0x15f   :  { %v752_v51 = vmul.f32 0.0, %v9418_v46  ;;  %v826_v46 = vld [vmem:[#allocation4 + $0xf0] sm:$0xff] }
 0x17f   :  { %v629_v17 = vpop.f32.mrb[2].mxu0 }
 0x180   :  { %v709_v20 = vadd.f32 %v629_v17, %v161_v16  ;;  %v700_v21 = vpop.f32.mrb[2].mxu1  ;;  %v631_v22 = vpop.f32.mrb[3].mxu0  ;;  %v810_v16 = vld [vmem:[#allocation4 + $0x70] sm:$0xff] }
 0x181   :  { %v711_v30 = vadd.f32 %v700_v21, %v163_v18  ;;  %v710_v31 = vadd.f32 %v631_v22, %v162_v19  ;;  %v702_v35 = vpop.f32.mrb[3].mxu1  ;;  %v817_v19 = vld [vmem:[#allocation4 + $0xa8] sm:$0xff]  ;;  %v6472_v21 = vrot.slane %v6467_v5, %v9874_v25  ;;  %v6476_v22 = vrot.slane %v6467_v5, %v9883_v28  ;;  %v832_v5 = vld [vmem:[#allocation4 + $0x120] sm:$0xff] }
 0x182   :  { %9419 = vtanh.f32 %v709_v20  ;;  %v712_v37 = vadd.f32 %v702_v35, %v164_v26  ;;  %v825_v26 = vld [vmem:[#allocation4 + $0xe8] sm:$0xff]  ;;  %v6480_v35 = vunpack.c.0.s8 %v6479_v9 }
 0x183   :  { %v6760_v39 = vmul.f32 -1.442695, %v711_v30  ;;  %9421 = vtanh.f32 %v710_v31  ;;  %v819_v30 = vld [vmem:[#allocation4 + $0xb8] sm:$0xff] }
 0x184   :  { %v6761_v41 = vmul.f32 -1.442695, %v712_v37  ;;  %v827_v31 = vld [vmem:[#allocation4 + $0xf8] sm:$0xff] }
 0x185   :  { %9423 = vpow2.f32 %v6760_v39  ;;  %v7220_v39 = vpack.c.bf16 %v808_v13, %v800_v10  ;;  %v842_v13 = vld [vmem:[#allocation4 + $0x170] sm:$0xff] }
 0x186   :  { %9425 = vpow2.f32 %v6761_v41  ;;  %v7284_v41 = vpack.c.bf16 %v810_v16, %v802_v15  ;;  %v849_v15 = vld [vmem:[#allocation4 + $0x1a8] sm:$0xff] }
 0x187   :  { %v857_v16 = vld [vmem:[#allocation4 + $0x1e8] sm:$0xff] }
 0x18c   :  { %v9420_v47 = vpop.eup %9419 }
 0x18d   :  { %v9422_v48 = vpop.eup %9421  ;;  %v753_v50 = vmul.f32 %v9420_v47, %v9412_v43  ;;  %v816_v43 = vld [vmem:[#allocation4 + $0xa0] sm:$0xff]  ;;  %v833_v47 = vld [vmem:[#allocation4 + $0x128] sm:$0xff] }
 0x18e   :  { %v754_v52 = vmul.f32 %v9422_v48, %v9416_v45  ;;  %v818_v45 = vld [vmem:[#allocation4 + $0xb0] sm:$0xff] }
 0x18f   :  { %v9424_v53 = vpop.eup %9423  ;;  %v9967_v54 = vadd.f32 %v753_v50, %v751_v49  ;;  %v7222_v49 = vpack.c.bf16 %v825_v26, %v817_v19  ;;  %v7286_v50 = vpack.c.bf16 %v827_v31, %v819_v30  ;;  %v859_v19 = vld [vmem:[#allocation4 + $0x1f8] sm:$0xff]  ;;  %v848_v26 = vld [vmem:[#allocation4 + $0x1a0] sm:$0xff]  ;;  %v7230_v31 = vpack.c.bf16 %v857_v16, %v849_v15 }
 0x190   :  { %v9426_v60 = vpop.eup %9425  ;;  %v745_v63 = vadd.f32 1.0, %v9424_v53  ;;  %v9969_v2 = vadd.f32 %v754_v52, %v752_v51  ;;  %v841_v51 = vld [vmem:[#allocation4 + $0x168] sm:$0xff]  ;;  %v835_v52 = vld [vmem:[#allocation4 + $0x138] sm:$0xff]  ;;  %v856_v30 = vld [vmem:[#allocation4 + $0x1e0] sm:$0xff] }
 0x191   :  { %9427 = vtanh.f32 %v9967_v54  ;;  %v746_v3 = vadd.f32 1.0, %v9426_v60  ;;  %v843_v53 = vld [vmem:[#allocation4 + $0x178] sm:$0xff]  ;;  %v6477_v60 = vcombine.low %v6472_v21, %v6476_v22  ;;  %v7226_v9 = vpack.c.bf16 %v841_v51, %v833_v47  ;;  %v880_v16 = vld [vmem:[#allocation4 + $0x2a0] sm:$0xff] }
 0x192   :  { %9429 = vrcp.f32 %v745_v63  ;;  %v9984_v63 = vsub.s32 %v6480_v35, %v9871_v24  ;;  %v7290_v10 = vpack.c.bf16 %v843_v53, %v835_v52  ;;  %v7228_v21 = vpack.c.bf16 %v840_v8, %v832_v5  ;;  %v872_v53 = vld [vmem:[#allocation4 + $0x260] sm:$0xff]  ;;  %v881_v5 = vld [vmem:[#allocation4 + $0x2a8] sm:$0xff] }
 0x193   :  { %9431 = vtanh.f32 %v9969_v2  ;;  %v7232_v47 = vpack.c.bf16 %v856_v30, %v848_v26  ;;  %v889_v8 = vld [vmem:[#allocation4 + $0x2e8] sm:$0xff] }
 0x194   :  { %9433 = vrcp.f32 %v746_v3  ;;  %v7224_v3 = vpack.c.bf16 %v824_v44, %v816_v43  ;;  %v873_v43 = vld [vmem:[#allocation4 + $0x268] sm:$0xff]  ;;  %v867_v44 = vld [vmem:[#allocation4 + $0x238] sm:$0xff] }
 0x195   :  { %v897_v26 = vld [vmem:[#allocation4 + $0x328] sm:$0xff] }
 0x19b   :  { %v9428_v4 = vpop.eup %9427 }
 0x19c   :  { %v9430_v12 = vpop.eup %9429 }
 0x19d   :  { %v9432_v17 = vpop.eup %9431  ;;  %v9976_v18 = vmul.f32 %v9430_v12, %v9428_v4  ;;  %v7288_v4 = vpack.c.bf16 %v826_v46, %v818_v45  ;;  %v834_v12 = vld [vmem:[#allocation4 + $0x130] sm:$0xff]  ;;  %v875_v45 = vld [vmem:[#allocation4 + $0x278] sm:$0xff] }
 0x19e   :  { %v9434_v20 = vpop.eup %9433  ;;  %v7292_v22 = vpack.c.bf16 %v842_v13, %v834_v12  ;;  %v7298_v52 = vpack.c.bf16 %v875_v45, %v867_v44 }
 0x19f   :  { %v760_v37 = vmul.f32 %v9434_v20, %v9432_v17  ;;  %v851_v17 = vld [vmem:[#allocation4 + $0x1b8] sm:$0xff]  ;;  %v9987_v20 = vrot.slane %v6477_v60, %v9984_v63  ;;  %v866_v60 = vld [vmem:[#allocation4 + $0x230] sm:$0xff] }
 0x1a0   :  { %v7294_v35 = vpack.c.bf16 %v859_v19, %v851_v17  ;;  %v888_v17 = vld [vmem:[#allocation4 + $0x2e0] sm:$0xff]  ;;  %v7238_v19 = vpack.c.bf16 %v889_v8, %v881_v5 }
 0x1a1   :  { %1116 = vmatprep.mubr.f32.mxu0 %v760_v37  ;;  %1187 = vmatprep.mubr.f32.mxu1 %v760_v37  ;;  %v763_v48 = vcombine.low %v9976_v18, %v760_v37  ;;  %v7240_v44 = vpack.c.bf16 %v888_v17, %v880_v16  ;;  %v912_v8 = vld [vmem:[#allocation4 + $0x3a0] sm:$0xff]  ;;  %v929_v16 = vld [vmem:[#allocation4 + $0x428] sm:$0xff] }
 0x1a2   :  { %1117 = vmatmul.mubr.f32.vlgmr.msra.gmra.mrb[4].mxu0 %v9976_v18  ;;  %1188 = vmatmul.mubr.f32.vlgmr.msra.gmra.mrb[4].mxu1 %v9976_v18  ;;  %v937_v17 = vld [vmem:[#allocation4 + $0x468] sm:$0xff] }
 0x1a3   :  { %6762 = vst.sshfl [vmem:[#allocation2] sm:$0x33 pattern:$0x76325410] %v763_v48  ;;  %7221 = vmatpush1.bf16.msra.mxu0 %v7220_v39  ;;  %7285 = vmatpush1.bf16.msra.mxu1 %v7284_v41  ;;  %v858_v39 = vld [vmem:[#allocation4 + $0x1f0] sm:$0xff]  ;;  %v865_v41 = vld [vmem:[#allocation4 + $0x228] sm:$0xff] }
 0x1a4   :  { %1258 = vmatprep.mubr.f32.mxu0 %v760_v37  ;;  %1329 = vmatprep.mubr.f32.mxu1 %v760_v37  ;;  %v850_v37 = vld [vmem:[#allocation4 + $0x1b0] sm:$0xff]  ;;  %v7234_v51 = vpack.c.bf16 %v873_v43, %v865_v41  ;;  %v907_v41 = vld [vmem:[#allocation4 + $0x378] sm:$0xff] }
 0x1a5   :  { %7223 = vmatprep.subr.bf16.mxu0 %v7222_v49  ;;  %7287 = vmatprep.subr.bf16.mxu1 %v7286_v50  ;;  %v7296_v48 = vpack.c.bf16 %v858_v39, %v850_v37  ;;  %v864_v49 = vld [vmem:[#allocation4 + $0x220] sm:$0xff]  ;;  %v905_v37 = vld [vmem:[#allocation4 + $0x368] sm:$0xff]  ;;  %v899_v39 = vld [vmem:[#allocation4 + $0x338] sm:$0xff] }
 0x1a6   :  { %v7236_v12 = vpack.c.bf16 %v872_v53, %v864_v49  ;;  %v7306_v49 = vpack.c.bf16 %v907_v41, %v899_v39  ;;  %v921_v53 = vld [vmem:[#allocation4 + $0x3e8] sm:$0xff]  ;;  %v930_v39 = vld [vmem:[#allocation4 + $0x430] sm:$0xff] }
 0x1a7   :  { %7225 = vmatpush1.bf16.msra.mxu0 %v7224_v3  ;;  %7289 = vmatpush1.bf16.msra.mxu1 %v7288_v4  ;;  %v874_v3 = vld [vmem:[#allocation4 + $0x270] sm:$0xff] }
 0x1a8   :  { %7227 = vmatprep.subr.bf16.mxu0 %v7226_v9  ;;  %7291 = vmatprep.subr.bf16.mxu1 %v7290_v10  ;;  %v883_v9 = vld [vmem:[#allocation4 + $0x2b8] sm:$0xff]  ;;  %v7300_v13 = vpack.c.bf16 %v874_v3, %v866_v60  ;;  %v938_v41 = vld [vmem:[#allocation4 + $0x470] sm:$0xff] }
 0x1a9   :  { %v891_v10 = vld [vmem:[#allocation4 + $0x2f8] sm:$0xff] }
 0x1aa   :  { %v6457_v46 = vld [vmem:[#allocation2] sm:$0xf] }
 0x1ab   :  { %7229 = vmatpush1.bf16.msra.mxu0 %v7228_v21  ;;  %7293 = vmatpush1.bf16.msra.mxu1 %v7292_v22  ;;  %v6486_v50 = vmul.f32 %v9987_v20, %v6457_v46  ;;  %v882_v21 = vld [vmem:[#allocation4 + $0x2b0] sm:$0xff]  ;;  %v896_v46 = vld [vmem:[#allocation4 + $0x320] sm:$0xff]  ;;  %v915_v60 = vld [vmem:[#allocation4 + $0x3b8] sm:$0xff] }
 0x1ac   :  { %7231 = vmatprep.subr.bf16.mxu0 %v7230_v31  ;;  %7295 = vmatprep.subr.bf16.mxu1 %v7294_v35  ;;  %v890_v22 = vld [vmem:[#allocation4 + $0x2f0] sm:$0xff]  ;;  %v7302_v35 = vpack.c.bf16 %v891_v10, %v883_v9  ;;  %v923_v3 = vld [vmem:[#allocation4 + $0x3f8] sm:$0xff]  ;;  %v920_v9 = vld [vmem:[#allocation4 + $0x3e0] sm:$0xff] }
 0x1ad   :  { %v6512_v4 = vrot.slane %v6486_v50, %v9984_v63  ;;  %v7304_v45 = vpack.c.bf16 %v890_v22, %v882_v21  ;;  %v898_v50 = vld [vmem:[#allocation4 + $0x330] sm:$0xff]  ;;  %v939_v21 = vld [vmem:[#allocation4 + $0x478] sm:$0xff]  ;;  %v7248_v22 = vpack.c.bf16 %v920_v9, %v912_v8 }
 0x1ae   :  { %v971_v8 = vld [vmem:[#allocation4 + $0x578] sm:$0xff] }
 0x1af   :  { %7233 = vmatpush1.bf16.msra.mxu0 %v7232_v47  ;;  %7297 = vmatpush1.bf16.msra.mxu1 %v7296_v48  ;;  %v6513_v15 = vcombine.high %v6512_v4, %v6512_v4  ;;  %v6607_v30 = vsel %vm6606_vm0, %v6512_v4, 0.0  ;;  %v904_v47 = vld [vmem:[#allocation4 + $0x360] sm:$0xff]  ;;  %v7242_v48 = vpack.c.bf16 %v905_v37, %v897_v26 }
 0x1b0   :  { %7235 = vmatprep.subr.bf16.mxu0 %v7234_v51  ;;  %7299 = vmatprep.subr.bf16.mxu1 %v7298_v52  ;;  %v906_v51 = vld [vmem:[#allocation4 + $0x370] sm:$0xff]  ;;  %v913_v52 = vld [vmem:[#allocation4 + $0x3a8] sm:$0xff]  ;;  %v7244_v4 = vpack.c.bf16 %v904_v47, %v896_v46  ;;  %v955_v46 = vld [vmem:[#allocation4 + $0x4f8] sm:$0xff] }
 0x1b1   :  { %v6608_v31 = vsel %vm6606_vm0, %v6513_v15, 0.0  ;;  %v7308_v5 = vpack.c.bf16 %v906_v51, %v898_v50  ;;  %v7246_v10 = vpack.c.bf16 %v921_v53, %v913_v52  ;;  %v922_v15 = vld [vmem:[#allocation4 + $0x3f0] sm:$0xff]  ;;  %v952_v50 = vld [vmem:[#allocation4 + $0x4e0] sm:$0xff] }
 0x1b2   :  { %v6609_v43 = vadd.f32 %v6608_v31, %v6607_v30  ;;  %v928_v30 = vld [vmem:[#allocation4 + $0x420] sm:$0xff]  ;;  %v946_v53 = vld [vmem:[#allocation4 + $0x4b0] sm:$0xff] }
 0x1b3   :  { %7237 = vmatpush1.bf16.msra.mxu0 %v7236_v12  ;;  %7301 = vmatpush1.bf16.msra.mxu1 %v7300_v13  ;;  %v7310_v12 = vpack.c.bf16 %v923_v3, %v915_v60  ;;  %v914_v13 = vld [vmem:[#allocation4 + $0x3b0] sm:$0xff]  ;;  %v936_v31 = vld [vmem:[#allocation4 + $0x460] sm:$0xff]  ;;  %v961_v3 = vld [vmem:[#allocation4 + $0x528] sm:$0xff] }
 0x1b4   :  { %6610 = vadd.xlane.f32.xlu0 %v6609_v43  ;;  %7239 = vmatprep.subr.bf16.mxu0 %v7238_v19  ;;  %v931_v19 = vld [vmem:[#allocation4 + $0x438] sm:$0xff]  ;;  %v7312_v26 = vpack.c.bf16 %v922_v15, %v914_v13  ;;  %v945_v43 = vld [vmem:[#allocation4 + $0x4a8] sm:$0xff]  ;;  %v7252_v47 = vpack.c.bf16 %v936_v31, %v928_v30  ;;  %v954_v60 = vld [vmem:[#allocation4 + $0x4f0] sm:$0xff] }
 0x1b5   :  { %7303 = vmatprep.subr.bf16.mxu1 %v7302_v35  ;;  %v7250_v35 = vpack.c.bf16 %v937_v17, %v929_v16  ;;  %v7314_v37 = vpack.c.bf16 %v939_v21, %v931_v19  ;;  %v968_v13 = vld [vmem:[#allocation4 + $0x560] sm:$0xff]  ;;  %v962_v17 = vld [vmem:[#allocation4 + $0x530] sm:$0xff]  ;;  %v977_v21 = vld [vmem:[#allocation4 + $0x5a8] sm:$0xff] }
 0x1b6   :  { %v970_v19 = vld [vmem:[#allocation4 + $0x570] sm:$0xff]  ;;  %v987_v30 = vld [vmem:[#allocation4 + $0x5f8] sm:$0xff] }
 0x1b7   :  { %7241 = vmatpush1.bf16.msra.mxu0 %v7240_v44  ;;  %7305 = vmatpush1.bf16.msra.mxu1 %v7304_v45  ;;  %v953_v44 = vld [vmem:[#allocation4 + $0x4e8] sm:$0xff]  ;;  %v947_v45 = vld [vmem:[#allocation4 + $0x4b8] sm:$0xff] }
 0x1b8   :  { %7243 = vmatprep.subr.bf16.mxu0 %v7242_v48  ;;  %7307 = vmatprep.subr.bf16.mxu1 %v7306_v49  ;;  %v7316_v48 = vpack.c.bf16 %v938_v41, %v930_v39  ;;  %v944_v49 = vld [vmem:[#allocation4 + $0x4a0] sm:$0xff]  ;;  %v7254_v51 = vpack.c.bf16 %v953_v44, %v945_v43  ;;  %v7318_v52 = vpack.c.bf16 %v955_v46, %v947_v45  ;;  %v978_v44 = vld [vmem:[#allocation4 + $0x5b0] sm:$0xff]  ;;  %v993_v46 = vld [vmem:[#allocation4 + $0x628] sm:$0xff] }
 0x1b9   :  { %v7256_v9 = vpack.c.bf16 %v952_v50, %v944_v49  ;;  %v984_v39 = vld [vmem:[#allocation4 + $0x5e0] sm:$0xff]  ;;  %v986_v45 = vld [vmem:[#allocation4 + $0x5f0] sm:$0xff]  ;;  %v1003_v49 = vld [vmem:[#allocation4 + $0x678] sm:$0xff] }
 0x1bb   :  { %7245 = vmatpush1.bf16.msra.mxu0 %v7244_v4  ;;  %7309 = vmatpush1.bf16.msra.mxu1 %v7308_v5  ;;  %v969_v4 = vld [vmem:[#allocation4 + $0x568] sm:$0xff]  ;;  %v963_v5 = vld [vmem:[#allocation4 + $0x538] sm:$0xff] }
 0x1bc   :  { %7247 = vmatprep.subr.bf16.mxu0 %v7246_v10  ;;  %7311 = vmatprep.subr.bf16.mxu1 %v7310_v12  ;;  %v7320_v10 = vpack.c.bf16 %v954_v60, %v946_v53  ;;  %v960_v12 = vld [vmem:[#allocation4 + $0x520] sm:$0xff]  ;;  %v7258_v15 = vpack.c.bf16 %v969_v4, %v961_v3  ;;  %v7322_v16 = vpack.c.bf16 %v971_v8, %v963_v5  ;;  %v994_v4 = vld [vmem:[#allocation4 + $0x630] sm:$0xff]  ;;  %v1009_v8 = vld [vmem:[#allocation4 + $0x6a8] sm:$0xff] }
 0x1bd   :  { %v7260_v31 = vpack.c.bf16 %v968_v13, %v960_v12  ;;  %v1000_v53 = vld [vmem:[#allocation4 + $0x660] sm:$0xff]  ;;  %v1002_v5 = vld [vmem:[#allocation4 + $0x670] sm:$0xff]  ;;  %v1019_v12 = vld [vmem:[#allocation4 + $0x6f8] sm:$0xff] }
 0x1bf   :  { %7249 = vmatpush1.bf16.msra.mxu0 %v7248_v22  ;;  %7313 = vmatpush1.bf16.msra.mxu1 %v7312_v26  ;;  %v985_v22 = vld [vmem:[#allocation4 + $0x5e8] sm:$0xff]  ;;  %v979_v26 = vld [vmem:[#allocation4 + $0x5b8] sm:$0xff] }
 0x1c0   :  { %7251 = vmatprep.subr.bf16.mxu0 %v7250_v35  ;;  %7315 = vmatprep.subr.bf16.mxu1 %v7314_v37  ;;  %v7324_v35 = vpack.c.bf16 %v970_v19, %v962_v17  ;;  %v976_v37 = vld [vmem:[#allocation4 + $0x5a0] sm:$0xff]  ;;  %v7262_v41 = vpack.c.bf16 %v985_v22, %v977_v21  ;;  %v7326_v43 = vpack.c.bf16 %v987_v30, %v979_v26  ;;  %v1010_v22 = vld [vmem:[#allocation4 + $0x6b0] sm:$0xff]  ;;  %v1025_v30 = vld [vmem:[#allocation4 + $0x728] sm:$0xff] }
 0x1c1   :  { %v7264_v50 = vpack.c.bf16 %v984_v39, %v976_v37  ;;  %v1016_v17 = vld [vmem:[#allocation4 + $0x6e0] sm:$0xff]  ;;  %v1018_v26 = vld [vmem:[#allocation4 + $0x6f0] sm:$0xff]  ;;  %v1035_v37 = vld [vmem:[#allocation4 + $0x778] sm:$0xff] }
 0x1c3   :  { %7253 = vmatpush1.bf16.msra.mxu0 %v7252_v47  ;;  %7317 = vmatpush1.bf16.msra.mxu1 %v7316_v48  ;;  %v1001_v47 = vld [vmem:[#allocation4 + $0x668] sm:$0xff]  ;;  %v995_v48 = vld [vmem:[#allocation4 + $0x638] sm:$0xff] }
 0x1c4   :  { %7255 = vmatprep.subr.bf16.mxu0 %v7254_v51  ;;  %7319 = vmatprep.subr.bf16.mxu1 %v7318_v52  ;;  %v7328_v51 = vpack.c.bf16 %v986_v45, %v978_v44  ;;  %v992_v52 = vld [vmem:[#allocation4 + $0x620] sm:$0xff]  ;;  %v7266_v60 = vpack.c.bf16 %v1001_v47, %v993_v46  ;;  %v7330_v3 = vpack.c.bf16 %v1003_v49, %v995_v48  ;;  %v1026_v47 = vld [vmem:[#allocation4 + $0x730] sm:$0xff]  ;;  %v1041_v49 = vld [vmem:[#allocation4 + $0x7a8] sm:$0xff] }
 0x1c5   :  { %v7268_v13 = vpack.c.bf16 %v1000_v53, %v992_v52  ;;  %v1032_v44 = vld [vmem:[#allocation4 + $0x760] sm:$0xff]  ;;  %v1034_v48 = vld [vmem:[#allocation4 + $0x770] sm:$0xff]  ;;  %v1051_v52 = vld [vmem:[#allocation4 + $0x7f8] sm:$0xff] }
 0x1c7   :  { %7257 = vmatpush1.bf16.msra.mxu0 %v7256_v9  ;;  %7321 = vmatpush1.bf16.msra.mxu1 %v7320_v10  ;;  %v1017_v9 = vld [vmem:[#allocation4 + $0x6e8] sm:$0xff]  ;;  %v1011_v10 = vld [vmem:[#allocation4 + $0x6b8] sm:$0xff] }
 0x1c8   :  { %7259 = vmatprep.subr.bf16.mxu0 %v7258_v15  ;;  %7323 = vmatprep.subr.bf16.mxu1 %v7322_v16  ;;  %v7332_v15 = vpack.c.bf16 %v1002_v5, %v994_v4  ;;  %v1008_v16 = vld [vmem:[#allocation4 + $0x6a0] sm:$0xff]  ;;  %v7270_v19 = vpack.c.bf16 %v1017_v9, %v1009_v8  ;;  %v7334_v21 = vpack.c.bf16 %v1019_v12, %v1011_v10  ;;  %v1042_v9 = vld [vmem:[#allocation4 + $0x7b0] sm:$0xff] }
 0x1c9   :  { %v7272_v39 = vpack.c.bf16 %v1016_v17, %v1008_v16  ;;  %v1048_v8 = vld [vmem:[#allocation4 + $0x7e0] sm:$0xff]  ;;  %v1050_v10 = vld [vmem:[#allocation4 + $0x7f0] sm:$0xff]  ;;  %v1437_v16 = vld [vmem:[#allocation4 + $0x48] sm:$0xff] }
 0x1ca   :  { %v1431_v17 = vld [vmem:[#allocation4 + $0x18] sm:$0xff] }
 0x1cb   :  { %7261 = vmatpush1.bf16.msra.mxu0 %v7260_v31  ;;  %7325 = vmatpush1.bf16.msra.mxu1 %v7324_v35  ;;  %v1033_v31 = vld [vmem:[#allocation4 + $0x768] sm:$0xff]  ;;  %v1027_v35 = vld [vmem:[#allocation4 + $0x738] sm:$0xff] }
 0x1cc   :  { %7263 = vmatprep.subr.bf16.mxu0 %v7262_v41  ;;  %7327 = vmatprep.subr.bf16.mxu1 %v7326_v43  ;;  %v7336_v41 = vpack.c.bf16 %v1018_v26, %v1010_v22  ;;  %v1024_v43 = vld [vmem:[#allocation4 + $0x720] sm:$0xff]  ;;  %v7274_v45 = vpack.c.bf16 %v1033_v31, %v1025_v30  ;;  %v7338_v46 = vpack.c.bf16 %v1035_v37, %v1027_v35  ;;  %v1430_v35 = vld [vmem:[#allocation4 + $0x10] sm:$0xff] }
 0x1cd   :  { %v7276_v53 = vpack.c.bf16 %v1032_v44, %v1024_v43  ;;  %v1428_v22 = vld [vmem:[#allocation4] sm:$0xff]  ;;  %v1438_v37 = vld [vmem:[#allocation4 + $0x50] sm:$0xff]  ;;  %v1453_v43 = vld [vmem:[#allocation4 + $0xc8] sm:$0xff] }
 0x1ce   :  { %v1436_v26 = vld [vmem:[#allocation4 + $0x40] sm:$0xff]  ;;  %v1447_v44 = vld [vmem:[#allocation4 + $0x98] sm:$0xff] }
 0x1cf   :  { %7265 = vmatpush1.bf16.msra.mxu0 %v7264_v50  ;;  %7329 = vmatpush1.bf16.msra.mxu1 %v7328_v51  ;;  %v1049_v50 = vld [vmem:[#allocation4 + $0x7e8] sm:$0xff]  ;;  %v1043_v51 = vld [vmem:[#allocation4 + $0x7b8] sm:$0xff]  ;;  %v7348_v31 = vpack.c.bf16 %v1436_v26, %v1428_v22 }
 0x1d0   :  { %7267 = vmatprep.subr.bf16.mxu0 %v7266_v60  ;;  %7331 = vmatprep.subr.bf16.mxu1 %v7330_v3  ;;  %v7340_v60 = vpack.c.bf16 %v1034_v48, %v1026_v47  ;;  %v1040_v3 = vld [vmem:[#allocation4 + $0x7a0] sm:$0xff]  ;;  %v7278_v4 = vpack.c.bf16 %v1049_v50, %v1041_v49  ;;  %v7342_v5 = vpack.c.bf16 %v1051_v52, %v1043_v51  ;;  %v1446_v49 = vld [vmem:[#allocation4 + $0x90] sm:$0xff]  ;;  %v1461_v52 = vld [vmem:[#allocation4 + $0x108] sm:$0xff] }
 0x1d1   :  { %v7280_v12 = vpack.c.bf16 %v1048_v8, %v1040_v3  ;;  %v1444_v47 = vld [vmem:[#allocation4 + $0x80] sm:$0xff]  ;;  %v1454_v51 = vld [vmem:[#allocation4 + $0xd0] sm:$0xff]  ;;  %v1487_v26 = vld [vmem:[#allocation4 + $0x1d8] sm:$0xff] }
 0x1d2   :  { %v1452_v48 = vld [vmem:[#allocation4 + $0xc0] sm:$0xff] }
 0x1d3   :  { %7269 = vmatpush1.bf16.msra.mxu0 %v7268_v13  ;;  %7333 = vmatpush1.bf16.msra.mxu1 %v7332_v15  ;;  %v7344_v13 = vpack.c.bf16 %v1050_v10, %v1042_v9  ;;  %v1429_v15 = vld [vmem:[#allocation4 + $0x8] sm:$0xff]  ;;  %v7352_v50 = vpack.c.bf16 %v1452_v48, %v1444_v47  ;;  %v1460_v8 = vld [vmem:[#allocation4 + $0x100] sm:$0xff] }
 0x1d4   :  { %7271 = vmatprep.subr.bf16.mxu0 %v7270_v19  ;;  %7335 = vmatprep.subr.bf16.mxu1 %v7334_v21  ;;  %v7346_v19 = vpack.c.bf16 %v1437_v16, %v1429_v15  ;;  %v1439_v21 = vld [vmem:[#allocation4 + $0x58] sm:$0xff]  ;;  %v1468_v10 = vld [vmem:[#allocation4 + $0x140] sm:$0xff]  ;;  %v1477_v16 = vld [vmem:[#allocation4 + $0x188] sm:$0xff] }
 0x1d5   :  { %v7410_v30 = vpack.c.bf16 %v1439_v21, %v1431_v17  ;;  %v7356_v15 = vpack.c.bf16 %v1468_v10, %v1460_v8  ;;  %v1485_v17 = vld [vmem:[#allocation4 + $0x1c8] sm:$0xff]  ;;  %v1492_v48 = vld [vmem:[#allocation4 + $0x200] sm:$0xff] }
 0x1d6   :  { %v7358_v22 = vpack.c.bf16 %v1485_v17, %v1477_v16  ;;  %v1508_v10 = vld [vmem:[#allocation4 + $0x280] sm:$0xff]  ;;  %v1518_v16 = vld [vmem:[#allocation4 + $0x2d0] sm:$0xff]  ;;  %v1525_v17 = vld [vmem:[#allocation4 + $0x308] sm:$0xff] }
 0x1d7   :  { %7273 = vmatpush1.bf16.msra.mxu0 %v7272_v39  ;;  %7337 = vmatpush1.bf16.msra.mxu1 %v7336_v41  ;;  %v1445_v39 = vld [vmem:[#allocation4 + $0x88] sm:$0xff]  ;;  %v7412_v41 = vpack.c.bf16 %v1438_v37, %v1430_v35  ;;  %v1478_v37 = vld [vmem:[#allocation4 + $0x190] sm:$0xff] }
 0x1d8   :  { %7275 = vmatprep.subr.bf16.mxu0 %v7274_v45  ;;  %7339 = vmatprep.subr.bf16.mxu1 %v7338_v46  ;;  %v1455_v45 = vld [vmem:[#allocation4 + $0xd8] sm:$0xff] }
 0x1d9   :  { %v7414_v46 = vpack.c.bf16 %v1455_v45, %v1447_v44  ;;  %v1495_v44 = vld [vmem:[#allocation4 + $0x218] sm:$0xff] }
 0x1da   :  { %v1503_v45 = vld [vmem:[#allocation4 + $0x258] sm:$0xff] }
 0x1db   :  { %7277 = vmatpush1.bf16.msra.mxu0 %v7276_v53  ;;  %7341 = vmatpush1.bf16.msra.mxu1 %v7340_v60  ;;  %v1469_v53 = vld [vmem:[#allocation4 + $0x148] sm:$0xff]  ;;  %v7416_v60 = vpack.c.bf16 %v1454_v51, %v1446_v49  ;;  %v1500_v49 = vld [vmem:[#allocation4 + $0x240] sm:$0xff]  ;;  %v7426_v51 = vpack.c.bf16 %v1503_v45, %v1495_v44 }
 0x1dc   :  { %7279 = vmatprep.subr.bf16.mxu0 %v7278_v4  ;;  %7343 = vmatprep.subr.bf16.mxu1 %v7342_v5  ;;  %v7354_v3 = vpack.c.bf16 %v1469_v53, %v1461_v52  ;;  %v1463_v4 = vld [vmem:[#allocation4 + $0x118] sm:$0xff]  ;;  %v1502_v52 = vld [vmem:[#allocation4 + $0x250] sm:$0xff]  ;;  %v1509_v53 = vld [vmem:[#allocation4 + $0x288] sm:$0xff] }
 0x1dd   :  { %v1471_v5 = vld [vmem:[#allocation4 + $0x158] sm:$0xff]  ;;  %v1541_v44 = vld [vmem:[#allocation4 + $0x388] sm:$0xff] }
 0x1de   :  { %v7418_v9 = vpack.c.bf16 %v1471_v5, %v1463_v4  ;;  %v1519_v4 = vld [vmem:[#allocation4 + $0x2d8] sm:$0xff]  ;;  %v7364_v5 = vpack.c.bf16 %v1500_v49, %v1492_v48  ;;  %v1549_v45 = vld [vmem:[#allocation4 + $0x3c8] sm:$0xff] }
 0x1df   :  { %7281 = vmatpush1.bf16.msra.mxu0 %v7280_v12  ;;  %7345 = vmatpush1.bf16.msra.mxu1 %v7344_v13  ;;  %v1462_v12 = vld [vmem:[#allocation4 + $0x110] sm:$0xff]  ;;  %v7374_v49 = vpack.c.bf16 %v1549_v45, %v1541_v44  ;;  %v1580_v44 = vld [vmem:[#allocation4 + $0x4c0] sm:$0xff] }
 0x1e0   :  { %7347 = vmatprep.subr.bf16.mxu0 %v7346_v19  ;;  %7411 = vmatprep.subr.bf16.mxu1 %v7410_v30  ;;  %v1470_v13 = vld [vmem:[#allocation4 + $0x150] sm:$0xff]  ;;  %v1479_v19 = vld [vmem:[#allocation4 + $0x198] sm:$0xff]  ;;  %v1476_v30 = vld [vmem:[#allocation4 + $0x180] sm:$0xff] }
 0x1e1   :  { %v7420_v21 = vpack.c.bf16 %v1470_v13, %v1462_v12  ;;  %v7422_v35 = vpack.c.bf16 %v1487_v26, %v1479_v19  ;;  %v1516_v12 = vld [vmem:[#allocation4 + $0x2c0] sm:$0xff]  ;;  %v1510_v13 = vld [vmem:[#allocation4 + $0x290] sm:$0xff]  ;;  %v1533_v19 = vld [vmem:[#allocation4 + $0x348] sm:$0xff] }
 0x1e2   :  { %1259 = vmatmul.mubr.f32.vlgmr.msra.gmra.mrb[6].mxu0 %v9976_v18  ;;  %1330 = vmatmul.mubr.f32.vlgmr.msra.gmra.mrb[6].mxu1 %v9976_v18  ;;  %v7350_v18 = vpack.c.bf16 %v1453_v43, %v1445_v39  ;;  %v1486_v39 = vld [vmem:[#allocation4 + $0x1d0] sm:$0xff]  ;;  %v1501_v43 = vld [vmem:[#allocation4 + $0x248] sm:$0xff]  ;;  %v7368_v26 = vpack.c.bf16 %v1516_v12, %v1508_v10  ;;  %v1567_v12 = vld [vmem:[#allocation4 + $0x458] sm:$0xff] }
 0x1e3   :  { %7349 = vmatpush1.bf16.msra.mxu0 %v7348_v31  ;;  %7413 = vmatpush1.bf16.msra.mxu1 %v7412_v41  ;;  %v1484_v31 = vld [vmem:[#allocation4 + $0x1c0] sm:$0xff]  ;;  %v1493_v41 = vld [vmem:[#allocation4 + $0x208] sm:$0xff]  ;;  %v1574_v45 = vld [vmem:[#allocation4 + $0x490] sm:$0xff] }
 0x1e4   :  { %7351 = vmatprep.subr.bf16.mxu0 %v7350_v18  ;;  %7415 = vmatprep.subr.bf16.mxu1 %v7414_v46  ;;  %v7360_v18 = vpack.c.bf16 %v1484_v31, %v1476_v30  ;;  %v7424_v46 = vpack.c.bf16 %v1486_v39, %v1478_v37  ;;  %v7362_v47 = vpack.c.bf16 %v1501_v43, %v1493_v41  ;;  %v1532_v37 = vld [vmem:[#allocation4 + $0x340] sm:$0xff]  ;;  %v1526_v39 = vld [vmem:[#allocation4 + $0x310] sm:$0xff] }
 0x1e5   :  { %v7432_v30 = vpack.c.bf16 %v1518_v16, %v1510_v13  ;;  %v7370_v31 = vpack.c.bf16 %v1533_v19, %v1525_v17  ;;  %v1534_v43 = vld [vmem:[#allocation4 + $0x350] sm:$0xff]  ;;  %v1564_v16 = vld [vmem:[#allocation4 + $0x440] sm:$0xff] }
 0x1e6   :  { %v7436_v48 = vpack.c.bf16 %v1534_v43, %v1526_v39  ;;  %v1558_v17 = vld [vmem:[#allocation4 + $0x410] sm:$0xff]  ;;  %v1583_v39 = vld [vmem:[#allocation4 + $0x4d8] sm:$0xff] }
 0x1e7   :  { %7353 = vmatpush1.bf16.msra.mxu0 %v7352_v50  ;;  %7417 = vmatpush1.bf16.msra.mxu1 %v7416_v60  ;;  %v1494_v50 = vld [vmem:[#allocation4 + $0x210] sm:$0xff]  ;;  %v1517_v60 = vld [vmem:[#allocation4 + $0x2c8] sm:$0xff] }
 0x1e8   :  { %7355 = vmatprep.subr.bf16.mxu0 %v7354_v3  ;;  %7419 = vmatprep.subr.bf16.mxu1 %v7418_v9  ;;  %v1511_v3 = vld [vmem:[#allocation4 + $0x298] sm:$0xff]  ;;  %v7428_v8 = vpack.c.bf16 %v1502_v52, %v1494_v50  ;;  %v7366_v9 = vpack.c.bf16 %v1517_v60, %v1509_v53  ;;  %v1540_v50 = vld [vmem:[#allocation4 + $0x380] sm:$0xff]  ;;  %v1542_v53 = vld [vmem:[#allocation4 + $0x390] sm:$0xff] }
 0x1e9   :  { %v1550_v60 = vld [vmem:[#allocation4 + $0x3d0] sm:$0xff] }
 0x1eb   :  { %7357 = vmatpush1.bf16.msra.mxu0 %v7356_v15  ;;  %7421 = vmatpush1.bf16.msra.mxu1 %v7420_v21  ;;  %v7430_v15 = vpack.c.bf16 %v1519_v4, %v1511_v3  ;;  %v1527_v21 = vld [vmem:[#allocation4 + $0x318] sm:$0xff]  ;;  %v7440_v4 = vpack.c.bf16 %v1550_v60, %v1542_v53  ;;  %v1588_v60 = vld [vmem:[#allocation4 + $0x500] sm:$0xff] }
 0x1ec   :  { %7359 = vmatprep.subr.bf16.mxu0 %v7358_v22  ;;  %7423 = vmatprep.subr.bf16.mxu1 %v7422_v35  ;;  %v1535_v22 = vld [vmem:[#allocation4 + $0x358] sm:$0xff]  ;;  %v1524_v35 = vld [vmem:[#allocation4 + $0x300] sm:$0xff] }
 0x1ed   :  { %v7434_v41 = vpack.c.bf16 %v1535_v22, %v1527_v21  ;;  %v1566_v21 = vld [vmem:[#allocation4 + $0x450] sm:$0xff]  ;;  %v1599_v53 = vld [vmem:[#allocation4 + $0x558] sm:$0xff] }
 0x1ee   :  { %v7444_v22 = vpack.c.bf16 %v1566_v21, %v1558_v17  ;;  %v1604_v21 = vld [vmem:[#allocation4 + $0x580] sm:$0xff] }
 0x1ef   :  { %7361 = vmatpush1.bf16.msra.mxu0 %v7360_v18  ;;  %7425 = vmatpush1.bf16.msra.mxu1 %v7424_v46  ;;  %v1543_v18 = vld [vmem:[#allocation4 + $0x398] sm:$0xff] }
 0x1f0   :  { %7363 = vmatprep.subr.bf16.mxu0 %v7362_v47  ;;  %7427 = vmatprep.subr.bf16.mxu1 %v7426_v51  ;;  %v1551_v46 = vld [vmem:[#allocation4 + $0x3d8] sm:$0xff]  ;;  %v7372_v47 = vpack.c.bf16 %v1532_v37, %v1524_v35  ;;  %v1548_v51 = vld [vmem:[#allocation4 + $0x3c0] sm:$0xff] }
 0x1f1   :  { %v7438_v52 = vpack.c.bf16 %v1551_v46, %v1543_v18  ;;  %v7376_v3 = vpack.c.bf16 %v1548_v51, %v1540_v50  ;;  %v6771_v35 = vld [vmem:[%s10357_s0 + $0x4] sm:$0x3]  ;;  %v1582_v18 = vld [vmem:[#allocation4 + $0x4d0] sm:$0xff]  ;;  %v6779_v51 = vld [vmem:[%s10357_s0 + $0x6] sm:$0x3] }
 0x1f2   :  { %1409 = vperm.xlu1 %9402, %v6771_v35   ;;  %v1591_v50 = vld [vmem:[#allocation4 + $0x518] sm:$0xff] }
 0x1f3   :  { %7365 = vmatpush1.bf16.msra.mxu0 %v7364_v5  ;;  %7429 = vmatpush1.bf16.msra.mxu1 %v7428_v8  ;;  %v1557_v5 = vld [vmem:[#allocation4 + $0x408] sm:$0xff] }
 0x1f4   :  { %7367 = vmatprep.subr.bf16.mxu0 %v7366_v9  ;;  %7431 = vmatprep.subr.bf16.mxu1 %v7430_v15  ;;  %v1565_v8 = vld [vmem:[#allocation4 + $0x448] sm:$0xff]  ;;  %v1559_v9 = vld [vmem:[#allocation4 + $0x418] sm:$0xff]  ;;  %v1556_v15 = vld [vmem:[#allocation4 + $0x400] sm:$0xff] }
 0x1f5   :  { %v7378_v10 = vpack.c.bf16 %v1565_v8, %v1557_v5  ;;  %v7442_v13 = vpack.c.bf16 %v1567_v12, %v1559_v9  ;;  %v7380_v19 = vpack.c.bf16 %v1564_v16, %v1556_v15  ;;  %v1590_v5 = vld [vmem:[#allocation4 + $0x510] sm:$0xff]  ;;  %v1605_v12 = vld [vmem:[#allocation4 + $0x588] sm:$0xff]  ;;  %v1607_v15 = vld [vmem:[#allocation4 + $0x598] sm:$0xff] }
 0x1f6   :  { %2041 = vperm.xlu1 %9402, %v6779_v51   ;;  %v1598_v8 = vld [vmem:[#allocation4 + $0x550] sm:$0xff]  ;;  %v6795_v16 = vld [vmem:[%s10357_s0 + $0xa] sm:$0x3] }
 0x1f7   :  { %7369 = vmatpush1.bf16.msra.mxu0 %v7368_v26  ;;  %7433 = vmatpush1.bf16.msra.mxu1 %v7432_v30  ;;  %v1573_v26 = vld [vmem:[#allocation4 + $0x488] sm:$0xff] }
 0x1f8   :  { %7371 = vmatprep.subr.bf16.mxu0 %v7370_v31  ;;  %7435 = vmatprep.subr.bf16.mxu1 %v7434_v41  ;;  %v1581_v30 = vld [vmem:[#allocation4 + $0x4c8] sm:$0xff]  ;;  %v1575_v31 = vld [vmem:[#allocation4 + $0x498] sm:$0xff]  ;;  %v1572_v41 = vld [vmem:[#allocation4 + $0x480] sm:$0xff] }
 0x1f9   :  { %v7382_v37 = vpack.c.bf16 %v1581_v30, %v1573_v26  ;;  %v7446_v43 = vpack.c.bf16 %v1583_v39, %v1575_v31  ;;  %v7384_v46 = vpack.c.bf16 %v1580_v44, %v1572_v41  ;;  %v1612_v26 = vld [vmem:[#allocation4 + $0x5c0] sm:$0xff]  ;;  %v1606_v30 = vld [vmem:[#allocation4 + $0x590] sm:$0xff]  ;;  %v1621_v39 = vld [vmem:[#allocation4 + $0x608] sm:$0xff] }
 0x1fa   :  { %3305 = vperm.xlu1 %9402, %v6795_v16   ;;  %v1614_v31 = vld [vmem:[#allocation4 + $0x5d0] sm:$0xff]  ;;  %v7392_v35 = vpack.c.bf16 %v1612_v26, %v1604_v21  ;;  %v1629_v41 = vld [vmem:[#allocation4 + $0x648] sm:$0xff]  ;;  %v6811_v44 = vld [vmem:[%s10357_s0 + $0xe] sm:$0x3] }
 0x1fb   :  { %7373 = vmatpush1.bf16.msra.mxu0 %v7372_v47  ;;  %7437 = vmatpush1.bf16.msra.mxu1 %v7436_v48  ;;  %v7448_v47 = vpack.c.bf16 %v1582_v18, %v1574_v45  ;;  %v1589_v48 = vld [vmem:[#allocation4 + $0x508] sm:$0xff]  ;;  %v7394_v45 = vpack.c.bf16 %v1629_v41, %v1621_v39  ;;  %v1631_v18 = vld [vmem:[#allocation4 + $0x658] sm:$0xff]  ;;  %v1662_v41 = vld [vmem:[#allocation4 + $0x750] sm:$0xff] }
 0x1fc   :  { %7375 = vmatprep.subr.bf16.mxu0 %v7374_v49  ;;  %7439 = vmatprep.subr.bf16.mxu1 %v7438_v52  ;;  %v1597_v49 = vld [vmem:[#allocation4 + $0x548] sm:$0xff]  ;;  %v1655_v21 = vld [vmem:[#allocation4 + $0x718] sm:$0xff] }
 0x1fd   :  { %v7386_v52 = vpack.c.bf16 %v1597_v49, %v1589_v48  ;;  %v1628_v48 = vld [vmem:[#allocation4 + $0x640] sm:$0xff]  ;;  %v1622_v49 = vld [vmem:[#allocation4 + $0x610] sm:$0xff]  ;;  %v1653_v16 = vld [vmem:[#allocation4 + $0x708] sm:$0xff] }
 0x1fe   :  { %4569 = vperm.xlu1 %9402, %v6811_v44   ;;  %v1677_v44 = vld [vmem:[#allocation4 + $0x7c8] sm:$0xff] }
 0x1ff   :  { %7377 = vmatpush1.bf16.msra.mxu0 %v7376_v3  ;;  %7441 = vmatpush1.bf16.msra.mxu1 %v7440_v4  ;;  %v7450_v3 = vpack.c.bf16 %v1599_v53, %v1591_v50  ;;  %v1596_v4 = vld [vmem:[#allocation4 + $0x540] sm:$0xff]  ;;  %v1630_v50 = vld [vmem:[#allocation4 + $0x650] sm:$0xff]  ;;  %v1637_v53 = vld [vmem:[#allocation4 + $0x688] sm:$0xff] }
 0x200   :  { %7379 = vmatprep.subr.bf16.mxu0 %v7378_v10  ;;  %7443 = vmatprep.subr.bf16.mxu1 %v7442_v13  ;;  %v7388_v9 = vpack.c.bf16 %v1596_v4, %v1588_v60  ;;  %v7452_v10 = vpack.c.bf16 %v1598_v8, %v1590_v5  ;;  %v1613_v13 = vld [vmem:[#allocation4 + $0x5c8] sm:$0xff]  ;;  %v1647_v5 = vld [vmem:[#allocation4 + $0x6d8] sm:$0xff]  ;;  %v1636_v8 = vld [vmem:[#allocation4 + $0x680] sm:$0xff] }
 0x201   :  { %v7390_v17 = vpack.c.bf16 %v1613_v13, %v1605_v12  ;;  %v1645_v60 = vld [vmem:[#allocation4 + $0x6c8] sm:$0xff]  ;;  %v1638_v13 = vld [vmem:[#allocation4 + $0x690] sm:$0xff] }
 0x202   :  { %v7398_v4 = vpack.c.bf16 %v1645_v60, %v1637_v53 }
 0x203   :  { %7381 = vmatpush1.bf16.msra.mxu0 %v7380_v19  ;;  %7445 = vmatpush1.bf16.msra.mxu1 %v7444_v22  ;;  %v1615_v19 = vld [vmem:[#allocation4 + $0x5d8] sm:$0xff] }
 0x204   :  { %7383 = vmatprep.subr.bf16.mxu0 %v7382_v37  ;;  %7447 = vmatprep.subr.bf16.mxu1 %v7446_v43  ;;  %v7454_v22 = vpack.c.bf16 %v1615_v19, %v1607_v15  ;;  %v7456_v37 = vpack.c.bf16 %v1614_v31, %v1606_v30  ;;  %v1623_v43 = vld [vmem:[#allocation4 + $0x618] sm:$0xff]  ;;  %v1646_v15 = vld [vmem:[#allocation4 + $0x6d0] sm:$0xff]  ;;  %v1661_v19 = vld [vmem:[#allocation4 + $0x748] sm:$0xff] }
 0x205   :  { %v7402_v26 = vpack.c.bf16 %v1661_v19, %v1653_v16  ;;  %v1652_v31 = vld [vmem:[#allocation4 + $0x700] sm:$0xff] }
 0x207   :  { %7385 = vmatpush1.bf16.msra.mxu0 %v7384_v46  ;;  %7449 = vmatpush1.bf16.msra.mxu1 %v7448_v47  ;;  %v1620_v46 = vld [vmem:[#allocation4 + $0x600] sm:$0xff]  ;;  %v7458_v47 = vpack.c.bf16 %v1631_v18, %v1623_v43  ;;  %v1669_v43 = vld [vmem:[#allocation4 + $0x788] sm:$0xff] }
 0x208   :  { %7387 = vmatprep.subr.bf16.mxu0 %v7386_v52  ;;  %7451 = vmatprep.subr.bf16.mxu1 %v7450_v3  ;;  %v7396_v51 = vpack.c.bf16 %v1628_v48, %v1620_v46  ;;  %v7460_v52 = vpack.c.bf16 %v1630_v50, %v1622_v49  ;;  %v1639_v3 = vld [vmem:[#allocation4 + $0x698] sm:$0xff]  ;;  %v7406_v18 = vpack.c.bf16 %v1677_v44, %v1669_v43  ;;  %v1668_v48 = vld [vmem:[#allocation4 + $0x780] sm:$0xff] }
 0x209   :  { %v1671_v46 = vld [vmem:[#allocation4 + $0x798] sm:$0xff]  ;;  %v1676_v50 = vld [vmem:[#allocation4 + $0x7c0] sm:$0xff] }
 0x20a   :  { %v7408_v53 = vpack.c.bf16 %v1676_v50, %v1668_v48 }
 0x20b   :  { %7389 = vmatpush1.bf16.msra.mxu0 %v7388_v9  ;;  %7453 = vmatpush1.bf16.msra.mxu1 %v7452_v10  ;;  %v1644_v9 = vld [vmem:[#allocation4 + $0x6c0] sm:$0xff]  ;;  %v7462_v10 = vpack.c.bf16 %v1647_v5, %v1639_v3  ;;  %v1433_v3 = vld [vmem:[#allocation4 + $0x28] sm:$0xff]  ;;  %v1435_v5 = vld [vmem:[#allocation4 + $0x38] sm:$0xff] }
 0x20c   :  { %7391 = vmatprep.subr.bf16.mxu0 %v7390_v17  ;;  %7455 = vmatprep.subr.bf16.mxu1 %v7454_v22  ;;  %v7400_v12 = vpack.c.bf16 %v1644_v9, %v1636_v8  ;;  %v7464_v17 = vpack.c.bf16 %v1646_v15, %v1638_v13  ;;  %v1663_v22 = vld [vmem:[#allocation4 + $0x758] sm:$0xff] }
 0x20d   :  { %v7466_v30 = vpack.c.bf16 %v1663_v22, %v1655_v21  ;;  %v1443_v9 = vld [vmem:[#allocation4 + $0x78] sm:$0xff] }
 0x20f   :  { %7393 = vmatpush1.bf16.msra.mxu0 %v7392_v35  ;;  %7457 = vmatpush1.bf16.msra.mxu1 %v7456_v37  ;;  %v1660_v35 = vld [vmem:[#allocation4 + $0x740] sm:$0xff]  ;;  %v1654_v37 = vld [vmem:[#allocation4 + $0x710] sm:$0xff] }
 0x210   :  { %7395 = vmatprep.subr.bf16.mxu0 %v7394_v45  ;;  %7459 = vmatprep.subr.bf16.mxu1 %v7458_v47  ;;  %v7404_v39 = vpack.c.bf16 %v1660_v35, %v1652_v31  ;;  %v7468_v45 = vpack.c.bf16 %v1662_v41, %v1654_v37  ;;  %v1679_v47 = vld [vmem:[#allocation4 + $0x7d8] sm:$0xff] }
 0x211   :  { %v7470_v49 = vpack.c.bf16 %v1679_v47, %v1671_v46 }
 0x213   :  { %7397 = vmatpush1.bf16.msra.mxu0 %v7396_v51  ;;  %7461 = vmatpush1.bf16.msra.mxu1 %v7460_v52  ;;  %v1670_v51 = vld [vmem:[#allocation4 + $0x790] sm:$0xff] }
 0x214   :  { %7399 = vmatprep.subr.bf16.mxu0 %v7398_v4  ;;  %7463 = vmatprep.subr.bf16.mxu1 %v7462_v10  ;;  %v1678_v52 = vld [vmem:[#allocation4 + $0x7d0] sm:$0xff]  ;;  %v1441_v4 = vld [vmem:[#allocation4 + $0x68] sm:$0xff]  ;;  %v7538_v10 = vpack.c.bf16 %v1443_v9, %v1435_v5 }
 0x215   :  { %v7472_v60 = vpack.c.bf16 %v1678_v52, %v1670_v51  ;;  %v7474_v8 = vpack.c.bf16 %v1441_v4, %v1433_v3 }
 0x217   :  { %7401 = vmatpush1.bf16.msra.mxu0 %v7400_v12  ;;  %7465 = vmatpush1.bf16.msra.mxu1 %v7464_v17  ;;  %v778_v17 = vpop.permute.xlu0 %777 }
 0x218   :  { %7403 = vmatprep.subr.bf16.mxu0 %v7402_v26  ;;  %7467 = vmatprep.subr.bf16.mxu1 %v7466_v30  ;;  %v780_v19 = vmul.f32 %v778_v17, %v9889_v29  ;;  %v782_v21 = vmul.f32 %v778_v17, %v9895_v32  ;;  %v781_v22 = vmul.f32 %v778_v17, %v9898_v33 }
 0x219   :  { %v783_v26 = vmul.f32 %v778_v17, %v9901_v34  ;;  %v785_v4 = vmul.f32 %v778_v17, %v9942_v62  ;;  %v787_v5 = vmul.f32 %v778_v17, %v9945_v0 }
 0x21a   :  { %v788_v30 = vadd.f32 %v780_v19, %v9905_v36  ;;  %v790_v31 = vadd.f32 %v782_v21, %v9909_v38  ;;  %v789_v37 = vadd.f32 %v781_v22, %v9913_v40 }
 0x21b   :  { %7405 = vmatpush1.bf16.msra.mxu0 %v7404_v39  ;;  %7469 = vmatpush1.bf16.msra.mxu1 %v7468_v45  ;;  %v791_v41 = vadd.f32 %v783_v26, %v9917_v42  ;;  %v795_v19 = vadd.f32 %v787_v5, %v9961_v14 }
 0x21c   :  { %7407 = vmatprep.subr.bf16.mxu0 %v7406_v18  ;;  %7471 = vmatprep.subr.bf16.mxu1 %v7470_v49 }
 0x21f   :  { %7409 = vmatpush1.bf16.msra.mxu0 %v7408_v53  ;;  %7473 = vmatpush1.bf16.msra.mxu1 %v7472_v60  ;;  %v784_v53 = vmul.f32 %v778_v17, %v9936_v59  ;;  %v786_v60 = vmul.f32 %v778_v17, %v9939_v61 }
 0x220   :  { %7475 = vmatprep.subr.bf16.mxu0 %v7474_v8  ;;  %7539 = vmatprep.subr.bf16.mxu1 %v7538_v10 }
 0x221   :  { %v792_v10 = vadd.f32 %v784_v53, %v9949_v6 }
 0x275   :  { %v1118_v12 = vpop.f32.mrb[4].mxu0  ;;  %v1189_v13 = vpop.f32.mrb[4].mxu1 }
 0x276   :  { %v1120_v15 = vpop.f32.mrb[5].mxu0  ;;  %v1191_v16 = vpop.f32.mrb[5].mxu1  ;;  %v1336_v35 = vadd.f32 %v1118_v12, %v788_v30  ;;  %v1338_v39 = vadd.f32 %v1189_v13, %v790_v31  ;;  %v794_v12 = vadd.f32 %v786_v60, %v9952_v7 }
 0x277   :  { %v1337_v43 = vadd.f32 %v1120_v15, %v789_v37  ;;  %v1339_v44 = vadd.f32 %v1191_v16, %v791_v41  ;;  %v793_v16 = vadd.f32 %v785_v4, %v9957_v11 }
 0x278   :  { %v6764_v45 = vmul.f32 -1.442695, %v1336_v35  ;;  %v6766_v18 = vmul.f32 -1.442695, %v1338_v39 }
 0x279   :  { %v6765_v46 = vmul.f32 -1.442695, %v1337_v43  ;;  %v6767_v47 = vmul.f32 -1.442695, %v1339_v44 }
 0x27a   :  { %9435 = vpow2.f32 %v6764_v45 }
 0x27b   :  { %9437 = vpow2.f32 %v6766_v18 }
 0x27c   :  { %9439 = vpow2.f32 %v6765_v46 }
 0x27d   :  { %9441 = vpow2.f32 %v6767_v47 }
 0x284   :  { %v9436_v48 = vpop.eup %9435 }
 0x285   :  { %v9438_v49 = vpop.eup %9437  ;;  %v1350_v52 = vadd.f32 1.0, %v9436_v48 }
 0x286   :  { %v9440_v50 = vpop.eup %9439  ;;  %v1362_v3 = vadd.f32 1.0, %v9438_v49 }
 0x287   :  { %v9442_v51 = vpop.eup %9441  ;;  %v1351_v8 = vadd.f32 1.0, %v9440_v50  ;;  %9443 = vrcp.f32 %v1350_v52 }
 0x288   :  { %v1363_v9 = vadd.f32 1.0, %v9442_v51  ;;  %9445 = vrcp.f32 %v1362_v3 }
 0x289   :  { %9447 = vrcp.f32 %v1351_v8  ;;  %v1440_v8 = vld [vmem:[#allocation4 + $0x60] sm:$0xff] }
 0x28a   :  { %9449 = vrcp.f32 %v1363_v9  ;;  %v1434_v9 = vld [vmem:[#allocation4 + $0x30] sm:$0xff] }
 0x291   :  { %v9444_v39 = vpop.eup %9443 }
 0x292   :  { %v9446_v41 = vpop.eup %9445 }
 0x293   :  { %v9448_v43 = vpop.eup %9447  ;;  %v1382_v46 = vmul.f32 %v9446_v41, %v9967_v54  ;;  %v1432_v54 = vld [vmem:[#allocation4 + $0x20] sm:$0xff] }
 0x294   :  { %v9450_v44 = vpop.eup %9449 }
 0x295   :  { %v1383_v49 = vmul.f32 %v9450_v44, %v9969_v2  ;;  %v1442_v2 = vld [vmem:[#allocation4 + $0x70] sm:$0xff] }
 0x2b5   :  { %v1260_v13 = vpop.f32.mrb[6].mxu0  ;;  %v1331_v15 = vpop.f32.mrb[6].mxu1 }
 0x2b6   :  { %v1340_v21 = vadd.f32 %v1260_v13, %v792_v10  ;;  %v1342_v22 = vadd.f32 %v1331_v15, %v794_v12  ;;  %v1262_v26 = vpop.f32.mrb[7].mxu0  ;;  %v1333_v30 = vpop.f32.mrb[7].mxu1  ;;  %v1449_v13 = vld [vmem:[#allocation4 + $0xa8] sm:$0xff] }
 0x2b7   :  { %v1341_v17 = vadd.f32 %v1262_v26, %v793_v16  ;;  %v1343_v31 = vadd.f32 %v1333_v30, %v795_v19  ;;  %v1457_v16 = vld [vmem:[#allocation4 + $0xe8] sm:$0xff]  ;;  %v1451_v19 = vld [vmem:[#allocation4 + $0xb8] sm:$0xff]  ;;  %v7476_v26 = vpack.c.bf16 %v1440_v8, %v1432_v54  ;;  %v7540_v30 = vpack.c.bf16 %v1442_v2, %v1434_v9 }
 0x2b8   :  { %9451 = vtanh.f32 %v1340_v21  ;;  %v6768_v35 = vmul.f32 -1.442695, %v1342_v22  ;;  %v1459_v21 = vld [vmem:[#allocation4 + $0xf8] sm:$0xff]  ;;  %v1481_v54 = vld [vmem:[#allocation4 + $0x1a8] sm:$0xff] }
 0x2b9   :  { %9453 = vtanh.f32 %v1341_v17  ;;  %v6769_v37 = vmul.f32 -1.442695, %v1343_v31  ;;  %v1448_v17 = vld [vmem:[#allocation4 + $0xa0] sm:$0xff]  ;;  %v7542_v44 = vpack.c.bf16 %v1459_v21, %v1451_v19  ;;  %v1483_v8 = vld [vmem:[#allocation4 + $0x1b8] sm:$0xff]  ;;  %v1482_v21 = vld [vmem:[#allocation4 + $0x1b0] sm:$0xff] }
 0x2ba   :  { %9455 = vpow2.f32 %v6768_v35  ;;  %v1456_v31 = vld [vmem:[#allocation4 + $0xe0] sm:$0xff]  ;;  %v1450_v35 = vld [vmem:[#allocation4 + $0xb0] sm:$0xff]  ;;  %v1491_v9 = vld [vmem:[#allocation4 + $0x1f8] sm:$0xff] }
 0x2bb   :  { %9457 = vpow2.f32 %v6769_v37  ;;  %v1458_v37 = vld [vmem:[#allocation4 + $0xf0] sm:$0xff]  ;;  %v7550_v19 = vpack.c.bf16 %v1491_v9, %v1483_v8  ;;  %v1520_v8 = vld [vmem:[#allocation4 + $0x2e0] sm:$0xff] }
 0x2c2   :  { %v9452_v45 = vpop.eup %9451 }
 0x2c3   :  { %v9454_v18 = vpop.eup %9453  ;;  %v1384_v47 = vmul.f32 %v9452_v45, %v9444_v39  ;;  %v1465_v39 = vld [vmem:[#allocation4 + $0x128] sm:$0xff] }
 0x2c4   :  { %v9456_v48 = vpop.eup %9455  ;;  %v1385_v50 = vmul.f32 %v9454_v18, %v9448_v43  ;;  %v7478_v43 = vpack.c.bf16 %v1457_v16, %v1449_v13  ;;  %v1473_v45 = vld [vmem:[#allocation4 + $0x168] sm:$0xff]  ;;  %v1467_v18 = vld [vmem:[#allocation4 + $0x138] sm:$0xff]  ;;  %v1480_v13 = vld [vmem:[#allocation4 + $0x1a0] sm:$0xff] }
 0x2c5   :  { %v9458_v51 = vpop.eup %9457  ;;  %v10025_v52 = vadd.f32 %v1384_v47, %v1382_v46  ;;  %v1376_v53 = vadd.f32 1.0, %v9456_v48  ;;  %v1475_v46 = vld [vmem:[#allocation4 + $0x178] sm:$0xff]  ;;  %v7480_v47 = vpack.c.bf16 %v1456_v31, %v1448_v17  ;;  %v7544_v48 = vpack.c.bf16 %v1458_v37, %v1450_v35 }
 0x2c6   :  { %v10027_v60 = vadd.f32 %v1385_v50, %v1383_v49  ;;  %v1377_v3 = vadd.f32 1.0, %v9458_v51  ;;  %v1464_v49 = vld [vmem:[#allocation4 + $0x120] sm:$0xff]  ;;  %v7482_v51 = vpack.c.bf16 %v1473_v45, %v1465_v39  ;;  %v1499_v17 = vld [vmem:[#allocation4 + $0x238] sm:$0xff] }
 0x2c7   :  { %9459 = vtanh.f32 %v10025_v52  ;;  %v1472_v50 = vld [vmem:[#allocation4 + $0x160] sm:$0xff]  ;;  %v1507_v31 = vld [vmem:[#allocation4 + $0x278] sm:$0xff] }
 0x2c8   :  { %9461 = vrcp.f32 %v1376_v53  ;;  %v7546_v53 = vpack.c.bf16 %v1475_v46, %v1467_v18  ;;  %v7484_v2 = vpack.c.bf16 %v1472_v50, %v1464_v49  ;;  %v7554_v45 = vpack.c.bf16 %v1507_v31, %v1499_v17  ;;  %v1504_v18 = vld [vmem:[#allocation4 + $0x260] sm:$0xff]  ;;  %v1498_v46 = vld [vmem:[#allocation4 + $0x230] sm:$0xff]  ;;  %v1513_v49 = vld [vmem:[#allocation4 + $0x2a8] sm:$0xff] }
 0x2c9   :  { %9463 = vtanh.f32 %v10027_v60  ;;  %v1521_v50 = vld [vmem:[#allocation4 + $0x2e8] sm:$0xff] }
 0x2ca   :  { %9465 = vrcp.f32 %v1377_v3  ;;  %v1466_v3 = vld [vmem:[#allocation4 + $0x130] sm:$0xff]  ;;  %v7494_v9 = vpack.c.bf16 %v1521_v50, %v1513_v49  ;;  %v1544_v50 = vld [vmem:[#allocation4 + $0x3a0] sm:$0xff] }
 0x2d1   :  { %v9460_v4 = vpop.eup %9459 }
 0x2d2   :  { %v9462_v5 = vpop.eup %9461 }
 0x2d3   :  { %v9464_v10 = vpop.eup %9463  ;;  %v10031_v12 = vmul.f32 %v9462_v5, %v9460_v4  ;;  %v1474_v4 = vld [vmem:[#allocation4 + $0x170] sm:$0xff]  ;;  %v1489_v5 = vld [vmem:[#allocation4 + $0x1e8] sm:$0xff] }
 0x2d4   :  { %v9466_v15 = vpop.eup %9465  ;;  %v7486_v16 = vpack.c.bf16 %v1489_v5, %v1481_v54  ;;  %v1512_v5 = vld [vmem:[#allocation4 + $0x2a0] sm:$0xff] }
 0x2d5   :  { %v1391_v22 = vmul.f32 %v9466_v15, %v9464_v10  ;;  %v7548_v10 = vpack.c.bf16 %v1474_v4, %v1466_v3  ;;  %v1488_v15 = vld [vmem:[#allocation4 + $0x1e0] sm:$0xff]  ;;  %v7496_v17 = vpack.c.bf16 %v1520_v8, %v1512_v5  ;;  %v1561_v5 = vld [vmem:[#allocation4 + $0x428] sm:$0xff] }
 0x2d6   :  { %v7488_v37 = vpack.c.bf16 %v1488_v15, %v1480_v13  ;;  %v1529_v13 = vld [vmem:[#allocation4 + $0x328] sm:$0xff] }
 0x2d7   :  { %1748 = vmatprep.mubr.f32.mxu0 %v1391_v22  ;;  %1819 = vmatprep.mubr.f32.mxu1 %v1391_v22  ;;  %v1394_v41 = vcombine.low %v10031_v12, %v1391_v22  ;;  %v1569_v8 = vld [vmem:[#allocation4 + $0x468] sm:$0xff] }
 0x2d8   :  { %1749 = vmatmul.mubr.f32.vlgmr.msra.gmra.mrb[8].mxu0 %v10031_v12  ;;  %1820 = vmatmul.mubr.f32.vlgmr.msra.gmra.mrb[8].mxu1 %v10031_v12 }
 0x2d9   :  { %6770 = vst.sshfl [vmem:[#allocation2 + $0x4] sm:$0x33 pattern:$0x76325410] %v1394_v41  ;;  %7477 = vmatpush1.bf16.msra.mxu0 %v7476_v26  ;;  %7541 = vmatpush1.bf16.msra.mxu1 %v7540_v30  ;;  %v1497_v26 = vld [vmem:[#allocation4 + $0x228] sm:$0xff]  ;;  %v1496_v41 = vld [vmem:[#allocation4 + $0x220] sm:$0xff] }
 0x2da   :  { %1890 = vmatprep.mubr.f32.mxu0 %v1391_v22  ;;  %1961 = vmatprep.mubr.f32.mxu1 %v1391_v22  ;;  %v1490_v22 = vld [vmem:[#allocation4 + $0x1f0] sm:$0xff]  ;;  %v1505_v30 = vld [vmem:[#allocation4 + $0x268] sm:$0xff]  ;;  %v7492_v3 = vpack.c.bf16 %v1504_v18, %v1496_v41 }
 0x2db   :  { %7479 = vmatprep.subr.bf16.mxu0 %v7478_v43  ;;  %7543 = vmatprep.subr.bf16.mxu1 %v7542_v44  ;;  %v7552_v39 = vpack.c.bf16 %v1490_v22, %v1482_v21  ;;  %v7490_v44 = vpack.c.bf16 %v1505_v30, %v1497_v26  ;;  %v1537_v21 = vld [vmem:[#allocation4 + $0x368] sm:$0xff]  ;;  %v1531_v22 = vld [vmem:[#allocation4 + $0x338] sm:$0xff] }
 0x2dc   :  { %v1539_v26 = vld [vmem:[#allocation4 + $0x378] sm:$0xff]  ;;  %v1553_v18 = vld [vmem:[#allocation4 + $0x3e8] sm:$0xff] }
 0x2dd   :  { %7481 = vmatpush1.bf16.msra.mxu0 %v7480_v47  ;;  %7545 = vmatpush1.bf16.msra.mxu1 %v7544_v48  ;;  %v1506_v47 = vld [vmem:[#allocation4 + $0x270] sm:$0xff]  ;;  %v7562_v41 = vpack.c.bf16 %v1539_v26, %v1531_v22 }
 0x2de   :  { %7483 = vmatprep.subr.bf16.mxu0 %v7482_v51  ;;  %7547 = vmatprep.subr.bf16.mxu1 %v7546_v53  ;;  %v1515_v51 = vld [vmem:[#allocation4 + $0x2b8] sm:$0xff]  ;;  %v7556_v4 = vpack.c.bf16 %v1506_v47, %v1498_v46  ;;  %v1562_v22 = vld [vmem:[#allocation4 + $0x430] sm:$0xff] }
 0x2df   :  { %v1523_v53 = vld [vmem:[#allocation4 + $0x2f8] sm:$0xff]  ;;  %v1570_v26 = vld [vmem:[#allocation4 + $0x470] sm:$0xff] }
 0x2e0   :  { %v6458_v35 = vld [vmem:[#allocation2 + $0x4] sm:$0xf] }
 0x2e1   :  { %7485 = vmatpush1.bf16.msra.mxu0 %v7484_v2  ;;  %7549 = vmatpush1.bf16.msra.mxu1 %v7548_v10  ;;  %v6487_v43 = vmul.f32 %v9987_v20, %v6458_v35  ;;  %v1514_v2 = vld [vmem:[#allocation4 + $0x2b0] sm:$0xff]  ;;  %v1528_v35 = vld [vmem:[#allocation4 + $0x320] sm:$0xff]  ;;  %v1547_v46 = vld [vmem:[#allocation4 + $0x3b8] sm:$0xff] }
 0x2e2   :  { %7487 = vmatprep.subr.bf16.mxu0 %v7486_v16  ;;  %7551 = vmatprep.subr.bf16.mxu1 %v7550_v19  ;;  %v1522_v10 = vld [vmem:[#allocation4 + $0x2f0] sm:$0xff]  ;;  %v7558_v19 = vpack.c.bf16 %v1523_v53, %v1515_v51  ;;  %v1555_v47 = vld [vmem:[#allocation4 + $0x3f8] sm:$0xff]  ;;  %v1552_v51 = vld [vmem:[#allocation4 + $0x3e0] sm:$0xff] }
 0x2e3   :  { %v6520_v48 = vrot.slane %v6487_v43, %v9984_v63  ;;  %v7560_v31 = vpack.c.bf16 %v1522_v10, %v1514_v2  ;;  %v1530_v43 = vld [vmem:[#allocation4 + $0x330] sm:$0xff]  ;;  %v1571_v2 = vld [vmem:[#allocation4 + $0x478] sm:$0xff]  ;;  %v7504_v10 = vpack.c.bf16 %v1552_v51, %v1544_v50 }
 0x2e4   :  { %v1603_v50 = vld [vmem:[#allocation4 + $0x578] sm:$0xff] }
 0x2e5   :  { %7489 = vmatpush1.bf16.msra.mxu0 %v7488_v37  ;;  %7553 = vmatpush1.bf16.msra.mxu1 %v7552_v39  ;;  %v6521_v54 = vcombine.high %v6520_v48, %v6520_v48  ;;  %v6612_v15 = vsel %vm6606_vm0, %v6520_v48, 0.0  ;;  %v1536_v37 = vld [vmem:[#allocation4 + $0x360] sm:$0xff]  ;;  %v7498_v39 = vpack.c.bf16 %v1537_v21, %v1529_v13 }
 0x2e6   :  { %7491 = vmatprep.subr.bf16.mxu0 %v7490_v44  ;;  %7555 = vmatprep.subr.bf16.mxu1 %v7554_v45  ;;  %v1538_v44 = vld [vmem:[#allocation4 + $0x370] sm:$0xff]  ;;  %v1545_v45 = vld [vmem:[#allocation4 + $0x3a8] sm:$0xff]  ;;  %v7500_v48 = vpack.c.bf16 %v1536_v37, %v1528_v35  ;;  %v1587_v35 = vld [vmem:[#allocation4 + $0x4f8] sm:$0xff] }
 0x2e7   :  { %v6613_v16 = vsel %vm6606_vm0, %v6521_v54, 0.0  ;;  %v7564_v49 = vpack.c.bf16 %v1538_v44, %v1530_v43  ;;  %v7502_v53 = vpack.c.bf16 %v1553_v18, %v1545_v45  ;;  %v1554_v54 = vld [vmem:[#allocation4 + $0x3f0] sm:$0xff]  ;;  %v1584_v43 = vld [vmem:[#allocation4 + $0x4e0] sm:$0xff] }
 0x2e8   :  { %v6614_v30 = vadd.f32 %v6613_v16, %v6612_v15  ;;  %v1560_v15 = vld [vmem:[#allocation4 + $0x420] sm:$0xff]  ;;  %v1578_v18 = vld [vmem:[#allocation4 + $0x4b0] sm:$0xff] }
 0x2e9   :  { %7493 = vmatpush1.bf16.msra.mxu0 %v7492_v3  ;;  %7557 = vmatpush1.bf16.msra.mxu1 %v7556_v4  ;;  %v7566_v3 = vpack.c.bf16 %v1555_v47, %v1547_v46  ;;  %v1546_v4 = vld [vmem:[#allocation4 + $0x3b0] sm:$0xff]  ;;  %v1568_v16 = vld [vmem:[#allocation4 + $0x460] sm:$0xff]  ;;  %v1593_v47 = vld [vmem:[#allocation4 + $0x528] sm:$0xff] }
 0x2ea   :  { %6615 = vadd.xlane.f32.xlu1 %v6614_v30  ;;  %7495 = vmatprep.subr.bf16.mxu0 %v7494_v9  ;;  %v1563_v9 = vld [vmem:[#allocation4 + $0x438] sm:$0xff]  ;;  %v7568_v13 = vpack.c.bf16 %v1554_v54, %v1546_v4  ;;  %v1577_v30 = vld [vmem:[#allocation4 + $0x4a8] sm:$0xff]  ;;  %v7508_v37 = vpack.c.bf16 %v1568_v16, %v1560_v15  ;;  %v1586_v46 = vld [vmem:[#allocation4 + $0x4f0] sm:$0xff] }
 0x2eb   :  { %7559 = vmatprep.subr.bf16.mxu1 %v7558_v19  ;;  %v7506_v19 = vpack.c.bf16 %v1569_v8, %v1561_v5  ;;  %v7570_v21 = vpack.c.bf16 %v1571_v2, %v1563_v9  ;;  %v1600_v4 = vld [vmem:[#allocation4 + $0x560] sm:$0xff]  ;;  %v1594_v8 = vld [vmem:[#allocation4 + $0x530] sm:$0xff]  ;;  %v1609_v2 = vld [vmem:[#allocation4 + $0x5a8] sm:$0xff] }
 0x2ec   :  { %v1602_v9 = vld [vmem:[#allocation4 + $0x570] sm:$0xff]  ;;  %v1619_v15 = vld [vmem:[#allocation4 + $0x5f8] sm:$0xff] }
 0x2ed   :  { %7497 = vmatpush1.bf16.msra.mxu0 %v7496_v17  ;;  %7561 = vmatpush1.bf16.msra.mxu1 %v7560_v31  ;;  %v1585_v17 = vld [vmem:[#allocation4 + $0x4e8] sm:$0xff]  ;;  %v1579_v31 = vld [vmem:[#allocation4 + $0x4b8] sm:$0xff] }
 0x2ee   :  { %7499 = vmatprep.subr.bf16.mxu0 %v7498_v39  ;;  %7563 = vmatprep.subr.bf16.mxu1 %v7562_v41  ;;  %v7572_v39 = vpack.c.bf16 %v1570_v26, %v1562_v22  ;;  %v1576_v41 = vld [vmem:[#allocation4 + $0x4a0] sm:$0xff]  ;;  %v7510_v44 = vpack.c.bf16 %v1585_v17, %v1577_v30  ;;  %v7574_v45 = vpack.c.bf16 %v1587_v35, %v1579_v31  ;;  %v1610_v17 = vld [vmem:[#allocation4 + $0x5b0] sm:$0xff]  ;;  %v1625_v35 = vld [vmem:[#allocation4 + $0x628] sm:$0xff] }
 0x2ef   :  { %v7512_v51 = vpack.c.bf16 %v1584_v43, %v1576_v41  ;;  %v1616_v22 = vld [vmem:[#allocation4 + $0x5e0] sm:$0xff]  ;;  %v1618_v31 = vld [vmem:[#allocation4 + $0x5f0] sm:$0xff]  ;;  %v1635_v41 = vld [vmem:[#allocation4 + $0x678] sm:$0xff] }
 0x2f1   :  { %7501 = vmatpush1.bf16.msra.mxu0 %v7500_v48  ;;  %7565 = vmatpush1.bf16.msra.mxu1 %v7564_v49  ;;  %v1601_v48 = vld [vmem:[#allocation4 + $0x568] sm:$0xff]  ;;  %v1595_v49 = vld [vmem:[#allocation4 + $0x538] sm:$0xff] }
 0x2f2   :  { %7503 = vmatprep.subr.bf16.mxu0 %v7502_v53  ;;  %7567 = vmatprep.subr.bf16.mxu1 %v7566_v3  ;;  %v7576_v53 = vpack.c.bf16 %v1586_v46, %v1578_v18  ;;  %v1592_v3 = vld [vmem:[#allocation4 + $0x520] sm:$0xff]  ;;  %v7514_v54 = vpack.c.bf16 %v1601_v48, %v1593_v47  ;;  %v7578_v5 = vpack.c.bf16 %v1603_v50, %v1595_v49  ;;  %v1626_v48 = vld [vmem:[#allocation4 + $0x630] sm:$0xff]  ;;  %v1641_v50 = vld [vmem:[#allocation4 + $0x6a8] sm:$0xff] }
 0x2f3   :  { %v7516_v16 = vpack.c.bf16 %v1600_v4, %v1592_v3  ;;  %v1632_v18 = vld [vmem:[#allocation4 + $0x660] sm:$0xff]  ;;  %v1634_v49 = vld [vmem:[#allocation4 + $0x670] sm:$0xff]  ;;  %v1651_v3 = vld [vmem:[#allocation4 + $0x6f8] sm:$0xff] }
 0x2f5   :  { %7505 = vmatpush1.bf16.msra.mxu0 %v7504_v10  ;;  %7569 = vmatpush1.bf16.msra.mxu1 %v7568_v13  ;;  %v1617_v10 = vld [vmem:[#allocation4 + $0x5e8] sm:$0xff]  ;;  %v1611_v13 = vld [vmem:[#allocation4 + $0x5b8] sm:$0xff] }
 0x2f6   :  { %7507 = vmatprep.subr.bf16.mxu0 %v7506_v19  ;;  %7571 = vmatprep.subr.bf16.mxu1 %v7570_v21  ;;  %v7580_v19 = vpack.c.bf16 %v1602_v9, %v1594_v8  ;;  %v1608_v21 = vld [vmem:[#allocation4 + $0x5a0] sm:$0xff]  ;;  %v7518_v26 = vpack.c.bf16 %v1617_v10, %v1609_v2  ;;  %v7582_v30 = vpack.c.bf16 %v1619_v15, %v1611_v13  ;;  %v1642_v10 = vld [vmem:[#allocation4 + $0x6b0] sm:$0xff]  ;;  %v1657_v15 = vld [vmem:[#allocation4 + $0x728] sm:$0xff] }
 0x2f7   :  { %v7520_v43 = vpack.c.bf16 %v1616_v22, %v1608_v21  ;;  %v1648_v8 = vld [vmem:[#allocation4 + $0x6e0] sm:$0xff]  ;;  %v1650_v13 = vld [vmem:[#allocation4 + $0x6f0] sm:$0xff]  ;;  %v1667_v21 = vld [vmem:[#allocation4 + $0x778] sm:$0xff] }
 0x2f9   :  { %7509 = vmatpush1.bf16.msra.mxu0 %v7508_v37  ;;  %7573 = vmatpush1.bf16.msra.mxu1 %v7572_v39  ;;  %v1633_v37 = vld [vmem:[#allocation4 + $0x668] sm:$0xff]  ;;  %v1627_v39 = vld [vmem:[#allocation4 + $0x638] sm:$0xff] }
 0x2fa   :  { %7511 = vmatprep.subr.bf16.mxu0 %v7510_v44  ;;  %7575 = vmatprep.subr.bf16.mxu1 %v7574_v45  ;;  %v7584_v44 = vpack.c.bf16 %v1618_v31, %v1610_v17  ;;  %v1624_v45 = vld [vmem:[#allocation4 + $0x620] sm:$0xff]  ;;  %v7522_v46 = vpack.c.bf16 %v1633_v37, %v1625_v35  ;;  %v7586_v47 = vpack.c.bf16 %v1635_v41, %v1627_v39  ;;  %v1658_v37 = vld [vmem:[#allocation4 + $0x730] sm:$0xff]  ;;  %v1673_v41 = vld [vmem:[#allocation4 + $0x7a8] sm:$0xff] }
 0x2fb   :  { %v7524_v4 = vpack.c.bf16 %v1632_v18, %v1624_v45  ;;  %v1664_v17 = vld [vmem:[#allocation4 + $0x760] sm:$0xff]  ;;  %v1666_v39 = vld [vmem:[#allocation4 + $0x770] sm:$0xff]  ;;  %v1683_v45 = vld [vmem:[#allocation4 + $0x7f8] sm:$0xff] }
 0x2fd   :  { %7513 = vmatpush1.bf16.msra.mxu0 %v7512_v51  ;;  %7577 = vmatpush1.bf16.msra.mxu1 %v7576_v53  ;;  %v1649_v51 = vld [vmem:[#allocation4 + $0x6e8] sm:$0xff]  ;;  %v1643_v53 = vld [vmem:[#allocation4 + $0x6b8] sm:$0xff] }
 0x2fe   :  { %7515 = vmatprep.subr.bf16.mxu0 %v7514_v54  ;;  %7579 = vmatprep.subr.bf16.mxu1 %v7578_v5  ;;  %v7588_v54 = vpack.c.bf16 %v1634_v49, %v1626_v48  ;;  %v1640_v5 = vld [vmem:[#allocation4 + $0x6a0] sm:$0xff]  ;;  %v7526_v9 = vpack.c.bf16 %v1649_v51, %v1641_v50  ;;  %v7590_v2 = vpack.c.bf16 %v1651_v3, %v1643_v53  ;;  %v1674_v51 = vld [vmem:[#allocation4 + $0x7b0] sm:$0xff] }
 0x2ff   :  { %v7528_v22 = vpack.c.bf16 %v1648_v8, %v1640_v5  ;;  %v1680_v50 = vld [vmem:[#allocation4 + $0x7e0] sm:$0xff]  ;;  %v1682_v53 = vld [vmem:[#allocation4 + $0x7f0] sm:$0xff]  ;;  %v2069_v5 = vld [vmem:[#allocation4 + $0x48] sm:$0xff] }
 0x300   :  { %v2063_v8 = vld [vmem:[#allocation4 + $0x18] sm:$0xff] }
 0x301   :  { %7517 = vmatpush1.bf16.msra.mxu0 %v7516_v16  ;;  %7581 = vmatpush1.bf16.msra.mxu1 %v7580_v19  ;;  %v1665_v16 = vld [vmem:[#allocation4 + $0x768] sm:$0xff]  ;;  %v1659_v19 = vld [vmem:[#allocation4 + $0x738] sm:$0xff] }
 0x302   :  { %7519 = vmatprep.subr.bf16.mxu0 %v7518_v26  ;;  %7583 = vmatprep.subr.bf16.mxu1 %v7582_v30  ;;  %v7592_v26 = vpack.c.bf16 %v1650_v13, %v1642_v10  ;;  %v1656_v30 = vld [vmem:[#allocation4 + $0x720] sm:$0xff]  ;;  %v7530_v31 = vpack.c.bf16 %v1665_v16, %v1657_v15  ;;  %v7594_v35 = vpack.c.bf16 %v1667_v21, %v1659_v19  ;;  %v2062_v19 = vld [vmem:[#allocation4 + $0x10] sm:$0xff] }
 0x303   :  { %v7532_v18 = vpack.c.bf16 %v1664_v17, %v1656_v30  ;;  %v2060_v10 = vld [vmem:[#allocation4] sm:$0xff]  ;;  %v2070_v21 = vld [vmem:[#allocation4 + $0x50] sm:$0xff]  ;;  %v2085_v30 = vld [vmem:[#allocation4 + $0xc8] sm:$0xff] }
 0x304   :  { %v2068_v13 = vld [vmem:[#allocation4 + $0x40] sm:$0xff]  ;;  %v2079_v17 = vld [vmem:[#allocation4 + $0x98] sm:$0xff] }
 0x305   :  { %7521 = vmatpush1.bf16.msra.mxu0 %v7520_v43  ;;  %7585 = vmatpush1.bf16.msra.mxu1 %v7584_v44  ;;  %v1681_v43 = vld [vmem:[#allocation4 + $0x7e8] sm:$0xff]  ;;  %v1675_v44 = vld [vmem:[#allocation4 + $0x7b8] sm:$0xff]  ;;  %v7604_v16 = vpack.c.bf16 %v2068_v13, %v2060_v10 }
 0x306   :  { %7523 = vmatprep.subr.bf16.mxu0 %v7522_v46  ;;  %7587 = vmatprep.subr.bf16.mxu1 %v7586_v47  ;;  %v7596_v46 = vpack.c.bf16 %v1666_v39, %v1658_v37  ;;  %v1672_v47 = vld [vmem:[#allocation4 + $0x7a0] sm:$0xff]  ;;  %v7534_v48 = vpack.c.bf16 %v1681_v43, %v1673_v41  ;;  %v7598_v49 = vpack.c.bf16 %v1683_v45, %v1675_v44  ;;  %v2078_v41 = vld [vmem:[#allocation4 + $0x90] sm:$0xff]  ;;  %v2093_v45 = vld [vmem:[#allocation4 + $0x108] sm:$0xff] }
 0x307   :  { %v7536_v3 = vpack.c.bf16 %v1680_v50, %v1672_v47  ;;  %v2076_v37 = vld [vmem:[#allocation4 + $0x80] sm:$0xff]  ;;  %v2086_v44 = vld [vmem:[#allocation4 + $0xd0] sm:$0xff]  ;;  %v2119_v13 = vld [vmem:[#allocation4 + $0x1d8] sm:$0xff] }
 0x308   :  { %v2084_v39 = vld [vmem:[#allocation4 + $0xc0] sm:$0xff] }
 0x309   :  { %7525 = vmatpush1.bf16.msra.mxu0 %v7524_v4  ;;  %7589 = vmatpush1.bf16.msra.mxu1 %v7588_v54  ;;  %v7600_v4 = vpack.c.bf16 %v1682_v53, %v1674_v51  ;;  %v2061_v54 = vld [vmem:[#allocation4 + $0x8] sm:$0xff]  ;;  %v7608_v43 = vpack.c.bf16 %v2084_v39, %v2076_v37  ;;  %v2092_v50 = vld [vmem:[#allocation4 + $0x100] sm:$0xff] }
 0x30a   :  { %7527 = vmatprep.subr.bf16.mxu0 %v7526_v9  ;;  %7591 = vmatprep.subr.bf16.mxu1 %v7590_v2  ;;  %v7602_v9 = vpack.c.bf16 %v2069_v5, %v2061_v54  ;;  %v2071_v2 = vld [vmem:[#allocation4 + $0x58] sm:$0xff]  ;;  %v2100_v53 = vld [vmem:[#allocation4 + $0x140] sm:$0xff]  ;;  %v2109_v5 = vld [vmem:[#allocation4 + $0x188] sm:$0xff] }
 0x30b   :  { %v7666_v15 = vpack.c.bf16 %v2071_v2, %v2063_v8  ;;  %v7612_v54 = vpack.c.bf16 %v2100_v53, %v2092_v50  ;;  %v2117_v8 = vld [vmem:[#allocation4 + $0x1c8] sm:$0xff]  ;;  %v2124_v39 = vld [vmem:[#allocation4 + $0x200] sm:$0xff] }
 0x30c   :  { %v7614_v10 = vpack.c.bf16 %v2117_v8, %v2109_v5  ;;  %v2140_v53 = vld [vmem:[#allocation4 + $0x280] sm:$0xff]  ;;  %v2150_v5 = vld [vmem:[#allocation4 + $0x2d0] sm:$0xff]  ;;  %v2157_v8 = vld [vmem:[#allocation4 + $0x308] sm:$0xff] }
 0x30d   :  { %7529 = vmatpush1.bf16.msra.mxu0 %v7528_v22  ;;  %7593 = vmatpush1.bf16.msra.mxu1 %v7592_v26  ;;  %v2077_v22 = vld [vmem:[#allocation4 + $0x88] sm:$0xff]  ;;  %v7668_v26 = vpack.c.bf16 %v2070_v21, %v2062_v19  ;;  %v2110_v21 = vld [vmem:[#allocation4 + $0x190] sm:$0xff] }
 0x30e   :  { %7531 = vmatprep.subr.bf16.mxu0 %v7530_v31  ;;  %7595 = vmatprep.subr.bf16.mxu1 %v7594_v35  ;;  %v2087_v31 = vld [vmem:[#allocation4 + $0xd8] sm:$0xff] }
 0x30f   :  { %v7670_v35 = vpack.c.bf16 %v2087_v31, %v2079_v17  ;;  %v2127_v17 = vld [vmem:[#allocation4 + $0x218] sm:$0xff] }
 0x310   :  { %v2135_v31 = vld [vmem:[#allocation4 + $0x258] sm:$0xff] }
 0x311   :  { %7533 = vmatpush1.bf16.msra.mxu0 %v7532_v18  ;;  %7597 = vmatpush1.bf16.msra.mxu1 %v7596_v46  ;;  %v2101_v18 = vld [vmem:[#allocation4 + $0x148] sm:$0xff]  ;;  %v7672_v46 = vpack.c.bf16 %v2086_v44, %v2078_v41  ;;  %v2132_v41 = vld [vmem:[#allocation4 + $0x240] sm:$0xff]  ;;  %v7682_v44 = vpack.c.bf16 %v2135_v31, %v2127_v17 }
 0x312   :  { %7535 = vmatprep.subr.bf16.mxu0 %v7534_v48  ;;  %7599 = vmatprep.subr.bf16.mxu1 %v7598_v49  ;;  %v7610_v47 = vpack.c.bf16 %v2101_v18, %v2093_v45  ;;  %v2095_v48 = vld [vmem:[#allocation4 + $0x118] sm:$0xff]  ;;  %v2134_v45 = vld [vmem:[#allocation4 + $0x250] sm:$0xff]  ;;  %v2141_v18 = vld [vmem:[#allocation4 + $0x288] sm:$0xff] }
 0x313   :  { %v2103_v49 = vld [vmem:[#allocation4 + $0x158] sm:$0xff]  ;;  %v2173_v17 = vld [vmem:[#allocation4 + $0x388] sm:$0xff] }
 0x314   :  { %v7674_v51 = vpack.c.bf16 %v2103_v49, %v2095_v48  ;;  %v2151_v48 = vld [vmem:[#allocation4 + $0x2d8] sm:$0xff]  ;;  %v7620_v49 = vpack.c.bf16 %v2132_v41, %v2124_v39  ;;  %v2181_v31 = vld [vmem:[#allocation4 + $0x3c8] sm:$0xff] }
 0x315   :  { %7537 = vmatpush1.bf16.msra.mxu0 %v7536_v3  ;;  %7601 = vmatpush1.bf16.msra.mxu1 %v7600_v4  ;;  %v2094_v3 = vld [vmem:[#allocation4 + $0x110] sm:$0xff]  ;;  %v7630_v41 = vpack.c.bf16 %v2181_v31, %v2173_v17 }
 0x316   :  { %7603 = vmatprep.subr.bf16.mxu0 %v7602_v9  ;;  %7667 = vmatprep.subr.bf16.mxu1 %v7666_v15  ;;  %v2102_v4 = vld [vmem:[#allocation4 + $0x150] sm:$0xff]  ;;  %v2111_v9 = vld [vmem:[#allocation4 + $0x198] sm:$0xff]  ;;  %v2108_v15 = vld [vmem:[#allocation4 + $0x180] sm:$0xff] }
 0x317   :  { %v7676_v2 = vpack.c.bf16 %v2102_v4, %v2094_v3  ;;  %v7678_v19 = vpack.c.bf16 %v2119_v13, %v2111_v9  ;;  %v2148_v3 = vld [vmem:[#allocation4 + $0x2c0] sm:$0xff]  ;;  %v2142_v4 = vld [vmem:[#allocation4 + $0x290] sm:$0xff]  ;;  %v2165_v9 = vld [vmem:[#allocation4 + $0x348] sm:$0xff] }
 0x318   :  { %1891 = vmatmul.mubr.f32.vlgmr.msra.gmra.mrb[10].mxu0 %v10031_v12  ;;  %1962 = vmatmul.mubr.f32.vlgmr.msra.gmra.mrb[10].mxu1 %v10031_v12  ;;  %v7606_v12 = vpack.c.bf16 %v2085_v30, %v2077_v22  ;;  %v2118_v22 = vld [vmem:[#allocation4 + $0x1d0] sm:$0xff]  ;;  %v2133_v30 = vld [vmem:[#allocation4 + $0x248] sm:$0xff]  ;;  %v7624_v13 = vpack.c.bf16 %v2148_v3, %v2140_v53  ;;  %v2199_v3 = vld [vmem:[#allocation4 + $0x458] sm:$0xff] }
 0x319   :  { %7605 = vmatpush1.bf16.msra.mxu0 %v7604_v16  ;;  %7669 = vmatpush1.bf16.msra.mxu1 %v7668_v26  ;;  %v2116_v16 = vld [vmem:[#allocation4 + $0x1c0] sm:$0xff]  ;;  %v2125_v26 = vld [vmem:[#allocation4 + $0x208] sm:$0xff]  ;;  %v2206_v31 = vld [vmem:[#allocation4 + $0x490] sm:$0xff] }
 0x31a   :  { %7607 = vmatprep.subr.bf16.mxu0 %v7606_v12  ;;  %7671 = vmatprep.subr.bf16.mxu1 %v7670_v35  ;;  %v7616_v12 = vpack.c.bf16 %v2116_v16, %v2108_v15  ;;  %v7680_v35 = vpack.c.bf16 %v2118_v22, %v2110_v21  ;;  %v7618_v37 = vpack.c.bf16 %v2133_v30, %v2125_v26  ;;  %v2164_v21 = vld [vmem:[#allocation4 + $0x340] sm:$0xff]  ;;  %v2158_v22 = vld [vmem:[#allocation4 + $0x310] sm:$0xff] }
 0x31b   :  { %v7688_v15 = vpack.c.bf16 %v2150_v5, %v2142_v4  ;;  %v7626_v16 = vpack.c.bf16 %v2165_v9, %v2157_v8  ;;  %v2166_v30 = vld [vmem:[#allocation4 + $0x350] sm:$0xff]  ;;  %v2196_v5 = vld [vmem:[#allocation4 + $0x440] sm:$0xff] }
 0x31c   :  { %v7692_v39 = vpack.c.bf16 %v2166_v30, %v2158_v22  ;;  %v2190_v8 = vld [vmem:[#allocation4 + $0x410] sm:$0xff]  ;;  %v2204_v22 = vld [vmem:[#allocation4 + $0x480] sm:$0xff] }
 0x31d   :  { %7609 = vmatpush1.bf16.msra.mxu0 %v7608_v43  ;;  %7673 = vmatpush1.bf16.msra.mxu1 %v7672_v46  ;;  %v2126_v43 = vld [vmem:[#allocation4 + $0x210] sm:$0xff]  ;;  %v2149_v46 = vld [vmem:[#allocation4 + $0x2c8] sm:$0xff] }
 0x31e   :  { %7611 = vmatprep.subr.bf16.mxu0 %v7610_v47  ;;  %7675 = vmatprep.subr.bf16.mxu1 %v7674_v51  ;;  %v2143_v47 = vld [vmem:[#allocation4 + $0x298] sm:$0xff]  ;;  %v7684_v50 = vpack.c.bf16 %v2134_v45, %v2126_v43  ;;  %v7622_v51 = vpack.c.bf16 %v2149_v46, %v2141_v18  ;;  %v2172_v43 = vld [vmem:[#allocation4 + $0x380] sm:$0xff]  ;;  %v2174_v18 = vld [vmem:[#allocation4 + $0x390] sm:$0xff] }
 0x31f   :  { %v2182_v46 = vld [vmem:[#allocation4 + $0x3d0] sm:$0xff] }
 0x321   :  { %7613 = vmatpush1.bf16.msra.mxu0 %v7612_v54  ;;  %7677 = vmatpush1.bf16.msra.mxu1 %v7676_v2  ;;  %v7686_v54 = vpack.c.bf16 %v2151_v48, %v2143_v47  ;;  %v2159_v2 = vld [vmem:[#allocation4 + $0x318] sm:$0xff]  ;;  %v7696_v48 = vpack.c.bf16 %v2182_v46, %v2174_v18  ;;  %v2228_v18 = vld [vmem:[#allocation4 + $0x540] sm:$0xff] }
 0x322   :  { %7615 = vmatprep.subr.bf16.mxu0 %v7614_v10  ;;  %7679 = vmatprep.subr.bf16.mxu1 %v7678_v19  ;;  %v2167_v10 = vld [vmem:[#allocation4 + $0x358] sm:$0xff]  ;;  %v2156_v19 = vld [vmem:[#allocation4 + $0x300] sm:$0xff] }
 0x323   :  { %v7690_v26 = vpack.c.bf16 %v2167_v10, %v2159_v2  ;;  %v2198_v2 = vld [vmem:[#allocation4 + $0x450] sm:$0xff] }
 0x324   :  { %v7700_v10 = vpack.c.bf16 %v2198_v2, %v2190_v8  ;;  %v2244_v8 = vld [vmem:[#allocation4 + $0x5c0] sm:$0xff] }
 0x325   :  { %7617 = vmatpush1.bf16.msra.mxu0 %v7616_v12  ;;  %7681 = vmatpush1.bf16.msra.mxu1 %v7680_v35  ;;  %v2175_v12 = vld [vmem:[#allocation4 + $0x398] sm:$0xff] }
 0x326   :  { %7619 = vmatprep.subr.bf16.mxu0 %v7618_v37  ;;  %7683 = vmatprep.subr.bf16.mxu1 %v7682_v44  ;;  %v2183_v35 = vld [vmem:[#allocation4 + $0x3d8] sm:$0xff]  ;;  %v7628_v37 = vpack.c.bf16 %v2164_v21, %v2156_v19  ;;  %v2180_v44 = vld [vmem:[#allocation4 + $0x3c0] sm:$0xff] }
 0x327   :  { %v7694_v45 = vpack.c.bf16 %v2183_v35, %v2175_v12  ;;  %v7632_v47 = vpack.c.bf16 %v2180_v44, %v2172_v43  ;;  %v2215_v21 = vld [vmem:[#allocation4 + $0x4d8] sm:$0xff]  ;;  %v2214_v12 = vld [vmem:[#allocation4 + $0x4d0] sm:$0xff] }
 0x328   :  { %v7704_v35 = vpack.c.bf16 %v2214_v12, %v2206_v31  ;;  %v2231_v44 = vld [vmem:[#allocation4 + $0x558] sm:$0xff] }
 0x329   :  { %7621 = vmatpush1.bf16.msra.mxu0 %v7620_v49  ;;  %7685 = vmatpush1.bf16.msra.mxu1 %v7684_v50  ;;  %v2189_v49 = vld [vmem:[#allocation4 + $0x408] sm:$0xff] }
 0x32a   :  { %7623 = vmatprep.subr.bf16.mxu0 %v7622_v51  ;;  %7687 = vmatprep.subr.bf16.mxu1 %v7686_v54  ;;  %v2197_v50 = vld [vmem:[#allocation4 + $0x448] sm:$0xff]  ;;  %v2191_v51 = vld [vmem:[#allocation4 + $0x418] sm:$0xff]  ;;  %v2188_v54 = vld [vmem:[#allocation4 + $0x400] sm:$0xff] }
 0x32b   :  { %v7634_v53 = vpack.c.bf16 %v2197_v50, %v2189_v49  ;;  %v7698_v4 = vpack.c.bf16 %v2199_v3, %v2191_v51  ;;  %v7636_v9 = vpack.c.bf16 %v2196_v5, %v2188_v54  ;;  %v2230_v49 = vld [vmem:[#allocation4 + $0x550] sm:$0xff]  ;;  %v2237_v51 = vld [vmem:[#allocation4 + $0x588] sm:$0xff]  ;;  %v2239_v3 = vld [vmem:[#allocation4 + $0x598] sm:$0xff] }
 0x32c   :  { %v2247_v54 = vld [vmem:[#allocation4 + $0x5d8] sm:$0xff]  ;;  %v2236_v5 = vld [vmem:[#allocation4 + $0x580] sm:$0xff] }
 0x32d   :  { %7625 = vmatpush1.bf16.msra.mxu0 %v7624_v13  ;;  %7689 = vmatpush1.bf16.msra.mxu1 %v7688_v15  ;;  %v2205_v13 = vld [vmem:[#allocation4 + $0x488] sm:$0xff]  ;;  %v7648_v2 = vpack.c.bf16 %v2244_v8, %v2236_v5  ;;  %v2295_v5 = vld [vmem:[#allocation4 + $0x758] sm:$0xff] }
 0x32e   :  { %7627 = vmatprep.subr.bf16.mxu0 %v7626_v16  ;;  %7691 = vmatprep.subr.bf16.mxu1 %v7690_v26  ;;  %v2213_v15 = vld [vmem:[#allocation4 + $0x4c8] sm:$0xff]  ;;  %v2207_v16 = vld [vmem:[#allocation4 + $0x498] sm:$0xff]  ;;  %v2212_v26 = vld [vmem:[#allocation4 + $0x4c0] sm:$0xff] }
 0x32f   :  { %v7638_v19 = vpack.c.bf16 %v2213_v15, %v2205_v13  ;;  %v7702_v30 = vpack.c.bf16 %v2215_v21, %v2207_v16  ;;  %v7640_v17 = vpack.c.bf16 %v2212_v26, %v2204_v22  ;;  %v2246_v13 = vld [vmem:[#allocation4 + $0x5d0] sm:$0xff]  ;;  %v2253_v16 = vld [vmem:[#allocation4 + $0x608] sm:$0xff]  ;;  %v2255_v21 = vld [vmem:[#allocation4 + $0x618] sm:$0xff] }
 0x330   :  { %v2263_v26 = vld [vmem:[#allocation4 + $0x658] sm:$0xff] }
 0x331   :  { %7629 = vmatpush1.bf16.msra.mxu0 %v7628_v37  ;;  %7693 = vmatpush1.bf16.msra.mxu1 %v7692_v39  ;;  %v2221_v37 = vld [vmem:[#allocation4 + $0x508] sm:$0xff]  ;;  %v7714_v31 = vpack.c.bf16 %v2263_v26, %v2255_v21 }
 0x332   :  { %7631 = vmatprep.subr.bf16.mxu0 %v7630_v41  ;;  %7695 = vmatprep.subr.bf16.mxu1 %v7694_v45  ;;  %v2229_v39 = vld [vmem:[#allocation4 + $0x548] sm:$0xff]  ;;  %v2223_v41 = vld [vmem:[#allocation4 + $0x518] sm:$0xff]  ;;  %v2220_v45 = vld [vmem:[#allocation4 + $0x500] sm:$0xff] }
 0x333   :  { %v7642_v43 = vpack.c.bf16 %v2229_v39, %v2221_v37  ;;  %v7706_v46 = vpack.c.bf16 %v2231_v44, %v2223_v41  ;;  %v2262_v37 = vld [vmem:[#allocation4 + $0x650] sm:$0xff]  ;;  %v2269_v41 = vld [vmem:[#allocation4 + $0x688] sm:$0xff]  ;;  %v2271_v44 = vld [vmem:[#allocation4 + $0x698] sm:$0xff] }
 0x334   :  { %v2309_v21 = vld [vmem:[#allocation4 + $0x7c8] sm:$0xff] }
 0x335   :  { %7633 = vmatpush1.bf16.msra.mxu0 %v7632_v47  ;;  %7697 = vmatpush1.bf16.msra.mxu1 %v7696_v48  ;;  %v7644_v47 = vpack.c.bf16 %v2228_v18, %v2220_v45  ;;  %v2222_v48 = vld [vmem:[#allocation4 + $0x510] sm:$0xff]  ;;  %v2279_v18 = vld [vmem:[#allocation4 + $0x6d8] sm:$0xff] }
 0x336   :  { %7635 = vmatprep.subr.bf16.mxu0 %v7634_v53  ;;  %7699 = vmatprep.subr.bf16.mxu1 %v7698_v4  ;;  %v7708_v50 = vpack.c.bf16 %v2230_v49, %v2222_v48  ;;  %v2245_v53 = vld [vmem:[#allocation4 + $0x5c8] sm:$0xff]  ;;  %v7718_v48 = vpack.c.bf16 %v2279_v18, %v2271_v44  ;;  %v2067_v18 = vld [vmem:[#allocation4 + $0x38] sm:$0xff] }
 0x337   :  { %v7646_v4 = vpack.c.bf16 %v2245_v53, %v2237_v51  ;;  %v2278_v51 = vld [vmem:[#allocation4 + $0x6d0] sm:$0xff]  ;;  %v2285_v53 = vld [vmem:[#allocation4 + $0x708] sm:$0xff] }
 0x338   :  { %v2065_v44 = vld [vmem:[#allocation4 + $0x28] sm:$0xff] }
 0x339   :  { %7637 = vmatpush1.bf16.msra.mxu0 %v7636_v9  ;;  %7701 = vmatpush1.bf16.msra.mxu1 %v7700_v10  ;;  %v7710_v9 = vpack.c.bf16 %v2247_v54, %v2239_v3  ;;  %v2238_v10 = vld [vmem:[#allocation4 + $0x590] sm:$0xff]  ;;  %v2287_v54 = vld [vmem:[#allocation4 + $0x718] sm:$0xff] }
 0x33a   :  { %7639 = vmatprep.subr.bf16.mxu0 %v7638_v19  ;;  %7703 = vmatprep.subr.bf16.mxu1 %v7702_v30  ;;  %v7712_v15 = vpack.c.bf16 %v2246_v13, %v2238_v10  ;;  %v2261_v19 = vld [vmem:[#allocation4 + $0x648] sm:$0xff]  ;;  %v2252_v30 = vld [vmem:[#allocation4 + $0x600] sm:$0xff]  ;;  %v2286_v13 = vld [vmem:[#allocation4 + $0x710] sm:$0xff] }
 0x33b   :  { %v7650_v22 = vpack.c.bf16 %v2261_v19, %v2253_v16  ;;  %v2292_v10 = vld [vmem:[#allocation4 + $0x740] sm:$0xff]  ;;  %v2294_v16 = vld [vmem:[#allocation4 + $0x750] sm:$0xff]  ;;  %v2301_v19 = vld [vmem:[#allocation4 + $0x788] sm:$0xff] }
 0x33c   :  { %v7662_v26 = vpack.c.bf16 %v2309_v21, %v2301_v19 }
 0x33d   :  { %7641 = vmatpush1.bf16.msra.mxu0 %v7640_v17  ;;  %7705 = vmatpush1.bf16.msra.mxu1 %v7704_v35  ;;  %v2260_v17 = vld [vmem:[#allocation4 + $0x640] sm:$0xff]  ;;  %v2254_v35 = vld [vmem:[#allocation4 + $0x610] sm:$0xff] }
 0x33e   :  { %7643 = vmatprep.subr.bf16.mxu0 %v7642_v43  ;;  %7707 = vmatprep.subr.bf16.mxu1 %v7706_v46  ;;  %v7652_v12 = vpack.c.bf16 %v2260_v17, %v2252_v30  ;;  %v7716_v39 = vpack.c.bf16 %v2262_v37, %v2254_v35  ;;  %v2277_v43 = vld [vmem:[#allocation4 + $0x6c8] sm:$0xff]  ;;  %v2268_v46 = vld [vmem:[#allocation4 + $0x680] sm:$0xff]  ;;  %v2303_v30 = vld [vmem:[#allocation4 + $0x798] sm:$0xff] }
 0x33f   :  { %v7654_v45 = vpack.c.bf16 %v2277_v43, %v2269_v41  ;;  %v2311_v17 = vld [vmem:[#allocation4 + $0x7d8] sm:$0xff]  ;;  %v2308_v35 = vld [vmem:[#allocation4 + $0x7c0] sm:$0xff]  ;;  %v2302_v37 = vld [vmem:[#allocation4 + $0x790] sm:$0xff] }
 0x341   :  { %7645 = vmatpush1.bf16.msra.mxu0 %v7644_v47  ;;  %7709 = vmatpush1.bf16.msra.mxu1 %v7708_v50  ;;  %v2276_v47 = vld [vmem:[#allocation4 + $0x6c0] sm:$0xff]  ;;  %v2270_v50 = vld [vmem:[#allocation4 + $0x690] sm:$0xff] }
 0x342   :  { %7647 = vmatprep.subr.bf16.mxu0 %v7646_v4  ;;  %7711 = vmatprep.subr.bf16.mxu1 %v7710_v9  ;;  %v7656_v49 = vpack.c.bf16 %v2276_v47, %v2268_v46  ;;  %v7720_v3 = vpack.c.bf16 %v2278_v51, %v2270_v50  ;;  %v2293_v4 = vld [vmem:[#allocation4 + $0x748] sm:$0xff]  ;;  %v7722_v9 = vpack.c.bf16 %v2295_v5, %v2287_v54  ;;  %v2075_v47 = vld [vmem:[#allocation4 + $0x78] sm:$0xff] }
 0x343   :  { %v7658_v8 = vpack.c.bf16 %v2293_v4, %v2285_v53 }
 0x345   :  { %7649 = vmatpush1.bf16.msra.mxu0 %v7648_v2  ;;  %7713 = vmatpush1.bf16.msra.mxu1 %v7712_v15  ;;  %v2284_v2 = vld [vmem:[#allocation4 + $0x700] sm:$0xff] }
 0x346   :  { %7651 = vmatprep.subr.bf16.mxu0 %v7650_v22  ;;  %7715 = vmatprep.subr.bf16.mxu1 %v7714_v31  ;;  %v7660_v15 = vpack.c.bf16 %v2292_v10, %v2284_v2  ;;  %v7724_v22 = vpack.c.bf16 %v2294_v16, %v2286_v13  ;;  %v2300_v31 = vld [vmem:[#allocation4 + $0x780] sm:$0xff] }
 0x347   :  { %v7664_v41 = vpack.c.bf16 %v2308_v35, %v2300_v31 }
 0x349   :  { %7653 = vmatpush1.bf16.msra.mxu0 %v7652_v12  ;;  %7717 = vmatpush1.bf16.msra.mxu1 %v7716_v39  ;;  %v7726_v12 = vpack.c.bf16 %v2311_v17, %v2303_v30  ;;  %v2310_v39 = vld [vmem:[#allocation4 + $0x7d0] sm:$0xff] }
 0x34a   :  { %7655 = vmatprep.subr.bf16.mxu0 %v7654_v45  ;;  %7719 = vmatprep.subr.bf16.mxu1 %v7718_v48  ;;  %v7728_v43 = vpack.c.bf16 %v2310_v39, %v2302_v37  ;;  %v2073_v45 = vld [vmem:[#allocation4 + $0x68] sm:$0xff]  ;;  %v7794_v48 = vpack.c.bf16 %v2075_v47, %v2067_v18 }
 0x34b   :  { %v7730_v46 = vpack.c.bf16 %v2073_v45, %v2065_v44 }
 0x34d   :  { %7657 = vmatpush1.bf16.msra.mxu0 %v7656_v49  ;;  %7721 = vmatpush1.bf16.msra.mxu1 %v7720_v3  ;;  %v1410_v3 = vpop.permute.xlu1 %1409 }
 0x34e   :  { %7659 = vmatprep.subr.bf16.mxu0 %v7658_v8  ;;  %7723 = vmatprep.subr.bf16.mxu1 %v7722_v9  ;;  %v1412_v4 = vmul.f32 %v1410_v3, %v9889_v29  ;;  %v1414_v54 = vmul.f32 %v1410_v3, %v9895_v32  ;;  %v1413_v5 = vmul.f32 %v1410_v3, %v9898_v33 }
 0x34f   :  { %v1415_v8 = vmul.f32 %v1410_v3, %v9901_v34  ;;  %v1417_v45 = vmul.f32 %v1410_v3, %v9942_v62  ;;  %v1419_v18 = vmul.f32 %v1410_v3, %v9945_v0 }
 0x350   :  { %v1420_v9 = vadd.f32 %v1412_v4, %v9905_v36  ;;  %v1422_v2 = vadd.f32 %v1414_v54, %v9909_v38  ;;  %v1421_v10 = vadd.f32 %v1413_v5, %v9913_v40 }
 0x351   :  { %7661 = vmatpush1.bf16.msra.mxu0 %v7660_v15  ;;  %7725 = vmatpush1.bf16.msra.mxu1 %v7724_v22  ;;  %v1423_v13 = vadd.f32 %v1415_v8, %v9917_v42  ;;  %v1427_v4 = vadd.f32 %v1419_v18, %v9961_v14 }
 0x352   :  { %7663 = vmatprep.subr.bf16.mxu0 %v7662_v26  ;;  %7727 = vmatprep.subr.bf16.mxu1 %v7726_v12 }
 0x355   :  { %7665 = vmatpush1.bf16.msra.mxu0 %v7664_v41  ;;  %7729 = vmatpush1.bf16.msra.mxu1 %v7728_v43  ;;  %v1416_v41 = vmul.f32 %v1410_v3, %v9936_v59  ;;  %v1418_v43 = vmul.f32 %v1410_v3, %v9939_v61 }
 0x356   :  { %7731 = vmatprep.subr.bf16.mxu0 %v7730_v46  ;;  %7795 = vmatprep.subr.bf16.mxu1 %v7794_v48 }
 0x357   :  { %v1424_v48 = vadd.f32 %v1416_v41, %v9949_v6 }
 0x3ab   :  { %v1750_v49 = vpop.f32.mrb[8].mxu0  ;;  %v1821_v50 = vpop.f32.mrb[8].mxu1 }
 0x3ac   :  { %v1752_v51 = vpop.f32.mrb[9].mxu0  ;;  %v1823_v53 = vpop.f32.mrb[9].mxu1  ;;  %v1968_v15 = vadd.f32 %v1750_v49, %v1420_v9  ;;  %v1970_v16 = vadd.f32 %v1821_v50, %v1422_v2  ;;  %v1426_v49 = vadd.f32 %v1418_v43, %v9952_v7 }
 0x3ad   :  { %v1969_v19 = vadd.f32 %v1752_v51, %v1421_v10  ;;  %v1971_v21 = vadd.f32 %v1823_v53, %v1423_v13  ;;  %v1425_v53 = vadd.f32 %v1417_v45, %v9957_v11 }
 0x3ae   :  { %v6772_v22 = vmul.f32 -1.442695, %v1968_v15  ;;  %v6774_v26 = vmul.f32 -1.442695, %v1970_v16 }
 0x3af   :  { %v6773_v30 = vmul.f32 -1.442695, %v1969_v19  ;;  %v6775_v17 = vmul.f32 -1.442695, %v1971_v21 }
 0x3b0   :  { %9467 = vpow2.f32 %v6772_v22 }
 0x3b1   :  { %9469 = vpow2.f32 %v6774_v26 }
 0x3b2   :  { %9471 = vpow2.f32 %v6773_v30 }
 0x3b3   :  { %9473 = vpow2.f32 %v6775_v17 }
 0x3ba   :  { %v9468_v31 = vpop.eup %9467 }
 0x3bb   :  { %v9470_v12 = vpop.eup %9469  ;;  %v1982_v39 = vadd.f32 1.0, %v9468_v31 }
 0x3bc   :  { %v9472_v35 = vpop.eup %9471  ;;  %v1994_v44 = vadd.f32 1.0, %v9470_v12 }
 0x3bd   :  { %v9474_v37 = vpop.eup %9473  ;;  %v1983_v46 = vadd.f32 1.0, %v9472_v35  ;;  %9475 = vrcp.f32 %v1982_v39 }
 0x3be   :  { %v1995_v47 = vadd.f32 1.0, %v9474_v37  ;;  %9477 = vrcp.f32 %v1994_v44 }
 0x3bf   :  { %9479 = vrcp.f32 %v1983_v46  ;;  %v2072_v46 = vld [vmem:[#allocation4 + $0x60] sm:$0xff] }
 0x3c0   :  { %9481 = vrcp.f32 %v1995_v47  ;;  %v2066_v47 = vld [vmem:[#allocation4 + $0x30] sm:$0xff] }
 0x3c7   :  { %v9476_v15 = vpop.eup %9475 }
 0x3c8   :  { %v9478_v16 = vpop.eup %9477 }
 0x3c9   :  { %v9480_v19 = vpop.eup %9479  ;;  %v2014_v30 = vmul.f32 %v9478_v16, %v10025_v52  ;;  %v2064_v52 = vld [vmem:[#allocation4 + $0x20] sm:$0xff] }
 0x3ca   :  { %v9482_v21 = vpop.eup %9481 }
 0x3cb   :  { %v2015_v12 = vmul.f32 %v9482_v21, %v10027_v60  ;;  %v2074_v60 = vld [vmem:[#allocation4 + $0x70] sm:$0xff] }
 0x3eb   :  { %v1892_v50 = vpop.f32.mrb[10].mxu0  ;;  %v1963_v51 = vpop.f32.mrb[10].mxu1 }
 0x3ec   :  { %v1972_v54 = vadd.f32 %v1892_v50, %v1424_v48  ;;  %v1974_v5 = vadd.f32 %v1963_v51, %v1426_v49  ;;  %v1894_v8 = vpop.f32.mrb[11].mxu0  ;;  %v1965_v9 = vpop.f32.mrb[11].mxu1  ;;  %v2081_v50 = vld [vmem:[#allocation4 + $0xa8] sm:$0xff] }
 0x3ed   :  { %v1973_v3 = vadd.f32 %v1894_v8, %v1425_v53  ;;  %v1975_v2 = vadd.f32 %v1965_v9, %v1427_v4  ;;  %v2089_v53 = vld [vmem:[#allocation4 + $0xe8] sm:$0xff]  ;;  %v2083_v4 = vld [vmem:[#allocation4 + $0xb8] sm:$0xff]  ;;  %v7732_v8 = vpack.c.bf16 %v2072_v46, %v2064_v52  ;;  %v7796_v9 = vpack.c.bf16 %v2074_v60, %v2066_v47 }
 0x3ee   :  { %9483 = vtanh.f32 %v1972_v54  ;;  %v6776_v10 = vmul.f32 -1.442695, %v1974_v5  ;;  %v2091_v54 = vld [vmem:[#allocation4 + $0xf8] sm:$0xff]  ;;  %v2113_v52 = vld [vmem:[#allocation4 + $0x1a8] sm:$0xff] }
 0x3ef   :  { %9485 = vtanh.f32 %v1973_v3  ;;  %v6777_v13 = vmul.f32 -1.442695, %v1975_v2  ;;  %v2080_v3 = vld [vmem:[#allocation4 + $0xa0] sm:$0xff]  ;;  %v7798_v21 = vpack.c.bf16 %v2091_v54, %v2083_v4  ;;  %v2115_v46 = vld [vmem:[#allocation4 + $0x1b8] sm:$0xff]  ;;  %v2114_v54 = vld [vmem:[#allocation4 + $0x1b0] sm:$0xff] }
 0x3f0   :  { %9487 = vpow2.f32 %v6776_v10  ;;  %v2088_v2 = vld [vmem:[#allocation4 + $0xe0] sm:$0xff]  ;;  %v2082_v10 = vld [vmem:[#allocation4 + $0xb0] sm:$0xff]  ;;  %v2123_v47 = vld [vmem:[#allocation4 + $0x1f8] sm:$0xff] }
 0x3f1   :  { %9489 = vpow2.f32 %v6777_v13  ;;  %v2090_v13 = vld [vmem:[#allocation4 + $0xf0] sm:$0xff]  ;;  %v7806_v4 = vpack.c.bf16 %v2123_v47, %v2115_v46  ;;  %v2152_v46 = vld [vmem:[#allocation4 + $0x2e0] sm:$0xff] }
 0x3f8   :  { %v9484_v22 = vpop.eup %9483 }
 0x3f9   :  { %v9486_v26 = vpop.eup %9485  ;;  %v2016_v17 = vmul.f32 %v9484_v22, %v9476_v15  ;;  %v2097_v15 = vld [vmem:[#allocation4 + $0x128] sm:$0xff] }
 0x3fa   :  { %v9488_v31 = vpop.eup %9487  ;;  %v2017_v35 = vmul.f32 %v9486_v26, %v9480_v19  ;;  %v7734_v19 = vpack.c.bf16 %v2089_v53, %v2081_v50  ;;  %v2105_v22 = vld [vmem:[#allocation4 + $0x168] sm:$0xff]  ;;  %v2099_v26 = vld [vmem:[#allocation4 + $0x138] sm:$0xff]  ;;  %v2112_v50 = vld [vmem:[#allocation4 + $0x1a0] sm:$0xff] }
 0x3fb   :  { %v9490_v37 = vpop.eup %9489  ;;  %v10060_v39 = vadd.f32 %v2016_v17, %v2014_v30  ;;  %v2008_v41 = vadd.f32 1.0, %v9488_v31  ;;  %v2107_v30 = vld [vmem:[#allocation4 + $0x178] sm:$0xff]  ;;  %v7736_v17 = vpack.c.bf16 %v2088_v2, %v2080_v3  ;;  %v7800_v31 = vpack.c.bf16 %v2090_v13, %v2082_v10 }
 0x3fc   :  { %v10062_v43 = vadd.f32 %v2017_v35, %v2015_v12  ;;  %v2009_v44 = vadd.f32 1.0, %v9490_v37  ;;  %v2096_v12 = vld [vmem:[#allocation4 + $0x120] sm:$0xff]  ;;  %v7738_v37 = vpack.c.bf16 %v2105_v22, %v2097_v15  ;;  %v2131_v3 = vld [vmem:[#allocation4 + $0x238] sm:$0xff] }
 0x3fd   :  { %9491 = vtanh.f32 %v10060_v39  ;;  %v2104_v35 = vld [vmem:[#allocation4 + $0x160] sm:$0xff]  ;;  %v2139_v2 = vld [vmem:[#allocation4 + $0x278] sm:$0xff] }
 0x3fe   :  { %9493 = vrcp.f32 %v2008_v41  ;;  %v7802_v41 = vpack.c.bf16 %v2107_v30, %v2099_v26  ;;  %v7740_v60 = vpack.c.bf16 %v2104_v35, %v2096_v12  ;;  %v7810_v22 = vpack.c.bf16 %v2139_v2, %v2131_v3  ;;  %v2136_v26 = vld [vmem:[#allocation4 + $0x260] sm:$0xff]  ;;  %v2130_v30 = vld [vmem:[#allocation4 + $0x230] sm:$0xff]  ;;  %v2145_v12 = vld [vmem:[#allocation4 + $0x2a8] sm:$0xff] }
 0x3ff   :  { %9495 = vtanh.f32 %v10062_v43  ;;  %v2153_v35 = vld [vmem:[#allocation4 + $0x2e8] sm:$0xff] }
 0x400   :  { %9497 = vrcp.f32 %v2009_v44  ;;  %v2098_v44 = vld [vmem:[#allocation4 + $0x130] sm:$0xff]  ;;  %v7750_v47 = vpack.c.bf16 %v2153_v35, %v2145_v12  ;;  %v2176_v35 = vld [vmem:[#allocation4 + $0x3a0] sm:$0xff] }
 0x407   :  { %v9492_v45 = vpop.eup %9491 }
 0x408   :  { %v9494_v18 = vpop.eup %9493 }
 0x409   :  { %v9496_v48 = vpop.eup %9495  ;;  %v10066_v49 = vmul.f32 %v9494_v18, %v9492_v45  ;;  %v2106_v45 = vld [vmem:[#allocation4 + $0x170] sm:$0xff]  ;;  %v2121_v18 = vld [vmem:[#allocation4 + $0x1e8] sm:$0xff] }
 0x40a   :  { %v9498_v51 = vpop.eup %9497  ;;  %v7742_v53 = vpack.c.bf16 %v2121_v18, %v2113_v52  ;;  %v2144_v18 = vld [vmem:[#allocation4 + $0x2a0] sm:$0xff] }
 0x40b   :  { %v2023_v5 = vmul.f32 %v9498_v51, %v9496_v48  ;;  %v7804_v48 = vpack.c.bf16 %v2106_v45, %v2098_v44  ;;  %v2120_v51 = vld [vmem:[#allocation4 + $0x1e0] sm:$0xff]  ;;  %v7752_v3 = vpack.c.bf16 %v2152_v46, %v2144_v18  ;;  %v2193_v18 = vld [vmem:[#allocation4 + $0x428] sm:$0xff] }
 0x40c   :  { %v7744_v13 = vpack.c.bf16 %v2120_v51, %v2112_v50  ;;  %v2161_v50 = vld [vmem:[#allocation4 + $0x328] sm:$0xff] }
 0x40d   :  { %2380 = vmatprep.mubr.f32.mxu0 %v2023_v5  ;;  %2451 = vmatprep.mubr.f32.mxu1 %v2023_v5  ;;  %v2026_v16 = vcombine.low %v10066_v49, %v2023_v5  ;;  %v2201_v46 = vld [vmem:[#allocation4 + $0x468] sm:$0xff] }
 0x40e   :  { %2381 = vmatmul.mubr.f32.vlgmr.msra.gmra.mrb[12].mxu0 %v10066_v49  ;;  %2452 = vmatmul.mubr.f32.vlgmr.msra.gmra.mrb[12].mxu1 %v10066_v49 }
 0x40f   :  { %6778 = vst.sshfl [vmem:[#allocation2 + $0x8] sm:$0x33 pattern:$0x76325410] %v2026_v16  ;;  %7733 = vmatpush1.bf16.msra.mxu0 %v7732_v8  ;;  %7797 = vmatpush1.bf16.msra.mxu1 %v7796_v9  ;;  %v2129_v8 = vld [vmem:[#allocation4 + $0x228] sm:$0xff]  ;;  %v2128_v16 = vld [vmem:[#allocation4 + $0x220] sm:$0xff] }
 0x410   :  { %2522 = vmatprep.mubr.f32.mxu0 %v2023_v5  ;;  %2593 = vmatprep.mubr.f32.mxu1 %v2023_v5  ;;  %v2122_v5 = vld [vmem:[#allocation4 + $0x1f0] sm:$0xff]  ;;  %v2137_v9 = vld [vmem:[#allocation4 + $0x268] sm:$0xff]  ;;  %v7748_v44 = vpack.c.bf16 %v2136_v26, %v2128_v16 }
 0x411   :  { %7735 = vmatprep.subr.bf16.mxu0 %v7734_v19  ;;  %7799 = vmatprep.subr.bf16.mxu1 %v7798_v21  ;;  %v7808_v15 = vpack.c.bf16 %v2122_v5, %v2114_v54  ;;  %v7746_v21 = vpack.c.bf16 %v2137_v9, %v2129_v8  ;;  %v2169_v54 = vld [vmem:[#allocation4 + $0x368] sm:$0xff]  ;;  %v2163_v5 = vld [vmem:[#allocation4 + $0x338] sm:$0xff] }
 0x412   :  { %v2171_v8 = vld [vmem:[#allocation4 + $0x378] sm:$0xff]  ;;  %v2185_v26 = vld [vmem:[#allocation4 + $0x3e8] sm:$0xff] }
 0x413   :  { %7737 = vmatpush1.bf16.msra.mxu0 %v7736_v17  ;;  %7801 = vmatpush1.bf16.msra.mxu1 %v7800_v31  ;;  %v2138_v17 = vld [vmem:[#allocation4 + $0x270] sm:$0xff]  ;;  %v7818_v16 = vpack.c.bf16 %v2171_v8, %v2163_v5 }
 0x414   :  { %7739 = vmatprep.subr.bf16.mxu0 %v7738_v37  ;;  %7803 = vmatprep.subr.bf16.mxu1 %v7802_v41  ;;  %v2147_v37 = vld [vmem:[#allocation4 + $0x2b8] sm:$0xff]  ;;  %v7812_v45 = vpack.c.bf16 %v2138_v17, %v2130_v30  ;;  %v2194_v5 = vld [vmem:[#allocation4 + $0x430] sm:$0xff] }
 0x415   :  { %v2155_v41 = vld [vmem:[#allocation4 + $0x2f8] sm:$0xff]  ;;  %v2202_v8 = vld [vmem:[#allocation4 + $0x470] sm:$0xff] }
 0x416   :  { %v6459_v10 = vld [vmem:[#allocation2 + $0x8] sm:$0xf] }
 0x417   :  { %7741 = vmatpush1.bf16.msra.mxu0 %v7740_v60  ;;  %7805 = vmatpush1.bf16.msra.mxu1 %v7804_v48  ;;  %v6488_v19 = vmul.f32 %v9987_v20, %v6459_v10  ;;  %v2146_v60 = vld [vmem:[#allocation4 + $0x2b0] sm:$0xff]  ;;  %v2160_v10 = vld [vmem:[#allocation4 + $0x320] sm:$0xff]  ;;  %v2179_v30 = vld [vmem:[#allocation4 + $0x3b8] sm:$0xff] }
 0x418   :  { %7743 = vmatprep.subr.bf16.mxu0 %v7742_v53  ;;  %7807 = vmatprep.subr.bf16.mxu1 %v7806_v4  ;;  %v2154_v48 = vld [vmem:[#allocation4 + $0x2f0] sm:$0xff]  ;;  %v7814_v4 = vpack.c.bf16 %v2155_v41, %v2147_v37  ;;  %v2187_v17 = vld [vmem:[#allocation4 + $0x3f8] sm:$0xff]  ;;  %v2184_v37 = vld [vmem:[#allocation4 + $0x3e0] sm:$0xff] }
 0x419   :  { %v6528_v31 = vrot.slane %v6488_v19, %v9984_v63  ;;  %v7816_v2 = vpack.c.bf16 %v2154_v48, %v2146_v60  ;;  %v2162_v19 = vld [vmem:[#allocation4 + $0x330] sm:$0xff]  ;;  %v2203_v60 = vld [vmem:[#allocation4 + $0x478] sm:$0xff]  ;;  %v7760_v48 = vpack.c.bf16 %v2184_v37, %v2176_v35 }
 0x41a   :  { %v2235_v35 = vld [vmem:[#allocation4 + $0x578] sm:$0xff] }
 0x41b   :  { %7745 = vmatpush1.bf16.msra.mxu0 %v7744_v13  ;;  %7809 = vmatpush1.bf16.msra.mxu1 %v7808_v15  ;;  %v6529_v52 = vcombine.high %v6528_v31, %v6528_v31  ;;  %v6617_v51 = vsel %vm6606_vm0, %v6528_v31, 0.0  ;;  %v2168_v13 = vld [vmem:[#allocation4 + $0x360] sm:$0xff]  ;;  %v7754_v15 = vpack.c.bf16 %v2169_v54, %v2161_v50 }
 0x41c   :  { %7747 = vmatprep.subr.bf16.mxu0 %v7746_v21  ;;  %7811 = vmatprep.subr.bf16.mxu1 %v7810_v22  ;;  %v2170_v21 = vld [vmem:[#allocation4 + $0x370] sm:$0xff]  ;;  %v2177_v22 = vld [vmem:[#allocation4 + $0x3a8] sm:$0xff]  ;;  %v7756_v31 = vpack.c.bf16 %v2168_v13, %v2160_v10  ;;  %v2219_v10 = vld [vmem:[#allocation4 + $0x4f8] sm:$0xff] }
 0x41d   :  { %v6618_v53 = vsel %vm6606_vm0, %v6529_v52, 0.0  ;;  %v7820_v12 = vpack.c.bf16 %v2170_v21, %v2162_v19  ;;  %v7758_v41 = vpack.c.bf16 %v2185_v26, %v2177_v22  ;;  %v2186_v52 = vld [vmem:[#allocation4 + $0x3f0] sm:$0xff]  ;;  %v2216_v19 = vld [vmem:[#allocation4 + $0x4e0] sm:$0xff] }
 0x41e   :  { %v6619_v9 = vadd.f32 %v6618_v53, %v6617_v51  ;;  %v2192_v51 = vld [vmem:[#allocation4 + $0x420] sm:$0xff]  ;;  %v2210_v26 = vld [vmem:[#allocation4 + $0x4b0] sm:$0xff] }
 0x41f   :  { %7749 = vmatpush1.bf16.msra.mxu0 %v7748_v44  ;;  %7813 = vmatpush1.bf16.msra.mxu1 %v7812_v45  ;;  %v7822_v44 = vpack.c.bf16 %v2187_v17, %v2179_v30  ;;  %v2178_v45 = vld [vmem:[#allocation4 + $0x3b0] sm:$0xff]  ;;  %v2200_v53 = vld [vmem:[#allocation4 + $0x460] sm:$0xff]  ;;  %v2225_v17 = vld [vmem:[#allocation4 + $0x528] sm:$0xff] }
 0x420   :  { %6620 = vadd.xlane.f32.xlu0 %v6619_v9  ;;  %7751 = vmatprep.subr.bf16.mxu0 %v7750_v47  ;;  %v2195_v47 = vld [vmem:[#allocation4 + $0x438] sm:$0xff]  ;;  %v7824_v50 = vpack.c.bf16 %v2186_v52, %v2178_v45  ;;  %v2209_v9 = vld [vmem:[#allocation4 + $0x4a8] sm:$0xff]  ;;  %v7764_v13 = vpack.c.bf16 %v2200_v53, %v2192_v51  ;;  %v2218_v30 = vld [vmem:[#allocation4 + $0x4f0] sm:$0xff] }
 0x421   :  { %7815 = vmatprep.subr.bf16.mxu1 %v7814_v4  ;;  %v7762_v4 = vpack.c.bf16 %v2201_v46, %v2193_v18  ;;  %v7826_v54 = vpack.c.bf16 %v2203_v60, %v2195_v47  ;;  %v2232_v45 = vld [vmem:[#allocation4 + $0x560] sm:$0xff]  ;;  %v2226_v46 = vld [vmem:[#allocation4 + $0x530] sm:$0xff]  ;;  %v2241_v60 = vld [vmem:[#allocation4 + $0x5a8] sm:$0xff] }
 0x422   :  { %v2234_v47 = vld [vmem:[#allocation4 + $0x570] sm:$0xff]  ;;  %v2251_v51 = vld [vmem:[#allocation4 + $0x5f8] sm:$0xff] }
 0x423   :  { %7753 = vmatpush1.bf16.msra.mxu0 %v7752_v3  ;;  %7817 = vmatpush1.bf16.msra.mxu1 %v7816_v2  ;;  %v2217_v3 = vld [vmem:[#allocation4 + $0x4e8] sm:$0xff]  ;;  %v2211_v2 = vld [vmem:[#allocation4 + $0x4b8] sm:$0xff] }
 0x424   :  { %7755 = vmatprep.subr.bf16.mxu0 %v7754_v15  ;;  %7819 = vmatprep.subr.bf16.mxu1 %v7818_v16  ;;  %v7828_v15 = vpack.c.bf16 %v2202_v8, %v2194_v5  ;;  %v2208_v16 = vld [vmem:[#allocation4 + $0x4a0] sm:$0xff]  ;;  %v7766_v21 = vpack.c.bf16 %v2217_v3, %v2209_v9  ;;  %v7830_v22 = vpack.c.bf16 %v2219_v10, %v2211_v2  ;;  %v2242_v3 = vld [vmem:[#allocation4 + $0x5b0] sm:$0xff]  ;;  %v2257_v10 = vld [vmem:[#allocation4 + $0x628] sm:$0xff] }
 0x425   :  { %v7768_v37 = vpack.c.bf16 %v2216_v19, %v2208_v16  ;;  %v2248_v5 = vld [vmem:[#allocation4 + $0x5e0] sm:$0xff]  ;;  %v2250_v2 = vld [vmem:[#allocation4 + $0x5f0] sm:$0xff]  ;;  %v2267_v16 = vld [vmem:[#allocation4 + $0x678] sm:$0xff] }
 0x427   :  { %7757 = vmatpush1.bf16.msra.mxu0 %v7756_v31  ;;  %7821 = vmatpush1.bf16.msra.mxu1 %v7820_v12  ;;  %v2233_v31 = vld [vmem:[#allocation4 + $0x568] sm:$0xff]  ;;  %v2227_v12 = vld [vmem:[#allocation4 + $0x538] sm:$0xff] }
 0x428   :  { %7759 = vmatprep.subr.bf16.mxu0 %v7758_v41  ;;  %7823 = vmatprep.subr.bf16.mxu1 %v7822_v44  ;;  %v7832_v41 = vpack.c.bf16 %v2218_v30, %v2210_v26  ;;  %v2224_v44 = vld [vmem:[#allocation4 + $0x520] sm:$0xff]  ;;  %v7770_v52 = vpack.c.bf16 %v2233_v31, %v2225_v17  ;;  %v7834_v18 = vpack.c.bf16 %v2235_v35, %v2227_v12  ;;  %v2258_v31 = vld [vmem:[#allocation4 + $0x630] sm:$0xff]  ;;  %v2273_v35 = vld [vmem:[#allocation4 + $0x6a8] sm:$0xff] }
 0x429   :  { %v7772_v53 = vpack.c.bf16 %v2232_v45, %v2224_v44  ;;  %v2264_v26 = vld [vmem:[#allocation4 + $0x660] sm:$0xff]  ;;  %v2266_v12 = vld [vmem:[#allocation4 + $0x670] sm:$0xff]  ;;  %v2283_v44 = vld [vmem:[#allocation4 + $0x6f8] sm:$0xff] }
 0x42b   :  { %7761 = vmatpush1.bf16.msra.mxu0 %v7760_v48  ;;  %7825 = vmatpush1.bf16.msra.mxu1 %v7824_v50  ;;  %v2249_v48 = vld [vmem:[#allocation4 + $0x5e8] sm:$0xff]  ;;  %v2243_v50 = vld [vmem:[#allocation4 + $0x5b8] sm:$0xff] }
 0x42c   :  { %7763 = vmatprep.subr.bf16.mxu0 %v7762_v4  ;;  %7827 = vmatprep.subr.bf16.mxu1 %v7826_v54  ;;  %v7836_v4 = vpack.c.bf16 %v2234_v47, %v2226_v46  ;;  %v2240_v54 = vld [vmem:[#allocation4 + $0x5a0] sm:$0xff]  ;;  %v7774_v8 = vpack.c.bf16 %v2249_v48, %v2241_v60  ;;  %v7838_v9 = vpack.c.bf16 %v2251_v51, %v2243_v50  ;;  %v2274_v48 = vld [vmem:[#allocation4 + $0x6b0] sm:$0xff]  ;;  %v2289_v51 = vld [vmem:[#allocation4 + $0x728] sm:$0xff] }
 0x42d   :  { %v7776_v19 = vpack.c.bf16 %v2248_v5, %v2240_v54  ;;  %v2280_v46 = vld [vmem:[#allocation4 + $0x6e0] sm:$0xff]  ;;  %v2282_v50 = vld [vmem:[#allocation4 + $0x6f0] sm:$0xff]  ;;  %v2299_v54 = vld [vmem:[#allocation4 + $0x778] sm:$0xff] }
 0x42f   :  { %7765 = vmatpush1.bf16.msra.mxu0 %v7764_v13  ;;  %7829 = vmatpush1.bf16.msra.mxu1 %v7828_v15  ;;  %v2265_v13 = vld [vmem:[#allocation4 + $0x668] sm:$0xff]  ;;  %v2259_v15 = vld [vmem:[#allocation4 + $0x638] sm:$0xff] }
 0x430   :  { %7767 = vmatprep.subr.bf16.mxu0 %v7766_v21  ;;  %7831 = vmatprep.subr.bf16.mxu1 %v7830_v22  ;;  %v7840_v21 = vpack.c.bf16 %v2250_v2, %v2242_v3  ;;  %v2256_v22 = vld [vmem:[#allocation4 + $0x620] sm:$0xff]  ;;  %v7778_v30 = vpack.c.bf16 %v2265_v13, %v2257_v10  ;;  %v7842_v17 = vpack.c.bf16 %v2267_v16, %v2259_v15  ;;  %v2290_v13 = vld [vmem:[#allocation4 + $0x730] sm:$0xff]  ;;  %v2305_v16 = vld [vmem:[#allocation4 + $0x7a8] sm:$0xff] }
 0x431   :  { %v7780_v45 = vpack.c.bf16 %v2264_v26, %v2256_v22  ;;  %v2296_v3 = vld [vmem:[#allocation4 + $0x760] sm:$0xff]  ;;  %v2298_v15 = vld [vmem:[#allocation4 + $0x770] sm:$0xff]  ;;  %v2315_v22 = vld [vmem:[#allocation4 + $0x7f8] sm:$0xff] }
 0x433   :  { %7769 = vmatpush1.bf16.msra.mxu0 %v7768_v37  ;;  %7833 = vmatpush1.bf16.msra.mxu1 %v7832_v41  ;;  %v2281_v37 = vld [vmem:[#allocation4 + $0x6e8] sm:$0xff]  ;;  %v2275_v41 = vld [vmem:[#allocation4 + $0x6b8] sm:$0xff] }
 0x434   :  { %7771 = vmatprep.subr.bf16.mxu0 %v7770_v52  ;;  %7835 = vmatprep.subr.bf16.mxu1 %v7834_v18  ;;  %v7844_v52 = vpack.c.bf16 %v2266_v12, %v2258_v31  ;;  %v2272_v18 = vld [vmem:[#allocation4 + $0x6a0] sm:$0xff]  ;;  %v7782_v47 = vpack.c.bf16 %v2281_v37, %v2273_v35  ;;  %v7846_v60 = vpack.c.bf16 %v2283_v44, %v2275_v41  ;;  %v2306_v37 = vld [vmem:[#allocation4 + $0x7b0] sm:$0xff] }
 0x435   :  { %v7784_v5 = vpack.c.bf16 %v2280_v46, %v2272_v18  ;;  %v2312_v35 = vld [vmem:[#allocation4 + $0x7e0] sm:$0xff]  ;;  %v2314_v41 = vld [vmem:[#allocation4 + $0x7f0] sm:$0xff]  ;;  %v2701_v18 = vld [vmem:[#allocation4 + $0x48] sm:$0xff] }
 0x436   :  { %v2695_v46 = vld [vmem:[#allocation4 + $0x18] sm:$0xff] }
 0x437   :  { %7773 = vmatpush1.bf16.msra.mxu0 %v7772_v53  ;;  %7837 = vmatpush1.bf16.msra.mxu1 %v7836_v4  ;;  %v2297_v53 = vld [vmem:[#allocation4 + $0x768] sm:$0xff]  ;;  %v2291_v4 = vld [vmem:[#allocation4 + $0x738] sm:$0xff] }
 0x438   :  { %7775 = vmatprep.subr.bf16.mxu0 %v7774_v8  ;;  %7839 = vmatprep.subr.bf16.mxu1 %v7838_v9  ;;  %v7848_v8 = vpack.c.bf16 %v2282_v50, %v2274_v48  ;;  %v2288_v9 = vld [vmem:[#allocation4 + $0x720] sm:$0xff]  ;;  %v7786_v2 = vpack.c.bf16 %v2297_v53, %v2289_v51  ;;  %v7850_v10 = vpack.c.bf16 %v2299_v54, %v2291_v4  ;;  %v2694_v4 = vld [vmem:[#allocation4 + $0x10] sm:$0xff] }
 0x439   :  { %v7788_v26 = vpack.c.bf16 %v2296_v3, %v2288_v9  ;;  %v2692_v48 = vld [vmem:[#allocation4] sm:$0xff]  ;;  %v2702_v54 = vld [vmem:[#allocation4 + $0x50] sm:$0xff]  ;;  %v2717_v9 = vld [vmem:[#allocation4 + $0xc8] sm:$0xff] }
 0x43a   :  { %v2700_v50 = vld [vmem:[#allocation4 + $0x40] sm:$0xff]  ;;  %v2711_v3 = vld [vmem:[#allocation4 + $0x98] sm:$0xff] }
 0x43b   :  { %7777 = vmatpush1.bf16.msra.mxu0 %v7776_v19  ;;  %7841 = vmatpush1.bf16.msra.mxu1 %v7840_v21  ;;  %v2313_v19 = vld [vmem:[#allocation4 + $0x7e8] sm:$0xff]  ;;  %v2307_v21 = vld [vmem:[#allocation4 + $0x7b8] sm:$0xff]  ;;  %v7860_v53 = vpack.c.bf16 %v2700_v50, %v2692_v48 }
 0x43c   :  { %7779 = vmatprep.subr.bf16.mxu0 %v7778_v30  ;;  %7843 = vmatprep.subr.bf16.mxu1 %v7842_v17  ;;  %v7852_v30 = vpack.c.bf16 %v2298_v15, %v2290_v13  ;;  %v2304_v17 = vld [vmem:[#allocation4 + $0x7a0] sm:$0xff]  ;;  %v7790_v31 = vpack.c.bf16 %v2313_v19, %v2305_v16  ;;  %v7854_v12 = vpack.c.bf16 %v2315_v22, %v2307_v21  ;;  %v2710_v16 = vld [vmem:[#allocation4 + $0x90] sm:$0xff]  ;;  %v2725_v22 = vld [vmem:[#allocation4 + $0x108] sm:$0xff] }
 0x43d   :  { %v7792_v44 = vpack.c.bf16 %v2312_v35, %v2304_v17  ;;  %v2708_v13 = vld [vmem:[#allocation4 + $0x80] sm:$0xff]  ;;  %v2718_v21 = vld [vmem:[#allocation4 + $0xd0] sm:$0xff]  ;;  %v2751_v50 = vld [vmem:[#allocation4 + $0x1d8] sm:$0xff] }
 0x43e   :  { %v2716_v15 = vld [vmem:[#allocation4 + $0xc0] sm:$0xff] }
 0x43f   :  { %7781 = vmatpush1.bf16.msra.mxu0 %v7780_v45  ;;  %7845 = vmatpush1.bf16.msra.mxu1 %v7844_v52  ;;  %v7856_v45 = vpack.c.bf16 %v2314_v41, %v2306_v37  ;;  %v2693_v52 = vld [vmem:[#allocation4 + $0x8] sm:$0xff]  ;;  %v7864_v19 = vpack.c.bf16 %v2716_v15, %v2708_v13  ;;  %v2724_v35 = vld [vmem:[#allocation4 + $0x100] sm:$0xff] }
 0x440   :  { %7783 = vmatprep.subr.bf16.mxu0 %v7782_v47  ;;  %7847 = vmatprep.subr.bf16.mxu1 %v7846_v60  ;;  %v7858_v47 = vpack.c.bf16 %v2701_v18, %v2693_v52  ;;  %v2703_v60 = vld [vmem:[#allocation4 + $0x58] sm:$0xff]  ;;  %v2732_v41 = vld [vmem:[#allocation4 + $0x140] sm:$0xff]  ;;  %v2741_v18 = vld [vmem:[#allocation4 + $0x188] sm:$0xff] }
 0x441   :  { %v7922_v51 = vpack.c.bf16 %v2703_v60, %v2695_v46  ;;  %v7868_v52 = vpack.c.bf16 %v2732_v41, %v2724_v35  ;;  %v2749_v46 = vld [vmem:[#allocation4 + $0x1c8] sm:$0xff]  ;;  %v2756_v15 = vld [vmem:[#allocation4 + $0x200] sm:$0xff] }
 0x442   :  { %v7870_v48 = vpack.c.bf16 %v2749_v46, %v2741_v18  ;;  %v2772_v41 = vld [vmem:[#allocation4 + $0x280] sm:$0xff]  ;;  %v2782_v18 = vld [vmem:[#allocation4 + $0x2d0] sm:$0xff]  ;;  %v2789_v46 = vld [vmem:[#allocation4 + $0x308] sm:$0xff] }
 0x443   :  { %7785 = vmatpush1.bf16.msra.mxu0 %v7784_v5  ;;  %7849 = vmatpush1.bf16.msra.mxu1 %v7848_v8  ;;  %v2709_v5 = vld [vmem:[#allocation4 + $0x88] sm:$0xff]  ;;  %v7924_v8 = vpack.c.bf16 %v2702_v54, %v2694_v4  ;;  %v2742_v54 = vld [vmem:[#allocation4 + $0x190] sm:$0xff] }
 0x444   :  { %7787 = vmatprep.subr.bf16.mxu0 %v7786_v2  ;;  %7851 = vmatprep.subr.bf16.mxu1 %v7850_v10  ;;  %v2719_v2 = vld [vmem:[#allocation4 + $0xd8] sm:$0xff] }
 0x445   :  { %v7926_v10 = vpack.c.bf16 %v2719_v2, %v2711_v3  ;;  %v2759_v3 = vld [vmem:[#allocation4 + $0x218] sm:$0xff] }
 0x446   :  { %v2767_v2 = vld [vmem:[#allocation4 + $0x258] sm:$0xff] }
 0x447   :  { %7789 = vmatpush1.bf16.msra.mxu0 %v7788_v26  ;;  %7853 = vmatpush1.bf16.msra.mxu1 %v7852_v30  ;;  %v2733_v26 = vld [vmem:[#allocation4 + $0x148] sm:$0xff]  ;;  %v7928_v30 = vpack.c.bf16 %v2718_v21, %v2710_v16  ;;  %v2764_v16 = vld [vmem:[#allocation4 + $0x240] sm:$0xff]  ;;  %v7938_v21 = vpack.c.bf16 %v2767_v2, %v2759_v3 }
 0x448   :  { %7791 = vmatprep.subr.bf16.mxu0 %v7790_v31  ;;  %7855 = vmatprep.subr.bf16.mxu1 %v7854_v12  ;;  %v7866_v17 = vpack.c.bf16 %v2733_v26, %v2725_v22  ;;  %v2727_v31 = vld [vmem:[#allocation4 + $0x118] sm:$0xff]  ;;  %v2766_v22 = vld [vmem:[#allocation4 + $0x250] sm:$0xff]  ;;  %v2773_v26 = vld [vmem:[#allocation4 + $0x288] sm:$0xff] }
 0x449   :  { %v2735_v12 = vld [vmem:[#allocation4 + $0x158] sm:$0xff]  ;;  %v2805_v3 = vld [vmem:[#allocation4 + $0x388] sm:$0xff] }
 0x44a   :  { %v7930_v37 = vpack.c.bf16 %v2735_v12, %v2727_v31  ;;  %v2783_v31 = vld [vmem:[#allocation4 + $0x2d8] sm:$0xff]  ;;  %v7876_v12 = vpack.c.bf16 %v2764_v16, %v2756_v15  ;;  %v2813_v2 = vld [vmem:[#allocation4 + $0x3c8] sm:$0xff] }
 0x44b   :  { %7793 = vmatpush1.bf16.msra.mxu0 %v7792_v44  ;;  %7857 = vmatpush1.bf16.msra.mxu1 %v7856_v45  ;;  %v2726_v44 = vld [vmem:[#allocation4 + $0x110] sm:$0xff]  ;;  %v7886_v16 = vpack.c.bf16 %v2813_v2, %v2805_v3 }
 0x44c   :  { %7859 = vmatprep.subr.bf16.mxu0 %v7858_v47  ;;  %7923 = vmatprep.subr.bf16.mxu1 %v7922_v51  ;;  %v2734_v45 = vld [vmem:[#allocation4 + $0x150] sm:$0xff]  ;;  %v2743_v47 = vld [vmem:[#allocation4 + $0x198] sm:$0xff]  ;;  %v2740_v51 = vld [vmem:[#allocation4 + $0x180] sm:$0xff] }
 0x44d   :  { %v7932_v60 = vpack.c.bf16 %v2734_v45, %v2726_v44  ;;  %v7934_v4 = vpack.c.bf16 %v2751_v50, %v2743_v47  ;;  %v2780_v44 = vld [vmem:[#allocation4 + $0x2c0] sm:$0xff]  ;;  %v2774_v45 = vld [vmem:[#allocation4 + $0x290] sm:$0xff]  ;;  %v2797_v47 = vld [vmem:[#allocation4 + $0x348] sm:$0xff] }
 0x44e   :  { %2523 = vmatmul.mubr.f32.vlgmr.msra.gmra.mrb[14].mxu0 %v10066_v49  ;;  %2594 = vmatmul.mubr.f32.vlgmr.msra.gmra.mrb[14].mxu1 %v10066_v49  ;;  %v7862_v49 = vpack.c.bf16 %v2717_v9, %v2709_v5  ;;  %v2750_v5 = vld [vmem:[#allocation4 + $0x1d0] sm:$0xff]  ;;  %v2765_v9 = vld [vmem:[#allocation4 + $0x248] sm:$0xff]  ;;  %v7880_v50 = vpack.c.bf16 %v2780_v44, %v2772_v41  ;;  %v2831_v44 = vld [vmem:[#allocation4 + $0x458] sm:$0xff] }
 0x44f   :  { %7861 = vmatpush1.bf16.msra.mxu0 %v7860_v53  ;;  %7925 = vmatpush1.bf16.msra.mxu1 %v7924_v8  ;;  %v2748_v53 = vld [vmem:[#allocation4 + $0x1c0] sm:$0xff]  ;;  %v2757_v8 = vld [vmem:[#allocation4 + $0x208] sm:$0xff]  ;;  %v2838_v2 = vld [vmem:[#allocation4 + $0x490] sm:$0xff] }
 0x450   :  { %7863 = vmatprep.subr.bf16.mxu0 %v7862_v49  ;;  %7927 = vmatprep.subr.bf16.mxu1 %v7926_v10  ;;  %v7872_v49 = vpack.c.bf16 %v2748_v53, %v2740_v51  ;;  %v7936_v10 = vpack.c.bf16 %v2750_v5, %v2742_v54  ;;  %v7874_v13 = vpack.c.bf16 %v2765_v9, %v2757_v8  ;;  %v2796_v54 = vld [vmem:[#allocation4 + $0x340] sm:$0xff]  ;;  %v2790_v5 = vld [vmem:[#allocation4 + $0x310] sm:$0xff] }
 0x451   :  { %v7944_v51 = vpack.c.bf16 %v2782_v18, %v2774_v45  ;;  %v7882_v53 = vpack.c.bf16 %v2797_v47, %v2789_v46  ;;  %v2798_v9 = vld [vmem:[#allocation4 + $0x350] sm:$0xff]  ;;  %v2828_v18 = vld [vmem:[#allocation4 + $0x440] sm:$0xff] }
 0x452   :  { %v7948_v15 = vpack.c.bf16 %v2798_v9, %v2790_v5  ;;  %v2822_v46 = vld [vmem:[#allocation4 + $0x410] sm:$0xff]  ;;  %v2836_v5 = vld [vmem:[#allocation4 + $0x480] sm:$0xff] }
 0x453   :  { %7865 = vmatpush1.bf16.msra.mxu0 %v7864_v19  ;;  %7929 = vmatpush1.bf16.msra.mxu1 %v7928_v30  ;;  %v2758_v19 = vld [vmem:[#allocation4 + $0x210] sm:$0xff]  ;;  %v2781_v30 = vld [vmem:[#allocation4 + $0x2c8] sm:$0xff] }
 0x454   :  { %7867 = vmatprep.subr.bf16.mxu0 %v7866_v17  ;;  %7931 = vmatprep.subr.bf16.mxu1 %v7930_v37  ;;  %v2775_v17 = vld [vmem:[#allocation4 + $0x298] sm:$0xff]  ;;  %v7940_v35 = vpack.c.bf16 %v2766_v22, %v2758_v19  ;;  %v7878_v37 = vpack.c.bf16 %v2781_v30, %v2773_v26  ;;  %v2804_v19 = vld [vmem:[#allocation4 + $0x380] sm:$0xff]  ;;  %v2806_v26 = vld [vmem:[#allocation4 + $0x390] sm:$0xff] }
 0x455   :  { %v2814_v30 = vld [vmem:[#allocation4 + $0x3d0] sm:$0xff] }
 0x457   :  { %7869 = vmatpush1.bf16.msra.mxu0 %v7868_v52  ;;  %7933 = vmatpush1.bf16.msra.mxu1 %v7932_v60  ;;  %v7942_v52 = vpack.c.bf16 %v2783_v31, %v2775_v17  ;;  %v2791_v60 = vld [vmem:[#allocation4 + $0x318] sm:$0xff]  ;;  %v7952_v31 = vpack.c.bf16 %v2814_v30, %v2806_v26  ;;  %v2860_v26 = vld [vmem:[#allocation4 + $0x540] sm:$0xff] }
 0x458   :  { %7871 = vmatprep.subr.bf16.mxu0 %v7870_v48  ;;  %7935 = vmatprep.subr.bf16.mxu1 %v7934_v4  ;;  %v2799_v48 = vld [vmem:[#allocation4 + $0x358] sm:$0xff]  ;;  %v2788_v4 = vld [vmem:[#allocation4 + $0x300] sm:$0xff] }
 0x459   :  { %v7946_v8 = vpack.c.bf16 %v2799_v48, %v2791_v60  ;;  %v2830_v60 = vld [vmem:[#allocation4 + $0x450] sm:$0xff] }
 0x45a   :  { %v7956_v48 = vpack.c.bf16 %v2830_v60, %v2822_v46  ;;  %v2876_v46 = vld [vmem:[#allocation4 + $0x5c0] sm:$0xff] }
 0x45b   :  { %7873 = vmatpush1.bf16.msra.mxu0 %v7872_v49  ;;  %7937 = vmatpush1.bf16.msra.mxu1 %v7936_v10  ;;  %v2807_v49 = vld [vmem:[#allocation4 + $0x398] sm:$0xff] }
 0x45c   :  { %7875 = vmatprep.subr.bf16.mxu0 %v7874_v13  ;;  %7939 = vmatprep.subr.bf16.mxu1 %v7938_v21  ;;  %v2815_v10 = vld [vmem:[#allocation4 + $0x3d8] sm:$0xff]  ;;  %v7884_v13 = vpack.c.bf16 %v2796_v54, %v2788_v4  ;;  %v2812_v21 = vld [vmem:[#allocation4 + $0x3c0] sm:$0xff] }
 0x45d   :  { %v7950_v22 = vpack.c.bf16 %v2815_v10, %v2807_v49  ;;  %v7888_v17 = vpack.c.bf16 %v2812_v21, %v2804_v19  ;;  %v2847_v54 = vld [vmem:[#allocation4 + $0x4d8] sm:$0xff]  ;;  %v2846_v49 = vld [vmem:[#allocation4 + $0x4d0] sm:$0xff] }
 0x45e   :  { %v7960_v10 = vpack.c.bf16 %v2846_v49, %v2838_v2  ;;  %v2863_v21 = vld [vmem:[#allocation4 + $0x558] sm:$0xff] }
 0x45f   :  { %7877 = vmatpush1.bf16.msra.mxu0 %v7876_v12  ;;  %7941 = vmatpush1.bf16.msra.mxu1 %v7940_v35  ;;  %v2821_v12 = vld [vmem:[#allocation4 + $0x408] sm:$0xff] }
 0x460   :  { %7879 = vmatprep.subr.bf16.mxu0 %v7878_v37  ;;  %7943 = vmatprep.subr.bf16.mxu1 %v7942_v52  ;;  %v2829_v35 = vld [vmem:[#allocation4 + $0x448] sm:$0xff]  ;;  %v2823_v37 = vld [vmem:[#allocation4 + $0x418] sm:$0xff]  ;;  %v2820_v52 = vld [vmem:[#allocation4 + $0x400] sm:$0xff] }
 0x461   :  { %v7890_v41 = vpack.c.bf16 %v2829_v35, %v2821_v12  ;;  %v7954_v45 = vpack.c.bf16 %v2831_v44, %v2823_v37  ;;  %v7892_v47 = vpack.c.bf16 %v2828_v18, %v2820_v52  ;;  %v2862_v12 = vld [vmem:[#allocation4 + $0x550] sm:$0xff]  ;;  %v2869_v37 = vld [vmem:[#allocation4 + $0x588] sm:$0xff]  ;;  %v2871_v44 = vld [vmem:[#allocation4 + $0x598] sm:$0xff] }
 0x462   :  { %v2879_v52 = vld [vmem:[#allocation4 + $0x5d8] sm:$0xff]  ;;  %v2868_v18 = vld [vmem:[#allocation4 + $0x580] sm:$0xff] }
 0x463   :  { %7881 = vmatpush1.bf16.msra.mxu0 %v7880_v50  ;;  %7945 = vmatpush1.bf16.msra.mxu1 %v7944_v51  ;;  %v2837_v50 = vld [vmem:[#allocation4 + $0x488] sm:$0xff]  ;;  %v7904_v60 = vpack.c.bf16 %v2876_v46, %v2868_v18  ;;  %v2927_v18 = vld [vmem:[#allocation4 + $0x758] sm:$0xff] }
 0x464   :  { %7883 = vmatprep.subr.bf16.mxu0 %v7882_v53  ;;  %7947 = vmatprep.subr.bf16.mxu1 %v7946_v8  ;;  %v2845_v51 = vld [vmem:[#allocation4 + $0x4c8] sm:$0xff]  ;;  %v2839_v53 = vld [vmem:[#allocation4 + $0x498] sm:$0xff]  ;;  %v2844_v8 = vld [vmem:[#allocation4 + $0x4c0] sm:$0xff] }
 0x465   :  { %v7894_v4 = vpack.c.bf16 %v2845_v51, %v2837_v50  ;;  %v7958_v9 = vpack.c.bf16 %v2847_v54, %v2839_v53  ;;  %v7896_v3 = vpack.c.bf16 %v2844_v8, %v2836_v5  ;;  %v2878_v50 = vld [vmem:[#allocation4 + $0x5d0] sm:$0xff]  ;;  %v2885_v53 = vld [vmem:[#allocation4 + $0x608] sm:$0xff]  ;;  %v2887_v54 = vld [vmem:[#allocation4 + $0x618] sm:$0xff] }
 0x466   :  { %v2895_v8 = vld [vmem:[#allocation4 + $0x658] sm:$0xff] }
 0x467   :  { %7885 = vmatpush1.bf16.msra.mxu0 %v7884_v13  ;;  %7949 = vmatpush1.bf16.msra.mxu1 %v7948_v15  ;;  %v2853_v13 = vld [vmem:[#allocation4 + $0x508] sm:$0xff]  ;;  %v7970_v2 = vpack.c.bf16 %v2895_v8, %v2887_v54 }
 0x468   :  { %7887 = vmatprep.subr.bf16.mxu0 %v7886_v16  ;;  %7951 = vmatprep.subr.bf16.mxu1 %v7950_v22  ;;  %v2861_v15 = vld [vmem:[#allocation4 + $0x548] sm:$0xff]  ;;  %v2855_v16 = vld [vmem:[#allocation4 + $0x518] sm:$0xff]  ;;  %v2852_v22 = vld [vmem:[#allocation4 + $0x500] sm:$0xff] }
 0x469   :  { %v7898_v19 = vpack.c.bf16 %v2861_v15, %v2853_v13  ;;  %v7962_v30 = vpack.c.bf16 %v2863_v21, %v2855_v16  ;;  %v2894_v13 = vld [vmem:[#allocation4 + $0x650] sm:$0xff]  ;;  %v2901_v16 = vld [vmem:[#allocation4 + $0x688] sm:$0xff]  ;;  %v2903_v21 = vld [vmem:[#allocation4 + $0x698] sm:$0xff] }
 0x46a   :  { %v2941_v54 = vld [vmem:[#allocation4 + $0x7c8] sm:$0xff] }
 0x46b   :  { %7889 = vmatpush1.bf16.msra.mxu0 %v7888_v17  ;;  %7953 = vmatpush1.bf16.msra.mxu1 %v7952_v31  ;;  %v7900_v17 = vpack.c.bf16 %v2860_v26, %v2852_v22  ;;  %v2854_v31 = vld [vmem:[#allocation4 + $0x510] sm:$0xff]  ;;  %v2911_v26 = vld [vmem:[#allocation4 + $0x6d8] sm:$0xff] }
 0x46c   :  { %7891 = vmatprep.subr.bf16.mxu0 %v7890_v41  ;;  %7955 = vmatprep.subr.bf16.mxu1 %v7954_v45  ;;  %v7964_v35 = vpack.c.bf16 %v2862_v12, %v2854_v31  ;;  %v2877_v41 = vld [vmem:[#allocation4 + $0x5c8] sm:$0xff]  ;;  %v7974_v31 = vpack.c.bf16 %v2911_v26, %v2903_v21  ;;  %v2699_v26 = vld [vmem:[#allocation4 + $0x38] sm:$0xff] }
 0x46d   :  { %v7902_v45 = vpack.c.bf16 %v2877_v41, %v2869_v37  ;;  %v2910_v37 = vld [vmem:[#allocation4 + $0x6d0] sm:$0xff]  ;;  %v2917_v41 = vld [vmem:[#allocation4 + $0x708] sm:$0xff] }
 0x46e   :  { %v2697_v21 = vld [vmem:[#allocation4 + $0x28] sm:$0xff] }
 0x46f   :  { %7893 = vmatpush1.bf16.msra.mxu0 %v7892_v47  ;;  %7957 = vmatpush1.bf16.msra.mxu1 %v7956_v48  ;;  %v7966_v47 = vpack.c.bf16 %v2879_v52, %v2871_v44  ;;  %v2870_v48 = vld [vmem:[#allocation4 + $0x590] sm:$0xff]  ;;  %v2919_v52 = vld [vmem:[#allocation4 + $0x718] sm:$0xff] }
 0x470   :  { %7895 = vmatprep.subr.bf16.mxu0 %v7894_v4  ;;  %7959 = vmatprep.subr.bf16.mxu1 %v7958_v9  ;;  %v7968_v51 = vpack.c.bf16 %v2878_v50, %v2870_v48  ;;  %v2893_v4 = vld [vmem:[#allocation4 + $0x648] sm:$0xff]  ;;  %v2884_v9 = vld [vmem:[#allocation4 + $0x600] sm:$0xff]  ;;  %v2918_v50 = vld [vmem:[#allocation4 + $0x710] sm:$0xff] }
 0x471   :  { %v7906_v5 = vpack.c.bf16 %v2893_v4, %v2885_v53  ;;  %v2924_v48 = vld [vmem:[#allocation4 + $0x740] sm:$0xff]  ;;  %v2926_v53 = vld [vmem:[#allocation4 + $0x750] sm:$0xff]  ;;  %v2933_v4 = vld [vmem:[#allocation4 + $0x788] sm:$0xff] }
 0x472   :  { %v7918_v8 = vpack.c.bf16 %v2941_v54, %v2933_v4 }
 0x473   :  { %7897 = vmatpush1.bf16.msra.mxu0 %v7896_v3  ;;  %7961 = vmatpush1.bf16.msra.mxu1 %v7960_v10  ;;  %v2892_v3 = vld [vmem:[#allocation4 + $0x640] sm:$0xff]  ;;  %v2886_v10 = vld [vmem:[#allocation4 + $0x610] sm:$0xff] }
 0x474   :  { %7899 = vmatprep.subr.bf16.mxu0 %v7898_v19  ;;  %7963 = vmatprep.subr.bf16.mxu1 %v7962_v30  ;;  %v7908_v49 = vpack.c.bf16 %v2892_v3, %v2884_v9  ;;  %v7972_v15 = vpack.c.bf16 %v2894_v13, %v2886_v10  ;;  %v2909_v19 = vld [vmem:[#allocation4 + $0x6c8] sm:$0xff]  ;;  %v2900_v30 = vld [vmem:[#allocation4 + $0x680] sm:$0xff]  ;;  %v2935_v9 = vld [vmem:[#allocation4 + $0x798] sm:$0xff] }
 0x475   :  { %v7910_v22 = vpack.c.bf16 %v2909_v19, %v2901_v16  ;;  %v2943_v3 = vld [vmem:[#allocation4 + $0x7d8] sm:$0xff]  ;;  %v2940_v10 = vld [vmem:[#allocation4 + $0x7c0] sm:$0xff]  ;;  %v2934_v13 = vld [vmem:[#allocation4 + $0x790] sm:$0xff] }
 0x477   :  { %7901 = vmatpush1.bf16.msra.mxu0 %v7900_v17  ;;  %7965 = vmatpush1.bf16.msra.mxu1 %v7964_v35  ;;  %v2908_v17 = vld [vmem:[#allocation4 + $0x6c0] sm:$0xff]  ;;  %v2902_v35 = vld [vmem:[#allocation4 + $0x690] sm:$0xff] }
 0x478   :  { %7903 = vmatprep.subr.bf16.mxu0 %v7902_v45  ;;  %7967 = vmatprep.subr.bf16.mxu1 %v7966_v47  ;;  %v7912_v12 = vpack.c.bf16 %v2908_v17, %v2900_v30  ;;  %v7976_v44 = vpack.c.bf16 %v2910_v37, %v2902_v35  ;;  %v2925_v45 = vld [vmem:[#allocation4 + $0x748] sm:$0xff]  ;;  %v7978_v47 = vpack.c.bf16 %v2927_v18, %v2919_v52  ;;  %v2707_v17 = vld [vmem:[#allocation4 + $0x78] sm:$0xff] }
 0x479   :  { %v7914_v46 = vpack.c.bf16 %v2925_v45, %v2917_v41 }
 0x47b   :  { %7905 = vmatpush1.bf16.msra.mxu0 %v7904_v60  ;;  %7969 = vmatpush1.bf16.msra.mxu1 %v7968_v51  ;;  %v2916_v60 = vld [vmem:[#allocation4 + $0x700] sm:$0xff] }
 0x47c   :  { %7907 = vmatprep.subr.bf16.mxu0 %v7906_v5  ;;  %7971 = vmatprep.subr.bf16.mxu1 %v7970_v2  ;;  %v7916_v51 = vpack.c.bf16 %v2924_v48, %v2916_v60  ;;  %v7980_v5 = vpack.c.bf16 %v2926_v53, %v2918_v50  ;;  %v2932_v2 = vld [vmem:[#allocation4 + $0x780] sm:$0xff] }
 0x47d   :  { %v7920_v16 = vpack.c.bf16 %v2940_v10, %v2932_v2 }
 0x47f   :  { %7909 = vmatpush1.bf16.msra.mxu0 %v7908_v49  ;;  %7973 = vmatpush1.bf16.msra.mxu1 %v7972_v15  ;;  %v7982_v49 = vpack.c.bf16 %v2943_v3, %v2935_v9  ;;  %v2942_v15 = vld [vmem:[#allocation4 + $0x7d0] sm:$0xff] }
 0x480   :  { %7911 = vmatprep.subr.bf16.mxu0 %v7910_v22  ;;  %7975 = vmatprep.subr.bf16.mxu1 %v7974_v31  ;;  %v7984_v19 = vpack.c.bf16 %v2942_v15, %v2934_v13  ;;  %v2705_v22 = vld [vmem:[#allocation4 + $0x68] sm:$0xff]  ;;  %v8050_v31 = vpack.c.bf16 %v2707_v17, %v2699_v26 }
 0x481   :  { %v7986_v30 = vpack.c.bf16 %v2705_v22, %v2697_v21 }
 0x483   :  { %7913 = vmatpush1.bf16.msra.mxu0 %v7912_v12  ;;  %7977 = vmatpush1.bf16.msra.mxu1 %v7976_v44  ;;  %v2042_v44 = vpop.permute.xlu1 %2041 }
 0x484   :  { %7915 = vmatprep.subr.bf16.mxu0 %v7914_v46  ;;  %7979 = vmatprep.subr.bf16.mxu1 %v7978_v47  ;;  %v2044_v45 = vmul.f32 %v2042_v44, %v9889_v29  ;;  %v2046_v52 = vmul.f32 %v2042_v44, %v9895_v32  ;;  %v2045_v18 = vmul.f32 %v2042_v44, %v9898_v33 }
 0x485   :  { %v2047_v46 = vmul.f32 %v2042_v44, %v9901_v34  ;;  %v2049_v22 = vmul.f32 %v2042_v44, %v9942_v62  ;;  %v2051_v26 = vmul.f32 %v2042_v44, %v9945_v0 }
 0x486   :  { %v2052_v47 = vadd.f32 %v2044_v45, %v9905_v36  ;;  %v2054_v60 = vadd.f32 %v2046_v52, %v9909_v38  ;;  %v2053_v50 = vadd.f32 %v2045_v18, %v9913_v40 }
 0x487   :  { %7917 = vmatpush1.bf16.msra.mxu0 %v7916_v51  ;;  %7981 = vmatpush1.bf16.msra.mxu1 %v7980_v5  ;;  %v2055_v53 = vadd.f32 %v2047_v46, %v9917_v42  ;;  %v2059_v45 = vadd.f32 %v2051_v26, %v9961_v14 }
 0x488   :  { %7919 = vmatprep.subr.bf16.mxu0 %v7918_v8  ;;  %7983 = vmatprep.subr.bf16.mxu1 %v7982_v49 }
 0x48b   :  { %7921 = vmatpush1.bf16.msra.mxu0 %v7920_v16  ;;  %7985 = vmatpush1.bf16.msra.mxu1 %v7984_v19  ;;  %v2048_v16 = vmul.f32 %v2042_v44, %v9936_v59  ;;  %v2050_v19 = vmul.f32 %v2042_v44, %v9939_v61 }
 0x48c   :  { %7987 = vmatprep.subr.bf16.mxu0 %v7986_v30  ;;  %8051 = vmatprep.subr.bf16.mxu1 %v8050_v31 }
 0x48d   :  { %v2056_v31 = vadd.f32 %v2048_v16, %v9949_v6 }
 0x4e1   :  { %v2382_v12 = vpop.f32.mrb[12].mxu0  ;;  %v2453_v35 = vpop.f32.mrb[12].mxu1 }
 0x4e2   :  { %v2384_v37 = vpop.f32.mrb[13].mxu0  ;;  %v2455_v41 = vpop.f32.mrb[13].mxu1  ;;  %v2600_v48 = vadd.f32 %v2382_v12, %v2052_v47  ;;  %v2602_v51 = vadd.f32 %v2453_v35, %v2054_v60  ;;  %v2058_v12 = vadd.f32 %v2050_v19, %v9952_v7 }
 0x4e3   :  { %v2601_v4 = vadd.f32 %v2384_v37, %v2053_v50  ;;  %v2603_v54 = vadd.f32 %v2455_v41, %v2055_v53  ;;  %v2057_v41 = vadd.f32 %v2049_v22, %v9957_v11 }
 0x4e4   :  { %v6780_v5 = vmul.f32 -1.442695, %v2600_v48  ;;  %v6782_v8 = vmul.f32 -1.442695, %v2602_v51 }
 0x4e5   :  { %v6781_v9 = vmul.f32 -1.442695, %v2601_v4  ;;  %v6783_v3 = vmul.f32 -1.442695, %v2603_v54 }
 0x4e6   :  { %9499 = vpow2.f32 %v6780_v5 }
 0x4e7   :  { %9501 = vpow2.f32 %v6782_v8 }
 0x4e8   :  { %9503 = vpow2.f32 %v6781_v9 }
 0x4e9   :  { %9505 = vpow2.f32 %v6783_v3 }
 0x4f0   :  { %v9500_v2 = vpop.eup %9499 }
 0x4f1   :  { %v9502_v49 = vpop.eup %9501  ;;  %v2614_v15 = vadd.f32 1.0, %v9500_v2 }
 0x4f2   :  { %v9504_v10 = vpop.eup %9503  ;;  %v2626_v21 = vadd.f32 1.0, %v9502_v49 }
 0x4f3   :  { %v9506_v13 = vpop.eup %9505  ;;  %v2615_v30 = vadd.f32 1.0, %v9504_v10  ;;  %9507 = vrcp.f32 %v2614_v15 }
 0x4f4   :  { %v2627_v17 = vadd.f32 1.0, %v9506_v13  ;;  %9509 = vrcp.f32 %v2626_v21 }
 0x4f5   :  { %9511 = vrcp.f32 %v2615_v30  ;;  %v2704_v30 = vld [vmem:[#allocation4 + $0x60] sm:$0xff] }
 0x4f6   :  { %9513 = vrcp.f32 %v2627_v17  ;;  %v2698_v17 = vld [vmem:[#allocation4 + $0x30] sm:$0xff] }
 0x4fd   :  { %v9508_v51 = vpop.eup %9507 }
 0x4fe   :  { %v9510_v53 = vpop.eup %9509 }
 0x4ff   :  { %v9512_v4 = vpop.eup %9511  ;;  %v2646_v9 = vmul.f32 %v9510_v53, %v10060_v39  ;;  %v2696_v39 = vld [vmem:[#allocation4 + $0x20] sm:$0xff] }
 0x500   :  { %v9514_v54 = vpop.eup %9513 }
 0x501   :  { %v2647_v49 = vmul.f32 %v9514_v54, %v10062_v43  ;;  %v2706_v43 = vld [vmem:[#allocation4 + $0x70] sm:$0xff] }
 0x521   :  { %v2524_v35 = vpop.f32.mrb[14].mxu0  ;;  %v2595_v37 = vpop.f32.mrb[14].mxu1 }
 0x522   :  { %v2604_v52 = vadd.f32 %v2524_v35, %v2056_v31  ;;  %v2606_v18 = vadd.f32 %v2595_v37, %v2058_v12  ;;  %v2526_v46 = vpop.f32.mrb[15].mxu0  ;;  %v2597_v47 = vpop.f32.mrb[15].mxu1  ;;  %v2713_v35 = vld [vmem:[#allocation4 + $0xa8] sm:$0xff] }
 0x523   :  { %v2605_v44 = vadd.f32 %v2526_v46, %v2057_v41  ;;  %v2607_v60 = vadd.f32 %v2597_v47, %v2059_v45  ;;  %v2721_v41 = vld [vmem:[#allocation4 + $0xe8] sm:$0xff]  ;;  %v2715_v45 = vld [vmem:[#allocation4 + $0xb8] sm:$0xff]  ;;  %v7988_v46 = vpack.c.bf16 %v2704_v30, %v2696_v39  ;;  %v8052_v47 = vpack.c.bf16 %v2706_v43, %v2698_v17 }
 0x524   :  { %9515 = vtanh.f32 %v2604_v52  ;;  %v6784_v48 = vmul.f32 -1.442695, %v2606_v18  ;;  %v2723_v52 = vld [vmem:[#allocation4 + $0xf8] sm:$0xff]  ;;  %v2745_v39 = vld [vmem:[#allocation4 + $0x1a8] sm:$0xff] }
 0x525   :  { %9517 = vtanh.f32 %v2605_v44  ;;  %v6785_v50 = vmul.f32 -1.442695, %v2607_v60  ;;  %v2712_v44 = vld [vmem:[#allocation4 + $0xa0] sm:$0xff]  ;;  %v8054_v54 = vpack.c.bf16 %v2723_v52, %v2715_v45  ;;  %v2747_v30 = vld [vmem:[#allocation4 + $0x1b8] sm:$0xff]  ;;  %v2746_v52 = vld [vmem:[#allocation4 + $0x1b0] sm:$0xff] }
 0x526   :  { %9519 = vpow2.f32 %v6784_v48  ;;  %v2720_v60 = vld [vmem:[#allocation4 + $0xe0] sm:$0xff]  ;;  %v2714_v48 = vld [vmem:[#allocation4 + $0xb0] sm:$0xff]  ;;  %v2755_v17 = vld [vmem:[#allocation4 + $0x1f8] sm:$0xff] }
 0x527   :  { %9521 = vpow2.f32 %v6785_v50  ;;  %v2722_v50 = vld [vmem:[#allocation4 + $0xf0] sm:$0xff]  ;;  %v8062_v45 = vpack.c.bf16 %v2755_v17, %v2747_v30  ;;  %v2784_v30 = vld [vmem:[#allocation4 + $0x2e0] sm:$0xff] }
 0x52e   :  { %v9516_v5 = vpop.eup %9515 }
 0x52f   :  { %v9518_v8 = vpop.eup %9517  ;;  %v2648_v3 = vmul.f32 %v9516_v5, %v9508_v51  ;;  %v2729_v51 = vld [vmem:[#allocation4 + $0x128] sm:$0xff] }
 0x530   :  { %v9520_v2 = vpop.eup %9519  ;;  %v2649_v10 = vmul.f32 %v9518_v8, %v9512_v4  ;;  %v7990_v4 = vpack.c.bf16 %v2721_v41, %v2713_v35  ;;  %v2737_v5 = vld [vmem:[#allocation4 + $0x168] sm:$0xff]  ;;  %v2731_v8 = vld [vmem:[#allocation4 + $0x138] sm:$0xff]  ;;  %v2744_v35 = vld [vmem:[#allocation4 + $0x1a0] sm:$0xff] }
 0x531   :  { %v9522_v13 = vpop.eup %9521  ;;  %v10095_v15 = vadd.f32 %v2648_v3, %v2646_v9  ;;  %v2640_v16 = vadd.f32 1.0, %v9520_v2  ;;  %v2739_v9 = vld [vmem:[#allocation4 + $0x178] sm:$0xff]  ;;  %v7992_v3 = vpack.c.bf16 %v2720_v60, %v2712_v44  ;;  %v8056_v2 = vpack.c.bf16 %v2722_v50, %v2714_v48 }
 0x532   :  { %v10097_v19 = vadd.f32 %v2649_v10, %v2647_v49  ;;  %v2641_v21 = vadd.f32 1.0, %v9522_v13  ;;  %v2728_v49 = vld [vmem:[#allocation4 + $0x120] sm:$0xff]  ;;  %v7994_v13 = vpack.c.bf16 %v2737_v5, %v2729_v51  ;;  %v2763_v44 = vld [vmem:[#allocation4 + $0x238] sm:$0xff] }
 0x533   :  { %9523 = vtanh.f32 %v10095_v15  ;;  %v2736_v10 = vld [vmem:[#allocation4 + $0x160] sm:$0xff]  ;;  %v2771_v60 = vld [vmem:[#allocation4 + $0x278] sm:$0xff] }
 0x534   :  { %9525 = vrcp.f32 %v2640_v16  ;;  %v8058_v16 = vpack.c.bf16 %v2739_v9, %v2731_v8  ;;  %v7996_v43 = vpack.c.bf16 %v2736_v10, %v2728_v49  ;;  %v8066_v5 = vpack.c.bf16 %v2771_v60, %v2763_v44  ;;  %v2768_v8 = vld [vmem:[#allocation4 + $0x260] sm:$0xff]  ;;  %v2762_v9 = vld [vmem:[#allocation4 + $0x230] sm:$0xff]  ;;  %v2777_v49 = vld [vmem:[#allocation4 + $0x2a8] sm:$0xff] }
 0x535   :  { %9527 = vtanh.f32 %v10097_v19  ;;  %v2785_v10 = vld [vmem:[#allocation4 + $0x2e8] sm:$0xff] }
 0x536   :  { %9529 = vrcp.f32 %v2641_v21  ;;  %v2730_v21 = vld [vmem:[#allocation4 + $0x130] sm:$0xff]  ;;  %v8006_v17 = vpack.c.bf16 %v2785_v10, %v2777_v49  ;;  %v2808_v10 = vld [vmem:[#allocation4 + $0x3a0] sm:$0xff] }
 0x53d   :  { %v9524_v22 = vpop.eup %9523 }
 0x53e   :  { %v9526_v26 = vpop.eup %9525 }
 0x53f   :  { %v9528_v31 = vpop.eup %9527  ;;  %v10101_v12 = vmul.f32 %v9526_v26, %v9524_v22  ;;  %v2738_v22 = vld [vmem:[#allocation4 + $0x170] sm:$0xff]  ;;  %v2753_v26 = vld [vmem:[#allocation4 + $0x1e8] sm:$0xff] }
 0x540   :  { %v9530_v37 = vpop.eup %9529  ;;  %v7998_v41 = vpack.c.bf16 %v2753_v26, %v2745_v39  ;;  %v2776_v26 = vld [vmem:[#allocation4 + $0x2a0] sm:$0xff] }
 0x541   :  { %v2655_v18 = vmul.f32 %v9530_v37, %v9528_v31  ;;  %v8060_v31 = vpack.c.bf16 %v2738_v22, %v2730_v21  ;;  %v2752_v37 = vld [vmem:[#allocation4 + $0x1e0] sm:$0xff]  ;;  %v8008_v44 = vpack.c.bf16 %v2784_v30, %v2776_v26  ;;  %v2825_v26 = vld [vmem:[#allocation4 + $0x428] sm:$0xff] }
 0x542   :  { %v8000_v50 = vpack.c.bf16 %v2752_v37, %v2744_v35  ;;  %v2793_v35 = vld [vmem:[#allocation4 + $0x328] sm:$0xff] }
 0x543   :  { %3012 = vmatprep.mubr.f32.mxu0 %v2655_v18  ;;  %3083 = vmatprep.mubr.f32.mxu1 %v2655_v18  ;;  %v2658_v53 = vcombine.low %v10101_v12, %v2655_v18  ;;  %v2833_v30 = vld [vmem:[#allocation4 + $0x468] sm:$0xff] }
 0x544   :  { %3013 = vmatmul.mubr.f32.vlgmr.msra.gmra.mrb[16].mxu0 %v10101_v12  ;;  %3084 = vmatmul.mubr.f32.vlgmr.msra.gmra.mrb[16].mxu1 %v10101_v12 }
 0x545   :  { %6786 = vst.sshfl [vmem:[#allocation2 + $0xc] sm:$0x33 pattern:$0x76325410] %v2658_v53  ;;  %7989 = vmatpush1.bf16.msra.mxu0 %v7988_v46  ;;  %8053 = vmatpush1.bf16.msra.mxu1 %v8052_v47  ;;  %v2761_v46 = vld [vmem:[#allocation4 + $0x228] sm:$0xff]  ;;  %v2760_v53 = vld [vmem:[#allocation4 + $0x220] sm:$0xff] }
 0x546   :  { %3154 = vmatprep.mubr.f32.mxu0 %v2655_v18  ;;  %3225 = vmatprep.mubr.f32.mxu1 %v2655_v18  ;;  %v2754_v18 = vld [vmem:[#allocation4 + $0x1f0] sm:$0xff]  ;;  %v2769_v47 = vld [vmem:[#allocation4 + $0x268] sm:$0xff]  ;;  %v8004_v21 = vpack.c.bf16 %v2768_v8, %v2760_v53 }
 0x547   :  { %7991 = vmatprep.subr.bf16.mxu0 %v7990_v4  ;;  %8055 = vmatprep.subr.bf16.mxu1 %v8054_v54  ;;  %v8064_v51 = vpack.c.bf16 %v2754_v18, %v2746_v52  ;;  %v8002_v54 = vpack.c.bf16 %v2769_v47, %v2761_v46  ;;  %v2801_v52 = vld [vmem:[#allocation4 + $0x368] sm:$0xff]  ;;  %v2795_v18 = vld [vmem:[#allocation4 + $0x338] sm:$0xff] }
 0x548   :  { %v2803_v46 = vld [vmem:[#allocation4 + $0x378] sm:$0xff]  ;;  %v2817_v8 = vld [vmem:[#allocation4 + $0x3e8] sm:$0xff] }
 0x549   :  { %7993 = vmatpush1.bf16.msra.mxu0 %v7992_v3  ;;  %8057 = vmatpush1.bf16.msra.mxu1 %v8056_v2  ;;  %v2770_v3 = vld [vmem:[#allocation4 + $0x270] sm:$0xff]  ;;  %v8074_v53 = vpack.c.bf16 %v2803_v46, %v2795_v18 }
 0x54a   :  { %7995 = vmatprep.subr.bf16.mxu0 %v7994_v13  ;;  %8059 = vmatprep.subr.bf16.mxu1 %v8058_v16  ;;  %v2779_v13 = vld [vmem:[#allocation4 + $0x2b8] sm:$0xff]  ;;  %v8068_v22 = vpack.c.bf16 %v2770_v3, %v2762_v9  ;;  %v2826_v18 = vld [vmem:[#allocation4 + $0x430] sm:$0xff] }
 0x54b   :  { %v2787_v16 = vld [vmem:[#allocation4 + $0x2f8] sm:$0xff]  ;;  %v2834_v46 = vld [vmem:[#allocation4 + $0x470] sm:$0xff] }
 0x54c   :  { %v6460_v48 = vld [vmem:[#allocation2 + $0xc] sm:$0xf]  ;;  %v2811_v9 = vld [vmem:[#allocation4 + $0x3b8] sm:$0xff] }
 0x54d   :  { %7997 = vmatpush1.bf16.msra.mxu0 %v7996_v43  ;;  %8061 = vmatpush1.bf16.msra.mxu1 %v8060_v31  ;;  %v6489_v4 = vmul.f32 %v9987_v20, %v6460_v48  ;;  %v2778_v43 = vld [vmem:[#allocation4 + $0x2b0] sm:$0xff]  ;;  %v2792_v48 = vld [vmem:[#allocation4 + $0x320] sm:$0xff]  ;;  %v2819_v3 = vld [vmem:[#allocation4 + $0x3f8] sm:$0xff] }
 0x54e   :  { %7999 = vmatprep.subr.bf16.mxu0 %v7998_v41  ;;  %8063 = vmatprep.subr.bf16.mxu1 %v8062_v45  ;;  %v2786_v31 = vld [vmem:[#allocation4 + $0x2f0] sm:$0xff]  ;;  %v8070_v45 = vpack.c.bf16 %v2787_v16, %v2779_v13  ;;  %v2816_v13 = vld [vmem:[#allocation4 + $0x3e0] sm:$0xff] }
 0x54f   :  { %v6536_v2 = vrot.slane %v6489_v4, %v9984_v63  ;;  %v8072_v60 = vpack.c.bf16 %v2786_v31, %v2778_v43  ;;  %v2794_v4 = vld [vmem:[#allocation4 + $0x330] sm:$0xff]  ;;  %v2835_v43 = vld [vmem:[#allocation4 + $0x478] sm:$0xff]  ;;  %v8016_v31 = vpack.c.bf16 %v2816_v13, %v2808_v10 }
 0x550   :  { %v2867_v10 = vld [vmem:[#allocation4 + $0x578] sm:$0xff] }
 0x551   :  { %8001 = vmatpush1.bf16.msra.mxu0 %v8000_v50  ;;  %8065 = vmatpush1.bf16.msra.mxu1 %v8064_v51  ;;  %v6537_v39 = vcombine.high %v6536_v2, %v6536_v2  ;;  %v6622_v37 = vsel %vm6606_vm0, %v6536_v2, 0.0  ;;  %v2800_v50 = vld [vmem:[#allocation4 + $0x360] sm:$0xff]  ;;  %v8010_v51 = vpack.c.bf16 %v2801_v52, %v2793_v35 }
 0x552   :  { %8003 = vmatprep.subr.bf16.mxu0 %v8002_v54  ;;  %8067 = vmatprep.subr.bf16.mxu1 %v8066_v5  ;;  %v2802_v54 = vld [vmem:[#allocation4 + $0x370] sm:$0xff]  ;;  %v2809_v5 = vld [vmem:[#allocation4 + $0x3a8] sm:$0xff]  ;;  %v8012_v2 = vpack.c.bf16 %v2800_v50, %v2792_v48  ;;  %v2851_v48 = vld [vmem:[#allocation4 + $0x4f8] sm:$0xff] }
 0x553   :  { %v6623_v41 = vsel %vm6606_vm0, %v6537_v39, 0.0  ;;  %v8076_v49 = vpack.c.bf16 %v2802_v54, %v2794_v4  ;;  %v8014_v16 = vpack.c.bf16 %v2817_v8, %v2809_v5  ;;  %v2818_v39 = vld [vmem:[#allocation4 + $0x3f0] sm:$0xff]  ;;  %v2848_v4 = vld [vmem:[#allocation4 + $0x4e0] sm:$0xff] }
 0x554   :  { %v6624_v47 = vadd.f32 %v6623_v41, %v6622_v37  ;;  %v2824_v37 = vld [vmem:[#allocation4 + $0x420] sm:$0xff]  ;;  %v2842_v8 = vld [vmem:[#allocation4 + $0x4b0] sm:$0xff] }
 0x555   :  { %8005 = vmatpush1.bf16.msra.mxu0 %v8004_v21  ;;  %8069 = vmatpush1.bf16.msra.mxu1 %v8068_v22  ;;  %v8078_v21 = vpack.c.bf16 %v2819_v3, %v2811_v9  ;;  %v2810_v22 = vld [vmem:[#allocation4 + $0x3b0] sm:$0xff]  ;;  %v2832_v41 = vld [vmem:[#allocation4 + $0x460] sm:$0xff]  ;;  %v2857_v3 = vld [vmem:[#allocation4 + $0x528] sm:$0xff] }
 0x556   :  { %6625 = vadd.xlane.f32.xlu0 %v6624_v47  ;;  %8007 = vmatprep.subr.bf16.mxu0 %v8006_v17  ;;  %v2827_v17 = vld [vmem:[#allocation4 + $0x438] sm:$0xff]  ;;  %v8080_v35 = vpack.c.bf16 %v2818_v39, %v2810_v22  ;;  %v2841_v47 = vld [vmem:[#allocation4 + $0x4a8] sm:$0xff]  ;;  %v8020_v50 = vpack.c.bf16 %v2832_v41, %v2824_v37  ;;  %v2850_v9 = vld [vmem:[#allocation4 + $0x4f0] sm:$0xff] }
 0x557   :  { %8071 = vmatprep.subr.bf16.mxu1 %v8070_v45  ;;  %v8018_v45 = vpack.c.bf16 %v2833_v30, %v2825_v26  ;;  %v8082_v52 = vpack.c.bf16 %v2835_v43, %v2827_v17  ;;  %v2864_v22 = vld [vmem:[#allocation4 + $0x560] sm:$0xff]  ;;  %v2858_v30 = vld [vmem:[#allocation4 + $0x530] sm:$0xff]  ;;  %v2873_v43 = vld [vmem:[#allocation4 + $0x5a8] sm:$0xff] }
 0x558   :  { %v2866_v17 = vld [vmem:[#allocation4 + $0x570] sm:$0xff]  ;;  %v2883_v37 = vld [vmem:[#allocation4 + $0x5f8] sm:$0xff] }
 0x559   :  { %8009 = vmatpush1.bf16.msra.mxu0 %v8008_v44  ;;  %8073 = vmatpush1.bf16.msra.mxu1 %v8072_v60  ;;  %v2849_v44 = vld [vmem:[#allocation4 + $0x4e8] sm:$0xff]  ;;  %v2843_v60 = vld [vmem:[#allocation4 + $0x4b8] sm:$0xff] }
 0x55a   :  { %8011 = vmatprep.subr.bf16.mxu0 %v8010_v51  ;;  %8075 = vmatprep.subr.bf16.mxu1 %v8074_v53  ;;  %v8084_v51 = vpack.c.bf16 %v2834_v46, %v2826_v18  ;;  %v2840_v53 = vld [vmem:[#allocation4 + $0x4a0] sm:$0xff]  ;;  %v8022_v54 = vpack.c.bf16 %v2849_v44, %v2841_v47  ;;  %v8086_v5 = vpack.c.bf16 %v2851_v48, %v2843_v60  ;;  %v2874_v44 = vld [vmem:[#allocation4 + $0x5b0] sm:$0xff]  ;;  %v2889_v48 = vld [vmem:[#allocation4 + $0x628] sm:$0xff] }
 0x55b   :  { %v8024_v13 = vpack.c.bf16 %v2848_v4, %v2840_v53  ;;  %v2880_v18 = vld [vmem:[#allocation4 + $0x5e0] sm:$0xff]  ;;  %v2882_v60 = vld [vmem:[#allocation4 + $0x5f0] sm:$0xff]  ;;  %v2899_v53 = vld [vmem:[#allocation4 + $0x678] sm:$0xff] }
 0x55d   :  { %8013 = vmatpush1.bf16.msra.mxu0 %v8012_v2  ;;  %8077 = vmatpush1.bf16.msra.mxu1 %v8076_v49  ;;  %v2865_v2 = vld [vmem:[#allocation4 + $0x568] sm:$0xff]  ;;  %v2859_v49 = vld [vmem:[#allocation4 + $0x538] sm:$0xff] }
 0x55e   :  { %8015 = vmatprep.subr.bf16.mxu0 %v8014_v16  ;;  %8079 = vmatprep.subr.bf16.mxu1 %v8078_v21  ;;  %v8088_v16 = vpack.c.bf16 %v2850_v9, %v2842_v8  ;;  %v2856_v21 = vld [vmem:[#allocation4 + $0x520] sm:$0xff]  ;;  %v8026_v39 = vpack.c.bf16 %v2865_v2, %v2857_v3  ;;  %v8090_v26 = vpack.c.bf16 %v2867_v10, %v2859_v49  ;;  %v2890_v2 = vld [vmem:[#allocation4 + $0x630] sm:$0xff]  ;;  %v2905_v10 = vld [vmem:[#allocation4 + $0x6a8] sm:$0xff] }
 0x55f   :  { %v8028_v41 = vpack.c.bf16 %v2864_v22, %v2856_v21  ;;  %v2896_v8 = vld [vmem:[#allocation4 + $0x660] sm:$0xff]  ;;  %v2898_v49 = vld [vmem:[#allocation4 + $0x670] sm:$0xff]  ;;  %v2915_v21 = vld [vmem:[#allocation4 + $0x6f8] sm:$0xff] }
 0x561   :  { %8017 = vmatpush1.bf16.msra.mxu0 %v8016_v31  ;;  %8081 = vmatpush1.bf16.msra.mxu1 %v8080_v35  ;;  %v2881_v31 = vld [vmem:[#allocation4 + $0x5e8] sm:$0xff]  ;;  %v2875_v35 = vld [vmem:[#allocation4 + $0x5b8] sm:$0xff] }
 0x562   :  { %8019 = vmatprep.subr.bf16.mxu0 %v8018_v45  ;;  %8083 = vmatprep.subr.bf16.mxu1 %v8082_v52  ;;  %v8092_v45 = vpack.c.bf16 %v2866_v17, %v2858_v30  ;;  %v2872_v52 = vld [vmem:[#allocation4 + $0x5a0] sm:$0xff]  ;;  %v8030_v46 = vpack.c.bf16 %v2881_v31, %v2873_v43  ;;  %v8094_v47 = vpack.c.bf16 %v2883_v37, %v2875_v35  ;;  %v2906_v31 = vld [vmem:[#allocation4 + $0x6b0] sm:$0xff]  ;;  %v2921_v37 = vld [vmem:[#allocation4 + $0x728] sm:$0xff] }
 0x563   :  { %v8032_v4 = vpack.c.bf16 %v2880_v18, %v2872_v52  ;;  %v2912_v30 = vld [vmem:[#allocation4 + $0x6e0] sm:$0xff]  ;;  %v2914_v35 = vld [vmem:[#allocation4 + $0x6f0] sm:$0xff]  ;;  %v2931_v52 = vld [vmem:[#allocation4 + $0x778] sm:$0xff] }
 0x565   :  { %8021 = vmatpush1.bf16.msra.mxu0 %v8020_v50  ;;  %8085 = vmatpush1.bf16.msra.mxu1 %v8084_v51  ;;  %v2897_v50 = vld [vmem:[#allocation4 + $0x668] sm:$0xff]  ;;  %v2891_v51 = vld [vmem:[#allocation4 + $0x638] sm:$0xff] }
 0x566   :  { %8023 = vmatprep.subr.bf16.mxu0 %v8022_v54  ;;  %8087 = vmatprep.subr.bf16.mxu1 %v8086_v5  ;;  %v8096_v54 = vpack.c.bf16 %v2882_v60, %v2874_v44  ;;  %v2888_v5 = vld [vmem:[#allocation4 + $0x620] sm:$0xff]  ;;  %v8034_v9 = vpack.c.bf16 %v2897_v50, %v2889_v48  ;;  %v8098_v3 = vpack.c.bf16 %v2899_v53, %v2891_v51  ;;  %v2922_v50 = vld [vmem:[#allocation4 + $0x730] sm:$0xff]  ;;  %v2937_v53 = vld [vmem:[#allocation4 + $0x7a8] sm:$0xff] }
 0x567   :  { %v8036_v22 = vpack.c.bf16 %v2896_v8, %v2888_v5  ;;  %v2928_v44 = vld [vmem:[#allocation4 + $0x760] sm:$0xff]  ;;  %v2930_v51 = vld [vmem:[#allocation4 + $0x770] sm:$0xff]  ;;  %v2947_v5 = vld [vmem:[#allocation4 + $0x7f8] sm:$0xff] }
 0x569   :  { %8025 = vmatpush1.bf16.msra.mxu0 %v8024_v13  ;;  %8089 = vmatpush1.bf16.msra.mxu1 %v8088_v16  ;;  %v2913_v13 = vld [vmem:[#allocation4 + $0x6e8] sm:$0xff]  ;;  %v2907_v16 = vld [vmem:[#allocation4 + $0x6b8] sm:$0xff] }
 0x56a   :  { %8027 = vmatprep.subr.bf16.mxu0 %v8026_v39  ;;  %8091 = vmatprep.subr.bf16.mxu1 %v8090_v26  ;;  %v8100_v39 = vpack.c.bf16 %v2898_v49, %v2890_v2  ;;  %v2904_v26 = vld [vmem:[#allocation4 + $0x6a0] sm:$0xff]  ;;  %v8038_v17 = vpack.c.bf16 %v2913_v13, %v2905_v10  ;;  %v8102_v43 = vpack.c.bf16 %v2915_v21, %v2907_v16  ;;  %v2938_v13 = vld [vmem:[#allocation4 + $0x7b0] sm:$0xff] }
 0x56b   :  { %v8040_v18 = vpack.c.bf16 %v2912_v30, %v2904_v26  ;;  %v2944_v10 = vld [vmem:[#allocation4 + $0x7e0] sm:$0xff]  ;;  %v2946_v16 = vld [vmem:[#allocation4 + $0x7f0] sm:$0xff]  ;;  %v3333_v26 = vld [vmem:[#allocation4 + $0x48] sm:$0xff] }
 0x56c   :  { %v3327_v30 = vld [vmem:[#allocation4 + $0x18] sm:$0xff] }
 0x56d   :  { %8029 = vmatpush1.bf16.msra.mxu0 %v8028_v41  ;;  %8093 = vmatpush1.bf16.msra.mxu1 %v8092_v45  ;;  %v2929_v41 = vld [vmem:[#allocation4 + $0x768] sm:$0xff]  ;;  %v2923_v45 = vld [vmem:[#allocation4 + $0x738] sm:$0xff] }
 0x56e   :  { %8031 = vmatprep.subr.bf16.mxu0 %v8030_v46  ;;  %8095 = vmatprep.subr.bf16.mxu1 %v8094_v47  ;;  %v8104_v46 = vpack.c.bf16 %v2914_v35, %v2906_v31  ;;  %v2920_v47 = vld [vmem:[#allocation4 + $0x720] sm:$0xff]  ;;  %v8042_v60 = vpack.c.bf16 %v2929_v41, %v2921_v37  ;;  %v8106_v48 = vpack.c.bf16 %v2931_v52, %v2923_v45  ;;  %v3326_v45 = vld [vmem:[#allocation4 + $0x10] sm:$0xff] }
 0x56f   :  { %v8044_v8 = vpack.c.bf16 %v2928_v44, %v2920_v47  ;;  %v3324_v31 = vld [vmem:[#allocation4] sm:$0xff]  ;;  %v3334_v52 = vld [vmem:[#allocation4 + $0x50] sm:$0xff]  ;;  %v3349_v47 = vld [vmem:[#allocation4 + $0xc8] sm:$0xff] }
 0x570   :  { %v3332_v35 = vld [vmem:[#allocation4 + $0x40] sm:$0xff]  ;;  %v3343_v44 = vld [vmem:[#allocation4 + $0x98] sm:$0xff] }
 0x571   :  { %8033 = vmatpush1.bf16.msra.mxu0 %v8032_v4  ;;  %8097 = vmatpush1.bf16.msra.mxu1 %v8096_v54  ;;  %v2945_v4 = vld [vmem:[#allocation4 + $0x7e8] sm:$0xff]  ;;  %v2939_v54 = vld [vmem:[#allocation4 + $0x7b8] sm:$0xff]  ;;  %v8116_v41 = vpack.c.bf16 %v3332_v35, %v3324_v31 }
 0x572   :  { %8035 = vmatprep.subr.bf16.mxu0 %v8034_v9  ;;  %8099 = vmatprep.subr.bf16.mxu1 %v8098_v3  ;;  %v8108_v9 = vpack.c.bf16 %v2930_v51, %v2922_v50  ;;  %v2936_v3 = vld [vmem:[#allocation4 + $0x7a0] sm:$0xff]  ;;  %v8046_v2 = vpack.c.bf16 %v2945_v4, %v2937_v53  ;;  %v8110_v49 = vpack.c.bf16 %v2947_v5, %v2939_v54  ;;  %v3342_v53 = vld [vmem:[#allocation4 + $0x90] sm:$0xff]  ;;  %v3357_v5 = vld [vmem:[#allocation4 + $0x108] sm:$0xff] }
 0x573   :  { %v8048_v21 = vpack.c.bf16 %v2944_v10, %v2936_v3  ;;  %v3340_v50 = vld [vmem:[#allocation4 + $0x80] sm:$0xff]  ;;  %v3350_v54 = vld [vmem:[#allocation4 + $0xd0] sm:$0xff]  ;;  %v3383_v35 = vld [vmem:[#allocation4 + $0x1d8] sm:$0xff] }
 0x574   :  { %v3348_v51 = vld [vmem:[#allocation4 + $0xc0] sm:$0xff] }
 0x575   :  { %8037 = vmatpush1.bf16.msra.mxu0 %v8036_v22  ;;  %8101 = vmatpush1.bf16.msra.mxu1 %v8100_v39  ;;  %v8112_v22 = vpack.c.bf16 %v2946_v16, %v2938_v13  ;;  %v3325_v39 = vld [vmem:[#allocation4 + $0x8] sm:$0xff]  ;;  %v8120_v4 = vpack.c.bf16 %v3348_v51, %v3340_v50  ;;  %v3356_v10 = vld [vmem:[#allocation4 + $0x100] sm:$0xff] }
 0x576   :  { %8039 = vmatprep.subr.bf16.mxu0 %v8038_v17  ;;  %8103 = vmatprep.subr.bf16.mxu1 %v8102_v43  ;;  %v8114_v17 = vpack.c.bf16 %v3333_v26, %v3325_v39  ;;  %v3335_v43 = vld [vmem:[#allocation4 + $0x58] sm:$0xff]  ;;  %v3364_v16 = vld [vmem:[#allocation4 + $0x140] sm:$0xff]  ;;  %v3373_v26 = vld [vmem:[#allocation4 + $0x188] sm:$0xff] }
 0x577   :  { %v8178_v37 = vpack.c.bf16 %v3335_v43, %v3327_v30  ;;  %v8124_v39 = vpack.c.bf16 %v3364_v16, %v3356_v10  ;;  %v3381_v30 = vld [vmem:[#allocation4 + $0x1c8] sm:$0xff]  ;;  %v3388_v51 = vld [vmem:[#allocation4 + $0x200] sm:$0xff] }
 0x578   :  { %v8126_v31 = vpack.c.bf16 %v3381_v30, %v3373_v26  ;;  %v3404_v16 = vld [vmem:[#allocation4 + $0x280] sm:$0xff]  ;;  %v3414_v26 = vld [vmem:[#allocation4 + $0x2d0] sm:$0xff]  ;;  %v3421_v30 = vld [vmem:[#allocation4 + $0x308] sm:$0xff] }
 0x579   :  { %8041 = vmatpush1.bf16.msra.mxu0 %v8040_v18  ;;  %8105 = vmatpush1.bf16.msra.mxu1 %v8104_v46  ;;  %v3341_v18 = vld [vmem:[#allocation4 + $0x88] sm:$0xff]  ;;  %v8180_v46 = vpack.c.bf16 %v3334_v52, %v3326_v45  ;;  %v3374_v52 = vld [vmem:[#allocation4 + $0x190] sm:$0xff] }
 0x57a   :  { %8043 = vmatprep.subr.bf16.mxu0 %v8042_v60  ;;  %8107 = vmatprep.subr.bf16.mxu1 %v8106_v48  ;;  %v3351_v60 = vld [vmem:[#allocation4 + $0xd8] sm:$0xff] }
 0x57b   :  { %v8182_v48 = vpack.c.bf16 %v3351_v60, %v3343_v44  ;;  %v3391_v44 = vld [vmem:[#allocation4 + $0x218] sm:$0xff] }
 0x57c   :  { %v3399_v60 = vld [vmem:[#allocation4 + $0x258] sm:$0xff] }
 0x57d   :  { %8045 = vmatpush1.bf16.msra.mxu0 %v8044_v8  ;;  %8109 = vmatpush1.bf16.msra.mxu1 %v8108_v9  ;;  %v3365_v8 = vld [vmem:[#allocation4 + $0x148] sm:$0xff]  ;;  %v8184_v9 = vpack.c.bf16 %v3350_v54, %v3342_v53  ;;  %v3396_v53 = vld [vmem:[#allocation4 + $0x240] sm:$0xff]  ;;  %v8194_v54 = vpack.c.bf16 %v3399_v60, %v3391_v44 }
 0x57e   :  { %8047 = vmatprep.subr.bf16.mxu0 %v8046_v2  ;;  %8111 = vmatprep.subr.bf16.mxu1 %v8110_v49  ;;  %v8122_v3 = vpack.c.bf16 %v3365_v8, %v3357_v5  ;;  %v3359_v2 = vld [vmem:[#allocation4 + $0x118] sm:$0xff]  ;;  %v3398_v5 = vld [vmem:[#allocation4 + $0x250] sm:$0xff]  ;;  %v3405_v8 = vld [vmem:[#allocation4 + $0x288] sm:$0xff] }
 0x57f   :  { %v3367_v49 = vld [vmem:[#allocation4 + $0x158] sm:$0xff]  ;;  %v3437_v44 = vld [vmem:[#allocation4 + $0x388] sm:$0xff] }
 0x580   :  { %v8186_v13 = vpack.c.bf16 %v3367_v49, %v3359_v2  ;;  %v3415_v2 = vld [vmem:[#allocation4 + $0x2d8] sm:$0xff]  ;;  %v8132_v49 = vpack.c.bf16 %v3396_v53, %v3388_v51  ;;  %v3445_v60 = vld [vmem:[#allocation4 + $0x3c8] sm:$0xff] }
 0x581   :  { %8049 = vmatpush1.bf16.msra.mxu0 %v8048_v21  ;;  %8113 = vmatpush1.bf16.msra.mxu1 %v8112_v22  ;;  %v3358_v21 = vld [vmem:[#allocation4 + $0x110] sm:$0xff]  ;;  %v8142_v53 = vpack.c.bf16 %v3445_v60, %v3437_v44 }
 0x582   :  { %8115 = vmatprep.subr.bf16.mxu0 %v8114_v17  ;;  %8179 = vmatprep.subr.bf16.mxu1 %v8178_v37  ;;  %v3366_v22 = vld [vmem:[#allocation4 + $0x150] sm:$0xff]  ;;  %v3375_v17 = vld [vmem:[#allocation4 + $0x198] sm:$0xff]  ;;  %v3372_v37 = vld [vmem:[#allocation4 + $0x180] sm:$0xff] }
 0x583   :  { %v8188_v43 = vpack.c.bf16 %v3366_v22, %v3358_v21  ;;  %v8190_v45 = vpack.c.bf16 %v3383_v35, %v3375_v17  ;;  %v3412_v21 = vld [vmem:[#allocation4 + $0x2c0] sm:$0xff]  ;;  %v3406_v22 = vld [vmem:[#allocation4 + $0x290] sm:$0xff]  ;;  %v3429_v17 = vld [vmem:[#allocation4 + $0x348] sm:$0xff] }
 0x584   :  { %3155 = vmatmul.mubr.f32.vlgmr.msra.gmra.mrb[18].mxu0 %v10101_v12  ;;  %3226 = vmatmul.mubr.f32.vlgmr.msra.gmra.mrb[18].mxu1 %v10101_v12  ;;  %v8118_v12 = vpack.c.bf16 %v3349_v47, %v3341_v18  ;;  %v3382_v18 = vld [vmem:[#allocation4 + $0x1d0] sm:$0xff]  ;;  %v3397_v47 = vld [vmem:[#allocation4 + $0x248] sm:$0xff]  ;;  %v8136_v35 = vpack.c.bf16 %v3412_v21, %v3404_v16  ;;  %v3463_v21 = vld [vmem:[#allocation4 + $0x458] sm:$0xff] }
 0x585   :  { %8117 = vmatpush1.bf16.msra.mxu0 %v8116_v41  ;;  %8181 = vmatpush1.bf16.msra.mxu1 %v8180_v46  ;;  %v3380_v41 = vld [vmem:[#allocation4 + $0x1c0] sm:$0xff]  ;;  %v3389_v46 = vld [vmem:[#allocation4 + $0x208] sm:$0xff]  ;;  %v3470_v60 = vld [vmem:[#allocation4 + $0x490] sm:$0xff] }
 0x586   :  { %8119 = vmatprep.subr.bf16.mxu0 %v8118_v12  ;;  %8183 = vmatprep.subr.bf16.mxu1 %v8182_v48  ;;  %v8128_v12 = vpack.c.bf16 %v3380_v41, %v3372_v37  ;;  %v8192_v48 = vpack.c.bf16 %v3382_v18, %v3374_v52  ;;  %v8130_v50 = vpack.c.bf16 %v3397_v47, %v3389_v46  ;;  %v3428_v52 = vld [vmem:[#allocation4 + $0x340] sm:$0xff]  ;;  %v3422_v18 = vld [vmem:[#allocation4 + $0x310] sm:$0xff] }
 0x587   :  { %v8200_v37 = vpack.c.bf16 %v3414_v26, %v3406_v22  ;;  %v8138_v41 = vpack.c.bf16 %v3429_v17, %v3421_v30  ;;  %v3430_v47 = vld [vmem:[#allocation4 + $0x350] sm:$0xff]  ;;  %v3460_v26 = vld [vmem:[#allocation4 + $0x440] sm:$0xff] }
 0x588   :  { %v8204_v51 = vpack.c.bf16 %v3430_v47, %v3422_v18  ;;  %v3454_v30 = vld [vmem:[#allocation4 + $0x410] sm:$0xff]  ;;  %v3468_v18 = vld [vmem:[#allocation4 + $0x480] sm:$0xff] }
 0x589   :  { %8121 = vmatpush1.bf16.msra.mxu0 %v8120_v4  ;;  %8185 = vmatpush1.bf16.msra.mxu1 %v8184_v9  ;;  %v3390_v4 = vld [vmem:[#allocation4 + $0x210] sm:$0xff]  ;;  %v3413_v9 = vld [vmem:[#allocation4 + $0x2c8] sm:$0xff] }
 0x58a   :  { %8123 = vmatprep.subr.bf16.mxu0 %v8122_v3  ;;  %8187 = vmatprep.subr.bf16.mxu1 %v8186_v13  ;;  %v3407_v3 = vld [vmem:[#allocation4 + $0x298] sm:$0xff]  ;;  %v8196_v10 = vpack.c.bf16 %v3398_v5, %v3390_v4  ;;  %v8134_v13 = vpack.c.bf16 %v3413_v9, %v3405_v8  ;;  %v3436_v4 = vld [vmem:[#allocation4 + $0x380] sm:$0xff]  ;;  %v3438_v8 = vld [vmem:[#allocation4 + $0x390] sm:$0xff] }
 0x58b   :  { %v3446_v9 = vld [vmem:[#allocation4 + $0x3d0] sm:$0xff] }
 0x58d   :  { %8125 = vmatpush1.bf16.msra.mxu0 %v8124_v39  ;;  %8189 = vmatpush1.bf16.msra.mxu1 %v8188_v43  ;;  %v8198_v39 = vpack.c.bf16 %v3415_v2, %v3407_v3  ;;  %v3423_v43 = vld [vmem:[#allocation4 + $0x318] sm:$0xff]  ;;  %v8208_v2 = vpack.c.bf16 %v3446_v9, %v3438_v8  ;;  %v3492_v8 = vld [vmem:[#allocation4 + $0x540] sm:$0xff] }
 0x58e   :  { %8127 = vmatprep.subr.bf16.mxu0 %v8126_v31  ;;  %8191 = vmatprep.subr.bf16.mxu1 %v8190_v45  ;;  %v3431_v31 = vld [vmem:[#allocation4 + $0x358] sm:$0xff]  ;;  %v3420_v45 = vld [vmem:[#allocation4 + $0x300] sm:$0xff] }
 0x58f   :  { %v8202_v46 = vpack.c.bf16 %v3431_v31, %v3423_v43  ;;  %v3462_v43 = vld [vmem:[#allocation4 + $0x450] sm:$0xff] }
 0x590   :  { %v8212_v31 = vpack.c.bf16 %v3462_v43, %v3454_v30  ;;  %v3508_v30 = vld [vmem:[#allocation4 + $0x5c0] sm:$0xff] }
 0x591   :  { %8129 = vmatpush1.bf16.msra.mxu0 %v8128_v12  ;;  %8193 = vmatpush1.bf16.msra.mxu1 %v8192_v48  ;;  %v3439_v12 = vld [vmem:[#allocation4 + $0x398] sm:$0xff] }
 0x592   :  { %8131 = vmatprep.subr.bf16.mxu0 %v8130_v50  ;;  %8195 = vmatprep.subr.bf16.mxu1 %v8194_v54  ;;  %v3447_v48 = vld [vmem:[#allocation4 + $0x3d8] sm:$0xff]  ;;  %v8140_v50 = vpack.c.bf16 %v3428_v52, %v3420_v45  ;;  %v3444_v54 = vld [vmem:[#allocation4 + $0x3c0] sm:$0xff] }
 0x593   :  { %v8206_v5 = vpack.c.bf16 %v3447_v48, %v3439_v12  ;;  %v8144_v3 = vpack.c.bf16 %v3444_v54, %v3436_v4  ;;  %v3479_v52 = vld [vmem:[#allocation4 + $0x4d8] sm:$0xff]  ;;  %v3478_v12 = vld [vmem:[#allocation4 + $0x4d0] sm:$0xff] }
 0x594   :  { %v8216_v48 = vpack.c.bf16 %v3478_v12, %v3470_v60  ;;  %v3495_v54 = vld [vmem:[#allocation4 + $0x558] sm:$0xff] }
 0x595   :  { %8133 = vmatpush1.bf16.msra.mxu0 %v8132_v49  ;;  %8197 = vmatpush1.bf16.msra.mxu1 %v8196_v10  ;;  %v3453_v49 = vld [vmem:[#allocation4 + $0x408] sm:$0xff] }
 0x596   :  { %8135 = vmatprep.subr.bf16.mxu0 %v8134_v13  ;;  %8199 = vmatprep.subr.bf16.mxu1 %v8198_v39  ;;  %v3461_v10 = vld [vmem:[#allocation4 + $0x448] sm:$0xff]  ;;  %v3455_v13 = vld [vmem:[#allocation4 + $0x418] sm:$0xff]  ;;  %v3452_v39 = vld [vmem:[#allocation4 + $0x400] sm:$0xff] }
 0x597   :  { %v8146_v16 = vpack.c.bf16 %v3461_v10, %v3453_v49  ;;  %v8210_v22 = vpack.c.bf16 %v3463_v21, %v3455_v13  ;;  %v8148_v17 = vpack.c.bf16 %v3460_v26, %v3452_v39  ;;  %v3494_v49 = vld [vmem:[#allocation4 + $0x550] sm:$0xff]  ;;  %v3501_v13 = vld [vmem:[#allocation4 + $0x588] sm:$0xff]  ;;  %v3503_v21 = vld [vmem:[#allocation4 + $0x598] sm:$0xff] }
 0x598   :  { %v3511_v39 = vld [vmem:[#allocation4 + $0x5d8] sm:$0xff]  ;;  %v3500_v26 = vld [vmem:[#allocation4 + $0x580] sm:$0xff] }
 0x599   :  { %8137 = vmatpush1.bf16.msra.mxu0 %v8136_v35  ;;  %8201 = vmatpush1.bf16.msra.mxu1 %v8200_v37  ;;  %v3469_v35 = vld [vmem:[#allocation4 + $0x488] sm:$0xff]  ;;  %v8160_v43 = vpack.c.bf16 %v3508_v30, %v3500_v26  ;;  %v3559_v26 = vld [vmem:[#allocation4 + $0x758] sm:$0xff] }
 0x59a   :  { %8139 = vmatprep.subr.bf16.mxu0 %v8138_v41  ;;  %8203 = vmatprep.subr.bf16.mxu1 %v8202_v46  ;;  %v3477_v37 = vld [vmem:[#allocation4 + $0x4c8] sm:$0xff]  ;;  %v3471_v41 = vld [vmem:[#allocation4 + $0x498] sm:$0xff]  ;;  %v3476_v46 = vld [vmem:[#allocation4 + $0x4c0] sm:$0xff] }
 0x59b   :  { %v8150_v45 = vpack.c.bf16 %v3477_v37, %v3469_v35  ;;  %v8214_v47 = vpack.c.bf16 %v3479_v52, %v3471_v41  ;;  %v8152_v44 = vpack.c.bf16 %v3476_v46, %v3468_v18  ;;  %v3510_v35 = vld [vmem:[#allocation4 + $0x5d0] sm:$0xff]  ;;  %v3517_v41 = vld [vmem:[#allocation4 + $0x608] sm:$0xff]  ;;  %v3519_v52 = vld [vmem:[#allocation4 + $0x618] sm:$0xff] }
 0x59c   :  { %v3527_v46 = vld [vmem:[#allocation4 + $0x658] sm:$0xff] }
 0x59d   :  { %8141 = vmatpush1.bf16.msra.mxu0 %v8140_v50  ;;  %8205 = vmatpush1.bf16.msra.mxu1 %v8204_v51  ;;  %v3485_v50 = vld [vmem:[#allocation4 + $0x508] sm:$0xff]  ;;  %v8226_v60 = vpack.c.bf16 %v3527_v46, %v3519_v52 }
 0x59e   :  { %8143 = vmatprep.subr.bf16.mxu0 %v8142_v53  ;;  %8207 = vmatprep.subr.bf16.mxu1 %v8206_v5  ;;  %v3493_v51 = vld [vmem:[#allocation4 + $0x548] sm:$0xff]  ;;  %v3487_v53 = vld [vmem:[#allocation4 + $0x518] sm:$0xff]  ;;  %v3484_v5 = vld [vmem:[#allocation4 + $0x500] sm:$0xff] }
 0x59f   :  { %v8154_v4 = vpack.c.bf16 %v3493_v51, %v3485_v50  ;;  %v8218_v9 = vpack.c.bf16 %v3495_v54, %v3487_v53  ;;  %v3526_v50 = vld [vmem:[#allocation4 + $0x650] sm:$0xff]  ;;  %v3533_v53 = vld [vmem:[#allocation4 + $0x688] sm:$0xff]  ;;  %v3535_v54 = vld [vmem:[#allocation4 + $0x698] sm:$0xff] }
 0x5a0   :  { %v3573_v52 = vld [vmem:[#allocation4 + $0x7c8] sm:$0xff] }
 0x5a1   :  { %8145 = vmatpush1.bf16.msra.mxu0 %v8144_v3  ;;  %8209 = vmatpush1.bf16.msra.mxu1 %v8208_v2  ;;  %v8156_v3 = vpack.c.bf16 %v3492_v8, %v3484_v5  ;;  %v3486_v2 = vld [vmem:[#allocation4 + $0x510] sm:$0xff]  ;;  %v3543_v8 = vld [vmem:[#allocation4 + $0x6d8] sm:$0xff] }
 0x5a2   :  { %8147 = vmatprep.subr.bf16.mxu0 %v8146_v16  ;;  %8211 = vmatprep.subr.bf16.mxu1 %v8210_v22  ;;  %v8220_v10 = vpack.c.bf16 %v3494_v49, %v3486_v2  ;;  %v3509_v16 = vld [vmem:[#allocation4 + $0x5c8] sm:$0xff]  ;;  %v8230_v2 = vpack.c.bf16 %v3543_v8, %v3535_v54  ;;  %v3331_v8 = vld [vmem:[#allocation4 + $0x38] sm:$0xff] }
 0x5a3   :  { %v8158_v22 = vpack.c.bf16 %v3509_v16, %v3501_v13  ;;  %v3542_v13 = vld [vmem:[#allocation4 + $0x6d0] sm:$0xff]  ;;  %v3549_v16 = vld [vmem:[#allocation4 + $0x708] sm:$0xff] }
 0x5a4   :  { %v3329_v54 = vld [vmem:[#allocation4 + $0x28] sm:$0xff] }
 0x5a5   :  { %8149 = vmatpush1.bf16.msra.mxu0 %v8148_v17  ;;  %8213 = vmatpush1.bf16.msra.mxu1 %v8212_v31  ;;  %v8222_v17 = vpack.c.bf16 %v3511_v39, %v3503_v21  ;;  %v3502_v31 = vld [vmem:[#allocation4 + $0x590] sm:$0xff]  ;;  %v3551_v39 = vld [vmem:[#allocation4 + $0x718] sm:$0xff] }
 0x5a6   :  { %8151 = vmatprep.subr.bf16.mxu0 %v8150_v45  ;;  %8215 = vmatprep.subr.bf16.mxu1 %v8214_v47  ;;  %v8224_v37 = vpack.c.bf16 %v3510_v35, %v3502_v31  ;;  %v3525_v45 = vld [vmem:[#allocation4 + $0x648] sm:$0xff]  ;;  %v3516_v47 = vld [vmem:[#allocation4 + $0x600] sm:$0xff]  ;;  %v3550_v35 = vld [vmem:[#allocation4 + $0x710] sm:$0xff] }
 0x5a7   :  { %v8162_v18 = vpack.c.bf16 %v3525_v45, %v3517_v41  ;;  %v3556_v31 = vld [vmem:[#allocation4 + $0x740] sm:$0xff]  ;;  %v3558_v41 = vld [vmem:[#allocation4 + $0x750] sm:$0xff]  ;;  %v3565_v45 = vld [vmem:[#allocation4 + $0x788] sm:$0xff] }
 0x5a8   :  { %v8174_v46 = vpack.c.bf16 %v3573_v52, %v3565_v45 }
 0x5a9   :  { %8153 = vmatpush1.bf16.msra.mxu0 %v8152_v44  ;;  %8217 = vmatpush1.bf16.msra.mxu1 %v8216_v48  ;;  %v3524_v44 = vld [vmem:[#allocation4 + $0x640] sm:$0xff]  ;;  %v3518_v48 = vld [vmem:[#allocation4 + $0x610] sm:$0xff] }
 0x5aa   :  { %8155 = vmatprep.subr.bf16.mxu0 %v8154_v4  ;;  %8219 = vmatprep.subr.bf16.mxu1 %v8218_v9  ;;  %v8164_v12 = vpack.c.bf16 %v3524_v44, %v3516_v47  ;;  %v8228_v51 = vpack.c.bf16 %v3526_v50, %v3518_v48  ;;  %v3541_v4 = vld [vmem:[#allocation4 + $0x6c8] sm:$0xff]  ;;  %v3532_v9 = vld [vmem:[#allocation4 + $0x680] sm:$0xff]  ;;  %v3567_v47 = vld [vmem:[#allocation4 + $0x798] sm:$0xff] }
 0x5ab   :  { %v8166_v5 = vpack.c.bf16 %v3541_v4, %v3533_v53  ;;  %v3575_v44 = vld [vmem:[#allocation4 + $0x7d8] sm:$0xff]  ;;  %v3572_v48 = vld [vmem:[#allocation4 + $0x7c0] sm:$0xff]  ;;  %v3566_v50 = vld [vmem:[#allocation4 + $0x790] sm:$0xff] }
 0x5ad   :  { %8157 = vmatpush1.bf16.msra.mxu0 %v8156_v3  ;;  %8221 = vmatpush1.bf16.msra.mxu1 %v8220_v10  ;;  %v3540_v3 = vld [vmem:[#allocation4 + $0x6c0] sm:$0xff]  ;;  %v3534_v10 = vld [vmem:[#allocation4 + $0x690] sm:$0xff] }
 0x5ae   :  { %8159 = vmatprep.subr.bf16.mxu0 %v8158_v22  ;;  %8223 = vmatprep.subr.bf16.mxu1 %v8222_v17  ;;  %v8168_v49 = vpack.c.bf16 %v3540_v3, %v3532_v9  ;;  %v8232_v21 = vpack.c.bf16 %v3542_v13, %v3534_v10  ;;  %v3557_v22 = vld [vmem:[#allocation4 + $0x748] sm:$0xff]  ;;  %v8234_v17 = vpack.c.bf16 %v3559_v26, %v3551_v39  ;;  %v3339_v3 = vld [vmem:[#allocation4 + $0x78] sm:$0xff] }
 0x5af   :  { %v8170_v30 = vpack.c.bf16 %v3557_v22, %v3549_v16 }
 0x5b1   :  { %8161 = vmatpush1.bf16.msra.mxu0 %v8160_v43  ;;  %8225 = vmatpush1.bf16.msra.mxu1 %v8224_v37  ;;  %v3548_v43 = vld [vmem:[#allocation4 + $0x700] sm:$0xff] }
 0x5b2   :  { %8163 = vmatprep.subr.bf16.mxu0 %v8162_v18  ;;  %8227 = vmatprep.subr.bf16.mxu1 %v8226_v60  ;;  %v8172_v37 = vpack.c.bf16 %v3556_v31, %v3548_v43  ;;  %v8236_v18 = vpack.c.bf16 %v3558_v41, %v3550_v35  ;;  %v3564_v60 = vld [vmem:[#allocation4 + $0x780] sm:$0xff] }
 0x5b3   :  { %v8176_v53 = vpack.c.bf16 %v3572_v48, %v3564_v60 }
 0x5b5   :  { %8165 = vmatpush1.bf16.msra.mxu0 %v8164_v12  ;;  %8229 = vmatpush1.bf16.msra.mxu1 %v8228_v51  ;;  %v8238_v12 = vpack.c.bf16 %v3575_v44, %v3567_v47  ;;  %v3574_v51 = vld [vmem:[#allocation4 + $0x7d0] sm:$0xff] }
 0x5b6   :  { %8167 = vmatprep.subr.bf16.mxu0 %v8166_v5  ;;  %8231 = vmatprep.subr.bf16.mxu1 %v8230_v2  ;;  %v8240_v4 = vpack.c.bf16 %v3574_v51, %v3566_v50  ;;  %v3337_v5 = vld [vmem:[#allocation4 + $0x68] sm:$0xff]  ;;  %v8306_v2 = vpack.c.bf16 %v3339_v3, %v3331_v8 }
 0x5b7   :  { %v8242_v9 = vpack.c.bf16 %v3337_v5, %v3329_v54 }
 0x5b9   :  { %8169 = vmatpush1.bf16.msra.mxu0 %v8168_v49  ;;  %8233 = vmatpush1.bf16.msra.mxu1 %v8232_v21  ;;  %v2674_v21 = vpop.permute.xlu0 %2673 }
 0x5ba   :  { %8171 = vmatprep.subr.bf16.mxu0 %v8170_v30  ;;  %8235 = vmatprep.subr.bf16.mxu1 %v8234_v17  ;;  %v2676_v22 = vmul.f32 %v2674_v21, %v9889_v29  ;;  %v2678_v39 = vmul.f32 %v2674_v21, %v9895_v32  ;;  %v2677_v26 = vmul.f32 %v2674_v21, %v9898_v33 }
 0x5bb   :  { %v2679_v30 = vmul.f32 %v2674_v21, %v9901_v34  ;;  %v2681_v5 = vmul.f32 %v2674_v21, %v9942_v62  ;;  %v2683_v8 = vmul.f32 %v2674_v21, %v9945_v0 }
 0x5bc   :  { %v2684_v17 = vadd.f32 %v2676_v22, %v9905_v36  ;;  %v2686_v43 = vadd.f32 %v2678_v39, %v9909_v38  ;;  %v2685_v35 = vadd.f32 %v2677_v26, %v9913_v40 }
 0x5bd   :  { %8173 = vmatpush1.bf16.msra.mxu0 %v8172_v37  ;;  %8237 = vmatpush1.bf16.msra.mxu1 %v8236_v18  ;;  %v2687_v41 = vadd.f32 %v2679_v30, %v9917_v42  ;;  %v2691_v22 = vadd.f32 %v2683_v8, %v9961_v14 }
 0x5be   :  { %8175 = vmatprep.subr.bf16.mxu0 %v8174_v46  ;;  %8239 = vmatprep.subr.bf16.mxu1 %v8238_v12 }
 0x5c1   :  { %8177 = vmatpush1.bf16.msra.mxu0 %v8176_v53  ;;  %8241 = vmatpush1.bf16.msra.mxu1 %v8240_v4  ;;  %v2680_v53 = vmul.f32 %v2674_v21, %v9936_v59  ;;  %v2682_v4 = vmul.f32 %v2674_v21, %v9939_v61 }
 0x5c2   :  { %8243 = vmatprep.subr.bf16.mxu0 %v8242_v9  ;;  %8307 = vmatprep.subr.bf16.mxu1 %v8306_v2 }
 0x5c3   :  { %v2688_v2 = vadd.f32 %v2680_v53, %v9949_v6 }
 0x617   :  { %v3014_v49 = vpop.f32.mrb[16].mxu0  ;;  %v3085_v10 = vpop.f32.mrb[16].mxu1 }
 0x618   :  { %v3016_v13 = vpop.f32.mrb[17].mxu0  ;;  %v3087_v16 = vpop.f32.mrb[17].mxu1  ;;  %v3232_v31 = vadd.f32 %v3014_v49, %v2684_v17  ;;  %v3234_v37 = vadd.f32 %v3085_v10, %v2686_v43  ;;  %v2690_v49 = vadd.f32 %v2682_v4, %v9952_v7 }
 0x619   :  { %v3233_v45 = vadd.f32 %v3016_v13, %v2685_v35  ;;  %v3235_v52 = vadd.f32 %v3087_v16, %v2687_v41  ;;  %v2689_v16 = vadd.f32 %v2681_v5, %v9957_v11 }
 0x61a   :  { %v6788_v18 = vmul.f32 -1.442695, %v3232_v31  ;;  %v6790_v46 = vmul.f32 -1.442695, %v3234_v37 }
 0x61b   :  { %v6789_v47 = vmul.f32 -1.442695, %v3233_v45  ;;  %v6791_v44 = vmul.f32 -1.442695, %v3235_v52 }
 0x61c   :  { %9531 = vpow2.f32 %v6788_v18 }
 0x61d   :  { %9533 = vpow2.f32 %v6790_v46 }
 0x61e   :  { %9535 = vpow2.f32 %v6789_v47 }
 0x61f   :  { %9537 = vpow2.f32 %v6791_v44 }
 0x626   :  { %v9532_v60 = vpop.eup %9531 }
 0x627   :  { %v9534_v12 = vpop.eup %9533  ;;  %v3246_v51 = vadd.f32 1.0, %v9532_v60 }
 0x628   :  { %v9536_v48 = vpop.eup %9535  ;;  %v3258_v54 = vadd.f32 1.0, %v9534_v12 }
 0x629   :  { %v9538_v50 = vpop.eup %9537  ;;  %v3247_v9 = vadd.f32 1.0, %v9536_v48  ;;  %9539 = vrcp.f32 %v3246_v51 }
 0x62a   :  { %v3259_v3 = vadd.f32 1.0, %v9538_v50  ;;  %9541 = vrcp.f32 %v3258_v54 }
 0x62b   :  { %9543 = vrcp.f32 %v3247_v9  ;;  %v3336_v9 = vld [vmem:[#allocation4 + $0x60] sm:$0xff] }
 0x62c   :  { %9545 = vrcp.f32 %v3259_v3  ;;  %v3330_v3 = vld [vmem:[#allocation4 + $0x30] sm:$0xff] }
 0x633   :  { %v9540_v37 = vpop.eup %9539 }
 0x634   :  { %v9542_v41 = vpop.eup %9541 }
 0x635   :  { %v9544_v45 = vpop.eup %9543  ;;  %v3278_v47 = vmul.f32 %v9542_v41, %v10095_v15  ;;  %v3328_v15 = vld [vmem:[#allocation4 + $0x20] sm:$0xff] }
 0x636   :  { %v9546_v52 = vpop.eup %9545 }
 0x637   :  { %v3279_v12 = vmul.f32 %v9546_v52, %v10097_v19  ;;  %v3338_v19 = vld [vmem:[#allocation4 + $0x70] sm:$0xff] }
 0x657   :  { %v3156_v10 = vpop.f32.mrb[18].mxu0  ;;  %v3227_v13 = vpop.f32.mrb[18].mxu1 }
 0x658   :  { %v3236_v39 = vadd.f32 %v3156_v10, %v2688_v2  ;;  %v3238_v26 = vadd.f32 %v3227_v13, %v2690_v49  ;;  %v3158_v30 = vpop.f32.mrb[19].mxu0  ;;  %v3229_v17 = vpop.f32.mrb[19].mxu1  ;;  %v3345_v10 = vld [vmem:[#allocation4 + $0xa8] sm:$0xff] }
 0x659   :  { %v3237_v21 = vadd.f32 %v3158_v30, %v2689_v16  ;;  %v3239_v43 = vadd.f32 %v3229_v17, %v2691_v22  ;;  %v3353_v16 = vld [vmem:[#allocation4 + $0xe8] sm:$0xff]  ;;  %v3347_v22 = vld [vmem:[#allocation4 + $0xb8] sm:$0xff]  ;;  %v8244_v30 = vpack.c.bf16 %v3336_v9, %v3328_v15  ;;  %v8308_v17 = vpack.c.bf16 %v3338_v19, %v3330_v3 }
 0x65a   :  { %9547 = vtanh.f32 %v3236_v39  ;;  %v6792_v31 = vmul.f32 -1.442695, %v3238_v26  ;;  %v3355_v39 = vld [vmem:[#allocation4 + $0xf8] sm:$0xff]  ;;  %v3377_v15 = vld [vmem:[#allocation4 + $0x1a8] sm:$0xff] }
 0x65b   :  { %9549 = vtanh.f32 %v3237_v21  ;;  %v6793_v35 = vmul.f32 -1.442695, %v3239_v43  ;;  %v3344_v21 = vld [vmem:[#allocation4 + $0xa0] sm:$0xff]  ;;  %v8310_v52 = vpack.c.bf16 %v3355_v39, %v3347_v22  ;;  %v3379_v9 = vld [vmem:[#allocation4 + $0x1b8] sm:$0xff]  ;;  %v3378_v39 = vld [vmem:[#allocation4 + $0x1b0] sm:$0xff] }
 0x65c   :  { %9551 = vpow2.f32 %v6792_v31  ;;  %v3352_v43 = vld [vmem:[#allocation4 + $0xe0] sm:$0xff]  ;;  %v3346_v31 = vld [vmem:[#allocation4 + $0xb0] sm:$0xff]  ;;  %v3387_v3 = vld [vmem:[#allocation4 + $0x1f8] sm:$0xff] }
 0x65d   :  { %9553 = vpow2.f32 %v6793_v35  ;;  %v3354_v35 = vld [vmem:[#allocation4 + $0xf0] sm:$0xff]  ;;  %v8318_v22 = vpack.c.bf16 %v3387_v3, %v3379_v9  ;;  %v3416_v9 = vld [vmem:[#allocation4 + $0x2e0] sm:$0xff] }
 0x664   :  { %v9548_v18 = vpop.eup %9547 }
 0x665   :  { %v9550_v46 = vpop.eup %9549  ;;  %v3280_v44 = vmul.f32 %v9548_v18, %v9540_v37  ;;  %v3361_v37 = vld [vmem:[#allocation4 + $0x128] sm:$0xff] }
 0x666   :  { %v9552_v60 = vpop.eup %9551  ;;  %v3281_v48 = vmul.f32 %v9550_v46, %v9544_v45  ;;  %v8246_v45 = vpack.c.bf16 %v3353_v16, %v3345_v10  ;;  %v3369_v18 = vld [vmem:[#allocation4 + $0x168] sm:$0xff]  ;;  %v3363_v46 = vld [vmem:[#allocation4 + $0x138] sm:$0xff]  ;;  %v3376_v10 = vld [vmem:[#allocation4 + $0x1a0] sm:$0xff] }
 0x667   :  { %v9554_v50 = vpop.eup %9553  ;;  %v10130_v51 = vadd.f32 %v3280_v44, %v3278_v47  ;;  %v3272_v53 = vadd.f32 1.0, %v9552_v60  ;;  %v3371_v47 = vld [vmem:[#allocation4 + $0x178] sm:$0xff]  ;;  %v8248_v44 = vpack.c.bf16 %v3352_v43, %v3344_v21  ;;  %v8312_v60 = vpack.c.bf16 %v3354_v35, %v3346_v31 }
 0x668   :  { %v10132_v4 = vadd.f32 %v3281_v48, %v3279_v12  ;;  %v3273_v54 = vadd.f32 1.0, %v9554_v50  ;;  %v3360_v12 = vld [vmem:[#allocation4 + $0x120] sm:$0xff]  ;;  %v8250_v50 = vpack.c.bf16 %v3369_v18, %v3361_v37  ;;  %v3395_v21 = vld [vmem:[#allocation4 + $0x238] sm:$0xff] }
 0x669   :  { %9555 = vtanh.f32 %v10130_v51  ;;  %v3368_v48 = vld [vmem:[#allocation4 + $0x160] sm:$0xff]  ;;  %v3403_v43 = vld [vmem:[#allocation4 + $0x278] sm:$0xff] }
 0x66a   :  { %9557 = vrcp.f32 %v3272_v53  ;;  %v8314_v53 = vpack.c.bf16 %v3371_v47, %v3363_v46  ;;  %v8252_v19 = vpack.c.bf16 %v3368_v48, %v3360_v12  ;;  %v8322_v18 = vpack.c.bf16 %v3403_v43, %v3395_v21  ;;  %v3400_v46 = vld [vmem:[#allocation4 + $0x260] sm:$0xff]  ;;  %v3394_v47 = vld [vmem:[#allocation4 + $0x230] sm:$0xff]  ;;  %v3409_v12 = vld [vmem:[#allocation4 + $0x2a8] sm:$0xff] }
 0x66b   :  { %9559 = vtanh.f32 %v10132_v4  ;;  %v3417_v48 = vld [vmem:[#allocation4 + $0x2e8] sm:$0xff] }
 0x66c   :  { %9561 = vrcp.f32 %v3273_v54  ;;  %v3362_v54 = vld [vmem:[#allocation4 + $0x130] sm:$0xff]  ;;  %v8262_v3 = vpack.c.bf16 %v3417_v48, %v3409_v12  ;;  %v3440_v48 = vld [vmem:[#allocation4 + $0x3a0] sm:$0xff] }
 0x673   :  { %v9556_v5 = vpop.eup %9555 }
 0x674   :  { %v9558_v8 = vpop.eup %9557 }
 0x675   :  { %v9560_v2 = vpop.eup %9559  ;;  %v10136_v49 = vmul.f32 %v9558_v8, %v9556_v5  ;;  %v3370_v5 = vld [vmem:[#allocation4 + $0x170] sm:$0xff]  ;;  %v3385_v8 = vld [vmem:[#allocation4 + $0x1e8] sm:$0xff] }
 0x676   :  { %v9562_v13 = vpop.eup %9561  ;;  %v8254_v16 = vpack.c.bf16 %v3385_v8, %v3377_v15  ;;  %v3408_v8 = vld [vmem:[#allocation4 + $0x2a0] sm:$0xff] }
 0x677   :  { %v3287_v26 = vmul.f32 %v9562_v13, %v9560_v2  ;;  %v8316_v2 = vpack.c.bf16 %v3370_v5, %v3362_v54  ;;  %v3384_v13 = vld [vmem:[#allocation4 + $0x1e0] sm:$0xff]  ;;  %v8264_v21 = vpack.c.bf16 %v3416_v9, %v3408_v8  ;;  %v3457_v8 = vld [vmem:[#allocation4 + $0x428] sm:$0xff] }
 0x678   :  { %v8256_v35 = vpack.c.bf16 %v3384_v13, %v3376_v10  ;;  %v3425_v10 = vld [vmem:[#allocation4 + $0x328] sm:$0xff] }
 0x679   :  { %3644 = vmatprep.mubr.f32.mxu0 %v3287_v26  ;;  %3715 = vmatprep.mubr.f32.mxu1 %v3287_v26  ;;  %v3290_v41 = vcombine.low %v10136_v49, %v3287_v26  ;;  %v3465_v9 = vld [vmem:[#allocation4 + $0x468] sm:$0xff] }
 0x67a   :  { %3645 = vmatmul.mubr.f32.vlgmr.msra.gmra.mrb[20].mxu0 %v10136_v49  ;;  %3716 = vmatmul.mubr.f32.vlgmr.msra.gmra.mrb[20].mxu1 %v10136_v49 }
 0x67b   :  { %6794 = vst.sshfl [vmem:[#allocation2 + $0x10] sm:$0x33 pattern:$0x76325410] %v3290_v41  ;;  %8245 = vmatpush1.bf16.msra.mxu0 %v8244_v30  ;;  %8309 = vmatpush1.bf16.msra.mxu1 %v8308_v17  ;;  %v3393_v30 = vld [vmem:[#allocation4 + $0x228] sm:$0xff]  ;;  %v3392_v41 = vld [vmem:[#allocation4 + $0x220] sm:$0xff] }
 0x67c   :  { %3786 = vmatprep.mubr.f32.mxu0 %v3287_v26  ;;  %3857 = vmatprep.mubr.f32.mxu1 %v3287_v26  ;;  %v3386_v26 = vld [vmem:[#allocation4 + $0x1f0] sm:$0xff]  ;;  %v3401_v17 = vld [vmem:[#allocation4 + $0x268] sm:$0xff]  ;;  %v8260_v54 = vpack.c.bf16 %v3400_v46, %v3392_v41 }
 0x67d   :  { %8247 = vmatprep.subr.bf16.mxu0 %v8246_v45  ;;  %8311 = vmatprep.subr.bf16.mxu1 %v8310_v52  ;;  %v8320_v37 = vpack.c.bf16 %v3386_v26, %v3378_v39  ;;  %v8258_v52 = vpack.c.bf16 %v3401_v17, %v3393_v30  ;;  %v3433_v39 = vld [vmem:[#allocation4 + $0x368] sm:$0xff]  ;;  %v3427_v26 = vld [vmem:[#allocation4 + $0x338] sm:$0xff] }
 0x67e   :  { %v3435_v30 = vld [vmem:[#allocation4 + $0x378] sm:$0xff]  ;;  %v3449_v46 = vld [vmem:[#allocation4 + $0x3e8] sm:$0xff] }
 0x67f   :  { %8249 = vmatpush1.bf16.msra.mxu0 %v8248_v44  ;;  %8313 = vmatpush1.bf16.msra.mxu1 %v8312_v60  ;;  %v3402_v44 = vld [vmem:[#allocation4 + $0x270] sm:$0xff]  ;;  %v8330_v41 = vpack.c.bf16 %v3435_v30, %v3427_v26 }
 0x680   :  { %8251 = vmatprep.subr.bf16.mxu0 %v8250_v50  ;;  %8315 = vmatprep.subr.bf16.mxu1 %v8314_v53  ;;  %v3411_v50 = vld [vmem:[#allocation4 + $0x2b8] sm:$0xff]  ;;  %v8324_v5 = vpack.c.bf16 %v3402_v44, %v3394_v47  ;;  %v3458_v26 = vld [vmem:[#allocation4 + $0x430] sm:$0xff] }
 0x681   :  { %v3419_v53 = vld [vmem:[#allocation4 + $0x2f8] sm:$0xff]  ;;  %v3466_v30 = vld [vmem:[#allocation4 + $0x470] sm:$0xff] }
 0x682   :  { %v6461_v31 = vld [vmem:[#allocation2 + $0x10] sm:$0xf]  ;;  %v3443_v47 = vld [vmem:[#allocation4 + $0x3b8] sm:$0xff] }
 0x683   :  { %8253 = vmatpush1.bf16.msra.mxu0 %v8252_v19  ;;  %8317 = vmatpush1.bf16.msra.mxu1 %v8316_v2  ;;  %v6490_v45 = vmul.f32 %v9987_v20, %v6461_v31  ;;  %v3410_v19 = vld [vmem:[#allocation4 + $0x2b0] sm:$0xff]  ;;  %v3424_v31 = vld [vmem:[#allocation4 + $0x320] sm:$0xff]  ;;  %v3451_v44 = vld [vmem:[#allocation4 + $0x3f8] sm:$0xff] }
 0x684   :  { %8255 = vmatprep.subr.bf16.mxu0 %v8254_v16  ;;  %8319 = vmatprep.subr.bf16.mxu1 %v8318_v22  ;;  %v3418_v2 = vld [vmem:[#allocation4 + $0x2f0] sm:$0xff]  ;;  %v8326_v22 = vpack.c.bf16 %v3419_v53, %v3411_v50  ;;  %v3448_v50 = vld [vmem:[#allocation4 + $0x3e0] sm:$0xff] }
 0x685   :  { %v6544_v60 = vrot.slane %v6490_v45, %v9984_v63  ;;  %v8328_v43 = vpack.c.bf16 %v3418_v2, %v3410_v19  ;;  %v3426_v45 = vld [vmem:[#allocation4 + $0x330] sm:$0xff]  ;;  %v3467_v19 = vld [vmem:[#allocation4 + $0x478] sm:$0xff]  ;;  %v8272_v2 = vpack.c.bf16 %v3448_v50, %v3440_v48 }
 0x686   :  { %v3499_v48 = vld [vmem:[#allocation4 + $0x578] sm:$0xff] }
 0x687   :  { %8257 = vmatpush1.bf16.msra.mxu0 %v8256_v35  ;;  %8321 = vmatpush1.bf16.msra.mxu1 %v8320_v37  ;;  %v6545_v15 = vcombine.high %v6544_v60, %v6544_v60  ;;  %v6627_v13 = vsel %vm6606_vm0, %v6544_v60, 0.0  ;;  %v3432_v35 = vld [vmem:[#allocation4 + $0x360] sm:$0xff]  ;;  %v8266_v37 = vpack.c.bf16 %v3433_v39, %v3425_v10 }
 0x688   :  { %8259 = vmatprep.subr.bf16.mxu0 %v8258_v52  ;;  %8323 = vmatprep.subr.bf16.mxu1 %v8322_v18  ;;  %v3434_v52 = vld [vmem:[#allocation4 + $0x370] sm:$0xff]  ;;  %v3441_v18 = vld [vmem:[#allocation4 + $0x3a8] sm:$0xff]  ;;  %v8268_v60 = vpack.c.bf16 %v3432_v35, %v3424_v31  ;;  %v3483_v31 = vld [vmem:[#allocation4 + $0x4f8] sm:$0xff] }
 0x689   :  { %v6628_v16 = vsel %vm6606_vm0, %v6545_v15, 0.0  ;;  %v8332_v12 = vpack.c.bf16 %v3434_v52, %v3426_v45  ;;  %v8270_v53 = vpack.c.bf16 %v3449_v46, %v3441_v18  ;;  %v3450_v15 = vld [vmem:[#allocation4 + $0x3f0] sm:$0xff]  ;;  %v3480_v45 = vld [vmem:[#allocation4 + $0x4e0] sm:$0xff] }
 0x68a   :  { %v6629_v17 = vadd.f32 %v6628_v16, %v6627_v13  ;;  %v3456_v13 = vld [vmem:[#allocation4 + $0x420] sm:$0xff]  ;;  %v3474_v46 = vld [vmem:[#allocation4 + $0x4b0] sm:$0xff] }
 0x68b   :  { %8261 = vmatpush1.bf16.msra.mxu0 %v8260_v54  ;;  %8325 = vmatpush1.bf16.msra.mxu1 %v8324_v5  ;;  %v8334_v54 = vpack.c.bf16 %v3451_v44, %v3443_v47  ;;  %v3442_v5 = vld [vmem:[#allocation4 + $0x3b0] sm:$0xff]  ;;  %v3464_v16 = vld [vmem:[#allocation4 + $0x460] sm:$0xff]  ;;  %v3489_v44 = vld [vmem:[#allocation4 + $0x528] sm:$0xff] }
 0x68c   :  { %6630 = vadd.xlane.f32.xlu1 %v6629_v17  ;;  %8263 = vmatprep.subr.bf16.mxu0 %v8262_v3  ;;  %v3459_v3 = vld [vmem:[#allocation4 + $0x438] sm:$0xff]  ;;  %v8336_v10 = vpack.c.bf16 %v3450_v15, %v3442_v5  ;;  %v3473_v17 = vld [vmem:[#allocation4 + $0x4a8] sm:$0xff]  ;;  %v8276_v35 = vpack.c.bf16 %v3464_v16, %v3456_v13  ;;  %v3482_v47 = vld [vmem:[#allocation4 + $0x4f0] sm:$0xff] }
 0x68d   :  { %8327 = vmatprep.subr.bf16.mxu1 %v8326_v22  ;;  %v8274_v22 = vpack.c.bf16 %v3465_v9, %v3457_v8  ;;  %v8338_v39 = vpack.c.bf16 %v3467_v19, %v3459_v3  ;;  %v3496_v5 = vld [vmem:[#allocation4 + $0x560] sm:$0xff]  ;;  %v3490_v9 = vld [vmem:[#allocation4 + $0x530] sm:$0xff]  ;;  %v3505_v19 = vld [vmem:[#allocation4 + $0x5a8] sm:$0xff] }
 0x68e   :  { %v3498_v3 = vld [vmem:[#allocation4 + $0x570] sm:$0xff]  ;;  %v3515_v13 = vld [vmem:[#allocation4 + $0x5f8] sm:$0xff] }
 0x68f   :  { %8265 = vmatpush1.bf16.msra.mxu0 %v8264_v21  ;;  %8329 = vmatpush1.bf16.msra.mxu1 %v8328_v43  ;;  %v3481_v21 = vld [vmem:[#allocation4 + $0x4e8] sm:$0xff]  ;;  %v3475_v43 = vld [vmem:[#allocation4 + $0x4b8] sm:$0xff] }
 0x690   :  { %8267 = vmatprep.subr.bf16.mxu0 %v8266_v37  ;;  %8331 = vmatprep.subr.bf16.mxu1 %v8330_v41  ;;  %v8340_v37 = vpack.c.bf16 %v3466_v30, %v3458_v26  ;;  %v3472_v41 = vld [vmem:[#allocation4 + $0x4a0] sm:$0xff]  ;;  %v8278_v52 = vpack.c.bf16 %v3481_v21, %v3473_v17  ;;  %v8342_v18 = vpack.c.bf16 %v3483_v31, %v3475_v43  ;;  %v3506_v21 = vld [vmem:[#allocation4 + $0x5b0] sm:$0xff]  ;;  %v3521_v31 = vld [vmem:[#allocation4 + $0x628] sm:$0xff] }
 0x691   :  { %v8280_v50 = vpack.c.bf16 %v3480_v45, %v3472_v41  ;;  %v3512_v26 = vld [vmem:[#allocation4 + $0x5e0] sm:$0xff]  ;;  %v3514_v43 = vld [vmem:[#allocation4 + $0x5f0] sm:$0xff]  ;;  %v3531_v41 = vld [vmem:[#allocation4 + $0x678] sm:$0xff] }
 0x693   :  { %8269 = vmatpush1.bf16.msra.mxu0 %v8268_v60  ;;  %8333 = vmatpush1.bf16.msra.mxu1 %v8332_v12  ;;  %v3497_v60 = vld [vmem:[#allocation4 + $0x568] sm:$0xff]  ;;  %v3491_v12 = vld [vmem:[#allocation4 + $0x538] sm:$0xff] }
 0x694   :  { %8271 = vmatprep.subr.bf16.mxu0 %v8270_v53  ;;  %8335 = vmatprep.subr.bf16.mxu1 %v8334_v54  ;;  %v8344_v53 = vpack.c.bf16 %v3482_v47, %v3474_v46  ;;  %v3488_v54 = vld [vmem:[#allocation4 + $0x520] sm:$0xff]  ;;  %v8282_v15 = vpack.c.bf16 %v3497_v60, %v3489_v44  ;;  %v8346_v8 = vpack.c.bf16 %v3499_v48, %v3491_v12  ;;  %v3522_v60 = vld [vmem:[#allocation4 + $0x630] sm:$0xff]  ;;  %v3537_v48 = vld [vmem:[#allocation4 + $0x6a8] sm:$0xff] }
 0x695   :  { %v8284_v16 = vpack.c.bf16 %v3496_v5, %v3488_v54  ;;  %v3528_v46 = vld [vmem:[#allocation4 + $0x660] sm:$0xff]  ;;  %v3530_v12 = vld [vmem:[#allocation4 + $0x670] sm:$0xff]  ;;  %v3547_v54 = vld [vmem:[#allocation4 + $0x6f8] sm:$0xff] }
 0x697   :  { %8273 = vmatpush1.bf16.msra.mxu0 %v8272_v2  ;;  %8337 = vmatpush1.bf16.msra.mxu1 %v8336_v10  ;;  %v3513_v2 = vld [vmem:[#allocation4 + $0x5e8] sm:$0xff]  ;;  %v3507_v10 = vld [vmem:[#allocation4 + $0x5b8] sm:$0xff] }
 0x698   :  { %8275 = vmatprep.subr.bf16.mxu0 %v8274_v22  ;;  %8339 = vmatprep.subr.bf16.mxu1 %v8338_v39  ;;  %v8348_v22 = vpack.c.bf16 %v3498_v3, %v3490_v9  ;;  %v3504_v39 = vld [vmem:[#allocation4 + $0x5a0] sm:$0xff]  ;;  %v8286_v30 = vpack.c.bf16 %v3513_v2, %v3505_v19  ;;  %v8350_v17 = vpack.c.bf16 %v3515_v13, %v3507_v10  ;;  %v3538_v2 = vld [vmem:[#allocation4 + $0x6b0] sm:$0xff]  ;;  %v3553_v13 = vld [vmem:[#allocation4 + $0x728] sm:$0xff] }
 0x699   :  { %v8288_v45 = vpack.c.bf16 %v3512_v26, %v3504_v39  ;;  %v3544_v9 = vld [vmem:[#allocation4 + $0x6e0] sm:$0xff]  ;;  %v3546_v10 = vld [vmem:[#allocation4 + $0x6f0] sm:$0xff]  ;;  %v3563_v39 = vld [vmem:[#allocation4 + $0x778] sm:$0xff] }
 0x69b   :  { %8277 = vmatpush1.bf16.msra.mxu0 %v8276_v35  ;;  %8341 = vmatpush1.bf16.msra.mxu1 %v8340_v37  ;;  %v3529_v35 = vld [vmem:[#allocation4 + $0x668] sm:$0xff]  ;;  %v3523_v37 = vld [vmem:[#allocation4 + $0x638] sm:$0xff] }
 0x69c   :  { %8279 = vmatprep.subr.bf16.mxu0 %v8278_v52  ;;  %8343 = vmatprep.subr.bf16.mxu1 %v8342_v18  ;;  %v8352_v52 = vpack.c.bf16 %v3514_v43, %v3506_v21  ;;  %v3520_v18 = vld [vmem:[#allocation4 + $0x620] sm:$0xff]  ;;  %v8290_v47 = vpack.c.bf16 %v3529_v35, %v3521_v31  ;;  %v8354_v44 = vpack.c.bf16 %v3531_v41, %v3523_v37  ;;  %v3554_v35 = vld [vmem:[#allocation4 + $0x730] sm:$0xff]  ;;  %v3569_v41 = vld [vmem:[#allocation4 + $0x7a8] sm:$0xff] }
 0x69d   :  { %v8292_v5 = vpack.c.bf16 %v3528_v46, %v3520_v18  ;;  %v3560_v21 = vld [vmem:[#allocation4 + $0x760] sm:$0xff]  ;;  %v3562_v37 = vld [vmem:[#allocation4 + $0x770] sm:$0xff]  ;;  %v3579_v18 = vld [vmem:[#allocation4 + $0x7f8] sm:$0xff] }
 0x69f   :  { %8281 = vmatpush1.bf16.msra.mxu0 %v8280_v50  ;;  %8345 = vmatpush1.bf16.msra.mxu1 %v8344_v53  ;;  %v3545_v50 = vld [vmem:[#allocation4 + $0x6e8] sm:$0xff]  ;;  %v3539_v53 = vld [vmem:[#allocation4 + $0x6b8] sm:$0xff] }
 0x6a0   :  { %8283 = vmatprep.subr.bf16.mxu0 %v8282_v15  ;;  %8347 = vmatprep.subr.bf16.mxu1 %v8346_v8  ;;  %v8356_v15 = vpack.c.bf16 %v3530_v12, %v3522_v60  ;;  %v3536_v8 = vld [vmem:[#allocation4 + $0x6a0] sm:$0xff]  ;;  %v8294_v3 = vpack.c.bf16 %v3545_v50, %v3537_v48  ;;  %v8358_v19 = vpack.c.bf16 %v3547_v54, %v3539_v53  ;;  %v3570_v50 = vld [vmem:[#allocation4 + $0x7b0] sm:$0xff] }
 0x6a1   :  { %v8296_v26 = vpack.c.bf16 %v3544_v9, %v3536_v8  ;;  %v3576_v48 = vld [vmem:[#allocation4 + $0x7e0] sm:$0xff]  ;;  %v3578_v53 = vld [vmem:[#allocation4 + $0x7f0] sm:$0xff]  ;;  %v3965_v8 = vld [vmem:[#allocation4 + $0x48] sm:$0xff] }
 0x6a2   :  { %v3959_v9 = vld [vmem:[#allocation4 + $0x18] sm:$0xff] }
 0x6a3   :  { %8285 = vmatpush1.bf16.msra.mxu0 %v8284_v16  ;;  %8349 = vmatpush1.bf16.msra.mxu1 %v8348_v22  ;;  %v3561_v16 = vld [vmem:[#allocation4 + $0x768] sm:$0xff]  ;;  %v3555_v22 = vld [vmem:[#allocation4 + $0x738] sm:$0xff] }
 0x6a4   :  { %8287 = vmatprep.subr.bf16.mxu0 %v8286_v30  ;;  %8351 = vmatprep.subr.bf16.mxu1 %v8350_v17  ;;  %v8360_v30 = vpack.c.bf16 %v3546_v10, %v3538_v2  ;;  %v3552_v17 = vld [vmem:[#allocation4 + $0x720] sm:$0xff]  ;;  %v8298_v43 = vpack.c.bf16 %v3561_v16, %v3553_v13  ;;  %v8362_v31 = vpack.c.bf16 %v3563_v39, %v3555_v22  ;;  %v3958_v22 = vld [vmem:[#allocation4 + $0x10] sm:$0xff] }
 0x6a5   :  { %v8300_v46 = vpack.c.bf16 %v3560_v21, %v3552_v17  ;;  %v3956_v2 = vld [vmem:[#allocation4] sm:$0xff]  ;;  %v3966_v39 = vld [vmem:[#allocation4 + $0x50] sm:$0xff]  ;;  %v3981_v17 = vld [vmem:[#allocation4 + $0xc8] sm:$0xff] }
 0x6a6   :  { %v3964_v10 = vld [vmem:[#allocation4 + $0x40] sm:$0xff]  ;;  %v3975_v21 = vld [vmem:[#allocation4 + $0x98] sm:$0xff] }
 0x6a7   :  { %8289 = vmatpush1.bf16.msra.mxu0 %v8288_v45  ;;  %8353 = vmatpush1.bf16.msra.mxu1 %v8352_v52  ;;  %v3577_v45 = vld [vmem:[#allocation4 + $0x7e8] sm:$0xff]  ;;  %v3571_v52 = vld [vmem:[#allocation4 + $0x7b8] sm:$0xff]  ;;  %v8372_v16 = vpack.c.bf16 %v3964_v10, %v3956_v2 }
 0x6a8   :  { %8291 = vmatprep.subr.bf16.mxu0 %v8290_v47  ;;  %8355 = vmatprep.subr.bf16.mxu1 %v8354_v44  ;;  %v8364_v47 = vpack.c.bf16 %v3562_v37, %v3554_v35  ;;  %v3568_v44 = vld [vmem:[#allocation4 + $0x7a0] sm:$0xff]  ;;  %v8302_v60 = vpack.c.bf16 %v3577_v45, %v3569_v41  ;;  %v8366_v12 = vpack.c.bf16 %v3579_v18, %v3571_v52  ;;  %v3974_v41 = vld [vmem:[#allocation4 + $0x90] sm:$0xff]  ;;  %v3989_v18 = vld [vmem:[#allocation4 + $0x108] sm:$0xff] }
 0x6a9   :  { %v8304_v54 = vpack.c.bf16 %v3576_v48, %v3568_v44  ;;  %v3972_v35 = vld [vmem:[#allocation4 + $0x80] sm:$0xff]  ;;  %v3982_v52 = vld [vmem:[#allocation4 + $0xd0] sm:$0xff]  ;;  %v4015_v10 = vld [vmem:[#allocation4 + $0x1d8] sm:$0xff] }
 0x6aa   :  { %v3980_v37 = vld [vmem:[#allocation4 + $0xc0] sm:$0xff] }
 0x6ab   :  { %8293 = vmatpush1.bf16.msra.mxu0 %v8292_v5  ;;  %8357 = vmatpush1.bf16.msra.mxu1 %v8356_v15  ;;  %v8368_v5 = vpack.c.bf16 %v3578_v53, %v3570_v50  ;;  %v3957_v15 = vld [vmem:[#allocation4 + $0x8] sm:$0xff]  ;;  %v8376_v45 = vpack.c.bf16 %v3980_v37, %v3972_v35  ;;  %v3988_v48 = vld [vmem:[#allocation4 + $0x100] sm:$0xff] }
 0x6ac   :  { %8295 = vmatprep.subr.bf16.mxu0 %v8294_v3  ;;  %8359 = vmatprep.subr.bf16.mxu1 %v8358_v19  ;;  %v8370_v3 = vpack.c.bf16 %v3965_v8, %v3957_v15  ;;  %v3967_v19 = vld [vmem:[#allocation4 + $0x58] sm:$0xff]  ;;  %v3996_v53 = vld [vmem:[#allocation4 + $0x140] sm:$0xff]  ;;  %v4005_v8 = vld [vmem:[#allocation4 + $0x188] sm:$0xff] }
 0x6ad   :  { %v8434_v13 = vpack.c.bf16 %v3967_v19, %v3959_v9  ;;  %v8380_v15 = vpack.c.bf16 %v3996_v53, %v3988_v48  ;;  %v4013_v9 = vld [vmem:[#allocation4 + $0x1c8] sm:$0xff]  ;;  %v4020_v37 = vld [vmem:[#allocation4 + $0x200] sm:$0xff] }
 0x6ae   :  { %v8382_v2 = vpack.c.bf16 %v4013_v9, %v4005_v8  ;;  %v4036_v53 = vld [vmem:[#allocation4 + $0x280] sm:$0xff]  ;;  %v4046_v8 = vld [vmem:[#allocation4 + $0x2d0] sm:$0xff]  ;;  %v4053_v9 = vld [vmem:[#allocation4 + $0x308] sm:$0xff] }
 0x6af   :  { %8297 = vmatpush1.bf16.msra.mxu0 %v8296_v26  ;;  %8361 = vmatpush1.bf16.msra.mxu1 %v8360_v30  ;;  %v3973_v26 = vld [vmem:[#allocation4 + $0x88] sm:$0xff]  ;;  %v8436_v30 = vpack.c.bf16 %v3966_v39, %v3958_v22  ;;  %v4006_v39 = vld [vmem:[#allocation4 + $0x190] sm:$0xff] }
 0x6b0   :  { %8299 = vmatprep.subr.bf16.mxu0 %v8298_v43  ;;  %8363 = vmatprep.subr.bf16.mxu1 %v8362_v31  ;;  %v3983_v43 = vld [vmem:[#allocation4 + $0xd8] sm:$0xff] }
 0x6b1   :  { %v8438_v31 = vpack.c.bf16 %v3983_v43, %v3975_v21  ;;  %v4023_v21 = vld [vmem:[#allocation4 + $0x218] sm:$0xff] }
 0x6b2   :  { %v4031_v43 = vld [vmem:[#allocation4 + $0x258] sm:$0xff] }
 0x6b3   :  { %8301 = vmatpush1.bf16.msra.mxu0 %v8300_v46  ;;  %8365 = vmatpush1.bf16.msra.mxu1 %v8364_v47  ;;  %v3997_v46 = vld [vmem:[#allocation4 + $0x148] sm:$0xff]  ;;  %v8440_v47 = vpack.c.bf16 %v3982_v52, %v3974_v41  ;;  %v4028_v41 = vld [vmem:[#allocation4 + $0x240] sm:$0xff]  ;;  %v8450_v52 = vpack.c.bf16 %v4031_v43, %v4023_v21 }
 0x6b4   :  { %8303 = vmatprep.subr.bf16.mxu0 %v8302_v60  ;;  %8367 = vmatprep.subr.bf16.mxu1 %v8366_v12  ;;  %v8378_v44 = vpack.c.bf16 %v3997_v46, %v3989_v18  ;;  %v3991_v60 = vld [vmem:[#allocation4 + $0x118] sm:$0xff]  ;;  %v4030_v18 = vld [vmem:[#allocation4 + $0x250] sm:$0xff]  ;;  %v4037_v46 = vld [vmem:[#allocation4 + $0x288] sm:$0xff] }
 0x6b5   :  { %v3999_v12 = vld [vmem:[#allocation4 + $0x158] sm:$0xff]  ;;  %v4069_v21 = vld [vmem:[#allocation4 + $0x388] sm:$0xff] }
 0x6b6   :  { %v8442_v50 = vpack.c.bf16 %v3999_v12, %v3991_v60  ;;  %v4047_v60 = vld [vmem:[#allocation4 + $0x2d8] sm:$0xff]  ;;  %v8388_v12 = vpack.c.bf16 %v4028_v41, %v4020_v37  ;;  %v4077_v43 = vld [vmem:[#allocation4 + $0x3c8] sm:$0xff] }
 0x6b7   :  { %8305 = vmatpush1.bf16.msra.mxu0 %v8304_v54  ;;  %8369 = vmatpush1.bf16.msra.mxu1 %v8368_v5  ;;  %v3990_v54 = vld [vmem:[#allocation4 + $0x110] sm:$0xff]  ;;  %v8398_v41 = vpack.c.bf16 %v4077_v43, %v4069_v21 }
 0x6b8   :  { %8371 = vmatprep.subr.bf16.mxu0 %v8370_v3  ;;  %8435 = vmatprep.subr.bf16.mxu1 %v8434_v13  ;;  %v3998_v5 = vld [vmem:[#allocation4 + $0x150] sm:$0xff]  ;;  %v4007_v3 = vld [vmem:[#allocation4 + $0x198] sm:$0xff]  ;;  %v4004_v13 = vld [vmem:[#allocation4 + $0x180] sm:$0xff] }
 0x6b9   :  { %v8444_v19 = vpack.c.bf16 %v3998_v5, %v3990_v54  ;;  %v8446_v22 = vpack.c.bf16 %v4015_v10, %v4007_v3  ;;  %v4044_v54 = vld [vmem:[#allocation4 + $0x2c0] sm:$0xff]  ;;  %v4038_v5 = vld [vmem:[#allocation4 + $0x290] sm:$0xff]  ;;  %v4061_v3 = vld [vmem:[#allocation4 + $0x348] sm:$0xff] }
 0x6ba   :  { %3787 = vmatmul.mubr.f32.vlgmr.msra.gmra.mrb[22].mxu0 %v10136_v49  ;;  %3858 = vmatmul.mubr.f32.vlgmr.msra.gmra.mrb[22].mxu1 %v10136_v49  ;;  %v8374_v49 = vpack.c.bf16 %v3981_v17, %v3973_v26  ;;  %v4014_v26 = vld [vmem:[#allocation4 + $0x1d0] sm:$0xff]  ;;  %v4029_v17 = vld [vmem:[#allocation4 + $0x248] sm:$0xff]  ;;  %v8392_v10 = vpack.c.bf16 %v4044_v54, %v4036_v53  ;;  %v4095_v54 = vld [vmem:[#allocation4 + $0x458] sm:$0xff] }
 0x6bb   :  { %8373 = vmatpush1.bf16.msra.mxu0 %v8372_v16  ;;  %8437 = vmatpush1.bf16.msra.mxu1 %v8436_v30  ;;  %v4012_v16 = vld [vmem:[#allocation4 + $0x1c0] sm:$0xff]  ;;  %v4021_v30 = vld [vmem:[#allocation4 + $0x208] sm:$0xff]  ;;  %v4102_v43 = vld [vmem:[#allocation4 + $0x490] sm:$0xff] }
 0x6bc   :  { %8375 = vmatprep.subr.bf16.mxu0 %v8374_v49  ;;  %8439 = vmatprep.subr.bf16.mxu1 %v8438_v31  ;;  %v8384_v49 = vpack.c.bf16 %v4012_v16, %v4004_v13  ;;  %v8448_v31 = vpack.c.bf16 %v4014_v26, %v4006_v39  ;;  %v8386_v35 = vpack.c.bf16 %v4029_v17, %v4021_v30  ;;  %v4060_v39 = vld [vmem:[#allocation4 + $0x340] sm:$0xff]  ;;  %v4054_v26 = vld [vmem:[#allocation4 + $0x310] sm:$0xff] }
 0x6bd   :  { %v8456_v13 = vpack.c.bf16 %v4046_v8, %v4038_v5  ;;  %v8394_v16 = vpack.c.bf16 %v4061_v3, %v4053_v9  ;;  %v4062_v17 = vld [vmem:[#allocation4 + $0x350] sm:$0xff]  ;;  %v4092_v8 = vld [vmem:[#allocation4 + $0x440] sm:$0xff] }
 0x6be   :  { %v8460_v37 = vpack.c.bf16 %v4062_v17, %v4054_v26  ;;  %v4086_v9 = vld [vmem:[#allocation4 + $0x410] sm:$0xff]  ;;  %v4100_v26 = vld [vmem:[#allocation4 + $0x480] sm:$0xff] }
 0x6bf   :  { %8377 = vmatpush1.bf16.msra.mxu0 %v8376_v45  ;;  %8441 = vmatpush1.bf16.msra.mxu1 %v8440_v47  ;;  %v4022_v45 = vld [vmem:[#allocation4 + $0x210] sm:$0xff]  ;;  %v4045_v47 = vld [vmem:[#allocation4 + $0x2c8] sm:$0xff] }
 0x6c0   :  { %8379 = vmatprep.subr.bf16.mxu0 %v8378_v44  ;;  %8443 = vmatprep.subr.bf16.mxu1 %v8442_v50  ;;  %v4039_v44 = vld [vmem:[#allocation4 + $0x298] sm:$0xff]  ;;  %v8452_v48 = vpack.c.bf16 %v4030_v18, %v4022_v45  ;;  %v8390_v50 = vpack.c.bf16 %v4045_v47, %v4037_v46  ;;  %v4068_v45 = vld [vmem:[#allocation4 + $0x380] sm:$0xff]  ;;  %v4070_v46 = vld [vmem:[#allocation4 + $0x390] sm:$0xff] }
 0x6c1   :  { %v4078_v47 = vld [vmem:[#allocation4 + $0x3d0] sm:$0xff] }
 0x6c3   :  { %8381 = vmatpush1.bf16.msra.mxu0 %v8380_v15  ;;  %8445 = vmatpush1.bf16.msra.mxu1 %v8444_v19  ;;  %v8454_v15 = vpack.c.bf16 %v4047_v60, %v4039_v44  ;;  %v4055_v19 = vld [vmem:[#allocation4 + $0x318] sm:$0xff]  ;;  %v8464_v60 = vpack.c.bf16 %v4078_v47, %v4070_v46  ;;  %v4124_v46 = vld [vmem:[#allocation4 + $0x540] sm:$0xff] }
 0x6c4   :  { %8383 = vmatprep.subr.bf16.mxu0 %v8382_v2  ;;  %8447 = vmatprep.subr.bf16.mxu1 %v8446_v22  ;;  %v4063_v2 = vld [vmem:[#allocation4 + $0x358] sm:$0xff]  ;;  %v4052_v22 = vld [vmem:[#allocation4 + $0x300] sm:$0xff] }
 0x6c5   :  { %v8458_v30 = vpack.c.bf16 %v4063_v2, %v4055_v19  ;;  %v4094_v19 = vld [vmem:[#allocation4 + $0x450] sm:$0xff] }
 0x6c6   :  { %v8468_v2 = vpack.c.bf16 %v4094_v19, %v4086_v9  ;;  %v4140_v9 = vld [vmem:[#allocation4 + $0x5c0] sm:$0xff] }
 0x6c7   :  { %8385 = vmatpush1.bf16.msra.mxu0 %v8384_v49  ;;  %8449 = vmatpush1.bf16.msra.mxu1 %v8448_v31  ;;  %v4071_v49 = vld [vmem:[#allocation4 + $0x398] sm:$0xff] }
 0x6c8   :  { %8387 = vmatprep.subr.bf16.mxu0 %v8386_v35  ;;  %8451 = vmatprep.subr.bf16.mxu1 %v8450_v52  ;;  %v4079_v31 = vld [vmem:[#allocation4 + $0x3d8] sm:$0xff]  ;;  %v8396_v35 = vpack.c.bf16 %v4060_v39, %v4052_v22  ;;  %v4076_v52 = vld [vmem:[#allocation4 + $0x3c0] sm:$0xff] }
 0x6c9   :  { %v8462_v18 = vpack.c.bf16 %v4079_v31, %v4071_v49  ;;  %v8400_v44 = vpack.c.bf16 %v4076_v52, %v4068_v45  ;;  %v4111_v39 = vld [vmem:[#allocation4 + $0x4d8] sm:$0xff]  ;;  %v4110_v49 = vld [vmem:[#allocation4 + $0x4d0] sm:$0xff] }
 0x6ca   :  { %v8472_v31 = vpack.c.bf16 %v4110_v49, %v4102_v43  ;;  %v4127_v52 = vld [vmem:[#allocation4 + $0x558] sm:$0xff] }
 0x6cb   :  { %8389 = vmatpush1.bf16.msra.mxu0 %v8388_v12  ;;  %8453 = vmatpush1.bf16.msra.mxu1 %v8452_v48  ;;  %v4085_v12 = vld [vmem:[#allocation4 + $0x408] sm:$0xff] }
 0x6cc   :  { %8391 = vmatprep.subr.bf16.mxu0 %v8390_v50  ;;  %8455 = vmatprep.subr.bf16.mxu1 %v8454_v15  ;;  %v4093_v48 = vld [vmem:[#allocation4 + $0x448] sm:$0xff]  ;;  %v4087_v50 = vld [vmem:[#allocation4 + $0x418] sm:$0xff]  ;;  %v4084_v15 = vld [vmem:[#allocation4 + $0x400] sm:$0xff] }
 0x6cd   :  { %v8402_v53 = vpack.c.bf16 %v4093_v48, %v4085_v12  ;;  %v8466_v5 = vpack.c.bf16 %v4095_v54, %v4087_v50  ;;  %v8404_v3 = vpack.c.bf16 %v4092_v8, %v4084_v15  ;;  %v4126_v12 = vld [vmem:[#allocation4 + $0x550] sm:$0xff]  ;;  %v4133_v50 = vld [vmem:[#allocation4 + $0x588] sm:$0xff]  ;;  %v4135_v54 = vld [vmem:[#allocation4 + $0x598] sm:$0xff] }
 0x6ce   :  { %v4143_v15 = vld [vmem:[#allocation4 + $0x5d8] sm:$0xff]  ;;  %v4132_v8 = vld [vmem:[#allocation4 + $0x580] sm:$0xff] }
 0x6cf   :  { %8393 = vmatpush1.bf16.msra.mxu0 %v8392_v10  ;;  %8457 = vmatpush1.bf16.msra.mxu1 %v8456_v13  ;;  %v4101_v10 = vld [vmem:[#allocation4 + $0x488] sm:$0xff]  ;;  %v8416_v19 = vpack.c.bf16 %v4140_v9, %v4132_v8  ;;  %v4191_v8 = vld [vmem:[#allocation4 + $0x758] sm:$0xff] }
 0x6d0   :  { %8395 = vmatprep.subr.bf16.mxu0 %v8394_v16  ;;  %8459 = vmatprep.subr.bf16.mxu1 %v8458_v30  ;;  %v4109_v13 = vld [vmem:[#allocation4 + $0x4c8] sm:$0xff]  ;;  %v4103_v16 = vld [vmem:[#allocation4 + $0x498] sm:$0xff]  ;;  %v4108_v30 = vld [vmem:[#allocation4 + $0x4c0] sm:$0xff] }
 0x6d1   :  { %v8406_v22 = vpack.c.bf16 %v4109_v13, %v4101_v10  ;;  %v8470_v17 = vpack.c.bf16 %v4111_v39, %v4103_v16  ;;  %v8408_v21 = vpack.c.bf16 %v4108_v30, %v4100_v26  ;;  %v4142_v10 = vld [vmem:[#allocation4 + $0x5d0] sm:$0xff]  ;;  %v4149_v16 = vld [vmem:[#allocation4 + $0x608] sm:$0xff]  ;;  %v4151_v39 = vld [vmem:[#allocation4 + $0x618] sm:$0xff] }
 0x6d2   :  { %v4159_v30 = vld [vmem:[#allocation4 + $0x658] sm:$0xff] }
 0x6d3   :  { %8397 = vmatpush1.bf16.msra.mxu0 %v8396_v35  ;;  %8461 = vmatpush1.bf16.msra.mxu1 %v8460_v37  ;;  %v4117_v35 = vld [vmem:[#allocation4 + $0x508] sm:$0xff]  ;;  %v8482_v43 = vpack.c.bf16 %v4159_v30, %v4151_v39 }
 0x6d4   :  { %8399 = vmatprep.subr.bf16.mxu0 %v8398_v41  ;;  %8463 = vmatprep.subr.bf16.mxu1 %v8462_v18  ;;  %v4125_v37 = vld [vmem:[#allocation4 + $0x548] sm:$0xff]  ;;  %v4119_v41 = vld [vmem:[#allocation4 + $0x518] sm:$0xff]  ;;  %v4116_v18 = vld [vmem:[#allocation4 + $0x500] sm:$0xff] }
 0x6d5   :  { %v8410_v45 = vpack.c.bf16 %v4125_v37, %v4117_v35  ;;  %v8474_v47 = vpack.c.bf16 %v4127_v52, %v4119_v41  ;;  %v4158_v35 = vld [vmem:[#allocation4 + $0x650] sm:$0xff]  ;;  %v4165_v41 = vld [vmem:[#allocation4 + $0x688] sm:$0xff]  ;;  %v4167_v52 = vld [vmem:[#allocation4 + $0x698] sm:$0xff] }
 0x6d6   :  { %v4205_v39 = vld [vmem:[#allocation4 + $0x7c8] sm:$0xff] }
 0x6d7   :  { %8401 = vmatpush1.bf16.msra.mxu0 %v8400_v44  ;;  %8465 = vmatpush1.bf16.msra.mxu1 %v8464_v60  ;;  %v8412_v44 = vpack.c.bf16 %v4124_v46, %v4116_v18  ;;  %v4118_v60 = vld [vmem:[#allocation4 + $0x510] sm:$0xff]  ;;  %v4175_v46 = vld [vmem:[#allocation4 + $0x6d8] sm:$0xff] }
 0x6d8   :  { %8403 = vmatprep.subr.bf16.mxu0 %v8402_v53  ;;  %8467 = vmatprep.subr.bf16.mxu1 %v8466_v5  ;;  %v8476_v48 = vpack.c.bf16 %v4126_v12, %v4118_v60  ;;  %v4141_v53 = vld [vmem:[#allocation4 + $0x5c8] sm:$0xff]  ;;  %v8486_v60 = vpack.c.bf16 %v4175_v46, %v4167_v52  ;;  %v3963_v46 = vld [vmem:[#allocation4 + $0x38] sm:$0xff] }
 0x6d9   :  { %v8414_v5 = vpack.c.bf16 %v4141_v53, %v4133_v50  ;;  %v4174_v50 = vld [vmem:[#allocation4 + $0x6d0] sm:$0xff]  ;;  %v4181_v53 = vld [vmem:[#allocation4 + $0x708] sm:$0xff] }
 0x6da   :  { %v3961_v52 = vld [vmem:[#allocation4 + $0x28] sm:$0xff] }
 0x6db   :  { %8405 = vmatpush1.bf16.msra.mxu0 %v8404_v3  ;;  %8469 = vmatpush1.bf16.msra.mxu1 %v8468_v2  ;;  %v8478_v3 = vpack.c.bf16 %v4143_v15, %v4135_v54  ;;  %v4134_v2 = vld [vmem:[#allocation4 + $0x590] sm:$0xff]  ;;  %v4183_v15 = vld [vmem:[#allocation4 + $0x718] sm:$0xff] }
 0x6dc   :  { %8407 = vmatprep.subr.bf16.mxu0 %v8406_v22  ;;  %8471 = vmatprep.subr.bf16.mxu1 %v8470_v17  ;;  %v8480_v13 = vpack.c.bf16 %v4142_v10, %v4134_v2  ;;  %v4157_v22 = vld [vmem:[#allocation4 + $0x648] sm:$0xff]  ;;  %v4148_v17 = vld [vmem:[#allocation4 + $0x600] sm:$0xff]  ;;  %v4182_v10 = vld [vmem:[#allocation4 + $0x710] sm:$0xff] }
 0x6dd   :  { %v8418_v26 = vpack.c.bf16 %v4157_v22, %v4149_v16  ;;  %v4188_v2 = vld [vmem:[#allocation4 + $0x740] sm:$0xff]  ;;  %v4190_v16 = vld [vmem:[#allocation4 + $0x750] sm:$0xff]  ;;  %v4197_v22 = vld [vmem:[#allocation4 + $0x788] sm:$0xff] }
 0x6de   :  { %v8430_v30 = vpack.c.bf16 %v4205_v39, %v4197_v22 }
 0x6df   :  { %8409 = vmatpush1.bf16.msra.mxu0 %v8408_v21  ;;  %8473 = vmatpush1.bf16.msra.mxu1 %v8472_v31  ;;  %v4156_v21 = vld [vmem:[#allocation4 + $0x640] sm:$0xff]  ;;  %v4150_v31 = vld [vmem:[#allocation4 + $0x610] sm:$0xff] }
 0x6e0   :  { %8411 = vmatprep.subr.bf16.mxu0 %v8410_v45  ;;  %8475 = vmatprep.subr.bf16.mxu1 %v8474_v47  ;;  %v8420_v49 = vpack.c.bf16 %v4156_v21, %v4148_v17  ;;  %v8484_v37 = vpack.c.bf16 %v4158_v35, %v4150_v31  ;;  %v4173_v45 = vld [vmem:[#allocation4 + $0x6c8] sm:$0xff]  ;;  %v4164_v47 = vld [vmem:[#allocation4 + $0x680] sm:$0xff]  ;;  %v4199_v17 = vld [vmem:[#allocation4 + $0x798] sm:$0xff] }
 0x6e1   :  { %v8422_v18 = vpack.c.bf16 %v4173_v45, %v4165_v41  ;;  %v4207_v21 = vld [vmem:[#allocation4 + $0x7d8] sm:$0xff]  ;;  %v4204_v31 = vld [vmem:[#allocation4 + $0x7c0] sm:$0xff]  ;;  %v4198_v35 = vld [vmem:[#allocation4 + $0x790] sm:$0xff] }
 0x6e3   :  { %8413 = vmatpush1.bf16.msra.mxu0 %v8412_v44  ;;  %8477 = vmatpush1.bf16.msra.mxu1 %v8476_v48  ;;  %v4172_v44 = vld [vmem:[#allocation4 + $0x6c0] sm:$0xff]  ;;  %v4166_v48 = vld [vmem:[#allocation4 + $0x690] sm:$0xff] }
 0x6e4   :  { %8415 = vmatprep.subr.bf16.mxu0 %v8414_v5  ;;  %8479 = vmatprep.subr.bf16.mxu1 %v8478_v3  ;;  %v8424_v12 = vpack.c.bf16 %v4172_v44, %v4164_v47  ;;  %v8488_v54 = vpack.c.bf16 %v4174_v50, %v4166_v48  ;;  %v4189_v5 = vld [vmem:[#allocation4 + $0x748] sm:$0xff]  ;;  %v8490_v3 = vpack.c.bf16 %v4191_v8, %v4183_v15  ;;  %v3971_v44 = vld [vmem:[#allocation4 + $0x78] sm:$0xff] }
 0x6e5   :  { %v8426_v9 = vpack.c.bf16 %v4189_v5, %v4181_v53 }
 0x6e7   :  { %8417 = vmatpush1.bf16.msra.mxu0 %v8416_v19  ;;  %8481 = vmatpush1.bf16.msra.mxu1 %v8480_v13  ;;  %v4180_v19 = vld [vmem:[#allocation4 + $0x700] sm:$0xff] }
 0x6e8   :  { %8419 = vmatprep.subr.bf16.mxu0 %v8418_v26  ;;  %8483 = vmatprep.subr.bf16.mxu1 %v8482_v43  ;;  %v8428_v13 = vpack.c.bf16 %v4188_v2, %v4180_v19  ;;  %v8492_v26 = vpack.c.bf16 %v4190_v16, %v4182_v10  ;;  %v4196_v43 = vld [vmem:[#allocation4 + $0x780] sm:$0xff] }
 0x6e9   :  { %v8432_v41 = vpack.c.bf16 %v4204_v31, %v4196_v43 }
 0x6eb   :  { %8421 = vmatpush1.bf16.msra.mxu0 %v8420_v49  ;;  %8485 = vmatpush1.bf16.msra.mxu1 %v8484_v37  ;;  %v8494_v49 = vpack.c.bf16 %v4207_v21, %v4199_v17  ;;  %v4206_v37 = vld [vmem:[#allocation4 + $0x7d0] sm:$0xff] }
 0x6ec   :  { %8423 = vmatprep.subr.bf16.mxu0 %v8422_v18  ;;  %8487 = vmatprep.subr.bf16.mxu1 %v8486_v60  ;;  %v8496_v45 = vpack.c.bf16 %v4206_v37, %v4198_v35  ;;  %v3969_v18 = vld [vmem:[#allocation4 + $0x68] sm:$0xff]  ;;  %v8562_v60 = vpack.c.bf16 %v3971_v44, %v3963_v46 }
 0x6ed   :  { %v8498_v47 = vpack.c.bf16 %v3969_v18, %v3961_v52 }
 0x6ef   :  { %8425 = vmatpush1.bf16.msra.mxu0 %v8424_v12  ;;  %8489 = vmatpush1.bf16.msra.mxu1 %v8488_v54  ;;  %v3306_v54 = vpop.permute.xlu1 %3305 }
 0x6f0   :  { %8427 = vmatprep.subr.bf16.mxu0 %v8426_v9  ;;  %8491 = vmatprep.subr.bf16.mxu1 %v8490_v3  ;;  %v3308_v5 = vmul.f32 %v3306_v54, %v9889_v29  ;;  %v3310_v15 = vmul.f32 %v3306_v54, %v9895_v32  ;;  %v3309_v8 = vmul.f32 %v3306_v54, %v9898_v33 }
 0x6f1   :  { %v3311_v9 = vmul.f32 %v3306_v54, %v9901_v34  ;;  %v3313_v18 = vmul.f32 %v3306_v54, %v9942_v62  ;;  %v3315_v46 = vmul.f32 %v3306_v54, %v9945_v0 }
 0x6f2   :  { %v3316_v3 = vadd.f32 %v3308_v5, %v9905_v36  ;;  %v3318_v19 = vadd.f32 %v3310_v15, %v9909_v38  ;;  %v3317_v10 = vadd.f32 %v3309_v8, %v9913_v40 }
 0x6f3   :  { %8429 = vmatpush1.bf16.msra.mxu0 %v8428_v13  ;;  %8493 = vmatpush1.bf16.msra.mxu1 %v8492_v26  ;;  %v3319_v16 = vadd.f32 %v3311_v9, %v9917_v42  ;;  %v3323_v5 = vadd.f32 %v3315_v46, %v9961_v14 }
 0x6f4   :  { %8431 = vmatprep.subr.bf16.mxu0 %v8430_v30  ;;  %8495 = vmatprep.subr.bf16.mxu1 %v8494_v49 }
 0x6f7   :  { %8433 = vmatpush1.bf16.msra.mxu0 %v8432_v41  ;;  %8497 = vmatpush1.bf16.msra.mxu1 %v8496_v45  ;;  %v3312_v41 = vmul.f32 %v3306_v54, %v9936_v59  ;;  %v3314_v45 = vmul.f32 %v3306_v54, %v9939_v61 }
 0x6f8   :  { %8499 = vmatprep.subr.bf16.mxu0 %v8498_v47  ;;  %8563 = vmatprep.subr.bf16.mxu1 %v8562_v60 }
 0x6f9   :  { %v3320_v60 = vadd.f32 %v3312_v41, %v9949_v6 }
 0x74d   :  { %v3646_v12 = vpop.f32.mrb[20].mxu0  ;;  %v3717_v48 = vpop.f32.mrb[20].mxu1 }
 0x74e   :  { %v3648_v50 = vpop.f32.mrb[21].mxu0  ;;  %v3719_v53 = vpop.f32.mrb[21].mxu1  ;;  %v3864_v2 = vadd.f32 %v3646_v12, %v3316_v3  ;;  %v3866_v13 = vadd.f32 %v3717_v48, %v3318_v19  ;;  %v3322_v12 = vadd.f32 %v3314_v45, %v9952_v7 }
 0x74f   :  { %v3865_v22 = vadd.f32 %v3648_v50, %v3317_v10  ;;  %v3867_v39 = vadd.f32 %v3719_v53, %v3319_v16  ;;  %v3321_v53 = vadd.f32 %v3313_v18, %v9957_v11 }
 0x750   :  { %v6796_v26 = vmul.f32 -1.442695, %v3864_v2  ;;  %v6798_v30 = vmul.f32 -1.442695, %v3866_v13 }
 0x751   :  { %v6797_v17 = vmul.f32 -1.442695, %v3865_v22  ;;  %v6799_v21 = vmul.f32 -1.442695, %v3867_v39 }
 0x752   :  { %9563 = vpow2.f32 %v6796_v26 }
 0x753   :  { %9565 = vpow2.f32 %v6798_v30 }
 0x754   :  { %9567 = vpow2.f32 %v6797_v17 }
 0x755   :  { %9569 = vpow2.f32 %v6799_v21 }
 0x75c   :  { %v9564_v43 = vpop.eup %9563 }
 0x75d   :  { %v9566_v49 = vpop.eup %9565  ;;  %v3878_v37 = vadd.f32 1.0, %v9564_v43 }
 0x75e   :  { %v9568_v31 = vpop.eup %9567  ;;  %v3890_v52 = vadd.f32 1.0, %v9566_v49 }
 0x75f   :  { %v9570_v35 = vpop.eup %9569  ;;  %v3879_v47 = vadd.f32 1.0, %v9568_v31  ;;  %9571 = vrcp.f32 %v3878_v37 }
 0x760   :  { %v3891_v44 = vadd.f32 1.0, %v9570_v35  ;;  %9573 = vrcp.f32 %v3890_v52 }
 0x761   :  { %9575 = vrcp.f32 %v3879_v47  ;;  %v3968_v47 = vld [vmem:[#allocation4 + $0x60] sm:$0xff] }
 0x762   :  { %9577 = vrcp.f32 %v3891_v44  ;;  %v3962_v44 = vld [vmem:[#allocation4 + $0x30] sm:$0xff] }
 0x769   :  { %v9572_v13 = vpop.eup %9571 }
 0x76a   :  { %v9574_v16 = vpop.eup %9573 }
 0x76b   :  { %v9576_v22 = vpop.eup %9575  ;;  %v3910_v17 = vmul.f32 %v9574_v16, %v10130_v51  ;;  %v3960_v51 = vld [vmem:[#allocation4 + $0x20] sm:$0xff] }
 0x76c   :  { %v9578_v39 = vpop.eup %9577 }
 0x76d   :  { %v3911_v49 = vmul.f32 %v9578_v39, %v10132_v4  ;;  %v3970_v4 = vld [vmem:[#allocation4 + $0x70] sm:$0xff] }
 0x78d   :  { %v3788_v48 = vpop.f32.mrb[22].mxu0  ;;  %v3859_v50 = vpop.f32.mrb[22].mxu1 }
 0x78e   :  { %v3868_v15 = vadd.f32 %v3788_v48, %v3320_v60  ;;  %v3870_v8 = vadd.f32 %v3859_v50, %v3322_v12  ;;  %v3790_v9 = vpop.f32.mrb[23].mxu0  ;;  %v3861_v3 = vpop.f32.mrb[23].mxu1  ;;  %v3977_v48 = vld [vmem:[#allocation4 + $0xa8] sm:$0xff] }
 0x78f   :  { %v3869_v54 = vadd.f32 %v3790_v9, %v3321_v53  ;;  %v3871_v19 = vadd.f32 %v3861_v3, %v3323_v5  ;;  %v3985_v53 = vld [vmem:[#allocation4 + $0xe8] sm:$0xff]  ;;  %v3979_v5 = vld [vmem:[#allocation4 + $0xb8] sm:$0xff]  ;;  %v8500_v9 = vpack.c.bf16 %v3968_v47, %v3960_v51  ;;  %v8564_v3 = vpack.c.bf16 %v3970_v4, %v3962_v44 }
 0x790   :  { %9579 = vtanh.f32 %v3868_v15  ;;  %v6800_v2 = vmul.f32 -1.442695, %v3870_v8  ;;  %v3987_v15 = vld [vmem:[#allocation4 + $0xf8] sm:$0xff]  ;;  %v4009_v51 = vld [vmem:[#allocation4 + $0x1a8] sm:$0xff] }
 0x791   :  { %9581 = vtanh.f32 %v3869_v54  ;;  %v6801_v10 = vmul.f32 -1.442695, %v3871_v19  ;;  %v3976_v54 = vld [vmem:[#allocation4 + $0xa0] sm:$0xff]  ;;  %v8566_v39 = vpack.c.bf16 %v3987_v15, %v3979_v5  ;;  %v4011_v47 = vld [vmem:[#allocation4 + $0x1b8] sm:$0xff]  ;;  %v4010_v15 = vld [vmem:[#allocation4 + $0x1b0] sm:$0xff] }
 0x792   :  { %9583 = vpow2.f32 %v6800_v2  ;;  %v3984_v19 = vld [vmem:[#allocation4 + $0xe0] sm:$0xff]  ;;  %v3978_v2 = vld [vmem:[#allocation4 + $0xb0] sm:$0xff]  ;;  %v4019_v44 = vld [vmem:[#allocation4 + $0x1f8] sm:$0xff] }
 0x793   :  { %9585 = vpow2.f32 %v6801_v10  ;;  %v3986_v10 = vld [vmem:[#allocation4 + $0xf0] sm:$0xff]  ;;  %v8574_v5 = vpack.c.bf16 %v4019_v44, %v4011_v47  ;;  %v4048_v47 = vld [vmem:[#allocation4 + $0x2e0] sm:$0xff] }
 0x79a   :  { %v9580_v26 = vpop.eup %9579 }
 0x79b   :  { %v9582_v30 = vpop.eup %9581  ;;  %v3912_v21 = vmul.f32 %v9580_v26, %v9572_v13  ;;  %v3993_v13 = vld [vmem:[#allocation4 + $0x128] sm:$0xff] }
 0x79c   :  { %v9584_v43 = vpop.eup %9583  ;;  %v3913_v31 = vmul.f32 %v9582_v30, %v9576_v22  ;;  %v8502_v22 = vpack.c.bf16 %v3985_v53, %v3977_v48  ;;  %v4001_v26 = vld [vmem:[#allocation4 + $0x168] sm:$0xff]  ;;  %v3995_v30 = vld [vmem:[#allocation4 + $0x138] sm:$0xff]  ;;  %v4008_v48 = vld [vmem:[#allocation4 + $0x1a0] sm:$0xff] }
 0x79d   :  { %v9586_v35 = vpop.eup %9585  ;;  %v10165_v37 = vadd.f32 %v3912_v21, %v3910_v17  ;;  %v3904_v41 = vadd.f32 1.0, %v9584_v43  ;;  %v4003_v17 = vld [vmem:[#allocation4 + $0x178] sm:$0xff]  ;;  %v8504_v21 = vpack.c.bf16 %v3984_v19, %v3976_v54  ;;  %v8568_v43 = vpack.c.bf16 %v3986_v10, %v3978_v2 }
 0x79e   :  { %v10167_v45 = vadd.f32 %v3913_v31, %v3911_v49  ;;  %v3905_v52 = vadd.f32 1.0, %v9586_v35  ;;  %v3992_v49 = vld [vmem:[#allocation4 + $0x120] sm:$0xff]  ;;  %v8506_v35 = vpack.c.bf16 %v4001_v26, %v3993_v13  ;;  %v4027_v54 = vld [vmem:[#allocation4 + $0x238] sm:$0xff] }
 0x79f   :  { %9587 = vtanh.f32 %v10165_v37  ;;  %v4000_v31 = vld [vmem:[#allocation4 + $0x160] sm:$0xff]  ;;  %v4035_v19 = vld [vmem:[#allocation4 + $0x278] sm:$0xff] }
 0x7a0   :  { %9589 = vrcp.f32 %v3904_v41  ;;  %v8570_v41 = vpack.c.bf16 %v4003_v17, %v3995_v30  ;;  %v8508_v4 = vpack.c.bf16 %v4000_v31, %v3992_v49  ;;  %v8578_v26 = vpack.c.bf16 %v4035_v19, %v4027_v54  ;;  %v4032_v30 = vld [vmem:[#allocation4 + $0x260] sm:$0xff]  ;;  %v4026_v17 = vld [vmem:[#allocation4 + $0x230] sm:$0xff]  ;;  %v4041_v49 = vld [vmem:[#allocation4 + $0x2a8] sm:$0xff] }
 0x7a1   :  { %9591 = vtanh.f32 %v10167_v45  ;;  %v4049_v31 = vld [vmem:[#allocation4 + $0x2e8] sm:$0xff] }
 0x7a2   :  { %9593 = vrcp.f32 %v3905_v52  ;;  %v3994_v52 = vld [vmem:[#allocation4 + $0x130] sm:$0xff]  ;;  %v8518_v44 = vpack.c.bf16 %v4049_v31, %v4041_v49  ;;  %v4072_v31 = vld [vmem:[#allocation4 + $0x3a0] sm:$0xff] }
 0x7a9   :  { %v9588_v18 = vpop.eup %9587 }
 0x7aa   :  { %v9590_v46 = vpop.eup %9589 }
 0x7ab   :  { %v9592_v60 = vpop.eup %9591  ;;  %v10171_v12 = vmul.f32 %v9590_v46, %v9588_v18  ;;  %v4002_v18 = vld [vmem:[#allocation4 + $0x170] sm:$0xff]  ;;  %v4017_v46 = vld [vmem:[#allocation4 + $0x1e8] sm:$0xff] }
 0x7ac   :  { %v9594_v50 = vpop.eup %9593  ;;  %v8510_v53 = vpack.c.bf16 %v4017_v46, %v4009_v51  ;;  %v4040_v46 = vld [vmem:[#allocation4 + $0x2a0] sm:$0xff] }
 0x7ad   :  { %v3919_v8 = vmul.f32 %v9594_v50, %v9592_v60  ;;  %v8572_v60 = vpack.c.bf16 %v4002_v18, %v3994_v52  ;;  %v4016_v50 = vld [vmem:[#allocation4 + $0x1e0] sm:$0xff]  ;;  %v8520_v54 = vpack.c.bf16 %v4048_v47, %v4040_v46  ;;  %v4089_v46 = vld [vmem:[#allocation4 + $0x428] sm:$0xff] }
 0x7ae   :  { %v8512_v10 = vpack.c.bf16 %v4016_v50, %v4008_v48  ;;  %v4057_v48 = vld [vmem:[#allocation4 + $0x328] sm:$0xff] }
 0x7af   :  { %4276 = vmatprep.mubr.f32.mxu0 %v3919_v8  ;;  %4347 = vmatprep.mubr.f32.mxu1 %v3919_v8  ;;  %v3922_v16 = vcombine.low %v10171_v12, %v3919_v8  ;;  %v4097_v47 = vld [vmem:[#allocation4 + $0x468] sm:$0xff] }
 0x7b0   :  { %4277 = vmatmul.mubr.f32.vlgmr.msra.gmra.mrb[24].mxu0 %v10171_v12  ;;  %4348 = vmatmul.mubr.f32.vlgmr.msra.gmra.mrb[24].mxu1 %v10171_v12 }
 0x7b1   :  { %6802 = vst.sshfl [vmem:[#allocation2 + $0x14] sm:$0x33 pattern:$0x76325410] %v3922_v16  ;;  %8501 = vmatpush1.bf16.msra.mxu0 %v8500_v9  ;;  %8565 = vmatpush1.bf16.msra.mxu1 %v8564_v3  ;;  %v4025_v9 = vld [vmem:[#allocation4 + $0x228] sm:$0xff]  ;;  %v4024_v16 = vld [vmem:[#allocation4 + $0x220] sm:$0xff] }
 0x7b2   :  { %4418 = vmatprep.mubr.f32.mxu0 %v3919_v8  ;;  %4489 = vmatprep.mubr.f32.mxu1 %v3919_v8  ;;  %v4018_v8 = vld [vmem:[#allocation4 + $0x1f0] sm:$0xff]  ;;  %v4033_v3 = vld [vmem:[#allocation4 + $0x268] sm:$0xff]  ;;  %v8516_v52 = vpack.c.bf16 %v4032_v30, %v4024_v16 }
 0x7b3   :  { %8503 = vmatprep.subr.bf16.mxu0 %v8502_v22  ;;  %8567 = vmatprep.subr.bf16.mxu1 %v8566_v39  ;;  %v8576_v13 = vpack.c.bf16 %v4018_v8, %v4010_v15  ;;  %v8514_v39 = vpack.c.bf16 %v4033_v3, %v4025_v9  ;;  %v4065_v15 = vld [vmem:[#allocation4 + $0x368] sm:$0xff]  ;;  %v4059_v8 = vld [vmem:[#allocation4 + $0x338] sm:$0xff] }
 0x7b4   :  { %v4067_v9 = vld [vmem:[#allocation4 + $0x378] sm:$0xff]  ;;  %v4081_v30 = vld [vmem:[#allocation4 + $0x3e8] sm:$0xff] }
 0x7b5   :  { %8505 = vmatpush1.bf16.msra.mxu0 %v8504_v21  ;;  %8569 = vmatpush1.bf16.msra.mxu1 %v8568_v43  ;;  %v4034_v21 = vld [vmem:[#allocation4 + $0x270] sm:$0xff]  ;;  %v8586_v16 = vpack.c.bf16 %v4067_v9, %v4059_v8 }
 0x7b6   :  { %8507 = vmatprep.subr.bf16.mxu0 %v8506_v35  ;;  %8571 = vmatprep.subr.bf16.mxu1 %v8570_v41  ;;  %v4043_v35 = vld [vmem:[#allocation4 + $0x2b8] sm:$0xff]  ;;  %v8580_v18 = vpack.c.bf16 %v4034_v21, %v4026_v17  ;;  %v4090_v8 = vld [vmem:[#allocation4 + $0x430] sm:$0xff] }
 0x7b7   :  { %v4051_v41 = vld [vmem:[#allocation4 + $0x2f8] sm:$0xff]  ;;  %v4098_v9 = vld [vmem:[#allocation4 + $0x470] sm:$0xff] }
 0x7b8   :  { %v6462_v2 = vld [vmem:[#allocation2 + $0x14] sm:$0xf]  ;;  %v4075_v17 = vld [vmem:[#allocation4 + $0x3b8] sm:$0xff] }
 0x7b9   :  { %8509 = vmatpush1.bf16.msra.mxu0 %v8508_v4  ;;  %8573 = vmatpush1.bf16.msra.mxu1 %v8572_v60  ;;  %v6491_v22 = vmul.f32 %v9987_v20, %v6462_v2  ;;  %v4042_v4 = vld [vmem:[#allocation4 + $0x2b0] sm:$0xff]  ;;  %v4056_v2 = vld [vmem:[#allocation4 + $0x320] sm:$0xff]  ;;  %v4083_v21 = vld [vmem:[#allocation4 + $0x3f8] sm:$0xff] }
 0x7ba   :  { %8511 = vmatprep.subr.bf16.mxu0 %v8510_v53  ;;  %8575 = vmatprep.subr.bf16.mxu1 %v8574_v5  ;;  %v4050_v60 = vld [vmem:[#allocation4 + $0x2f0] sm:$0xff]  ;;  %v8582_v5 = vpack.c.bf16 %v4051_v41, %v4043_v35  ;;  %v4080_v35 = vld [vmem:[#allocation4 + $0x3e0] sm:$0xff] }
 0x7bb   :  { %v6552_v43 = vrot.slane %v6491_v22, %v9984_v63  ;;  %v8584_v19 = vpack.c.bf16 %v4050_v60, %v4042_v4  ;;  %v4058_v22 = vld [vmem:[#allocation4 + $0x330] sm:$0xff]  ;;  %v4099_v4 = vld [vmem:[#allocation4 + $0x478] sm:$0xff]  ;;  %v8528_v60 = vpack.c.bf16 %v4080_v35, %v4072_v31 }
 0x7bc   :  { %v4131_v31 = vld [vmem:[#allocation4 + $0x578] sm:$0xff] }
 0x7bd   :  { %8513 = vmatpush1.bf16.msra.mxu0 %v8512_v10  ;;  %8577 = vmatpush1.bf16.msra.mxu1 %v8576_v13  ;;  %v6553_v51 = vcombine.high %v6552_v43, %v6552_v43  ;;  %v6632_v50 = vsel %vm6606_vm0, %v6552_v43, 0.0  ;;  %v4064_v10 = vld [vmem:[#allocation4 + $0x360] sm:$0xff]  ;;  %v8522_v13 = vpack.c.bf16 %v4065_v15, %v4057_v48 }
 0x7be   :  { %8515 = vmatprep.subr.bf16.mxu0 %v8514_v39  ;;  %8579 = vmatprep.subr.bf16.mxu1 %v8578_v26  ;;  %v4066_v39 = vld [vmem:[#allocation4 + $0x370] sm:$0xff]  ;;  %v4073_v26 = vld [vmem:[#allocation4 + $0x3a8] sm:$0xff]  ;;  %v8524_v43 = vpack.c.bf16 %v4064_v10, %v4056_v2  ;;  %v4115_v2 = vld [vmem:[#allocation4 + $0x4f8] sm:$0xff] }
 0x7bf   :  { %v6633_v53 = vsel %vm6606_vm0, %v6553_v51, 0.0  ;;  %v8588_v49 = vpack.c.bf16 %v4066_v39, %v4058_v22  ;;  %v8526_v41 = vpack.c.bf16 %v4081_v30, %v4073_v26  ;;  %v4082_v51 = vld [vmem:[#allocation4 + $0x3f0] sm:$0xff]  ;;  %v4112_v22 = vld [vmem:[#allocation4 + $0x4e0] sm:$0xff] }
 0x7c0   :  { %v6634_v3 = vadd.f32 %v6633_v53, %v6632_v50  ;;  %v4088_v50 = vld [vmem:[#allocation4 + $0x420] sm:$0xff]  ;;  %v4106_v30 = vld [vmem:[#allocation4 + $0x4b0] sm:$0xff] }
 0x7c1   :  { %8517 = vmatpush1.bf16.msra.mxu0 %v8516_v52  ;;  %8581 = vmatpush1.bf16.msra.mxu1 %v8580_v18  ;;  %v8590_v52 = vpack.c.bf16 %v4083_v21, %v4075_v17  ;;  %v4074_v18 = vld [vmem:[#allocation4 + $0x3b0] sm:$0xff]  ;;  %v4096_v53 = vld [vmem:[#allocation4 + $0x460] sm:$0xff]  ;;  %v4121_v21 = vld [vmem:[#allocation4 + $0x528] sm:$0xff] }
 0x7c2   :  { %6635 = vadd.xlane.f32.xlu0 %v6634_v3  ;;  %8519 = vmatprep.subr.bf16.mxu0 %v8518_v44  ;;  %v4091_v44 = vld [vmem:[#allocation4 + $0x438] sm:$0xff]  ;;  %v8592_v48 = vpack.c.bf16 %v4082_v51, %v4074_v18  ;;  %v4105_v3 = vld [vmem:[#allocation4 + $0x4a8] sm:$0xff]  ;;  %v8532_v10 = vpack.c.bf16 %v4096_v53, %v4088_v50  ;;  %v4114_v17 = vld [vmem:[#allocation4 + $0x4f0] sm:$0xff] }
 0x7c3   :  { %8583 = vmatprep.subr.bf16.mxu1 %v8582_v5  ;;  %v8530_v5 = vpack.c.bf16 %v4097_v47, %v4089_v46  ;;  %v8594_v15 = vpack.c.bf16 %v4099_v4, %v4091_v44  ;;  %v4128_v18 = vld [vmem:[#allocation4 + $0x560] sm:$0xff]  ;;  %v4122_v47 = vld [vmem:[#allocation4 + $0x530] sm:$0xff]  ;;  %v4137_v4 = vld [vmem:[#allocation4 + $0x5a8] sm:$0xff] }
 0x7c4   :  { %v4130_v44 = vld [vmem:[#allocation4 + $0x570] sm:$0xff]  ;;  %v4147_v50 = vld [vmem:[#allocation4 + $0x5f8] sm:$0xff] }
 0x7c5   :  { %8521 = vmatpush1.bf16.msra.mxu0 %v8520_v54  ;;  %8585 = vmatpush1.bf16.msra.mxu1 %v8584_v19  ;;  %v4113_v54 = vld [vmem:[#allocation4 + $0x4e8] sm:$0xff]  ;;  %v4107_v19 = vld [vmem:[#allocation4 + $0x4b8] sm:$0xff] }
 0x7c6   :  { %8523 = vmatprep.subr.bf16.mxu0 %v8522_v13  ;;  %8587 = vmatprep.subr.bf16.mxu1 %v8586_v16  ;;  %v8596_v13 = vpack.c.bf16 %v4098_v9, %v4090_v8  ;;  %v4104_v16 = vld [vmem:[#allocation4 + $0x4a0] sm:$0xff]  ;;  %v8534_v39 = vpack.c.bf16 %v4113_v54, %v4105_v3  ;;  %v8598_v26 = vpack.c.bf16 %v4115_v2, %v4107_v19  ;;  %v4138_v54 = vld [vmem:[#allocation4 + $0x5b0] sm:$0xff]  ;;  %v4153_v2 = vld [vmem:[#allocation4 + $0x628] sm:$0xff] }
 0x7c7   :  { %v8536_v35 = vpack.c.bf16 %v4112_v22, %v4104_v16  ;;  %v4144_v8 = vld [vmem:[#allocation4 + $0x5e0] sm:$0xff]  ;;  %v4146_v19 = vld [vmem:[#allocation4 + $0x5f0] sm:$0xff]  ;;  %v4163_v16 = vld [vmem:[#allocation4 + $0x678] sm:$0xff] }
 0x7c9   :  { %8525 = vmatpush1.bf16.msra.mxu0 %v8524_v43  ;;  %8589 = vmatpush1.bf16.msra.mxu1 %v8588_v49  ;;  %v4129_v43 = vld [vmem:[#allocation4 + $0x568] sm:$0xff]  ;;  %v4123_v49 = vld [vmem:[#allocation4 + $0x538] sm:$0xff] }
 0x7ca   :  { %8527 = vmatprep.subr.bf16.mxu0 %v8526_v41  ;;  %8591 = vmatprep.subr.bf16.mxu1 %v8590_v52  ;;  %v8600_v41 = vpack.c.bf16 %v4114_v17, %v4106_v30  ;;  %v4120_v52 = vld [vmem:[#allocation4 + $0x520] sm:$0xff]  ;;  %v8538_v51 = vpack.c.bf16 %v4129_v43, %v4121_v21  ;;  %v8602_v46 = vpack.c.bf16 %v4131_v31, %v4123_v49  ;;  %v4154_v43 = vld [vmem:[#allocation4 + $0x630] sm:$0xff]  ;;  %v4169_v31 = vld [vmem:[#allocation4 + $0x6a8] sm:$0xff] }
 0x7cb   :  { %v8540_v53 = vpack.c.bf16 %v4128_v18, %v4120_v52  ;;  %v4160_v30 = vld [vmem:[#allocation4 + $0x660] sm:$0xff]  ;;  %v4162_v49 = vld [vmem:[#allocation4 + $0x670] sm:$0xff]  ;;  %v4179_v52 = vld [vmem:[#allocation4 + $0x6f8] sm:$0xff] }
 0x7cd   :  { %8529 = vmatpush1.bf16.msra.mxu0 %v8528_v60  ;;  %8593 = vmatpush1.bf16.msra.mxu1 %v8592_v48  ;;  %v4145_v60 = vld [vmem:[#allocation4 + $0x5e8] sm:$0xff]  ;;  %v4139_v48 = vld [vmem:[#allocation4 + $0x5b8] sm:$0xff] }
 0x7ce   :  { %8531 = vmatprep.subr.bf16.mxu0 %v8530_v5  ;;  %8595 = vmatprep.subr.bf16.mxu1 %v8594_v15  ;;  %v8604_v5 = vpack.c.bf16 %v4130_v44, %v4122_v47  ;;  %v4136_v15 = vld [vmem:[#allocation4 + $0x5a0] sm:$0xff]  ;;  %v8542_v9 = vpack.c.bf16 %v4145_v60, %v4137_v4  ;;  %v8606_v3 = vpack.c.bf16 %v4147_v50, %v4139_v48  ;;  %v4170_v60 = vld [vmem:[#allocation4 + $0x6b0] sm:$0xff]  ;;  %v4185_v50 = vld [vmem:[#allocation4 + $0x728] sm:$0xff] }
 0x7cf   :  { %v8544_v22 = vpack.c.bf16 %v4144_v8, %v4136_v15  ;;  %v4176_v47 = vld [vmem:[#allocation4 + $0x6e0] sm:$0xff]  ;;  %v4178_v48 = vld [vmem:[#allocation4 + $0x6f0] sm:$0xff]  ;;  %v4195_v15 = vld [vmem:[#allocation4 + $0x778] sm:$0xff] }
 0x7d1   :  { %8533 = vmatpush1.bf16.msra.mxu0 %v8532_v10  ;;  %8597 = vmatpush1.bf16.msra.mxu1 %v8596_v13  ;;  %v4161_v10 = vld [vmem:[#allocation4 + $0x668] sm:$0xff]  ;;  %v4155_v13 = vld [vmem:[#allocation4 + $0x638] sm:$0xff] }
 0x7d2   :  { %8535 = vmatprep.subr.bf16.mxu0 %v8534_v39  ;;  %8599 = vmatprep.subr.bf16.mxu1 %v8598_v26  ;;  %v8608_v39 = vpack.c.bf16 %v4146_v19, %v4138_v54  ;;  %v4152_v26 = vld [vmem:[#allocation4 + $0x620] sm:$0xff]  ;;  %v8546_v17 = vpack.c.bf16 %v4161_v10, %v4153_v2  ;;  %v8610_v21 = vpack.c.bf16 %v4163_v16, %v4155_v13  ;;  %v4186_v10 = vld [vmem:[#allocation4 + $0x730] sm:$0xff]  ;;  %v4201_v16 = vld [vmem:[#allocation4 + $0x7a8] sm:$0xff] }
 0x7d3   :  { %v8548_v18 = vpack.c.bf16 %v4160_v30, %v4152_v26  ;;  %v4192_v54 = vld [vmem:[#allocation4 + $0x760] sm:$0xff]  ;;  %v4194_v13 = vld [vmem:[#allocation4 + $0x770] sm:$0xff]  ;;  %v4211_v26 = vld [vmem:[#allocation4 + $0x7f8] sm:$0xff] }
 0x7d5   :  { %8537 = vmatpush1.bf16.msra.mxu0 %v8536_v35  ;;  %8601 = vmatpush1.bf16.msra.mxu1 %v8600_v41  ;;  %v4177_v35 = vld [vmem:[#allocation4 + $0x6e8] sm:$0xff]  ;;  %v4171_v41 = vld [vmem:[#allocation4 + $0x6b8] sm:$0xff] }
 0x7d6   :  { %8539 = vmatprep.subr.bf16.mxu0 %v8538_v51  ;;  %8603 = vmatprep.subr.bf16.mxu1 %v8602_v46  ;;  %v8612_v51 = vpack.c.bf16 %v4162_v49, %v4154_v43  ;;  %v4168_v46 = vld [vmem:[#allocation4 + $0x6a0] sm:$0xff]  ;;  %v8550_v44 = vpack.c.bf16 %v4177_v35, %v4169_v31  ;;  %v8614_v4 = vpack.c.bf16 %v4179_v52, %v4171_v41  ;;  %v4202_v35 = vld [vmem:[#allocation4 + $0x7b0] sm:$0xff] }
 0x7d7   :  { %v8552_v8 = vpack.c.bf16 %v4176_v47, %v4168_v46  ;;  %v4208_v31 = vld [vmem:[#allocation4 + $0x7e0] sm:$0xff]  ;;  %v4210_v41 = vld [vmem:[#allocation4 + $0x7f0] sm:$0xff]  ;;  %v4597_v46 = vld [vmem:[#allocation4 + $0x48] sm:$0xff] }
 0x7d8   :  { %v4591_v47 = vld [vmem:[#allocation4 + $0x18] sm:$0xff] }
 0x7d9   :  { %8541 = vmatpush1.bf16.msra.mxu0 %v8540_v53  ;;  %8605 = vmatpush1.bf16.msra.mxu1 %v8604_v5  ;;  %v4193_v53 = vld [vmem:[#allocation4 + $0x768] sm:$0xff]  ;;  %v4187_v5 = vld [vmem:[#allocation4 + $0x738] sm:$0xff] }
 0x7da   :  { %8543 = vmatprep.subr.bf16.mxu0 %v8542_v9  ;;  %8607 = vmatprep.subr.bf16.mxu1 %v8606_v3  ;;  %v8616_v9 = vpack.c.bf16 %v4178_v48, %v4170_v60  ;;  %v4184_v3 = vld [vmem:[#allocation4 + $0x720] sm:$0xff]  ;;  %v8554_v19 = vpack.c.bf16 %v4193_v53, %v4185_v50  ;;  %v8618_v2 = vpack.c.bf16 %v4195_v15, %v4187_v5  ;;  %v4590_v5 = vld [vmem:[#allocation4 + $0x10] sm:$0xff] }
 0x7db   :  { %v8556_v30 = vpack.c.bf16 %v4192_v54, %v4184_v3  ;;  %v4588_v60 = vld [vmem:[#allocation4] sm:$0xff]  ;;  %v4598_v15 = vld [vmem:[#allocation4 + $0x50] sm:$0xff]  ;;  %v4613_v3 = vld [vmem:[#allocation4 + $0xc8] sm:$0xff] }
 0x7dc   :  { %v4596_v48 = vld [vmem:[#allocation4 + $0x40] sm:$0xff]  ;;  %v4607_v54 = vld [vmem:[#allocation4 + $0x98] sm:$0xff] }
 0x7dd   :  { %8545 = vmatpush1.bf16.msra.mxu0 %v8544_v22  ;;  %8609 = vmatpush1.bf16.msra.mxu1 %v8608_v39  ;;  %v4209_v22 = vld [vmem:[#allocation4 + $0x7e8] sm:$0xff]  ;;  %v4203_v39 = vld [vmem:[#allocation4 + $0x7b8] sm:$0xff]  ;;  %v8628_v53 = vpack.c.bf16 %v4596_v48, %v4588_v60 }
 0x7de   :  { %8547 = vmatprep.subr.bf16.mxu0 %v8546_v17  ;;  %8611 = vmatprep.subr.bf16.mxu1 %v8610_v21  ;;  %v8620_v17 = vpack.c.bf16 %v4194_v13, %v4186_v10  ;;  %v4200_v21 = vld [vmem:[#allocation4 + $0x7a0] sm:$0xff]  ;;  %v8558_v43 = vpack.c.bf16 %v4209_v22, %v4201_v16  ;;  %v8622_v49 = vpack.c.bf16 %v4211_v26, %v4203_v39  ;;  %v4606_v16 = vld [vmem:[#allocation4 + $0x90] sm:$0xff]  ;;  %v4621_v26 = vld [vmem:[#allocation4 + $0x108] sm:$0xff] }
 0x7df   :  { %v8560_v52 = vpack.c.bf16 %v4208_v31, %v4200_v21  ;;  %v4604_v10 = vld [vmem:[#allocation4 + $0x80] sm:$0xff]  ;;  %v4614_v39 = vld [vmem:[#allocation4 + $0xd0] sm:$0xff]  ;;  %v4647_v48 = vld [vmem:[#allocation4 + $0x1d8] sm:$0xff] }
 0x7e0   :  { %v4612_v13 = vld [vmem:[#allocation4 + $0xc0] sm:$0xff] }
 0x7e1   :  { %8549 = vmatpush1.bf16.msra.mxu0 %v8548_v18  ;;  %8613 = vmatpush1.bf16.msra.mxu1 %v8612_v51  ;;  %v8624_v18 = vpack.c.bf16 %v4210_v41, %v4202_v35  ;;  %v4589_v51 = vld [vmem:[#allocation4 + $0x8] sm:$0xff]  ;;  %v8632_v22 = vpack.c.bf16 %v4612_v13, %v4604_v10  ;;  %v4620_v31 = vld [vmem:[#allocation4 + $0x100] sm:$0xff] }
 0x7e2   :  { %8551 = vmatprep.subr.bf16.mxu0 %v8550_v44  ;;  %8615 = vmatprep.subr.bf16.mxu1 %v8614_v4  ;;  %v8626_v44 = vpack.c.bf16 %v4597_v46, %v4589_v51  ;;  %v4599_v4 = vld [vmem:[#allocation4 + $0x58] sm:$0xff]  ;;  %v4628_v41 = vld [vmem:[#allocation4 + $0x140] sm:$0xff]  ;;  %v4637_v46 = vld [vmem:[#allocation4 + $0x188] sm:$0xff] }
 0x7e3   :  { %v8690_v50 = vpack.c.bf16 %v4599_v4, %v4591_v47  ;;  %v8636_v51 = vpack.c.bf16 %v4628_v41, %v4620_v31  ;;  %v4645_v47 = vld [vmem:[#allocation4 + $0x1c8] sm:$0xff]  ;;  %v4652_v13 = vld [vmem:[#allocation4 + $0x200] sm:$0xff] }
 0x7e4   :  { %v8638_v60 = vpack.c.bf16 %v4645_v47, %v4637_v46  ;;  %v4668_v41 = vld [vmem:[#allocation4 + $0x280] sm:$0xff]  ;;  %v4678_v46 = vld [vmem:[#allocation4 + $0x2d0] sm:$0xff]  ;;  %v4685_v47 = vld [vmem:[#allocation4 + $0x308] sm:$0xff] }
 0x7e5   :  { %8553 = vmatpush1.bf16.msra.mxu0 %v8552_v8  ;;  %8617 = vmatpush1.bf16.msra.mxu1 %v8616_v9  ;;  %v4605_v8 = vld [vmem:[#allocation4 + $0x88] sm:$0xff]  ;;  %v8692_v9 = vpack.c.bf16 %v4598_v15, %v4590_v5  ;;  %v4638_v15 = vld [vmem:[#allocation4 + $0x190] sm:$0xff] }
 0x7e6   :  { %8555 = vmatprep.subr.bf16.mxu0 %v8554_v19  ;;  %8619 = vmatprep.subr.bf16.mxu1 %v8618_v2  ;;  %v4615_v19 = vld [vmem:[#allocation4 + $0xd8] sm:$0xff] }
 0x7e7   :  { %v8694_v2 = vpack.c.bf16 %v4615_v19, %v4607_v54  ;;  %v4655_v54 = vld [vmem:[#allocation4 + $0x218] sm:$0xff] }
 0x7e8   :  { %v4663_v19 = vld [vmem:[#allocation4 + $0x258] sm:$0xff] }
 0x7e9   :  { %8557 = vmatpush1.bf16.msra.mxu0 %v8556_v30  ;;  %8621 = vmatpush1.bf16.msra.mxu1 %v8620_v17  ;;  %v4629_v30 = vld [vmem:[#allocation4 + $0x148] sm:$0xff]  ;;  %v8696_v17 = vpack.c.bf16 %v4614_v39, %v4606_v16  ;;  %v4660_v16 = vld [vmem:[#allocation4 + $0x240] sm:$0xff]  ;;  %v8706_v39 = vpack.c.bf16 %v4663_v19, %v4655_v54 }
 0x7ea   :  { %8559 = vmatprep.subr.bf16.mxu0 %v8558_v43  ;;  %8623 = vmatprep.subr.bf16.mxu1 %v8622_v49  ;;  %v8634_v21 = vpack.c.bf16 %v4629_v30, %v4621_v26  ;;  %v4623_v43 = vld [vmem:[#allocation4 + $0x118] sm:$0xff]  ;;  %v4662_v26 = vld [vmem:[#allocation4 + $0x250] sm:$0xff]  ;;  %v4669_v30 = vld [vmem:[#allocation4 + $0x288] sm:$0xff] }
 0x7eb   :  { %v4631_v49 = vld [vmem:[#allocation4 + $0x158] sm:$0xff]  ;;  %v4701_v54 = vld [vmem:[#allocation4 + $0x388] sm:$0xff] }
 0x7ec   :  { %v8698_v35 = vpack.c.bf16 %v4631_v49, %v4623_v43  ;;  %v4679_v43 = vld [vmem:[#allocation4 + $0x2d8] sm:$0xff]  ;;  %v8644_v49 = vpack.c.bf16 %v4660_v16, %v4652_v13  ;;  %v4709_v19 = vld [vmem:[#allocation4 + $0x3c8] sm:$0xff] }
 0x7ed   :  { %8561 = vmatpush1.bf16.msra.mxu0 %v8560_v52  ;;  %8625 = vmatpush1.bf16.msra.mxu1 %v8624_v18  ;;  %v4622_v52 = vld [vmem:[#allocation4 + $0x110] sm:$0xff]  ;;  %v8654_v16 = vpack.c.bf16 %v4709_v19, %v4701_v54 }
 0x7ee   :  { %8627 = vmatprep.subr.bf16.mxu0 %v8626_v44  ;;  %8691 = vmatprep.subr.bf16.mxu1 %v8690_v50  ;;  %v4630_v18 = vld [vmem:[#allocation4 + $0x150] sm:$0xff]  ;;  %v4639_v44 = vld [vmem:[#allocation4 + $0x198] sm:$0xff]  ;;  %v4636_v50 = vld [vmem:[#allocation4 + $0x180] sm:$0xff] }
 0x7ef   :  { %v8700_v4 = vpack.c.bf16 %v4630_v18, %v4622_v52  ;;  %v8702_v5 = vpack.c.bf16 %v4647_v48, %v4639_v44  ;;  %v4676_v52 = vld [vmem:[#allocation4 + $0x2c0] sm:$0xff]  ;;  %v4670_v18 = vld [vmem:[#allocation4 + $0x290] sm:$0xff]  ;;  %v4693_v44 = vld [vmem:[#allocation4 + $0x348] sm:$0xff] }
 0x7f0   :  { %4419 = vmatmul.mubr.f32.vlgmr.msra.gmra.mrb[26].mxu0 %v10171_v12  ;;  %4490 = vmatmul.mubr.f32.vlgmr.msra.gmra.mrb[26].mxu1 %v10171_v12  ;;  %v8630_v12 = vpack.c.bf16 %v4613_v3, %v4605_v8  ;;  %v4646_v8 = vld [vmem:[#allocation4 + $0x1d0] sm:$0xff]  ;;  %v4661_v3 = vld [vmem:[#allocation4 + $0x248] sm:$0xff]  ;;  %v8648_v48 = vpack.c.bf16 %v4676_v52, %v4668_v41  ;;  %v4727_v52 = vld [vmem:[#allocation4 + $0x458] sm:$0xff] }
 0x7f1   :  { %8629 = vmatpush1.bf16.msra.mxu0 %v8628_v53  ;;  %8693 = vmatpush1.bf16.msra.mxu1 %v8692_v9  ;;  %v4644_v53 = vld [vmem:[#allocation4 + $0x1c0] sm:$0xff]  ;;  %v4653_v9 = vld [vmem:[#allocation4 + $0x208] sm:$0xff]  ;;  %v4734_v19 = vld [vmem:[#allocation4 + $0x490] sm:$0xff] }
 0x7f2   :  { %8631 = vmatprep.subr.bf16.mxu0 %v8630_v12  ;;  %8695 = vmatprep.subr.bf16.mxu1 %v8694_v2  ;;  %v8640_v12 = vpack.c.bf16 %v4644_v53, %v4636_v50  ;;  %v8704_v2 = vpack.c.bf16 %v4646_v8, %v4638_v15  ;;  %v8642_v10 = vpack.c.bf16 %v4661_v3, %v4653_v9  ;;  %v4692_v15 = vld [vmem:[#allocation4 + $0x340] sm:$0xff]  ;;  %v4686_v8 = vld [vmem:[#allocation4 + $0x310] sm:$0xff] }
 0x7f3   :  { %v8712_v50 = vpack.c.bf16 %v4678_v46, %v4670_v18  ;;  %v8650_v53 = vpack.c.bf16 %v4693_v44, %v4685_v47  ;;  %v4694_v3 = vld [vmem:[#allocation4 + $0x350] sm:$0xff]  ;;  %v4724_v46 = vld [vmem:[#allocation4 + $0x440] sm:$0xff] }
 0x7f4   :  { %v8716_v13 = vpack.c.bf16 %v4694_v3, %v4686_v8  ;;  %v4718_v47 = vld [vmem:[#allocation4 + $0x410] sm:$0xff]  ;;  %v4732_v8 = vld [vmem:[#allocation4 + $0x480] sm:$0xff] }
 0x7f5   :  { %8633 = vmatpush1.bf16.msra.mxu0 %v8632_v22  ;;  %8697 = vmatpush1.bf16.msra.mxu1 %v8696_v17  ;;  %v4654_v22 = vld [vmem:[#allocation4 + $0x210] sm:$0xff]  ;;  %v4677_v17 = vld [vmem:[#allocation4 + $0x2c8] sm:$0xff] }
 0x7f6   :  { %8635 = vmatprep.subr.bf16.mxu0 %v8634_v21  ;;  %8699 = vmatprep.subr.bf16.mxu1 %v8698_v35  ;;  %v4671_v21 = vld [vmem:[#allocation4 + $0x298] sm:$0xff]  ;;  %v8708_v31 = vpack.c.bf16 %v4662_v26, %v4654_v22  ;;  %v8646_v35 = vpack.c.bf16 %v4677_v17, %v4669_v30  ;;  %v4700_v22 = vld [vmem:[#allocation4 + $0x380] sm:$0xff]  ;;  %v4702_v30 = vld [vmem:[#allocation4 + $0x390] sm:$0xff] }
 0x7f7   :  { %v4710_v17 = vld [vmem:[#allocation4 + $0x3d0] sm:$0xff] }
 0x7f9   :  { %8637 = vmatpush1.bf16.msra.mxu0 %v8636_v51  ;;  %8701 = vmatpush1.bf16.msra.mxu1 %v8700_v4  ;;  %v8710_v51 = vpack.c.bf16 %v4679_v43, %v4671_v21  ;;  %v4687_v4 = vld [vmem:[#allocation4 + $0x318] sm:$0xff]  ;;  %v8720_v43 = vpack.c.bf16 %v4710_v17, %v4702_v30  ;;  %v4756_v30 = vld [vmem:[#allocation4 + $0x540] sm:$0xff] }
 0x7fa   :  { %8639 = vmatprep.subr.bf16.mxu0 %v8638_v60  ;;  %8703 = vmatprep.subr.bf16.mxu1 %v8702_v5  ;;  %v4695_v60 = vld [vmem:[#allocation4 + $0x358] sm:$0xff]  ;;  %v4684_v5 = vld [vmem:[#allocation4 + $0x300] sm:$0xff] }
 0x7fb   :  { %v8714_v9 = vpack.c.bf16 %v4695_v60, %v4687_v4  ;;  %v4726_v4 = vld [vmem:[#allocation4 + $0x450] sm:$0xff] }
 0x7fc   :  { %v8724_v60 = vpack.c.bf16 %v4726_v4, %v4718_v47  ;;  %v4772_v47 = vld [vmem:[#allocation4 + $0x5c0] sm:$0xff] }
 0x7fd   :  { %8641 = vmatpush1.bf16.msra.mxu0 %v8640_v12  ;;  %8705 = vmatpush1.bf16.msra.mxu1 %v8704_v2  ;;  %v4703_v12 = vld [vmem:[#allocation4 + $0x398] sm:$0xff] }
 0x7fe   :  { %8643 = vmatprep.subr.bf16.mxu0 %v8642_v10  ;;  %8707 = vmatprep.subr.bf16.mxu1 %v8706_v39  ;;  %v4711_v2 = vld [vmem:[#allocation4 + $0x3d8] sm:$0xff]  ;;  %v8652_v10 = vpack.c.bf16 %v4692_v15, %v4684_v5  ;;  %v4708_v39 = vld [vmem:[#allocation4 + $0x3c0] sm:$0xff] }
 0x7ff   :  { %v8718_v26 = vpack.c.bf16 %v4711_v2, %v4703_v12  ;;  %v8656_v21 = vpack.c.bf16 %v4708_v39, %v4700_v22  ;;  %v4743_v15 = vld [vmem:[#allocation4 + $0x4d8] sm:$0xff]  ;;  %v4742_v12 = vld [vmem:[#allocation4 + $0x4d0] sm:$0xff] }
 0x800   :  { %v8728_v2 = vpack.c.bf16 %v4742_v12, %v4734_v19  ;;  %v4759_v39 = vld [vmem:[#allocation4 + $0x558] sm:$0xff] }
 0x801   :  { %8645 = vmatpush1.bf16.msra.mxu0 %v8644_v49  ;;  %8709 = vmatpush1.bf16.msra.mxu1 %v8708_v31  ;;  %v4717_v49 = vld [vmem:[#allocation4 + $0x408] sm:$0xff] }
 0x802   :  { %8647 = vmatprep.subr.bf16.mxu0 %v8646_v35  ;;  %8711 = vmatprep.subr.bf16.mxu1 %v8710_v51  ;;  %v4725_v31 = vld [vmem:[#allocation4 + $0x448] sm:$0xff]  ;;  %v4719_v35 = vld [vmem:[#allocation4 + $0x418] sm:$0xff]  ;;  %v4716_v51 = vld [vmem:[#allocation4 + $0x400] sm:$0xff] }
 0x803   :  { %v8658_v41 = vpack.c.bf16 %v4725_v31, %v4717_v49  ;;  %v8722_v18 = vpack.c.bf16 %v4727_v52, %v4719_v35  ;;  %v8660_v44 = vpack.c.bf16 %v4724_v46, %v4716_v51  ;;  %v4758_v49 = vld [vmem:[#allocation4 + $0x550] sm:$0xff]  ;;  %v4765_v35 = vld [vmem:[#allocation4 + $0x588] sm:$0xff]  ;;  %v4767_v52 = vld [vmem:[#allocation4 + $0x598] sm:$0xff] }
 0x804   :  { %v4775_v51 = vld [vmem:[#allocation4 + $0x5d8] sm:$0xff]  ;;  %v4764_v46 = vld [vmem:[#allocation4 + $0x580] sm:$0xff] }
 0x805   :  { %8649 = vmatpush1.bf16.msra.mxu0 %v8648_v48  ;;  %8713 = vmatpush1.bf16.msra.mxu1 %v8712_v50  ;;  %v4733_v48 = vld [vmem:[#allocation4 + $0x488] sm:$0xff]  ;;  %v8672_v4 = vpack.c.bf16 %v4772_v47, %v4764_v46  ;;  %v4823_v46 = vld [vmem:[#allocation4 + $0x758] sm:$0xff] }
 0x806   :  { %8651 = vmatprep.subr.bf16.mxu0 %v8650_v53  ;;  %8715 = vmatprep.subr.bf16.mxu1 %v8714_v9  ;;  %v4741_v50 = vld [vmem:[#allocation4 + $0x4c8] sm:$0xff]  ;;  %v4735_v53 = vld [vmem:[#allocation4 + $0x498] sm:$0xff]  ;;  %v4740_v9 = vld [vmem:[#allocation4 + $0x4c0] sm:$0xff] }
 0x807   :  { %v8662_v5 = vpack.c.bf16 %v4741_v50, %v4733_v48  ;;  %v8726_v3 = vpack.c.bf16 %v4743_v15, %v4735_v53  ;;  %v8664_v54 = vpack.c.bf16 %v4740_v9, %v4732_v8  ;;  %v4774_v48 = vld [vmem:[#allocation4 + $0x5d0] sm:$0xff]  ;;  %v4781_v53 = vld [vmem:[#allocation4 + $0x608] sm:$0xff]  ;;  %v4783_v15 = vld [vmem:[#allocation4 + $0x618] sm:$0xff] }
 0x808   :  { %v4791_v9 = vld [vmem:[#allocation4 + $0x658] sm:$0xff] }
 0x809   :  { %8653 = vmatpush1.bf16.msra.mxu0 %v8652_v10  ;;  %8717 = vmatpush1.bf16.msra.mxu1 %v8716_v13  ;;  %v4749_v10 = vld [vmem:[#allocation4 + $0x508] sm:$0xff]  ;;  %v8738_v19 = vpack.c.bf16 %v4791_v9, %v4783_v15 }
 0x80a   :  { %8655 = vmatprep.subr.bf16.mxu0 %v8654_v16  ;;  %8719 = vmatprep.subr.bf16.mxu1 %v8718_v26  ;;  %v4757_v13 = vld [vmem:[#allocation4 + $0x548] sm:$0xff]  ;;  %v4751_v16 = vld [vmem:[#allocation4 + $0x518] sm:$0xff]  ;;  %v4748_v26 = vld [vmem:[#allocation4 + $0x500] sm:$0xff] }
 0x80b   :  { %v8666_v22 = vpack.c.bf16 %v4757_v13, %v4749_v10  ;;  %v8730_v17 = vpack.c.bf16 %v4759_v39, %v4751_v16  ;;  %v4790_v10 = vld [vmem:[#allocation4 + $0x650] sm:$0xff]  ;;  %v4797_v16 = vld [vmem:[#allocation4 + $0x688] sm:$0xff]  ;;  %v4799_v39 = vld [vmem:[#allocation4 + $0x698] sm:$0xff] }
 0x80c   :  { %v4837_v15 = vld [vmem:[#allocation4 + $0x7c8] sm:$0xff] }
 0x80d   :  { %8657 = vmatpush1.bf16.msra.mxu0 %v8656_v21  ;;  %8721 = vmatpush1.bf16.msra.mxu1 %v8720_v43  ;;  %v8668_v21 = vpack.c.bf16 %v4756_v30, %v4748_v26  ;;  %v4750_v43 = vld [vmem:[#allocation4 + $0x510] sm:$0xff]  ;;  %v4807_v30 = vld [vmem:[#allocation4 + $0x6d8] sm:$0xff] }
 0x80e   :  { %8659 = vmatprep.subr.bf16.mxu0 %v8658_v41  ;;  %8723 = vmatprep.subr.bf16.mxu1 %v8722_v18  ;;  %v8732_v31 = vpack.c.bf16 %v4758_v49, %v4750_v43  ;;  %v4773_v41 = vld [vmem:[#allocation4 + $0x5c8] sm:$0xff]  ;;  %v8742_v43 = vpack.c.bf16 %v4807_v30, %v4799_v39  ;;  %v4595_v30 = vld [vmem:[#allocation4 + $0x38] sm:$0xff] }
 0x80f   :  { %v8670_v18 = vpack.c.bf16 %v4773_v41, %v4765_v35  ;;  %v4806_v35 = vld [vmem:[#allocation4 + $0x6d0] sm:$0xff]  ;;  %v4813_v41 = vld [vmem:[#allocation4 + $0x708] sm:$0xff] }
 0x810   :  { %v4593_v39 = vld [vmem:[#allocation4 + $0x28] sm:$0xff] }
 0x811   :  { %8661 = vmatpush1.bf16.msra.mxu0 %v8660_v44  ;;  %8725 = vmatpush1.bf16.msra.mxu1 %v8724_v60  ;;  %v8734_v44 = vpack.c.bf16 %v4775_v51, %v4767_v52  ;;  %v4766_v60 = vld [vmem:[#allocation4 + $0x590] sm:$0xff]  ;;  %v4815_v51 = vld [vmem:[#allocation4 + $0x718] sm:$0xff] }
 0x812   :  { %8663 = vmatprep.subr.bf16.mxu0 %v8662_v5  ;;  %8727 = vmatprep.subr.bf16.mxu1 %v8726_v3  ;;  %v8736_v50 = vpack.c.bf16 %v4774_v48, %v4766_v60  ;;  %v4789_v5 = vld [vmem:[#allocation4 + $0x648] sm:$0xff]  ;;  %v4780_v3 = vld [vmem:[#allocation4 + $0x600] sm:$0xff]  ;;  %v4814_v48 = vld [vmem:[#allocation4 + $0x710] sm:$0xff] }
 0x813   :  { %v8674_v8 = vpack.c.bf16 %v4789_v5, %v4781_v53  ;;  %v4820_v60 = vld [vmem:[#allocation4 + $0x740] sm:$0xff]  ;;  %v4822_v53 = vld [vmem:[#allocation4 + $0x750] sm:$0xff]  ;;  %v4829_v5 = vld [vmem:[#allocation4 + $0x788] sm:$0xff] }
 0x814   :  { %v8686_v9 = vpack.c.bf16 %v4837_v15, %v4829_v5 }
 0x815   :  { %8665 = vmatpush1.bf16.msra.mxu0 %v8664_v54  ;;  %8729 = vmatpush1.bf16.msra.mxu1 %v8728_v2  ;;  %v4788_v54 = vld [vmem:[#allocation4 + $0x640] sm:$0xff]  ;;  %v4782_v2 = vld [vmem:[#allocation4 + $0x610] sm:$0xff] }
 0x816   :  { %8667 = vmatprep.subr.bf16.mxu0 %v8666_v22  ;;  %8731 = vmatprep.subr.bf16.mxu1 %v8730_v17  ;;  %v8676_v12 = vpack.c.bf16 %v4788_v54, %v4780_v3  ;;  %v8740_v13 = vpack.c.bf16 %v4790_v10, %v4782_v2  ;;  %v4805_v22 = vld [vmem:[#allocation4 + $0x6c8] sm:$0xff]  ;;  %v4796_v17 = vld [vmem:[#allocation4 + $0x680] sm:$0xff]  ;;  %v4831_v3 = vld [vmem:[#allocation4 + $0x798] sm:$0xff] }
 0x817   :  { %v8678_v26 = vpack.c.bf16 %v4805_v22, %v4797_v16  ;;  %v4839_v54 = vld [vmem:[#allocation4 + $0x7d8] sm:$0xff]  ;;  %v4836_v2 = vld [vmem:[#allocation4 + $0x7c0] sm:$0xff]  ;;  %v4830_v10 = vld [vmem:[#allocation4 + $0x790] sm:$0xff] }
 0x819   :  { %8669 = vmatpush1.bf16.msra.mxu0 %v8668_v21  ;;  %8733 = vmatpush1.bf16.msra.mxu1 %v8732_v31  ;;  %v4804_v21 = vld [vmem:[#allocation4 + $0x6c0] sm:$0xff]  ;;  %v4798_v31 = vld [vmem:[#allocation4 + $0x690] sm:$0xff] }
 0x81a   :  { %8671 = vmatprep.subr.bf16.mxu0 %v8670_v18  ;;  %8735 = vmatprep.subr.bf16.mxu1 %v8734_v44  ;;  %v8680_v49 = vpack.c.bf16 %v4804_v21, %v4796_v17  ;;  %v8744_v52 = vpack.c.bf16 %v4806_v35, %v4798_v31  ;;  %v4821_v18 = vld [vmem:[#allocation4 + $0x748] sm:$0xff]  ;;  %v8746_v44 = vpack.c.bf16 %v4823_v46, %v4815_v51  ;;  %v4603_v21 = vld [vmem:[#allocation4 + $0x78] sm:$0xff] }
 0x81b   :  { %v8682_v47 = vpack.c.bf16 %v4821_v18, %v4813_v41 }
 0x81d   :  { %8673 = vmatpush1.bf16.msra.mxu0 %v8672_v4  ;;  %8737 = vmatpush1.bf16.msra.mxu1 %v8736_v50  ;;  %v4812_v4 = vld [vmem:[#allocation4 + $0x700] sm:$0xff] }
 0x81e   :  { %8675 = vmatprep.subr.bf16.mxu0 %v8674_v8  ;;  %8739 = vmatprep.subr.bf16.mxu1 %v8738_v19  ;;  %v8684_v50 = vpack.c.bf16 %v4820_v60, %v4812_v4  ;;  %v8748_v8 = vpack.c.bf16 %v4822_v53, %v4814_v48  ;;  %v4828_v19 = vld [vmem:[#allocation4 + $0x780] sm:$0xff] }
 0x81f   :  { %v8688_v16 = vpack.c.bf16 %v4836_v2, %v4828_v19 }
 0x821   :  { %8677 = vmatpush1.bf16.msra.mxu0 %v8676_v12  ;;  %8741 = vmatpush1.bf16.msra.mxu1 %v8740_v13  ;;  %v8750_v12 = vpack.c.bf16 %v4839_v54, %v4831_v3  ;;  %v4838_v13 = vld [vmem:[#allocation4 + $0x7d0] sm:$0xff] }
 0x822   :  { %8679 = vmatprep.subr.bf16.mxu0 %v8678_v26  ;;  %8743 = vmatprep.subr.bf16.mxu1 %v8742_v43  ;;  %v8752_v22 = vpack.c.bf16 %v4838_v13, %v4830_v10  ;;  %v4601_v26 = vld [vmem:[#allocation4 + $0x68] sm:$0xff]  ;;  %v8818_v43 = vpack.c.bf16 %v4603_v21, %v4595_v30 }
 0x823   :  { %v8754_v17 = vpack.c.bf16 %v4601_v26, %v4593_v39 }
 0x825   :  { %8681 = vmatpush1.bf16.msra.mxu0 %v8680_v49  ;;  %8745 = vmatpush1.bf16.msra.mxu1 %v8744_v52  ;;  %v3938_v52 = vpop.permute.xlu0 %3937 }
 0x826   :  { %8683 = vmatprep.subr.bf16.mxu0 %v8682_v47  ;;  %8747 = vmatprep.subr.bf16.mxu1 %v8746_v44  ;;  %v3940_v18 = vmul.f32 %v3938_v52, %v9889_v29  ;;  %v3942_v51 = vmul.f32 %v3938_v52, %v9895_v32  ;;  %v3941_v46 = vmul.f32 %v3938_v52, %v9898_v33 }
 0x827   :  { %v3943_v47 = vmul.f32 %v3938_v52, %v9901_v34  ;;  %v3945_v26 = vmul.f32 %v3938_v52, %v9942_v62  ;;  %v3947_v30 = vmul.f32 %v3938_v52, %v9945_v0 }
 0x828   :  { %v3948_v44 = vadd.f32 %v3940_v18, %v9905_v36  ;;  %v3950_v4 = vadd.f32 %v3942_v51, %v9909_v38  ;;  %v3949_v48 = vadd.f32 %v3941_v46, %v9913_v40 }
 0x829   :  { %8685 = vmatpush1.bf16.msra.mxu0 %v8684_v50  ;;  %8749 = vmatpush1.bf16.msra.mxu1 %v8748_v8  ;;  %v3951_v53 = vadd.f32 %v3943_v47, %v9917_v42  ;;  %v3955_v18 = vadd.f32 %v3947_v30, %v9961_v14 }
 0x82a   :  { %8687 = vmatprep.subr.bf16.mxu0 %v8686_v9  ;;  %8751 = vmatprep.subr.bf16.mxu1 %v8750_v12 }
 0x82d   :  { %8689 = vmatpush1.bf16.msra.mxu0 %v8688_v16  ;;  %8753 = vmatpush1.bf16.msra.mxu1 %v8752_v22  ;;  %v3944_v16 = vmul.f32 %v3938_v52, %v9936_v59  ;;  %v3946_v22 = vmul.f32 %v3938_v52, %v9939_v61 }
 0x82e   :  { %8755 = vmatprep.subr.bf16.mxu0 %v8754_v17  ;;  %8819 = vmatprep.subr.bf16.mxu1 %v8818_v43 }
 0x82f   :  { %v3952_v43 = vadd.f32 %v3944_v16, %v9949_v6 }
 0x883   :  { %v4278_v49 = vpop.f32.mrb[24].mxu0  ;;  %v4349_v31 = vpop.f32.mrb[24].mxu1 }
 0x884   :  { %v4280_v35 = vpop.f32.mrb[25].mxu0  ;;  %v4351_v41 = vpop.f32.mrb[25].mxu1  ;;  %v4496_v60 = vadd.f32 %v4278_v49, %v3948_v44  ;;  %v4498_v50 = vadd.f32 %v4349_v31, %v3950_v4  ;;  %v3954_v49 = vadd.f32 %v3946_v22, %v9952_v7 }
 0x885   :  { %v4497_v5 = vadd.f32 %v4280_v35, %v3949_v48  ;;  %v4499_v15 = vadd.f32 %v4351_v41, %v3951_v53  ;;  %v3953_v41 = vadd.f32 %v3945_v26, %v9957_v11 }
 0x886   :  { %v6804_v8 = vmul.f32 -1.442695, %v4496_v60  ;;  %v6806_v9 = vmul.f32 -1.442695, %v4498_v50 }
 0x887   :  { %v6805_v3 = vmul.f32 -1.442695, %v4497_v5  ;;  %v6807_v54 = vmul.f32 -1.442695, %v4499_v15 }
 0x888   :  { %9595 = vpow2.f32 %v6804_v8 }
 0x889   :  { %9597 = vpow2.f32 %v6806_v9 }
 0x88a   :  { %9599 = vpow2.f32 %v6805_v3 }
 0x88b   :  { %9601 = vpow2.f32 %v6807_v54 }
 0x892   :  { %v9596_v19 = vpop.eup %9595 }
 0x893   :  { %v9598_v12 = vpop.eup %9597  ;;  %v4510_v13 = vadd.f32 1.0, %v9596_v19 }
 0x894   :  { %v9600_v2 = vpop.eup %9599  ;;  %v4522_v39 = vadd.f32 1.0, %v9598_v12 }
 0x895   :  { %v9602_v10 = vpop.eup %9601  ;;  %v4511_v17 = vadd.f32 1.0, %v9600_v2  ;;  %9603 = vrcp.f32 %v4510_v13 }
 0x896   :  { %v4523_v21 = vadd.f32 1.0, %v9602_v10  ;;  %9605 = vrcp.f32 %v4522_v39 }
 0x897   :  { %9607 = vrcp.f32 %v4511_v17  ;;  %v4600_v17 = vld [vmem:[#allocation4 + $0x60] sm:$0xff] }
 0x898   :  { %9609 = vrcp.f32 %v4523_v21  ;;  %v4594_v21 = vld [vmem:[#allocation4 + $0x30] sm:$0xff] }
 0x89f   :  { %v9604_v50 = vpop.eup %9603 }
 0x8a0   :  { %v9606_v53 = vpop.eup %9605 }
 0x8a1   :  { %v9608_v5 = vpop.eup %9607  ;;  %v4542_v3 = vmul.f32 %v9606_v53, %v10165_v37  ;;  %v4592_v37 = vld [vmem:[#allocation4 + $0x20] sm:$0xff] }
 0x8a2   :  { %v9610_v15 = vpop.eup %9609 }
 0x8a3   :  { %v4543_v12 = vmul.f32 %v9610_v15, %v10167_v45  ;;  %v4602_v45 = vld [vmem:[#allocation4 + $0x70] sm:$0xff] }
 0x8c3   :  { %v4420_v31 = vpop.f32.mrb[26].mxu0  ;;  %v4491_v35 = vpop.f32.mrb[26].mxu1 }
 0x8c4   :  { %v4500_v51 = vadd.f32 %v4420_v31, %v3952_v43  ;;  %v4502_v46 = vadd.f32 %v4491_v35, %v3954_v49  ;;  %v4422_v47 = vpop.f32.mrb[27].mxu0  ;;  %v4493_v44 = vpop.f32.mrb[27].mxu1  ;;  %v4609_v31 = vld [vmem:[#allocation4 + $0xa8] sm:$0xff] }
 0x8c5   :  { %v4501_v52 = vadd.f32 %v4422_v47, %v3953_v41  ;;  %v4503_v4 = vadd.f32 %v4493_v44, %v3955_v18  ;;  %v4617_v41 = vld [vmem:[#allocation4 + $0xe8] sm:$0xff]  ;;  %v4611_v18 = vld [vmem:[#allocation4 + $0xb8] sm:$0xff]  ;;  %v8756_v47 = vpack.c.bf16 %v4600_v17, %v4592_v37  ;;  %v8820_v44 = vpack.c.bf16 %v4602_v45, %v4594_v21 }
 0x8c6   :  { %9611 = vtanh.f32 %v4500_v51  ;;  %v6808_v60 = vmul.f32 -1.442695, %v4502_v46  ;;  %v4619_v51 = vld [vmem:[#allocation4 + $0xf8] sm:$0xff]  ;;  %v4641_v37 = vld [vmem:[#allocation4 + $0x1a8] sm:$0xff] }
 0x8c7   :  { %9613 = vtanh.f32 %v4501_v52  ;;  %v6809_v48 = vmul.f32 -1.442695, %v4503_v4  ;;  %v4608_v52 = vld [vmem:[#allocation4 + $0xa0] sm:$0xff]  ;;  %v8822_v15 = vpack.c.bf16 %v4619_v51, %v4611_v18  ;;  %v4643_v17 = vld [vmem:[#allocation4 + $0x1b8] sm:$0xff]  ;;  %v4642_v51 = vld [vmem:[#allocation4 + $0x1b0] sm:$0xff] }
 0x8c8   :  { %9615 = vpow2.f32 %v6808_v60  ;;  %v4616_v4 = vld [vmem:[#allocation4 + $0xe0] sm:$0xff]  ;;  %v4610_v60 = vld [vmem:[#allocation4 + $0xb0] sm:$0xff]  ;;  %v4651_v21 = vld [vmem:[#allocation4 + $0x1f8] sm:$0xff] }
 0x8c9   :  { %9617 = vpow2.f32 %v6809_v48  ;;  %v4618_v48 = vld [vmem:[#allocation4 + $0xf0] sm:$0xff]  ;;  %v8830_v18 = vpack.c.bf16 %v4651_v21, %v4643_v17  ;;  %v4680_v17 = vld [vmem:[#allocation4 + $0x2e0] sm:$0xff] }
 0x8d0   :  { %v9612_v8 = vpop.eup %9611 }
 0x8d1   :  { %v9614_v9 = vpop.eup %9613  ;;  %v4544_v54 = vmul.f32 %v9612_v8, %v9604_v50  ;;  %v4625_v50 = vld [vmem:[#allocation4 + $0x128] sm:$0xff] }
 0x8d2   :  { %v9616_v19 = vpop.eup %9615  ;;  %v4545_v2 = vmul.f32 %v9614_v9, %v9608_v5  ;;  %v8758_v5 = vpack.c.bf16 %v4617_v41, %v4609_v31  ;;  %v4633_v8 = vld [vmem:[#allocation4 + $0x168] sm:$0xff]  ;;  %v4627_v9 = vld [vmem:[#allocation4 + $0x138] sm:$0xff]  ;;  %v4640_v31 = vld [vmem:[#allocation4 + $0x1a0] sm:$0xff] }
 0x8d3   :  { %v9618_v10 = vpop.eup %9617  ;;  %v10200_v13 = vadd.f32 %v4544_v54, %v4542_v3  ;;  %v4536_v16 = vadd.f32 1.0, %v9616_v19  ;;  %v4635_v3 = vld [vmem:[#allocation4 + $0x178] sm:$0xff]  ;;  %v8760_v54 = vpack.c.bf16 %v4616_v4, %v4608_v52  ;;  %v8824_v19 = vpack.c.bf16 %v4618_v48, %v4610_v60 }
 0x8d4   :  { %v10202_v22 = vadd.f32 %v4545_v2, %v4543_v12  ;;  %v4537_v39 = vadd.f32 1.0, %v9618_v10  ;;  %v4624_v12 = vld [vmem:[#allocation4 + $0x120] sm:$0xff]  ;;  %v8762_v10 = vpack.c.bf16 %v4633_v8, %v4625_v50  ;;  %v4659_v52 = vld [vmem:[#allocation4 + $0x238] sm:$0xff] }
 0x8d5   :  { %9619 = vtanh.f32 %v10200_v13  ;;  %v4632_v2 = vld [vmem:[#allocation4 + $0x160] sm:$0xff]  ;;  %v4667_v4 = vld [vmem:[#allocation4 + $0x278] sm:$0xff] }
 0x8d6   :  { %9621 = vrcp.f32 %v4536_v16  ;;  %v8826_v16 = vpack.c.bf16 %v4635_v3, %v4627_v9  ;;  %v8764_v45 = vpack.c.bf16 %v4632_v2, %v4624_v12  ;;  %v8834_v8 = vpack.c.bf16 %v4667_v4, %v4659_v52  ;;  %v4664_v9 = vld [vmem:[#allocation4 + $0x260] sm:$0xff]  ;;  %v4658_v3 = vld [vmem:[#allocation4 + $0x230] sm:$0xff]  ;;  %v4673_v12 = vld [vmem:[#allocation4 + $0x2a8] sm:$0xff] }
 0x8d7   :  { %9623 = vtanh.f32 %v10202_v22  ;;  %v4681_v2 = vld [vmem:[#allocation4 + $0x2e8] sm:$0xff] }
 0x8d8   :  { %9625 = vrcp.f32 %v4537_v39  ;;  %v4626_v39 = vld [vmem:[#allocation4 + $0x130] sm:$0xff]  ;;  %v8774_v21 = vpack.c.bf16 %v4681_v2, %v4673_v12  ;;  %v4704_v2 = vld [vmem:[#allocation4 + $0x3a0] sm:$0xff] }
 0x8df   :  { %v9620_v26 = vpop.eup %9619 }
 0x8e0   :  { %v9622_v30 = vpop.eup %9621 }
 0x8e1   :  { %v9624_v43 = vpop.eup %9623  ;;  %v10206_v49 = vmul.f32 %v9622_v30, %v9620_v26  ;;  %v4634_v26 = vld [vmem:[#allocation4 + $0x170] sm:$0xff]  ;;  %v4649_v30 = vld [vmem:[#allocation4 + $0x1e8] sm:$0xff] }
 0x8e2   :  { %v9626_v35 = vpop.eup %9625  ;;  %v8766_v41 = vpack.c.bf16 %v4649_v30, %v4641_v37  ;;  %v4672_v30 = vld [vmem:[#allocation4 + $0x2a0] sm:$0xff] }
 0x8e3   :  { %v4551_v46 = vmul.f32 %v9626_v35, %v9624_v43  ;;  %v8828_v43 = vpack.c.bf16 %v4634_v26, %v4626_v39  ;;  %v4648_v35 = vld [vmem:[#allocation4 + $0x1e0] sm:$0xff]  ;;  %v8776_v52 = vpack.c.bf16 %v4680_v17, %v4672_v30  ;;  %v4721_v30 = vld [vmem:[#allocation4 + $0x428] sm:$0xff] }
 0x8e4   :  { %v8768_v48 = vpack.c.bf16 %v4648_v35, %v4640_v31  ;;  %v4689_v31 = vld [vmem:[#allocation4 + $0x328] sm:$0xff] }
 0x8e5   :  { %4908 = vmatprep.mubr.f32.mxu0 %v4551_v46  ;;  %4979 = vmatprep.mubr.f32.mxu1 %v4551_v46  ;;  %v4554_v53 = vcombine.low %v10206_v49, %v4551_v46  ;;  %v4729_v17 = vld [vmem:[#allocation4 + $0x468] sm:$0xff] }
 0x8e6   :  { %4909 = vmatmul.mubr.f32.vlgmr.msra.gmra.mrb[28].mxu0 %v10206_v49  ;;  %4980 = vmatmul.mubr.f32.vlgmr.msra.gmra.mrb[28].mxu1 %v10206_v49 }
 0x8e7   :  { %6810 = vst.sshfl [vmem:[#allocation2 + $0x18] sm:$0x33 pattern:$0x76325410] %v4554_v53  ;;  %8757 = vmatpush1.bf16.msra.mxu0 %v8756_v47  ;;  %8821 = vmatpush1.bf16.msra.mxu1 %v8820_v44  ;;  %v4657_v47 = vld [vmem:[#allocation4 + $0x228] sm:$0xff]  ;;  %v4656_v53 = vld [vmem:[#allocation4 + $0x220] sm:$0xff] }
 0x8e8   :  { %5050 = vmatprep.mubr.f32.mxu0 %v4551_v46  ;;  %5121 = vmatprep.mubr.f32.mxu1 %v4551_v46  ;;  %v4650_v46 = vld [vmem:[#allocation4 + $0x1f0] sm:$0xff]  ;;  %v4665_v44 = vld [vmem:[#allocation4 + $0x268] sm:$0xff]  ;;  %v8772_v39 = vpack.c.bf16 %v4664_v9, %v4656_v53 }
 0x8e9   :  { %8759 = vmatprep.subr.bf16.mxu0 %v8758_v5  ;;  %8823 = vmatprep.subr.bf16.mxu1 %v8822_v15  ;;  %v8832_v50 = vpack.c.bf16 %v4650_v46, %v4642_v51  ;;  %v8770_v15 = vpack.c.bf16 %v4665_v44, %v4657_v47  ;;  %v4697_v51 = vld [vmem:[#allocation4 + $0x368] sm:$0xff]  ;;  %v4691_v46 = vld [vmem:[#allocation4 + $0x338] sm:$0xff] }
 0x8ea   :  { %v4699_v47 = vld [vmem:[#allocation4 + $0x378] sm:$0xff]  ;;  %v4713_v9 = vld [vmem:[#allocation4 + $0x3e8] sm:$0xff] }
 0x8eb   :  { %8761 = vmatpush1.bf16.msra.mxu0 %v8760_v54  ;;  %8825 = vmatpush1.bf16.msra.mxu1 %v8824_v19  ;;  %v4666_v54 = vld [vmem:[#allocation4 + $0x270] sm:$0xff]  ;;  %v8842_v53 = vpack.c.bf16 %v4699_v47, %v4691_v46 }
 0x8ec   :  { %8763 = vmatprep.subr.bf16.mxu0 %v8762_v10  ;;  %8827 = vmatprep.subr.bf16.mxu1 %v8826_v16  ;;  %v4675_v10 = vld [vmem:[#allocation4 + $0x2b8] sm:$0xff]  ;;  %v8836_v26 = vpack.c.bf16 %v4666_v54, %v4658_v3  ;;  %v4722_v46 = vld [vmem:[#allocation4 + $0x430] sm:$0xff] }
 0x8ed   :  { %v4683_v16 = vld [vmem:[#allocation4 + $0x2f8] sm:$0xff]  ;;  %v4730_v47 = vld [vmem:[#allocation4 + $0x470] sm:$0xff] }
 0x8ee   :  { %v6463_v60 = vld [vmem:[#allocation2 + $0x18] sm:$0xf]  ;;  %v4707_v3 = vld [vmem:[#allocation4 + $0x3b8] sm:$0xff] }
 0x8ef   :  { %8765 = vmatpush1.bf16.msra.mxu0 %v8764_v45  ;;  %8829 = vmatpush1.bf16.msra.mxu1 %v8828_v43  ;;  %v6492_v5 = vmul.f32 %v9987_v20, %v6463_v60  ;;  %v4674_v45 = vld [vmem:[#allocation4 + $0x2b0] sm:$0xff]  ;;  %v4688_v60 = vld [vmem:[#allocation4 + $0x320] sm:$0xff]  ;;  %v4715_v54 = vld [vmem:[#allocation4 + $0x3f8] sm:$0xff] }
 0x8f0   :  { %8767 = vmatprep.subr.bf16.mxu0 %v8766_v41  ;;  %8831 = vmatprep.subr.bf16.mxu1 %v8830_v18  ;;  %v4682_v43 = vld [vmem:[#allocation4 + $0x2f0] sm:$0xff]  ;;  %v8838_v18 = vpack.c.bf16 %v4683_v16, %v4675_v10  ;;  %v4712_v10 = vld [vmem:[#allocation4 + $0x3e0] sm:$0xff] }
 0x8f1   :  { %v6560_v19 = vrot.slane %v6492_v5, %v9984_v63  ;;  %v8840_v4 = vpack.c.bf16 %v4682_v43, %v4674_v45  ;;  %v4690_v5 = vld [vmem:[#allocation4 + $0x330] sm:$0xff]  ;;  %v4731_v45 = vld [vmem:[#allocation4 + $0x478] sm:$0xff]  ;;  %v8784_v43 = vpack.c.bf16 %v4712_v10, %v4704_v2 }
 0x8f2   :  { %v4763_v2 = vld [vmem:[#allocation4 + $0x578] sm:$0xff] }
 0x8f3   :  { %8769 = vmatpush1.bf16.msra.mxu0 %v8768_v48  ;;  %8833 = vmatpush1.bf16.msra.mxu1 %v8832_v50  ;;  %v6561_v37 = vcombine.high %v6560_v19, %v6560_v19  ;;  %v6637_v35 = vsel %vm6606_vm0, %v6560_v19, 0.0  ;;  %v4696_v48 = vld [vmem:[#allocation4 + $0x360] sm:$0xff]  ;;  %v8778_v50 = vpack.c.bf16 %v4697_v51, %v4689_v31 }
 0x8f4   :  { %8771 = vmatprep.subr.bf16.mxu0 %v8770_v15  ;;  %8835 = vmatprep.subr.bf16.mxu1 %v8834_v8  ;;  %v4698_v15 = vld [vmem:[#allocation4 + $0x370] sm:$0xff]  ;;  %v4705_v8 = vld [vmem:[#allocation4 + $0x3a8] sm:$0xff]  ;;  %v8780_v19 = vpack.c.bf16 %v4696_v48, %v4688_v60  ;;  %v4747_v60 = vld [vmem:[#allocation4 + $0x4f8] sm:$0xff] }
 0x8f5   :  { %v6638_v41 = vsel %vm6606_vm0, %v6561_v37, 0.0  ;;  %v8844_v12 = vpack.c.bf16 %v4698_v15, %v4690_v5  ;;  %v8782_v16 = vpack.c.bf16 %v4713_v9, %v4705_v8  ;;  %v4714_v37 = vld [vmem:[#allocation4 + $0x3f0] sm:$0xff]  ;;  %v4744_v5 = vld [vmem:[#allocation4 + $0x4e0] sm:$0xff] }
 0x8f6   :  { %v6639_v44 = vadd.f32 %v6638_v41, %v6637_v35  ;;  %v4720_v35 = vld [vmem:[#allocation4 + $0x420] sm:$0xff]  ;;  %v4738_v9 = vld [vmem:[#allocation4 + $0x4b0] sm:$0xff] }
 0x8f7   :  { %8773 = vmatpush1.bf16.msra.mxu0 %v8772_v39  ;;  %8837 = vmatpush1.bf16.msra.mxu1 %v8836_v26  ;;  %v8846_v39 = vpack.c.bf16 %v4715_v54, %v4707_v3  ;;  %v4706_v26 = vld [vmem:[#allocation4 + $0x3b0] sm:$0xff]  ;;  %v4728_v41 = vld [vmem:[#allocation4 + $0x460] sm:$0xff]  ;;  %v4753_v54 = vld [vmem:[#allocation4 + $0x528] sm:$0xff] }
 0x8f8   :  { %6640 = vadd.xlane.f32.xlu1 %v6639_v44  ;;  %8775 = vmatprep.subr.bf16.mxu0 %v8774_v21  ;;  %v4723_v21 = vld [vmem:[#allocation4 + $0x438] sm:$0xff]  ;;  %v8848_v31 = vpack.c.bf16 %v4714_v37, %v4706_v26  ;;  %v4737_v44 = vld [vmem:[#allocation4 + $0x4a8] sm:$0xff]  ;;  %v8788_v48 = vpack.c.bf16 %v4728_v41, %v4720_v35  ;;  %v4746_v3 = vld [vmem:[#allocation4 + $0x4f0] sm:$0xff] }
 0x8f9   :  { %8839 = vmatprep.subr.bf16.mxu1 %v8838_v18  ;;  %v8786_v18 = vpack.c.bf16 %v4729_v17, %v4721_v30  ;;  %v8850_v51 = vpack.c.bf16 %v4731_v45, %v4723_v21  ;;  %v4760_v26 = vld [vmem:[#allocation4 + $0x560] sm:$0xff]  ;;  %v4754_v17 = vld [vmem:[#allocation4 + $0x530] sm:$0xff]  ;;  %v4769_v45 = vld [vmem:[#allocation4 + $0x5a8] sm:$0xff] }
 0x8fa   :  { %v4762_v21 = vld [vmem:[#allocation4 + $0x570] sm:$0xff]  ;;  %v4779_v35 = vld [vmem:[#allocation4 + $0x5f8] sm:$0xff] }
 0x8fb   :  { %8777 = vmatpush1.bf16.msra.mxu0 %v8776_v52  ;;  %8841 = vmatpush1.bf16.msra.mxu1 %v8840_v4  ;;  %v4745_v52 = vld [vmem:[#allocation4 + $0x4e8] sm:$0xff]  ;;  %v4739_v4 = vld [vmem:[#allocation4 + $0x4b8] sm:$0xff] }
 0x8fc   :  { %8779 = vmatprep.subr.bf16.mxu0 %v8778_v50  ;;  %8843 = vmatprep.subr.bf16.mxu1 %v8842_v53  ;;  %v8852_v50 = vpack.c.bf16 %v4730_v47, %v4722_v46  ;;  %v4736_v53 = vld [vmem:[#allocation4 + $0x4a0] sm:$0xff]  ;;  %v8790_v15 = vpack.c.bf16 %v4745_v52, %v4737_v44  ;;  %v8854_v8 = vpack.c.bf16 %v4747_v60, %v4739_v4  ;;  %v4770_v52 = vld [vmem:[#allocation4 + $0x5b0] sm:$0xff]  ;;  %v4785_v60 = vld [vmem:[#allocation4 + $0x628] sm:$0xff] }
 0x8fd   :  { %v8792_v10 = vpack.c.bf16 %v4744_v5, %v4736_v53  ;;  %v4776_v46 = vld [vmem:[#allocation4 + $0x5e0] sm:$0xff]  ;;  %v4778_v4 = vld [vmem:[#allocation4 + $0x5f0] sm:$0xff]  ;;  %v4795_v53 = vld [vmem:[#allocation4 + $0x678] sm:$0xff] }
 0x8ff   :  { %8781 = vmatpush1.bf16.msra.mxu0 %v8780_v19  ;;  %8845 = vmatpush1.bf16.msra.mxu1 %v8844_v12  ;;  %v4761_v19 = vld [vmem:[#allocation4 + $0x568] sm:$0xff]  ;;  %v4755_v12 = vld [vmem:[#allocation4 + $0x538] sm:$0xff] }
 0x900   :  { %8783 = vmatprep.subr.bf16.mxu0 %v8782_v16  ;;  %8847 = vmatprep.subr.bf16.mxu1 %v8846_v39  ;;  %v8856_v16 = vpack.c.bf16 %v4746_v3, %v4738_v9  ;;  %v4752_v39 = vld [vmem:[#allocation4 + $0x520] sm:$0xff]  ;;  %v8794_v37 = vpack.c.bf16 %v4761_v19, %v4753_v54  ;;  %v8858_v30 = vpack.c.bf16 %v4763_v2, %v4755_v12  ;;  %v4786_v19 = vld [vmem:[#allocation4 + $0x630] sm:$0xff]  ;;  %v4801_v2 = vld [vmem:[#allocation4 + $0x6a8] sm:$0xff] }
 0x901   :  { %v8796_v41 = vpack.c.bf16 %v4760_v26, %v4752_v39  ;;  %v4792_v9 = vld [vmem:[#allocation4 + $0x660] sm:$0xff]  ;;  %v4794_v12 = vld [vmem:[#allocation4 + $0x670] sm:$0xff]  ;;  %v4811_v39 = vld [vmem:[#allocation4 + $0x6f8] sm:$0xff] }
 0x903   :  { %8785 = vmatpush1.bf16.msra.mxu0 %v8784_v43  ;;  %8849 = vmatpush1.bf16.msra.mxu1 %v8848_v31  ;;  %v4777_v43 = vld [vmem:[#allocation4 + $0x5e8] sm:$0xff]  ;;  %v4771_v31 = vld [vmem:[#allocation4 + $0x5b8] sm:$0xff] }
 0x904   :  { %8787 = vmatprep.subr.bf16.mxu0 %v8786_v18  ;;  %8851 = vmatprep.subr.bf16.mxu1 %v8850_v51  ;;  %v8860_v18 = vpack.c.bf16 %v4762_v21, %v4754_v17  ;;  %v4768_v51 = vld [vmem:[#allocation4 + $0x5a0] sm:$0xff]  ;;  %v8798_v47 = vpack.c.bf16 %v4777_v43, %v4769_v45  ;;  %v8862_v44 = vpack.c.bf16 %v4779_v35, %v4771_v31  ;;  %v4802_v43 = vld [vmem:[#allocation4 + $0x6b0] sm:$0xff]  ;;  %v4817_v35 = vld [vmem:[#allocation4 + $0x728] sm:$0xff] }
 0x905   :  { %v8800_v5 = vpack.c.bf16 %v4776_v46, %v4768_v51  ;;  %v4808_v17 = vld [vmem:[#allocation4 + $0x6e0] sm:$0xff]  ;;  %v4810_v31 = vld [vmem:[#allocation4 + $0x6f0] sm:$0xff]  ;;  %v4827_v51 = vld [vmem:[#allocation4 + $0x778] sm:$0xff] }
 0x907   :  { %8789 = vmatpush1.bf16.msra.mxu0 %v8788_v48  ;;  %8853 = vmatpush1.bf16.msra.mxu1 %v8852_v50  ;;  %v4793_v48 = vld [vmem:[#allocation4 + $0x668] sm:$0xff]  ;;  %v4787_v50 = vld [vmem:[#allocation4 + $0x638] sm:$0xff] }
 0x908   :  { %8791 = vmatprep.subr.bf16.mxu0 %v8790_v15  ;;  %8855 = vmatprep.subr.bf16.mxu1 %v8854_v8  ;;  %v8864_v15 = vpack.c.bf16 %v4778_v4, %v4770_v52  ;;  %v4784_v8 = vld [vmem:[#allocation4 + $0x620] sm:$0xff]  ;;  %v8802_v3 = vpack.c.bf16 %v4793_v48, %v4785_v60  ;;  %v8866_v54 = vpack.c.bf16 %v4795_v53, %v4787_v50  ;;  %v4818_v48 = vld [vmem:[#allocation4 + $0x730] sm:$0xff]  ;;  %v4833_v53 = vld [vmem:[#allocation4 + $0x7a8] sm:$0xff] }
 0x909   :  { %v8804_v26 = vpack.c.bf16 %v4792_v9, %v4784_v8  ;;  %v4824_v52 = vld [vmem:[#allocation4 + $0x760] sm:$0xff]  ;;  %v4826_v50 = vld [vmem:[#allocation4 + $0x770] sm:$0xff]  ;;  %v4843_v8 = vld [vmem:[#allocation4 + $0x7f8] sm:$0xff] }
 0x90b   :  { %8793 = vmatpush1.bf16.msra.mxu0 %v8792_v10  ;;  %8857 = vmatpush1.bf16.msra.mxu1 %v8856_v16  ;;  %v4809_v10 = vld [vmem:[#allocation4 + $0x6e8] sm:$0xff]  ;;  %v4803_v16 = vld [vmem:[#allocation4 + $0x6b8] sm:$0xff] }
 0x90c   :  { %8795 = vmatprep.subr.bf16.mxu0 %v8794_v37  ;;  %8859 = vmatprep.subr.bf16.mxu1 %v8858_v30  ;;  %v8868_v37 = vpack.c.bf16 %v4794_v12, %v4786_v19  ;;  %v4800_v30 = vld [vmem:[#allocation4 + $0x6a0] sm:$0xff]  ;;  %v8806_v21 = vpack.c.bf16 %v4809_v10, %v4801_v2  ;;  %v8870_v45 = vpack.c.bf16 %v4811_v39, %v4803_v16  ;;  %v4834_v10 = vld [vmem:[#allocation4 + $0x7b0] sm:$0xff] }
 0x90d   :  { %v8808_v46 = vpack.c.bf16 %v4808_v17, %v4800_v30  ;;  %v4840_v2 = vld [vmem:[#allocation4 + $0x7e0] sm:$0xff]  ;;  %v4842_v16 = vld [vmem:[#allocation4 + $0x7f0] sm:$0xff]  ;;  %v5207_v30 = vld [vmem:[#allocation6 + $0x48] sm:$0xff] }
 0x90e   :  { %v5201_v17 = vld [vmem:[#allocation6 + $0x18] sm:$0xff] }
 0x90f   :  { %8797 = vmatpush1.bf16.msra.mxu0 %v8796_v41  ;;  %8861 = vmatpush1.bf16.msra.mxu1 %v8860_v18  ;;  %v4825_v41 = vld [vmem:[#allocation4 + $0x768] sm:$0xff]  ;;  %v4819_v18 = vld [vmem:[#allocation4 + $0x738] sm:$0xff] }
 0x910   :  { %8799 = vmatprep.subr.bf16.mxu0 %v8798_v47  ;;  %8863 = vmatprep.subr.bf16.mxu1 %v8862_v44  ;;  %v8872_v47 = vpack.c.bf16 %v4810_v31, %v4802_v43  ;;  %v4816_v44 = vld [vmem:[#allocation4 + $0x720] sm:$0xff]  ;;  %v8810_v4 = vpack.c.bf16 %v4825_v41, %v4817_v35  ;;  %v8874_v60 = vpack.c.bf16 %v4827_v51, %v4819_v18  ;;  %v5200_v18 = vld [vmem:[#allocation6 + $0x10] sm:$0xff] }
 0x911   :  { %v8812_v9 = vpack.c.bf16 %v4824_v52, %v4816_v44  ;;  %v5198_v43 = vld [vmem:[#allocation6] sm:$0xff]  ;;  %v5208_v51 = vld [vmem:[#allocation6 + $0x50] sm:$0xff]  ;;  %v5223_v44 = vld [vmem:[#allocation6 + $0xc8] sm:$0xff] }
 0x912   :  { %v5206_v31 = vld [vmem:[#allocation6 + $0x40] sm:$0xff]  ;;  %v5217_v52 = vld [vmem:[#allocation6 + $0x98] sm:$0xff] }
 0x913   :  { %8801 = vmatpush1.bf16.msra.mxu0 %v8800_v5  ;;  %8865 = vmatpush1.bf16.msra.mxu1 %v8864_v15  ;;  %v4841_v5 = vld [vmem:[#allocation4 + $0x7e8] sm:$0xff]  ;;  %v4835_v15 = vld [vmem:[#allocation4 + $0x7b8] sm:$0xff]  ;;  %v8884_v41 = vpack.c.bf16 %v5206_v31, %v5198_v43 }
 0x914   :  { %8803 = vmatprep.subr.bf16.mxu0 %v8802_v3  ;;  %8867 = vmatprep.subr.bf16.mxu1 %v8866_v54  ;;  %v8876_v3 = vpack.c.bf16 %v4826_v50, %v4818_v48  ;;  %v4832_v54 = vld [vmem:[#allocation4 + $0x7a0] sm:$0xff]  ;;  %v8814_v19 = vpack.c.bf16 %v4841_v5, %v4833_v53  ;;  %v8878_v12 = vpack.c.bf16 %v4843_v8, %v4835_v15  ;;  %v5216_v53 = vld [vmem:[#allocation6 + $0x90] sm:$0xff]  ;;  %v5231_v8 = vld [vmem:[#allocation6 + $0x108] sm:$0xff] }
 0x915   :  { %v8816_v39 = vpack.c.bf16 %v4840_v2, %v4832_v54  ;;  %v5214_v48 = vld [vmem:[#allocation6 + $0x80] sm:$0xff]  ;;  %v5224_v15 = vld [vmem:[#allocation6 + $0xd0] sm:$0xff]  ;;  %v5257_v31 = vld [vmem:[#allocation6 + $0x1d8] sm:$0xff] }
 0x916   :  { %v5222_v50 = vld [vmem:[#allocation6 + $0xc0] sm:$0xff] }
 0x917   :  { %8805 = vmatpush1.bf16.msra.mxu0 %v8804_v26  ;;  %8869 = vmatpush1.bf16.msra.mxu1 %v8868_v37  ;;  %v8880_v26 = vpack.c.bf16 %v4842_v16, %v4834_v10  ;;  %v5199_v37 = vld [vmem:[#allocation6 + $0x8] sm:$0xff]  ;;  %v8888_v5 = vpack.c.bf16 %v5222_v50, %v5214_v48  ;;  %v5230_v2 = vld [vmem:[#allocation6 + $0x100] sm:$0xff] }
 0x918   :  { %8807 = vmatprep.subr.bf16.mxu0 %v8806_v21  ;;  %8871 = vmatprep.subr.bf16.mxu1 %v8870_v45  ;;  %v8882_v21 = vpack.c.bf16 %v5207_v30, %v5199_v37  ;;  %v5209_v45 = vld [vmem:[#allocation6 + $0x58] sm:$0xff]  ;;  %v5238_v16 = vld [vmem:[#allocation6 + $0x140] sm:$0xff]  ;;  %v5247_v30 = vld [vmem:[#allocation6 + $0x188] sm:$0xff] }
 0x919   :  { %v8946_v35 = vpack.c.bf16 %v5209_v45, %v5201_v17  ;;  %v8892_v37 = vpack.c.bf16 %v5238_v16, %v5230_v2  ;;  %v5255_v17 = vld [vmem:[#allocation6 + $0x1c8] sm:$0xff]  ;;  %v5262_v50 = vld [vmem:[#allocation6 + $0x200] sm:$0xff] }
 0x91a   :  { %v8894_v43 = vpack.c.bf16 %v5255_v17, %v5247_v30  ;;  %v5278_v16 = vld [vmem:[#allocation6 + $0x280] sm:$0xff]  ;;  %v5288_v30 = vld [vmem:[#allocation6 + $0x2d0] sm:$0xff]  ;;  %v5295_v17 = vld [vmem:[#allocation6 + $0x308] sm:$0xff] }
 0x91b   :  { %8809 = vmatpush1.bf16.msra.mxu0 %v8808_v46  ;;  %8873 = vmatpush1.bf16.msra.mxu1 %v8872_v47  ;;  %v5215_v46 = vld [vmem:[#allocation6 + $0x88] sm:$0xff]  ;;  %v8948_v47 = vpack.c.bf16 %v5208_v51, %v5200_v18  ;;  %v5248_v51 = vld [vmem:[#allocation6 + $0x190] sm:$0xff] }
 0x91c   :  { %8811 = vmatprep.subr.bf16.mxu0 %v8810_v4  ;;  %8875 = vmatprep.subr.bf16.mxu1 %v8874_v60  ;;  %v5225_v4 = vld [vmem:[#allocation6 + $0xd8] sm:$0xff] }
 0x91d   :  { %v8950_v60 = vpack.c.bf16 %v5225_v4, %v5217_v52  ;;  %v5265_v52 = vld [vmem:[#allocation6 + $0x218] sm:$0xff] }
 0x91e   :  { %v5273_v4 = vld [vmem:[#allocation6 + $0x258] sm:$0xff] }
 0x91f   :  { %8813 = vmatpush1.bf16.msra.mxu0 %v8812_v9  ;;  %8877 = vmatpush1.bf16.msra.mxu1 %v8876_v3  ;;  %v5239_v9 = vld [vmem:[#allocation6 + $0x148] sm:$0xff]  ;;  %v8952_v3 = vpack.c.bf16 %v5224_v15, %v5216_v53  ;;  %v5270_v53 = vld [vmem:[#allocation6 + $0x240] sm:$0xff]  ;;  %v8962_v15 = vpack.c.bf16 %v5273_v4, %v5265_v52 }
 0x920   :  { %8815 = vmatprep.subr.bf16.mxu0 %v8814_v19  ;;  %8879 = vmatprep.subr.bf16.mxu1 %v8878_v12  ;;  %v8890_v54 = vpack.c.bf16 %v5239_v9, %v5231_v8  ;;  %v5233_v19 = vld [vmem:[#allocation6 + $0x118] sm:$0xff]  ;;  %v5272_v8 = vld [vmem:[#allocation6 + $0x250] sm:$0xff]  ;;  %v5279_v9 = vld [vmem:[#allocation6 + $0x288] sm:$0xff] }
 0x921   :  { %v5241_v12 = vld [vmem:[#allocation6 + $0x158] sm:$0xff]  ;;  %v5311_v52 = vld [vmem:[#allocation6 + $0x388] sm:$0xff] }
 0x922   :  { %v8954_v10 = vpack.c.bf16 %v5241_v12, %v5233_v19  ;;  %v5289_v19 = vld [vmem:[#allocation6 + $0x2d8] sm:$0xff]  ;;  %v8900_v12 = vpack.c.bf16 %v5270_v53, %v5262_v50  ;;  %v5319_v4 = vld [vmem:[#allocation6 + $0x3c8] sm:$0xff] }
 0x923   :  { %8817 = vmatpush1.bf16.msra.mxu0 %v8816_v39  ;;  %8881 = vmatpush1.bf16.msra.mxu1 %v8880_v26  ;;  %v5232_v39 = vld [vmem:[#allocation6 + $0x110] sm:$0xff]  ;;  %v8910_v53 = vpack.c.bf16 %v5319_v4, %v5311_v52 }
 0x924   :  { %8883 = vmatprep.subr.bf16.mxu0 %v8882_v21  ;;  %8947 = vmatprep.subr.bf16.mxu1 %v8946_v35  ;;  %v5240_v26 = vld [vmem:[#allocation6 + $0x150] sm:$0xff]  ;;  %v5249_v21 = vld [vmem:[#allocation6 + $0x198] sm:$0xff]  ;;  %v5246_v35 = vld [vmem:[#allocation6 + $0x180] sm:$0xff] }
 0x925   :  { %v8956_v45 = vpack.c.bf16 %v5240_v26, %v5232_v39  ;;  %v8958_v18 = vpack.c.bf16 %v5257_v31, %v5249_v21  ;;  %v5286_v39 = vld [vmem:[#allocation6 + $0x2c0] sm:$0xff]  ;;  %v5280_v26 = vld [vmem:[#allocation6 + $0x290] sm:$0xff]  ;;  %v5303_v21 = vld [vmem:[#allocation6 + $0x348] sm:$0xff] }
 0x926   :  { %5051 = vmatmul.mubr.f32.vlgmr.msra.gmra.mrb[30].mxu0 %v10206_v49  ;;  %5122 = vmatmul.mubr.f32.vlgmr.msra.gmra.mrb[30].mxu1 %v10206_v49  ;;  %v8886_v49 = vpack.c.bf16 %v5223_v44, %v5215_v46  ;;  %v5256_v46 = vld [vmem:[#allocation6 + $0x1d0] sm:$0xff]  ;;  %v5271_v44 = vld [vmem:[#allocation6 + $0x248] sm:$0xff]  ;;  %v8904_v31 = vpack.c.bf16 %v5286_v39, %v5278_v16  ;;  %v5337_v39 = vld [vmem:[#allocation6 + $0x458] sm:$0xff] }
 0x927   :  { %8885 = vmatpush1.bf16.msra.mxu0 %v8884_v41  ;;  %8949 = vmatpush1.bf16.msra.mxu1 %v8948_v47  ;;  %v5254_v41 = vld [vmem:[#allocation6 + $0x1c0] sm:$0xff]  ;;  %v5263_v47 = vld [vmem:[#allocation6 + $0x208] sm:$0xff]  ;;  %v5344_v4 = vld [vmem:[#allocation6 + $0x490] sm:$0xff] }
 0x928   :  { %8887 = vmatprep.subr.bf16.mxu0 %v8886_v49  ;;  %8951 = vmatprep.subr.bf16.mxu1 %v8950_v60  ;;  %v8896_v49 = vpack.c.bf16 %v5254_v41, %v5246_v35  ;;  %v8960_v60 = vpack.c.bf16 %v5256_v46, %v5248_v51  ;;  %v8898_v48 = vpack.c.bf16 %v5271_v44, %v5263_v47  ;;  %v5302_v51 = vld [vmem:[#allocation6 + $0x340] sm:$0xff]  ;;  %v5296_v46 = vld [vmem:[#allocation6 + $0x310] sm:$0xff] }
 0x929   :  { %v8968_v35 = vpack.c.bf16 %v5288_v30, %v5280_v26  ;;  %v8906_v41 = vpack.c.bf16 %v5303_v21, %v5295_v17  ;;  %v5304_v44 = vld [vmem:[#allocation6 + $0x350] sm:$0xff]  ;;  %v5334_v30 = vld [vmem:[#allocation6 + $0x440] sm:$0xff] }
 0x92a   :  { %v8972_v50 = vpack.c.bf16 %v5304_v44, %v5296_v46  ;;  %v5328_v17 = vld [vmem:[#allocation6 + $0x410] sm:$0xff]  ;;  %v5342_v46 = vld [vmem:[#allocation6 + $0x480] sm:$0xff] }
 0x92b   :  { %8889 = vmatpush1.bf16.msra.mxu0 %v8888_v5  ;;  %8953 = vmatpush1.bf16.msra.mxu1 %v8952_v3  ;;  %v5264_v5 = vld [vmem:[#allocation6 + $0x210] sm:$0xff]  ;;  %v5287_v3 = vld [vmem:[#allocation6 + $0x2c8] sm:$0xff] }
 0x92c   :  { %8891 = vmatprep.subr.bf16.mxu0 %v8890_v54  ;;  %8955 = vmatprep.subr.bf16.mxu1 %v8954_v10  ;;  %v5281_v54 = vld [vmem:[#allocation6 + $0x298] sm:$0xff]  ;;  %v8964_v2 = vpack.c.bf16 %v5272_v8, %v5264_v5  ;;  %v8902_v10 = vpack.c.bf16 %v5287_v3, %v5279_v9  ;;  %v5310_v5 = vld [vmem:[#allocation6 + $0x380] sm:$0xff]  ;;  %v5312_v9 = vld [vmem:[#allocation6 + $0x390] sm:$0xff] }
 0x92d   :  { %v5320_v3 = vld [vmem:[#allocation6 + $0x3d0] sm:$0xff] }
 0x92f   :  { %8893 = vmatpush1.bf16.msra.mxu0 %v8892_v37  ;;  %8957 = vmatpush1.bf16.msra.mxu1 %v8956_v45  ;;  %v8966_v37 = vpack.c.bf16 %v5289_v19, %v5281_v54  ;;  %v5297_v45 = vld [vmem:[#allocation6 + $0x318] sm:$0xff]  ;;  %v8976_v19 = vpack.c.bf16 %v5320_v3, %v5312_v9  ;;  %v5366_v9 = vld [vmem:[#allocation6 + $0x540] sm:$0xff] }
 0x930   :  { %8895 = vmatprep.subr.bf16.mxu0 %v8894_v43  ;;  %8959 = vmatprep.subr.bf16.mxu1 %v8958_v18  ;;  %v5305_v43 = vld [vmem:[#allocation6 + $0x358] sm:$0xff]  ;;  %v5294_v18 = vld [vmem:[#allocation6 + $0x300] sm:$0xff] }
 0x931   :  { %v8970_v47 = vpack.c.bf16 %v5305_v43, %v5297_v45  ;;  %v5336_v45 = vld [vmem:[#allocation6 + $0x450] sm:$0xff] }
 0x932   :  { %v8980_v43 = vpack.c.bf16 %v5336_v45, %v5328_v17  ;;  %v5382_v17 = vld [vmem:[#allocation6 + $0x5c0] sm:$0xff] }
 0x933   :  { %8897 = vmatpush1.bf16.msra.mxu0 %v8896_v49  ;;  %8961 = vmatpush1.bf16.msra.mxu1 %v8960_v60  ;;  %v5313_v49 = vld [vmem:[#allocation6 + $0x398] sm:$0xff] }
 0x934   :  { %8899 = vmatprep.subr.bf16.mxu0 %v8898_v48  ;;  %8963 = vmatprep.subr.bf16.mxu1 %v8962_v15  ;;  %v5321_v60 = vld [vmem:[#allocation6 + $0x3d8] sm:$0xff]  ;;  %v8908_v48 = vpack.c.bf16 %v5302_v51, %v5294_v18  ;;  %v5318_v15 = vld [vmem:[#allocation6 + $0x3c0] sm:$0xff] }
 0x935   :  { %v8974_v8 = vpack.c.bf16 %v5321_v60, %v5313_v49  ;;  %v8912_v54 = vpack.c.bf16 %v5318_v15, %v5310_v5  ;;  %v5353_v51 = vld [vmem:[#allocation6 + $0x4d8] sm:$0xff]  ;;  %v5352_v49 = vld [vmem:[#allocation6 + $0x4d0] sm:$0xff] }
 0x936   :  { %v8984_v60 = vpack.c.bf16 %v5352_v49, %v5344_v4  ;;  %v5369_v15 = vld [vmem:[#allocation6 + $0x558] sm:$0xff] }
 0x937   :  { %8901 = vmatpush1.bf16.msra.mxu0 %v8900_v12  ;;  %8965 = vmatpush1.bf16.msra.mxu1 %v8964_v2  ;;  %v5327_v12 = vld [vmem:[#allocation6 + $0x408] sm:$0xff] }
 0x938   :  { %8903 = vmatprep.subr.bf16.mxu0 %v8902_v10  ;;  %8967 = vmatprep.subr.bf16.mxu1 %v8966_v37  ;;  %v5335_v2 = vld [vmem:[#allocation6 + $0x448] sm:$0xff]  ;;  %v5329_v10 = vld [vmem:[#allocation6 + $0x418] sm:$0xff]  ;;  %v5326_v37 = vld [vmem:[#allocation6 + $0x400] sm:$0xff] }
 0x939   :  { %v8914_v16 = vpack.c.bf16 %v5335_v2, %v5327_v12  ;;  %v8978_v26 = vpack.c.bf16 %v5337_v39, %v5329_v10  ;;  %v8916_v21 = vpack.c.bf16 %v5334_v30, %v5326_v37  ;;  %v5368_v12 = vld [vmem:[#allocation6 + $0x550] sm:$0xff]  ;;  %v5375_v10 = vld [vmem:[#allocation6 + $0x588] sm:$0xff]  ;;  %v5377_v39 = vld [vmem:[#allocation6 + $0x598] sm:$0xff] }
 0x93a   :  { %v5385_v37 = vld [vmem:[#allocation6 + $0x5d8] sm:$0xff]  ;;  %v5374_v30 = vld [vmem:[#allocation6 + $0x580] sm:$0xff] }
 0x93b   :  { %8905 = vmatpush1.bf16.msra.mxu0 %v8904_v31  ;;  %8969 = vmatpush1.bf16.msra.mxu1 %v8968_v35  ;;  %v5343_v31 = vld [vmem:[#allocation6 + $0x488] sm:$0xff]  ;;  %v8928_v45 = vpack.c.bf16 %v5382_v17, %v5374_v30  ;;  %v5433_v30 = vld [vmem:[#allocation6 + $0x758] sm:$0xff] }
 0x93c   :  { %8907 = vmatprep.subr.bf16.mxu0 %v8906_v41  ;;  %8971 = vmatprep.subr.bf16.mxu1 %v8970_v47  ;;  %v5351_v35 = vld [vmem:[#allocation6 + $0x4c8] sm:$0xff]  ;;  %v5345_v41 = vld [vmem:[#allocation6 + $0x498] sm:$0xff]  ;;  %v5350_v47 = vld [vmem:[#allocation6 + $0x4c0] sm:$0xff] }
 0x93d   :  { %v8918_v18 = vpack.c.bf16 %v5351_v35, %v5343_v31  ;;  %v8982_v44 = vpack.c.bf16 %v5353_v51, %v5345_v41  ;;  %v8920_v52 = vpack.c.bf16 %v5350_v47, %v5342_v46  ;;  %v5384_v31 = vld [vmem:[#allocation6 + $0x5d0] sm:$0xff]  ;;  %v5391_v41 = vld [vmem:[#allocation6 + $0x608] sm:$0xff]  ;;  %v5393_v51 = vld [vmem:[#allocation6 + $0x618] sm:$0xff] }
 0x93e   :  { %v5401_v47 = vld [vmem:[#allocation6 + $0x658] sm:$0xff] }
 0x93f   :  { %8909 = vmatpush1.bf16.msra.mxu0 %v8908_v48  ;;  %8973 = vmatpush1.bf16.msra.mxu1 %v8972_v50  ;;  %v5359_v48 = vld [vmem:[#allocation6 + $0x508] sm:$0xff]  ;;  %v8994_v4 = vpack.c.bf16 %v5401_v47, %v5393_v51 }
 0x940   :  { %8911 = vmatprep.subr.bf16.mxu0 %v8910_v53  ;;  %8975 = vmatprep.subr.bf16.mxu1 %v8974_v8  ;;  %v5367_v50 = vld [vmem:[#allocation6 + $0x548] sm:$0xff]  ;;  %v5361_v53 = vld [vmem:[#allocation6 + $0x518] sm:$0xff]  ;;  %v5358_v8 = vld [vmem:[#allocation6 + $0x500] sm:$0xff] }
 0x941   :  { %v8922_v5 = vpack.c.bf16 %v5367_v50, %v5359_v48  ;;  %v8986_v3 = vpack.c.bf16 %v5369_v15, %v5361_v53  ;;  %v5400_v48 = vld [vmem:[#allocation6 + $0x650] sm:$0xff]  ;;  %v5407_v53 = vld [vmem:[#allocation6 + $0x688] sm:$0xff]  ;;  %v5409_v15 = vld [vmem:[#allocation6 + $0x698] sm:$0xff] }
 0x942   :  { %v5447_v51 = vld [vmem:[#allocation6 + $0x7c8] sm:$0xff] }
 0x943   :  { %8913 = vmatpush1.bf16.msra.mxu0 %v8912_v54  ;;  %8977 = vmatpush1.bf16.msra.mxu1 %v8976_v19  ;;  %v8924_v54 = vpack.c.bf16 %v5366_v9, %v5358_v8  ;;  %v5360_v19 = vld [vmem:[#allocation6 + $0x510] sm:$0xff]  ;;  %v5417_v9 = vld [vmem:[#allocation6 + $0x6d8] sm:$0xff] }
 0x944   :  { %8915 = vmatprep.subr.bf16.mxu0 %v8914_v16  ;;  %8979 = vmatprep.subr.bf16.mxu1 %v8978_v26  ;;  %v8988_v2 = vpack.c.bf16 %v5368_v12, %v5360_v19  ;;  %v5383_v16 = vld [vmem:[#allocation6 + $0x5c8] sm:$0xff]  ;;  %v8998_v19 = vpack.c.bf16 %v5417_v9, %v5409_v15  ;;  %v5205_v9 = vld [vmem:[#allocation6 + $0x38] sm:$0xff] }
 0x945   :  { %v8926_v26 = vpack.c.bf16 %v5383_v16, %v5375_v10  ;;  %v5416_v10 = vld [vmem:[#allocation6 + $0x6d0] sm:$0xff]  ;;  %v5423_v16 = vld [vmem:[#allocation6 + $0x708] sm:$0xff] }
 0x946   :  { %v5203_v15 = vld [vmem:[#allocation6 + $0x28] sm:$0xff] }
 0x947   :  { %8917 = vmatpush1.bf16.msra.mxu0 %v8916_v21  ;;  %8981 = vmatpush1.bf16.msra.mxu1 %v8980_v43  ;;  %v8990_v21 = vpack.c.bf16 %v5385_v37, %v5377_v39  ;;  %v5376_v43 = vld [vmem:[#allocation6 + $0x590] sm:$0xff]  ;;  %v5425_v37 = vld [vmem:[#allocation6 + $0x718] sm:$0xff] }
 0x948   :  { %8919 = vmatprep.subr.bf16.mxu0 %v8918_v18  ;;  %8983 = vmatprep.subr.bf16.mxu1 %v8982_v44  ;;  %v8992_v35 = vpack.c.bf16 %v5384_v31, %v5376_v43  ;;  %v5399_v18 = vld [vmem:[#allocation6 + $0x648] sm:$0xff]  ;;  %v5390_v44 = vld [vmem:[#allocation6 + $0x600] sm:$0xff]  ;;  %v5424_v31 = vld [vmem:[#allocation6 + $0x710] sm:$0xff] }
 0x949   :  { %v8930_v46 = vpack.c.bf16 %v5399_v18, %v5391_v41  ;;  %v5430_v43 = vld [vmem:[#allocation6 + $0x740] sm:$0xff]  ;;  %v5432_v41 = vld [vmem:[#allocation6 + $0x750] sm:$0xff]  ;;  %v5439_v18 = vld [vmem:[#allocation6 + $0x788] sm:$0xff] }
 0x94a   :  { %v8942_v47 = vpack.c.bf16 %v5447_v51, %v5439_v18 }
 0x94b   :  { %8921 = vmatpush1.bf16.msra.mxu0 %v8920_v52  ;;  %8985 = vmatpush1.bf16.msra.mxu1 %v8984_v60  ;;  %v5398_v52 = vld [vmem:[#allocation6 + $0x640] sm:$0xff]  ;;  %v5392_v60 = vld [vmem:[#allocation6 + $0x610] sm:$0xff] }
 0x94c   :  { %8923 = vmatprep.subr.bf16.mxu0 %v8922_v5  ;;  %8987 = vmatprep.subr.bf16.mxu1 %v8986_v3  ;;  %v8932_v49 = vpack.c.bf16 %v5398_v52, %v5390_v44  ;;  %v8996_v50 = vpack.c.bf16 %v5400_v48, %v5392_v60  ;;  %v5415_v5 = vld [vmem:[#allocation6 + $0x6c8] sm:$0xff]  ;;  %v5406_v3 = vld [vmem:[#allocation6 + $0x680] sm:$0xff]  ;;  %v5441_v44 = vld [vmem:[#allocation6 + $0x798] sm:$0xff] }
 0x94d   :  { %v8934_v8 = vpack.c.bf16 %v5415_v5, %v5407_v53  ;;  %v5449_v52 = vld [vmem:[#allocation6 + $0x7d8] sm:$0xff]  ;;  %v5446_v60 = vld [vmem:[#allocation6 + $0x7c0] sm:$0xff]  ;;  %v5440_v48 = vld [vmem:[#allocation6 + $0x790] sm:$0xff] }
 0x94f   :  { %8925 = vmatpush1.bf16.msra.mxu0 %v8924_v54  ;;  %8989 = vmatpush1.bf16.msra.mxu1 %v8988_v2  ;;  %v5414_v54 = vld [vmem:[#allocation6 + $0x6c0] sm:$0xff]  ;;  %v5408_v2 = vld [vmem:[#allocation6 + $0x690] sm:$0xff] }
 0x950   :  { %8927 = vmatprep.subr.bf16.mxu0 %v8926_v26  ;;  %8991 = vmatprep.subr.bf16.mxu1 %v8990_v21  ;;  %v8936_v12 = vpack.c.bf16 %v5414_v54, %v5406_v3  ;;  %v9000_v39 = vpack.c.bf16 %v5416_v10, %v5408_v2  ;;  %v5431_v26 = vld [vmem:[#allocation6 + $0x748] sm:$0xff]  ;;  %v9002_v21 = vpack.c.bf16 %v5433_v30, %v5425_v37  ;;  %v5213_v54 = vld [vmem:[#allocation6 + $0x78] sm:$0xff] }
 0x951   :  { %v8938_v17 = vpack.c.bf16 %v5431_v26, %v5423_v16 }
 0x953   :  { %8929 = vmatpush1.bf16.msra.mxu0 %v8928_v45  ;;  %8993 = vmatpush1.bf16.msra.mxu1 %v8992_v35  ;;  %v5422_v45 = vld [vmem:[#allocation6 + $0x700] sm:$0xff] }
 0x954   :  { %8931 = vmatprep.subr.bf16.mxu0 %v8930_v46  ;;  %8995 = vmatprep.subr.bf16.mxu1 %v8994_v4  ;;  %v8940_v35 = vpack.c.bf16 %v5430_v43, %v5422_v45  ;;  %v9004_v46 = vpack.c.bf16 %v5432_v41, %v5424_v31  ;;  %v5438_v4 = vld [vmem:[#allocation6 + $0x780] sm:$0xff] }
 0x955   :  { %v8944_v53 = vpack.c.bf16 %v5446_v60, %v5438_v4 }
 0x957   :  { %8933 = vmatpush1.bf16.msra.mxu0 %v8932_v49  ;;  %8997 = vmatpush1.bf16.msra.mxu1 %v8996_v50  ;;  %v9006_v49 = vpack.c.bf16 %v5449_v52, %v5441_v44  ;;  %v5448_v50 = vld [vmem:[#allocation6 + $0x7d0] sm:$0xff] }
 0x958   :  { %8935 = vmatprep.subr.bf16.mxu0 %v8934_v8  ;;  %8999 = vmatprep.subr.bf16.mxu1 %v8998_v19  ;;  %v9008_v5 = vpack.c.bf16 %v5448_v50, %v5440_v48  ;;  %v5211_v8 = vld [vmem:[#allocation6 + $0x68] sm:$0xff]  ;;  %v9074_v19 = vpack.c.bf16 %v5213_v54, %v5205_v9 }
 0x959   :  { %v9010_v3 = vpack.c.bf16 %v5211_v8, %v5203_v15 }
 0x95b   :  { %8937 = vmatpush1.bf16.msra.mxu0 %v8936_v12  ;;  %9001 = vmatpush1.bf16.msra.mxu1 %v9000_v39  ;;  %v4570_v39 = vpop.permute.xlu1 %4569 }
 0x95c   :  { %8939 = vmatprep.subr.bf16.mxu0 %v8938_v17  ;;  %9003 = vmatprep.subr.bf16.mxu1 %v9002_v21  ;;  %v4572_v26 = vmul.f32 %v4570_v39, %v9889_v29  ;;  %v4574_v37 = vmul.f32 %v4570_v39, %v9895_v32  ;;  %v4573_v30 = vmul.f32 %v4570_v39, %v9898_v33 }
 0x95d   :  { %v4575_v17 = vmul.f32 %v4570_v39, %v9901_v34  ;;  %v4578_v52 = vmul.f32 %v4570_v39, %v9939_v61  ;;  %v4577_v4 = vmul.f32 %v4570_v39, %v9942_v62 }
 0x95e   :  { %v4580_v21 = vadd.f32 %v4572_v26, %v9905_v36  ;;  %v4582_v45 = vadd.f32 %v4574_v37, %v9909_v38  ;;  %v4581_v31 = vadd.f32 %v4573_v30, %v9913_v40  ;;  %v4576_v40 = vmul.f32 %v4570_v39, %v9936_v59 }
 0x95f   :  { %8941 = vmatpush1.bf16.msra.mxu0 %v8940_v35  ;;  %9005 = vmatpush1.bf16.msra.mxu1 %v9004_v46  ;;  %v4583_v41 = vadd.f32 %v4575_v17, %v9917_v42  ;;  %v4585_v8 = vadd.f32 %v4577_v4, %v9957_v11  ;;  %v5220_v4 = vld [vmem:[#allocation6 + $0xb0] sm:$0xff] }
 0x960   :  { %8943 = vmatprep.subr.bf16.mxu0 %v8942_v47  ;;  %9007 = vmatprep.subr.bf16.mxu1 %v9006_v49  ;;  %v4579_v49 = vmul.f32 %v4570_v39, %v9945_v0  ;;  %v4584_v50 = vadd.f32 %v4576_v40, %v9949_v6 }
 0x962   :  { %v4587_v59 = vadd.f32 %v4579_v49, %v9961_v14  ;;  %v5228_v49 = vld [vmem:[#allocation6 + $0xf0] sm:$0xff] }
 0x963   :  { %8945 = vmatpush1.bf16.msra.mxu0 %v8944_v53  ;;  %9009 = vmatpush1.bf16.msra.mxu1 %v9008_v5  ;;  %v4586_v53 = vadd.f32 %v4578_v52, %v9952_v7  ;;  %v5218_v52 = vld [vmem:[#allocation6 + $0xa0] sm:$0xff] }
 0x964   :  { %9011 = vmatprep.subr.bf16.mxu0 %v9010_v3  ;;  %9075 = vmatprep.subr.bf16.mxu1 %v9074_v19 }
 0x9b9   :  { %v4910_v12 = vpop.f32.mrb[28].mxu0  ;;  %v4981_v2 = vpop.f32.mrb[28].mxu1 }
 0x9ba   :  { %v4912_v10 = vpop.f32.mrb[29].mxu0  ;;  %v4983_v16 = vpop.f32.mrb[29].mxu1  ;;  %v5128_v43 = vadd.f32 %v4910_v12, %v4580_v21  ;;  %v5130_v35 = vadd.f32 %v4981_v2, %v4582_v45 }
 0x9bb   :  { %v5129_v18 = vadd.f32 %v4912_v10, %v4581_v31  ;;  %v5131_v51 = vadd.f32 %v4983_v16, %v4583_v41 }
 0x9bc   :  { %v6812_v46 = vmul.f32 -1.442695, %v5128_v43  ;;  %v6814_v29 = vmul.f32 -1.442695, %v5130_v35 }
 0x9bd   :  { %v6813_v47 = vmul.f32 -1.442695, %v5129_v18  ;;  %v6815_v32 = vmul.f32 -1.442695, %v5131_v51  ;;  %v5210_v18 = vld [vmem:[#allocation6 + $0x60] sm:$0xff]  ;;  %v5204_v51 = vld [vmem:[#allocation6 + $0x30] sm:$0xff] }
 0x9be   :  { %9627 = vpow2.f32 %v6812_v46 }
 0x9bf   :  { %9629 = vpow2.f32 %v6814_v29 }
 0x9c0   :  { %9631 = vpow2.f32 %v6813_v47  ;;  %v5219_v47 = vld [vmem:[#allocation6 + $0xa8] sm:$0xff] }
 0x9c1   :  { %9633 = vpow2.f32 %v6815_v32 }
 0x9c8   :  { %v9628_v33 = vpop.eup %9627 }
 0x9c9   :  { %v9630_v34 = vpop.eup %9629  ;;  %v5142_v44 = vadd.f32 1.0, %v9628_v33  ;;  %v5227_v33 = vld [vmem:[#allocation6 + $0xe8] sm:$0xff] }
 0x9ca   :  { %v9632_v36 = vpop.eup %9631  ;;  %v5154_v42 = vadd.f32 1.0, %v9630_v34  ;;  %v5221_v34 = vld [vmem:[#allocation6 + $0xb8] sm:$0xff] }
 0x9cb   :  { %v9634_v38 = vpop.eup %9633  ;;  %v5143_v60 = vadd.f32 1.0, %v9632_v36  ;;  %9635 = vrcp.f32 %v5142_v44  ;;  %v5229_v36 = vld [vmem:[#allocation6 + $0xf8] sm:$0xff] }
 0x9cc   :  { %v5155_v48 = vadd.f32 1.0, %v9634_v38  ;;  %9637 = vrcp.f32 %v5154_v42  ;;  %v5226_v42 = vld [vmem:[#allocation6 + $0xe0] sm:$0xff] }
 0x9cd   :  { %9639 = vrcp.f32 %v5143_v60  ;;  %v5235_v60 = vld [vmem:[#allocation6 + $0x128] sm:$0xff] }
 0x9ce   :  { %9641 = vrcp.f32 %v5155_v48 }
 0x9d5   :  { %v9636_v7 = vpop.eup %9635 }
 0x9d6   :  { %v9638_v12 = vpop.eup %9637 }
 0x9d7   :  { %v9640_v2 = vpop.eup %9639  ;;  %v5174_v16 = vmul.f32 %v9638_v12, %v10200_v13  ;;  %v5202_v13 = vld [vmem:[#allocation6 + $0x20] sm:$0xff]  ;;  %v5253_v12 = vld [vmem:[#allocation6 + $0x1b8] sm:$0xff] }
 0x9d8   :  { %v9642_v11 = vpop.eup %9641  ;;  %v9012_v44 = vpack.c.bf16 %v5210_v18, %v5202_v13 }
 0x9d9   :  { %v5175_v37 = vmul.f32 %v9642_v11, %v10202_v22  ;;  %v5212_v22 = vld [vmem:[#allocation6 + $0x70] sm:$0xff] }
 0x9da   :  { %v9076_v40 = vpack.c.bf16 %v5212_v22, %v5204_v51  ;;  %v5266_v51 = vld [vmem:[#allocation6 + $0x220] sm:$0xff] }
 0x9f9   :  { %v5052_v5 = vpop.f32.mrb[30].mxu0  ;;  %v5123_v15 = vpop.f32.mrb[30].mxu1 }
 0x9fa   :  { %v5132_v61 = vadd.f32 %v5052_v5, %v4584_v50  ;;  %v5134_v9 = vadd.f32 %v5123_v15, %v4586_v53  ;;  %v5054_v62 = vpop.f32.mrb[31].mxu0  ;;  %v5125_v3 = vpop.f32.mrb[31].mxu1  ;;  %v9014_v50 = vpack.c.bf16 %v5227_v33, %v5219_v47  ;;  %v9078_v53 = vpack.c.bf16 %v5229_v36, %v5221_v34  ;;  %v5243_v5 = vld [vmem:[#allocation6 + $0x168] sm:$0xff]  ;;  %v5237_v15 = vld [vmem:[#allocation6 + $0x138] sm:$0xff]  ;;  %v5268_v33 = vld [vmem:[#allocation6 + $0x230] sm:$0xff] }
 0x9fb   :  { %v5133_v0 = vadd.f32 %v5054_v62, %v4585_v8  ;;  %v5135_v54 = vadd.f32 %v5125_v3, %v4587_v59  ;;  %v5245_v8 = vld [vmem:[#allocation6 + $0x178] sm:$0xff]  ;;  %v9016_v59 = vpack.c.bf16 %v5226_v42, %v5218_v52  ;;  %v5242_v62 = vld [vmem:[#allocation6 + $0x160] sm:$0xff]  ;;  %v9018_v3 = vpack.c.bf16 %v5243_v5, %v5235_v60  ;;  %v5276_v34 = vld [vmem:[#allocation6 + $0x270] sm:$0xff] }
 0x9fc   :  { %9643 = vtanh.f32 %v5132_v61  ;;  %v6816_v19 = vmul.f32 -1.442695, %v5134_v9  ;;  %v9080_v61 = vpack.c.bf16 %v5228_v49, %v5220_v4  ;;  %v5234_v9 = vld [vmem:[#allocation6 + $0x120] sm:$0xff]  ;;  %v5293_v52 = vld [vmem:[#allocation6 + $0x2f8] sm:$0xff]  ;;  %v9092_v4 = vpack.c.bf16 %v5276_v34, %v5268_v33  ;;  %v5292_v5 = vld [vmem:[#allocation6 + $0x2f0] sm:$0xff] }
 0x9fd   :  { %9645 = vtanh.f32 %v5133_v0  ;;  %v6817_v6 = vmul.f32 -1.442695, %v5135_v54  ;;  %v9082_v0 = vpack.c.bf16 %v5245_v8, %v5237_v15  ;;  %v5236_v54 = vld [vmem:[#allocation6 + $0x130] sm:$0xff]  ;;  %v9020_v11 = vpack.c.bf16 %v5242_v62, %v5234_v9  ;;  %v5282_v60 = vld [vmem:[#allocation6 + $0x2a0] sm:$0xff]  ;;  %v5299_v15 = vld [vmem:[#allocation6 + $0x328] sm:$0xff] }
 0x9fe   :  { %9647 = vpow2.f32 %v6816_v19  ;;  %v5244_v19 = vld [vmem:[#allocation6 + $0x170] sm:$0xff]  ;;  %v5307_v9 = vld [vmem:[#allocation6 + $0x368] sm:$0xff]  ;;  %v5301_v62 = vld [vmem:[#allocation6 + $0x338] sm:$0xff] }
 0x9ff   :  { %9649 = vpow2.f32 %v6817_v6  ;;  %v5251_v6 = vld [vmem:[#allocation6 + $0x1a8] sm:$0xff]  ;;  %v5330_v33 = vld [vmem:[#allocation6 + $0x420] sm:$0xff] }
 0xa00   :  { %v5338_v34 = vld [vmem:[#allocation6 + $0x460] sm:$0xff] }
 0xa06   :  { %v9644_v10 = vpop.eup %9643 }
 0xa07   :  { %v9646_v14 = vpop.eup %9645  ;;  %v5176_v39 = vmul.f32 %v9644_v10, %v9636_v7  ;;  %v5259_v7 = vld [vmem:[#allocation6 + $0x1e8] sm:$0xff]  ;;  %v9084_v10 = vpack.c.bf16 %v5244_v19, %v5236_v54 }
 0xa08   :  { %v9648_v26 = vpop.eup %9647  ;;  %v5177_v30 = vmul.f32 %v9646_v14, %v9640_v2  ;;  %v5261_v2 = vld [vmem:[#allocation6 + $0x1f8] sm:$0xff]  ;;  %v5250_v14 = vld [vmem:[#allocation6 + $0x1a0] sm:$0xff] }
 0xa09   :  { %v9650_v17 = vpop.eup %9649  ;;  %v10235_v21 = vadd.f32 %v5176_v39, %v5174_v16  ;;  %v5168_v45 = vadd.f32 1.0, %v9648_v26  ;;  %v5258_v16 = vld [vmem:[#allocation6 + $0x1e0] sm:$0xff]  ;;  %v9022_v39 = vpack.c.bf16 %v5259_v7, %v5251_v6  ;;  %v9086_v26 = vpack.c.bf16 %v5261_v2, %v5253_v12 }
 0xa0a   :  { %v10237_v43 = vadd.f32 %v5177_v30, %v5175_v37  ;;  %v5169_v31 = vadd.f32 1.0, %v9650_v17  ;;  %v5252_v37 = vld [vmem:[#allocation6 + $0x1b0] sm:$0xff]  ;;  %v5267_v17 = vld [vmem:[#allocation6 + $0x228] sm:$0xff]  ;;  %v5298_v6 = vld [vmem:[#allocation6 + $0x320] sm:$0xff]  ;;  %v9034_v12 = vpack.c.bf16 %v5307_v9, %v5299_v15 }
 0xa0b   :  { %9651 = vtanh.f32 %v10235_v21  ;;  %v5260_v30 = vld [vmem:[#allocation6 + $0x1f0] sm:$0xff]  ;;  %v5306_v7 = vld [vmem:[#allocation6 + $0x360] sm:$0xff]  ;;  %v5371_v9 = vld [vmem:[#allocation6 + $0x568] sm:$0xff] }
 0xa0c   :  { %9653 = vrcp.f32 %v5168_v45  ;;  %v5275_v45 = vld [vmem:[#allocation6 + $0x268] sm:$0xff]  ;;  %v9088_v18 = vpack.c.bf16 %v5260_v30, %v5252_v37  ;;  %v9036_v37 = vpack.c.bf16 %v5306_v7, %v5298_v6  ;;  %v5370_v6 = vld [vmem:[#allocation6 + $0x560] sm:$0xff] }
 0xa0d   :  { %9655 = vtanh.f32 %v10237_v43 }
 0xa0e   :  { %9657 = vrcp.f32 %v5169_v31  ;;  %v5269_v31 = vld [vmem:[#allocation6 + $0x238] sm:$0xff] }
 0xa15   :  { %v9652_v35 = vpop.eup %9651 }
 0xa16   :  { %v9654_v41 = vpop.eup %9653 }
 0xa17   :  { %v9656_v46 = vpop.eup %9655  ;;  %v10241_v29 = vmul.f32 %v9654_v41, %v9652_v35  ;;  %v5277_v35 = vld [vmem:[#allocation6 + $0x278] sm:$0xff]  ;;  %v9024_v41 = vpack.c.bf16 %v5258_v16, %v5250_v14  ;;  %v5315_v14 = vld [vmem:[#allocation6 + $0x3a8] sm:$0xff] }
 0xa18   :  { %v9658_v32 = vpop.eup %9657  ;;  %v9090_v47 = vpack.c.bf16 %v5277_v35, %v5269_v31  ;;  %v5323_v16 = vld [vmem:[#allocation6 + $0x3e8] sm:$0xff] }
 0xa19   :  { %v5183_v38 = vmul.f32 %v9658_v32, %v9656_v46  ;;  %v9026_v46 = vpack.c.bf16 %v5275_v45, %v5267_v17  ;;  %v5274_v32 = vld [vmem:[#allocation6 + $0x260] sm:$0xff]  ;;  %v9038_v31 = vpack.c.bf16 %v5323_v16, %v5315_v14  ;;  %v5387_v14 = vld [vmem:[#allocation6 + $0x5e8] sm:$0xff]  ;;  %v5381_v16 = vld [vmem:[#allocation6 + $0x5b8] sm:$0xff] }
 0xa1a   :  { %v9028_v42 = vpack.c.bf16 %v5274_v32, %v5266_v51  ;;  %v5314_v17 = vld [vmem:[#allocation6 + $0x3a0] sm:$0xff]  ;;  %v5339_v51 = vld [vmem:[#allocation6 + $0x468] sm:$0xff] }
 0xa1b   :  { %5518 = vmatprep.mubr.f32.mxu0 %v5183_v38  ;;  %5589 = vmatprep.mubr.f32.mxu1 %v5183_v38  ;;  %v5186_v48 = vcombine.low %v10241_v29, %v5183_v38  ;;  %v5322_v45 = vld [vmem:[#allocation6 + $0x3e0] sm:$0xff] }
 0xa1c   :  { %5519 = vmatmul.mubr.f32.vlgmr.msra.gmra.mrb[32].mxu0 %v10241_v29  ;;  %5590 = vmatmul.mubr.f32.vlgmr.msra.gmra.mrb[32].mxu1 %v10241_v29 }
 0xa1d   :  { %6818 = vst.sshfl [vmem:[#allocation2 + $0x1c] sm:$0x33 pattern:$0x76325410] %v5186_v48  ;;  %9013 = vmatpush1.bf16.msra.mxu0 %v9012_v44  ;;  %9077 = vmatpush1.bf16.msra.mxu1 %v9076_v40  ;;  %v5291_v44 = vld [vmem:[#allocation6 + $0x2e8] sm:$0xff]  ;;  %v5285_v40 = vld [vmem:[#allocation6 + $0x2b8] sm:$0xff] }
 0xa1e   :  { %5660 = vmatprep.mubr.f32.mxu0 %v5183_v38  ;;  %5731 = vmatprep.mubr.f32.mxu1 %v5183_v38  ;;  %v5283_v38 = vld [vmem:[#allocation6 + $0x2a8] sm:$0xff]  ;;  %v5290_v48 = vld [vmem:[#allocation6 + $0x2e0] sm:$0xff] }
 0xa1f   :  { %9015 = vmatprep.subr.bf16.mxu0 %v9014_v50  ;;  %9079 = vmatprep.subr.bf16.mxu1 %v9078_v53  ;;  %v9030_v50 = vpack.c.bf16 %v5291_v44, %v5283_v38  ;;  %v5284_v53 = vld [vmem:[#allocation6 + $0x2b0] sm:$0xff]  ;;  %v9032_v54 = vpack.c.bf16 %v5290_v48, %v5282_v60  ;;  %v9044_v60 = vpack.c.bf16 %v5338_v34, %v5330_v33  ;;  %v5402_v33 = vld [vmem:[#allocation6 + $0x660] sm:$0xff] }
 0xa20   :  { %v9096_v19 = vpack.c.bf16 %v5292_v5, %v5284_v53  ;;  %v5332_v44 = vld [vmem:[#allocation6 + $0x430] sm:$0xff]  ;;  %v5354_v53 = vld [vmem:[#allocation6 + $0x4e0] sm:$0xff] }
 0xa21   :  { %9017 = vmatpush1.bf16.msra.mxu0 %v9016_v59  ;;  %9081 = vmatpush1.bf16.msra.mxu1 %v9080_v61  ;;  %v9094_v61 = vpack.c.bf16 %v5293_v52, %v5285_v40  ;;  %v5340_v40 = vld [vmem:[#allocation6 + $0x470] sm:$0xff]  ;;  %v5347_v52 = vld [vmem:[#allocation6 + $0x4a8] sm:$0xff] }
 0xa22   :  { %9019 = vmatprep.subr.bf16.mxu0 %v9018_v3  ;;  %9083 = vmatprep.subr.bf16.mxu1 %v9082_v0  ;;  %v5309_v3 = vld [vmem:[#allocation6 + $0x378] sm:$0xff]  ;;  %v9108_v48 = vpack.c.bf16 %v5340_v40, %v5332_v44  ;;  %v5404_v44 = vld [vmem:[#allocation6 + $0x670] sm:$0xff]  ;;  %v5411_v40 = vld [vmem:[#allocation6 + $0x6a8] sm:$0xff] }
 0xa23   :  { %v9098_v2 = vpack.c.bf16 %v5309_v3, %v5301_v62  ;;  %v5365_v62 = vld [vmem:[#allocation6 + $0x538] sm:$0xff] }
 0xa24   :  { %v6464_v13 = vld [vmem:[#allocation2 + $0x1c] sm:$0xf]  ;;  %v5373_v3 = vld [vmem:[#allocation6 + $0x578] sm:$0xff] }
 0xa25   :  { %9021 = vmatpush1.bf16.msra.mxu0 %v9020_v11  ;;  %9085 = vmatpush1.bf16.msra.mxu1 %v9084_v10  ;;  %v6493_v22 = vmul.f32 %v9987_v20, %v6464_v13  ;;  %v5300_v11 = vld [vmem:[#allocation6 + $0x330] sm:$0xff] }
 0xa26   :  { %9023 = vmatprep.subr.bf16.mxu0 %v9022_v39  ;;  %9087 = vmatprep.subr.bf16.mxu1 %v9086_v26  ;;  %v5308_v10 = vld [vmem:[#allocation6 + $0x370] sm:$0xff]  ;;  %v5317_v39 = vld [vmem:[#allocation6 + $0x3b8] sm:$0xff] }
 0xa27   :  { %v6568_v36 = vrot.slane %v6493_v22, %v9984_v63  ;;  %v5325_v26 = vld [vmem:[#allocation6 + $0x3f8] sm:$0xff]  ;;  %v9100_v30 = vpack.c.bf16 %v5308_v10, %v5300_v11  ;;  %v5316_v13 = vld [vmem:[#allocation6 + $0x3b0] sm:$0xff]  ;;  %v5379_v10 = vld [vmem:[#allocation6 + $0x5a8] sm:$0xff] }
 0xa28   :  { %v9102_v35 = vpack.c.bf16 %v5325_v26, %v5317_v39  ;;  %v5333_v22 = vld [vmem:[#allocation6 + $0x438] sm:$0xff]  ;;  %v5372_v11 = vld [vmem:[#allocation6 + $0x570] sm:$0xff] }
 0xa29   :  { %9025 = vmatpush1.bf16.msra.mxu0 %v9024_v41  ;;  %9089 = vmatpush1.bf16.msra.mxu1 %v9088_v18  ;;  %v6569_v49 = vcombine.high %v6568_v36, %v6568_v36  ;;  %v6642_v8 = vsel %vm6606_vm0, %v6568_v36, 0.0  ;;  %v5324_v41 = vld [vmem:[#allocation6 + $0x3f0] sm:$0xff]  ;;  %v5331_v18 = vld [vmem:[#allocation6 + $0x428] sm:$0xff]  ;;  %v5389_v39 = vld [vmem:[#allocation6 + $0x5f8] sm:$0xff] }
 0xa2a   :  { %9027 = vmatprep.subr.bf16.mxu0 %v9026_v46  ;;  %9091 = vmatprep.subr.bf16.mxu1 %v9090_v47  ;;  %v5341_v46 = vld [vmem:[#allocation6 + $0x478] sm:$0xff]  ;;  %v9040_v47 = vpack.c.bf16 %v5322_v45, %v5314_v17  ;;  %v9104_v32 = vpack.c.bf16 %v5324_v41, %v5316_v13  ;;  %v9042_v36 = vpack.c.bf16 %v5339_v51, %v5331_v18  ;;  %v5386_v17 = vld [vmem:[#allocation6 + $0x5e0] sm:$0xff]  ;;  %v5388_v13 = vld [vmem:[#allocation6 + $0x5f0] sm:$0xff] }
 0xa2b   :  { %v6643_v59 = vsel %vm6606_vm0, %v6569_v49, 0.0  ;;  %v9106_v38 = vpack.c.bf16 %v5341_v46, %v5333_v22  ;;  %v5357_v49 = vld [vmem:[#allocation6 + $0x4f8] sm:$0xff]  ;;  %v9054_v45 = vpack.c.bf16 %v5387_v14, %v5379_v10  ;;  %v5395_v41 = vld [vmem:[#allocation6 + $0x628] sm:$0xff] }
 0xa2c   :  { %v6644_v0 = vadd.f32 %v6643_v59, %v6642_v8  ;;  %v5348_v8 = vld [vmem:[#allocation6 + $0x4b0] sm:$0xff]  ;;  %v5403_v18 = vld [vmem:[#allocation6 + $0x668] sm:$0xff]  ;;  %v5397_v51 = vld [vmem:[#allocation6 + $0x638] sm:$0xff] }
 0xa2d   :  { %9029 = vmatpush1.bf16.msra.mxu0 %v9028_v42  ;;  %9093 = vmatpush1.bf16.msra.mxu1 %v9092_v4  ;;  %v5355_v42 = vld [vmem:[#allocation6 + $0x4e8] sm:$0xff]  ;;  %v5349_v4 = vld [vmem:[#allocation6 + $0x4b8] sm:$0xff]  ;;  %v5356_v59 = vld [vmem:[#allocation6 + $0x4f0] sm:$0xff]  ;;  %v9058_v34 = vpack.c.bf16 %v5403_v18, %v5395_v41 }
 0xa2e   :  { %6645 = vadd.xlane.f32.xlu0 %v6644_v0  ;;  %9031 = vmatprep.subr.bf16.mxu0 %v9030_v50  ;;  %v5346_v50 = vld [vmem:[#allocation6 + $0x4a0] sm:$0xff]  ;;  %v9046_v5 = vpack.c.bf16 %v5355_v42, %v5347_v52  ;;  %v9110_v15 = vpack.c.bf16 %v5357_v49, %v5349_v4  ;;  %v5405_v22 = vld [vmem:[#allocation6 + $0x678] sm:$0xff]  ;;  %v5419_v52 = vld [vmem:[#allocation6 + $0x6e8] sm:$0xff] }
 0xa2f   :  { %9095 = vmatprep.subr.bf16.mxu1 %v9094_v61  ;;  %v5363_v61 = vld [vmem:[#allocation6 + $0x528] sm:$0xff]  ;;  %v9048_v0 = vpack.c.bf16 %v5354_v53, %v5346_v50  ;;  %v5413_v42 = vld [vmem:[#allocation6 + $0x6b8] sm:$0xff]  ;;  %v5418_v50 = vld [vmem:[#allocation6 + $0x6e0] sm:$0xff]  ;;  %v9062_v53 = vpack.c.bf16 %v5419_v52, %v5411_v40 }
 0xa30   :  { %v9050_v7 = vpack.c.bf16 %v5371_v9, %v5363_v61  ;;  %v5421_v4 = vld [vmem:[#allocation6 + $0x6f8] sm:$0xff]  ;;  %v5435_v61 = vld [vmem:[#allocation6 + $0x768] sm:$0xff] }
 0xa31   :  { %9033 = vmatpush1.bf16.msra.mxu0 %v9032_v54  ;;  %9097 = vmatpush1.bf16.msra.mxu1 %v9096_v19  ;;  %v9112_v54 = vpack.c.bf16 %v5356_v59, %v5348_v8  ;;  %v5362_v19 = vld [vmem:[#allocation6 + $0x520] sm:$0xff]  ;;  %v5420_v8 = vld [vmem:[#allocation6 + $0x6f0] sm:$0xff]  ;;  %v5427_v59 = vld [vmem:[#allocation6 + $0x728] sm:$0xff] }
 0xa32   :  { %9035 = vmatprep.subr.bf16.mxu0 %v9034_v12  ;;  %9099 = vmatprep.subr.bf16.mxu1 %v9098_v2  ;;  %v9114_v12 = vpack.c.bf16 %v5373_v3, %v5365_v62  ;;  %v5364_v2 = vld [vmem:[#allocation6 + $0x530] sm:$0xff]  ;;  %v9052_v26 = vpack.c.bf16 %v5370_v6, %v5362_v19  ;;  %v5429_v9 = vld [vmem:[#allocation6 + $0x738] sm:$0xff]  ;;  %v5434_v19 = vld [vmem:[#allocation6 + $0x760] sm:$0xff]  ;;  %v9066_v6 = vpack.c.bf16 %v5435_v61, %v5427_v59 }
 0xa33   :  { %v5437_v62 = vld [vmem:[#allocation6 + $0x778] sm:$0xff]  ;;  %v5451_v10 = vld [vmem:[#allocation6 + $0x7e8] sm:$0xff] }
 0xa34   :  { %v5445_v14 = vld [vmem:[#allocation6 + $0x7b8] sm:$0xff]  ;;  %v5849_v18 = vld [vmem:[#allocation6 + $0x8] sm:$0xff] }
 0xa35   :  { %9037 = vmatpush1.bf16.msra.mxu0 %v9036_v37  ;;  %9101 = vmatpush1.bf16.msra.mxu1 %v9100_v30  ;;  %v9116_v37 = vpack.c.bf16 %v5372_v11, %v5364_v2  ;;  %v5378_v30 = vld [vmem:[#allocation6 + $0x5a0] sm:$0xff]  ;;  %v5436_v2 = vld [vmem:[#allocation6 + $0x770] sm:$0xff]  ;;  %v5443_v11 = vld [vmem:[#allocation6 + $0x7a8] sm:$0xff] }
 0xa36   :  { %9039 = vmatprep.subr.bf16.mxu0 %v9038_v31  ;;  %9103 = vmatprep.subr.bf16.mxu1 %v9102_v35  ;;  %v9118_v31 = vpack.c.bf16 %v5389_v39, %v5381_v16  ;;  %v5380_v35 = vld [vmem:[#allocation6 + $0x5b0] sm:$0xff]  ;;  %v9056_v46 = vpack.c.bf16 %v5386_v17, %v5378_v30  ;;  %v5453_v16 = vld [vmem:[#allocation6 + $0x7f8] sm:$0xff]  ;;  %v9070_v30 = vpack.c.bf16 %v5451_v10, %v5443_v11  ;;  %v5865_v40 = vld [vmem:[#allocation6 + $0x88] sm:$0xff] }
 0xa37   :  { %v9134_v17 = vpack.c.bf16 %v5453_v16, %v5445_v14  ;;  %v5889_v59 = vld [vmem:[#allocation6 + $0x148] sm:$0xff]  ;;  %v5899_v10 = vld [vmem:[#allocation6 + $0x198] sm:$0xff] }
 0xa38   :  { %v5905_v11 = vld [vmem:[#allocation6 + $0x1c8] sm:$0xff] }
 0xa39   :  { %9041 = vmatpush1.bf16.msra.mxu0 %v9040_v47  ;;  %9105 = vmatpush1.bf16.msra.mxu1 %v9104_v32  ;;  %v9120_v47 = vpack.c.bf16 %v5388_v13, %v5380_v35  ;;  %v5394_v32 = vld [vmem:[#allocation6 + $0x620] sm:$0xff]  ;;  %v5452_v35 = vld [vmem:[#allocation6 + $0x7f0] sm:$0xff] }
 0xa3a   :  { %9043 = vmatprep.subr.bf16.mxu0 %v9042_v36  ;;  %9107 = vmatprep.subr.bf16.mxu1 %v9106_v38  ;;  %v9122_v36 = vpack.c.bf16 %v5405_v22, %v5397_v51  ;;  %v5396_v38 = vld [vmem:[#allocation6 + $0x630] sm:$0xff]  ;;  %v9060_v49 = vpack.c.bf16 %v5402_v33, %v5394_v32  ;;  %v5857_v51 = vld [vmem:[#allocation6 + $0x48] sm:$0xff]  ;;  %v5851_v22 = vld [vmem:[#allocation6 + $0x18] sm:$0xff] }
 0xa3b   :  { %v5848_v32 = vld [vmem:[#allocation6] sm:$0xff] }
 0xa3c   :  { %v5856_v33 = vld [vmem:[#allocation6 + $0x40] sm:$0xff] }
 0xa3d   :  { %9045 = vmatpush1.bf16.msra.mxu0 %v9044_v60  ;;  %9109 = vmatpush1.bf16.msra.mxu1 %v9108_v48  ;;  %v9124_v60 = vpack.c.bf16 %v5404_v44, %v5396_v38  ;;  %v5410_v48 = vld [vmem:[#allocation6 + $0x6a0] sm:$0xff]  ;;  %v5850_v38 = vld [vmem:[#allocation6 + $0x10] sm:$0xff] }
 0xa3e   :  { %9047 = vmatprep.subr.bf16.mxu0 %v9046_v5  ;;  %9111 = vmatprep.subr.bf16.mxu1 %v9110_v15  ;;  %v9126_v5 = vpack.c.bf16 %v5421_v4, %v5413_v42  ;;  %v5412_v15 = vld [vmem:[#allocation6 + $0x6b0] sm:$0xff]  ;;  %v9064_v3 = vpack.c.bf16 %v5418_v50, %v5410_v48  ;;  %v5873_v42 = vld [vmem:[#allocation6 + $0xc8] sm:$0xff]  ;;  %v5867_v4 = vld [vmem:[#allocation6 + $0x98] sm:$0xff] }
 0xa3f   :  { %v5858_v44 = vld [vmem:[#allocation6 + $0x50] sm:$0xff]  ;;  %v5864_v48 = vld [vmem:[#allocation6 + $0x80] sm:$0xff] }
 0xa40   :  { %v9204_v52 = vpack.c.bf16 %v5858_v44, %v5850_v38  ;;  %v5872_v50 = vld [vmem:[#allocation6 + $0xc0] sm:$0xff]  ;;  %v5937_v38 = vld [vmem:[#allocation6 + $0x2c8] sm:$0xff]  ;;  %v5931_v44 = vld [vmem:[#allocation6 + $0x298] sm:$0xff] }
 0xa41   :  { %9049 = vmatpush1.bf16.msra.mxu0 %v9048_v0  ;;  %9113 = vmatpush1.bf16.msra.mxu1 %v9112_v54  ;;  %v9128_v0 = vpack.c.bf16 %v5420_v8, %v5412_v15  ;;  %v5426_v54 = vld [vmem:[#allocation6 + $0x720] sm:$0xff]  ;;  %v5874_v15 = vld [vmem:[#allocation6 + $0xd0] sm:$0xff]  ;;  %v5881_v8 = vld [vmem:[#allocation6 + $0x108] sm:$0xff] }
 0xa42   :  { %9051 = vmatprep.subr.bf16.mxu0 %v9050_v7  ;;  %9115 = vmatprep.subr.bf16.mxu1 %v9114_v12  ;;  %v9130_v7 = vpack.c.bf16 %v5437_v62, %v5429_v9  ;;  %v5428_v12 = vld [vmem:[#allocation6 + $0x730] sm:$0xff]  ;;  %v9068_v39 = vpack.c.bf16 %v5434_v19, %v5426_v54  ;;  %v9146_v9 = vpack.c.bf16 %v5889_v59, %v5881_v8  ;;  %v5883_v62 = vld [vmem:[#allocation6 + $0x118] sm:$0xff]  ;;  %v5888_v19 = vld [vmem:[#allocation6 + $0x140] sm:$0xff] }
 0xa43   :  { %v5955_v8 = vld [vmem:[#allocation6 + $0x358] sm:$0xff] }
 0xa45   :  { %9053 = vmatpush1.bf16.msra.mxu0 %v9052_v26  ;;  %9117 = vmatpush1.bf16.msra.mxu1 %v9116_v37  ;;  %v9132_v26 = vpack.c.bf16 %v5436_v2, %v5428_v12  ;;  %v5442_v37 = vld [vmem:[#allocation6 + $0x7a0] sm:$0xff]  ;;  %v5897_v2 = vld [vmem:[#allocation6 + $0x188] sm:$0xff] }
 0xa46   :  { %9055 = vmatprep.subr.bf16.mxu0 %v9054_v45  ;;  %9119 = vmatprep.subr.bf16.mxu1 %v9118_v31  ;;  %v5450_v45 = vld [vmem:[#allocation6 + $0x7e0] sm:$0xff]  ;;  %v5444_v31 = vld [vmem:[#allocation6 + $0x7b0] sm:$0xff]  ;;  %v9150_v16 = vpack.c.bf16 %v5905_v11, %v5897_v2  ;;  %v5971_v2 = vld [vmem:[#allocation6 + $0x3d8] sm:$0xff] }
 0xa47   :  { %v9072_v13 = vpack.c.bf16 %v5450_v45, %v5442_v37  ;;  %v9136_v41 = vpack.c.bf16 %v5452_v35, %v5444_v31  ;;  %v5904_v37 = vld [vmem:[#allocation6 + $0x1c0] sm:$0xff]  ;;  %v5906_v45 = vld [vmem:[#allocation6 + $0x1d0] sm:$0xff]  ;;  %v5913_v31 = vld [vmem:[#allocation6 + $0x208] sm:$0xff] }
 0xa48   :  { %v5921_v35 = vld [vmem:[#allocation6 + $0x248] sm:$0xff] }
 0xa49   :  { %9057 = vmatpush1.bf16.msra.mxu0 %v9056_v46  ;;  %9121 = vmatpush1.bf16.msra.mxu1 %v9120_v47  ;;  %v9138_v46 = vpack.c.bf16 %v5857_v51, %v5849_v18  ;;  %v5859_v47 = vld [vmem:[#allocation6 + $0x58] sm:$0xff] }
 0xa4a   :  { %9059 = vmatprep.subr.bf16.mxu0 %v9058_v34  ;;  %9123 = vmatprep.subr.bf16.mxu1 %v9122_v36  ;;  %v9202_v34 = vpack.c.bf16 %v5859_v47, %v5851_v22  ;;  %v9140_v36 = vpack.c.bf16 %v5856_v33, %v5848_v32  ;;  %v9154_v22 = vpack.c.bf16 %v5921_v35, %v5913_v31  ;;  %v5920_v47 = vld [vmem:[#allocation6 + $0x240] sm:$0xff]  ;;  %v5914_v32 = vld [vmem:[#allocation6 + $0x210] sm:$0xff]  ;;  %v5977_v31 = vld [vmem:[#allocation6 + $0x408] sm:$0xff] }
 0xa4b   :  { %v5985_v35 = vld [vmem:[#allocation6 + $0x448] sm:$0xff] }
 0xa4d   :  { %9061 = vmatpush1.bf16.msra.mxu0 %v9060_v49  ;;  %9125 = vmatpush1.bf16.msra.mxu1 %v9124_v60  ;;  %v5875_v49 = vld [vmem:[#allocation6 + $0xd8] sm:$0xff] }
 0xa4e   :  { %9063 = vmatprep.subr.bf16.mxu0 %v9062_v53  ;;  %9127 = vmatprep.subr.bf16.mxu1 %v9126_v5  ;;  %v9206_v60 = vpack.c.bf16 %v5875_v49, %v5867_v4  ;;  %v5866_v53 = vld [vmem:[#allocation6 + $0x90] sm:$0xff]  ;;  %v9144_v5 = vpack.c.bf16 %v5872_v50, %v5864_v48  ;;  %v5928_v49 = vld [vmem:[#allocation6 + $0x280] sm:$0xff] }
 0xa4f   :  { %v9208_v61 = vpack.c.bf16 %v5874_v15, %v5866_v53  ;;  %v5938_v50 = vld [vmem:[#allocation6 + $0x2d0] sm:$0xff]  ;;  %v5945_v53 = vld [vmem:[#allocation6 + $0x308] sm:$0xff]  ;;  %v5947_v15 = vld [vmem:[#allocation6 + $0x318] sm:$0xff] }
 0xa51   :  { %9065 = vmatpush1.bf16.msra.mxu0 %v9064_v3  ;;  %9129 = vmatpush1.bf16.msra.mxu1 %v9128_v0  ;;  %v5891_v3 = vld [vmem:[#allocation6 + $0x158] sm:$0xff]  ;;  %v5880_v0 = vld [vmem:[#allocation6 + $0x100] sm:$0xff] }
 0xa52   :  { %9067 = vmatprep.subr.bf16.mxu0 %v9066_v6  ;;  %9131 = vmatprep.subr.bf16.mxu1 %v9130_v7  ;;  %v9210_v54 = vpack.c.bf16 %v5891_v3, %v5883_v62  ;;  %v5882_v6 = vld [vmem:[#allocation6 + $0x110] sm:$0xff]  ;;  %v9148_v12 = vpack.c.bf16 %v5888_v19, %v5880_v0  ;;  %v5944_v62 = vld [vmem:[#allocation6 + $0x300] sm:$0xff] }
 0xa53   :  { %v5890_v7 = vld [vmem:[#allocation6 + $0x150] sm:$0xff]  ;;  %v5952_v3 = vld [vmem:[#allocation6 + $0x340] sm:$0xff] }
 0xa54   :  { %v9212_v14 = vpack.c.bf16 %v5890_v7, %v5882_v6  ;;  %v5946_v0 = vld [vmem:[#allocation6 + $0x310] sm:$0xff]  ;;  %v5961_v6 = vld [vmem:[#allocation6 + $0x388] sm:$0xff]  ;;  %v9164_v11 = vpack.c.bf16 %v5952_v3, %v5944_v62 }
 0xa55   :  { %9069 = vmatpush1.bf16.msra.mxu0 %v9068_v39  ;;  %9133 = vmatpush1.bf16.msra.mxu1 %v9132_v26  ;;  %v5907_v39 = vld [vmem:[#allocation6 + $0x1d8] sm:$0xff]  ;;  %v5896_v26 = vld [vmem:[#allocation6 + $0x180] sm:$0xff]  ;;  %v5954_v19 = vld [vmem:[#allocation6 + $0x350] sm:$0xff] }
 0xa56   :  { %9071 = vmatprep.subr.bf16.mxu0 %v9070_v30  ;;  %9135 = vmatprep.subr.bf16.mxu1 %v9134_v17  ;;  %v9214_v30 = vpack.c.bf16 %v5907_v39, %v5899_v10  ;;  %v5898_v17 = vld [vmem:[#allocation6 + $0x190] sm:$0xff]  ;;  %v9152_v18 = vpack.c.bf16 %v5904_v37, %v5896_v26  ;;  %v5969_v7 = vld [vmem:[#allocation6 + $0x3c8] sm:$0xff]  ;;  %v9228_v10 = vpack.c.bf16 %v5954_v19, %v5946_v0  ;;  %v5968_v39 = vld [vmem:[#allocation6 + $0x3c0] sm:$0xff] }
 0xa57   :  { %v9216_v51 = vpack.c.bf16 %v5906_v45, %v5898_v17  ;;  %v5962_v37 = vld [vmem:[#allocation6 + $0x390] sm:$0xff] }
 0xa58   :  { %v6010_v0 = vld [vmem:[#allocation6 + $0x510] sm:$0xff] }
 0xa59   :  { %9073 = vmatpush1.bf16.msra.mxu0 %v9072_v13  ;;  %9137 = vmatpush1.bf16.msra.mxu1 %v9136_v41  ;;  %v5915_v13 = vld [vmem:[#allocation6 + $0x218] sm:$0xff] }
 0xa5a   :  { %9139 = vmatprep.subr.bf16.mxu0 %v9138_v46  ;;  %9203 = vmatprep.subr.bf16.mxu1 %v9202_v34  ;;  %v5923_v41 = vld [vmem:[#allocation6 + $0x258] sm:$0xff]  ;;  %v5912_v46 = vld [vmem:[#allocation6 + $0x200] sm:$0xff]  ;;  %v5922_v34 = vld [vmem:[#allocation6 + $0x250] sm:$0xff] }
 0xa5b   :  { %v9218_v33 = vpack.c.bf16 %v5923_v41, %v5915_v13  ;;  %v5979_v13 = vld [vmem:[#allocation6 + $0x418] sm:$0xff]  ;;  %v9170_v41 = vpack.c.bf16 %v5985_v35, %v5977_v31 }
 0xa5c   :  { %5661 = vmatmul.mubr.f32.vlgmr.msra.gmra.mrb[34].mxu0 %v10241_v29  ;;  %5732 = vmatmul.mubr.f32.vlgmr.msra.gmra.mrb[34].mxu1 %v10241_v29  ;;  %v9142_v29 = vpack.c.bf16 %v5873_v42, %v5865_v40  ;;  %v5939_v40 = vld [vmem:[#allocation6 + $0x2d8] sm:$0xff]  ;;  %v9220_v42 = vpack.c.bf16 %v5922_v34, %v5914_v32 }
 0xa5d   :  { %9141 = vmatpush1.bf16.msra.mxu0 %v9140_v36  ;;  %9205 = vmatpush1.bf16.msra.mxu1 %v9204_v52  ;;  %v5929_v36 = vld [vmem:[#allocation6 + $0x288] sm:$0xff]  ;;  %v9156_v52 = vpack.c.bf16 %v5920_v47, %v5912_v46  ;;  %v9222_v48 = vpack.c.bf16 %v5939_v40, %v5931_v44  ;;  %v5984_v46 = vld [vmem:[#allocation6 + $0x440] sm:$0xff]  ;;  %v5978_v47 = vld [vmem:[#allocation6 + $0x410] sm:$0xff] }
 0xa5e   :  { %9143 = vmatprep.subr.bf16.mxu0 %v9142_v29  ;;  %9207 = vmatprep.subr.bf16.mxu1 %v9206_v60  ;;  %v9158_v4 = vpack.c.bf16 %v5937_v38, %v5929_v36  ;;  %v5936_v29 = vld [vmem:[#allocation6 + $0x2c0] sm:$0xff]  ;;  %v5930_v60 = vld [vmem:[#allocation6 + $0x290] sm:$0xff]  ;;  %v5993_v36 = vld [vmem:[#allocation6 + $0x488] sm:$0xff] }
 0xa5f   :  { %v9160_v59 = vpack.c.bf16 %v5936_v29, %v5928_v49  ;;  %v6001_v38 = vld [vmem:[#allocation6 + $0x4c8] sm:$0xff]  ;;  %v5995_v44 = vld [vmem:[#allocation6 + $0x498] sm:$0xff] }
 0xa60   :  { %v9174_v40 = vpack.c.bf16 %v6001_v38, %v5993_v36  ;;  %v6043_v31 = vld [vmem:[#allocation6 + $0x618] sm:$0xff] }
 0xa61   :  { %9145 = vmatpush1.bf16.msra.mxu0 %v9144_v5  ;;  %9209 = vmatpush1.bf16.msra.mxu1 %v9208_v61  ;;  %v5953_v5 = vld [vmem:[#allocation6 + $0x348] sm:$0xff]  ;;  %v9224_v61 = vpack.c.bf16 %v5938_v50, %v5930_v60  ;;  %v5994_v60 = vld [vmem:[#allocation6 + $0x490] sm:$0xff]  ;;  %v6059_v36 = vld [vmem:[#allocation6 + $0x698] sm:$0xff] }
 0xa62   :  { %9147 = vmatprep.subr.bf16.mxu0 %v9146_v9  ;;  %9211 = vmatprep.subr.bf16.mxu1 %v9210_v54  ;;  %v9162_v9 = vpack.c.bf16 %v5953_v5, %v5945_v53  ;;  %v9226_v54 = vpack.c.bf16 %v5955_v8, %v5947_v15  ;;  %v6009_v53 = vld [vmem:[#allocation6 + $0x508] sm:$0xff]  ;;  %v6011_v15 = vld [vmem:[#allocation6 + $0x518] sm:$0xff] }
 0xa63   :  { %v6017_v5 = vld [vmem:[#allocation6 + $0x548] sm:$0xff] }
 0xa64   :  { %v9178_v8 = vpack.c.bf16 %v6017_v5, %v6009_v53  ;;  %v6075_v53 = vld [vmem:[#allocation6 + $0x718] sm:$0xff] }
 0xa65   :  { %9149 = vmatpush1.bf16.msra.mxu0 %v9148_v12  ;;  %9213 = vmatpush1.bf16.msra.mxu1 %v9212_v14  ;;  %v5963_v12 = vld [vmem:[#allocation6 + $0x398] sm:$0xff]  ;;  %v9166_v14 = vpack.c.bf16 %v5969_v7, %v5961_v6  ;;  %v6025_v6 = vld [vmem:[#allocation6 + $0x588] sm:$0xff] }
 0xa66   :  { %9151 = vmatprep.subr.bf16.mxu0 %v9150_v16  ;;  %9215 = vmatprep.subr.bf16.mxu1 %v9214_v30  ;;  %v5960_v16 = vld [vmem:[#allocation6 + $0x380] sm:$0xff]  ;;  %v9230_v26 = vpack.c.bf16 %v5971_v2, %v5963_v12  ;;  %v5970_v30 = vld [vmem:[#allocation6 + $0x3d0] sm:$0xff]  ;;  %v6033_v7 = vld [vmem:[#allocation6 + $0x5c8] sm:$0xff] }
 0xa67   :  { %v9168_v17 = vpack.c.bf16 %v5968_v39, %v5960_v16  ;;  %v9232_v45 = vpack.c.bf16 %v5970_v30, %v5962_v37  ;;  %v6027_v12 = vld [vmem:[#allocation6 + $0x598] sm:$0xff]  ;;  %v9182_v2 = vpack.c.bf16 %v6033_v7, %v6025_v6  ;;  %v6034_v37 = vld [vmem:[#allocation6 + $0x5d0] sm:$0xff] }
 0xa68   :  { %v6083_v5 = vld [vmem:[#allocation6 + $0x758] sm:$0xff] }
 0xa69   :  { %9153 = vmatpush1.bf16.msra.mxu0 %v9152_v18  ;;  %9217 = vmatpush1.bf16.msra.mxu1 %v9216_v51  ;;  %v5987_v18 = vld [vmem:[#allocation6 + $0x458] sm:$0xff] }
 0xa6a   :  { %9155 = vmatprep.subr.bf16.mxu0 %v9154_v22  ;;  %9219 = vmatprep.subr.bf16.mxu1 %v9218_v33  ;;  %v9234_v51 = vpack.c.bf16 %v5987_v18, %v5979_v13  ;;  %v5976_v22 = vld [vmem:[#allocation6 + $0x400] sm:$0xff]  ;;  %v5986_v33 = vld [vmem:[#allocation6 + $0x450] sm:$0xff]  ;;  %v6051_v13 = vld [vmem:[#allocation6 + $0x658] sm:$0xff] }
 0xa6b   :  { %v9172_v32 = vpack.c.bf16 %v5984_v46, %v5976_v22  ;;  %v9236_v34 = vpack.c.bf16 %v5986_v33, %v5978_v47  ;;  %v6048_v18 = vld [vmem:[#allocation6 + $0x640] sm:$0xff]  ;;  %v6042_v46 = vld [vmem:[#allocation6 + $0x610] sm:$0xff]  ;;  %v6057_v33 = vld [vmem:[#allocation6 + $0x688] sm:$0xff] }
 0xa6c   :  { %v6050_v47 = vld [vmem:[#allocation6 + $0x650] sm:$0xff]  ;;  %v6091_v7 = vld [vmem:[#allocation6 + $0x798] sm:$0xff] }
 0xa6d   :  { %9157 = vmatpush1.bf16.msra.mxu0 %v9156_v52  ;;  %9221 = vmatpush1.bf16.msra.mxu1 %v9220_v42  ;;  %v6003_v52 = vld [vmem:[#allocation6 + $0x4d8] sm:$0xff]  ;;  %v5992_v42 = vld [vmem:[#allocation6 + $0x480] sm:$0xff] }
 0xa6e   :  { %9159 = vmatprep.subr.bf16.mxu0 %v9158_v4  ;;  %9223 = vmatprep.subr.bf16.mxu1 %v9222_v48  ;;  %v6000_v4 = vld [vmem:[#allocation6 + $0x4c0] sm:$0xff]  ;;  %v9238_v49 = vpack.c.bf16 %v6003_v52, %v5995_v44  ;;  %v6002_v48 = vld [vmem:[#allocation6 + $0x4d0] sm:$0xff]  ;;  %v6067_v44 = vld [vmem:[#allocation6 + $0x6d8] sm:$0xff] }
 0xa6f   :  { %v9176_v29 = vpack.c.bf16 %v6000_v4, %v5992_v42  ;;  %v9240_v50 = vpack.c.bf16 %v6002_v48, %v5994_v60  ;;  %v6064_v52 = vld [vmem:[#allocation6 + $0x6c0] sm:$0xff]  ;;  %v9254_v42 = vpack.c.bf16 %v6067_v44, %v6059_v36  ;;  %v6073_v60 = vld [vmem:[#allocation6 + $0x708] sm:$0xff] }
 0xa71   :  { %9161 = vmatpush1.bf16.msra.mxu0 %v9160_v59  ;;  %9225 = vmatpush1.bf16.msra.mxu1 %v9224_v61  ;;  %v6019_v59 = vld [vmem:[#allocation6 + $0x558] sm:$0xff]  ;;  %v6008_v61 = vld [vmem:[#allocation6 + $0x500] sm:$0xff] }
 0xa72   :  { %9163 = vmatprep.subr.bf16.mxu0 %v9162_v9  ;;  %9227 = vmatprep.subr.bf16.mxu1 %v9226_v54  ;;  %v6016_v9 = vld [vmem:[#allocation6 + $0x540] sm:$0xff]  ;;  %v9242_v62 = vpack.c.bf16 %v6019_v59, %v6011_v15  ;;  %v6018_v54 = vld [vmem:[#allocation6 + $0x550] sm:$0xff] }
 0xa73   :  { %v9180_v3 = vpack.c.bf16 %v6016_v9, %v6008_v61  ;;  %v9244_v19 = vpack.c.bf16 %v6018_v54, %v6010_v0  ;;  %v6072_v59 = vld [vmem:[#allocation6 + $0x700] sm:$0xff]  ;;  %v6074_v9 = vld [vmem:[#allocation6 + $0x710] sm:$0xff]  ;;  %v6089_v0 = vld [vmem:[#allocation6 + $0x788] sm:$0xff] }
 0xa74   :  { %v6080_v61 = vld [vmem:[#allocation6 + $0x740] sm:$0xff]  ;;  %v6097_v54 = vld [vmem:[#allocation6 + $0x7c8] sm:$0xff] }
 0xa75   :  { %9165 = vmatpush1.bf16.msra.mxu0 %v9164_v11  ;;  %9229 = vmatpush1.bf16.msra.mxu1 %v9228_v10  ;;  %v6035_v11 = vld [vmem:[#allocation6 + $0x5d8] sm:$0xff]  ;;  %v6024_v10 = vld [vmem:[#allocation6 + $0x580] sm:$0xff]  ;;  %v9198_v6 = vpack.c.bf16 %v6097_v54, %v6089_v0 }
 0xa76   :  { %9167 = vmatprep.subr.bf16.mxu0 %v9166_v14  ;;  %9231 = vmatprep.subr.bf16.mxu1 %v9230_v26  ;;  %v6032_v14 = vld [vmem:[#allocation6 + $0x5c0] sm:$0xff]  ;;  %v9246_v16 = vpack.c.bf16 %v6035_v11, %v6027_v12  ;;  %v6026_v26 = vld [vmem:[#allocation6 + $0x590] sm:$0xff]  ;;  %v6099_v12 = vld [vmem:[#allocation6 + $0x7d8] sm:$0xff] }
 0xa77   :  { %v9184_v39 = vpack.c.bf16 %v6032_v14, %v6024_v10  ;;  %v9248_v30 = vpack.c.bf16 %v6034_v37, %v6026_v26  ;;  %v9262_v11 = vpack.c.bf16 %v6099_v12, %v6091_v7  ;;  %v6096_v10 = vld [vmem:[#allocation6 + $0x7c0] sm:$0xff]  ;;  %v6090_v14 = vld [vmem:[#allocation6 + $0x790] sm:$0xff]  ;;  %v5853_v37 = vld [vmem:[#allocation6 + $0x28] sm:$0xff] }
 0xa79   :  { %9169 = vmatpush1.bf16.msra.mxu0 %v9168_v17  ;;  %9233 = vmatpush1.bf16.msra.mxu1 %v9232_v45  ;;  %v6041_v17 = vld [vmem:[#allocation6 + $0x608] sm:$0xff] }
 0xa7a   :  { %9171 = vmatprep.subr.bf16.mxu0 %v9170_v41  ;;  %9235 = vmatprep.subr.bf16.mxu1 %v9234_v51  ;;  %v6049_v45 = vld [vmem:[#allocation6 + $0x648] sm:$0xff]  ;;  %v6040_v41 = vld [vmem:[#allocation6 + $0x600] sm:$0xff]  ;;  %v9250_v51 = vpack.c.bf16 %v6051_v13, %v6043_v31  ;;  %v5863_v31 = vld [vmem:[#allocation6 + $0x78] sm:$0xff] }
 0xa7b   :  { %v9186_v35 = vpack.c.bf16 %v6049_v45, %v6041_v17  ;;  %v9188_v22 = vpack.c.bf16 %v6048_v18, %v6040_v41  ;;  %v5855_v17 = vld [vmem:[#allocation6 + $0x38] sm:$0xff] }
 0xa7d   :  { %9173 = vmatpush1.bf16.msra.mxu0 %v9172_v32  ;;  %9237 = vmatpush1.bf16.msra.mxu1 %v9236_v34  ;;  %v9252_v32 = vpack.c.bf16 %v6050_v47, %v6042_v46  ;;  %v6065_v34 = vld [vmem:[#allocation6 + $0x6c8] sm:$0xff] }
 0xa7e   :  { %9175 = vmatprep.subr.bf16.mxu0 %v9174_v40  ;;  %9239 = vmatprep.subr.bf16.mxu1 %v9238_v49  ;;  %v9190_v38 = vpack.c.bf16 %v6065_v34, %v6057_v33  ;;  %v6056_v40 = vld [vmem:[#allocation6 + $0x680] sm:$0xff]  ;;  %v6058_v49 = vld [vmem:[#allocation6 + $0x690] sm:$0xff] }
 0xa7f   :  { %v9192_v4 = vpack.c.bf16 %v6064_v52, %v6056_v40 }
 0xa81   :  { %9177 = vmatpush1.bf16.msra.mxu0 %v9176_v29  ;;  %9241 = vmatpush1.bf16.msra.mxu1 %v9240_v50  ;;  %v6066_v29 = vld [vmem:[#allocation6 + $0x6d0] sm:$0xff]  ;;  %v6081_v50 = vld [vmem:[#allocation6 + $0x748] sm:$0xff] }
 0xa82   :  { %9179 = vmatprep.subr.bf16.mxu0 %v9178_v8  ;;  %9243 = vmatprep.subr.bf16.mxu1 %v9242_v62  ;;  %v9256_v48 = vpack.c.bf16 %v6066_v29, %v6058_v49  ;;  %v9194_v15 = vpack.c.bf16 %v6081_v50, %v6073_v60  ;;  %v9258_v8 = vpack.c.bf16 %v6083_v5, %v6075_v53 }
 0xa83   :  { %v9196_v62 = vpack.c.bf16 %v6080_v61, %v6072_v59 }
 0xa85   :  { %9181 = vmatpush1.bf16.msra.mxu0 %v9180_v3  ;;  %9245 = vmatpush1.bf16.msra.mxu1 %v9244_v19  ;;  %v6082_v3 = vld [vmem:[#allocation6 + $0x750] sm:$0xff] }
 0xa86   :  { %9183 = vmatprep.subr.bf16.mxu0 %v9182_v2  ;;  %9247 = vmatprep.subr.bf16.mxu1 %v9246_v16  ;;  %v9260_v19 = vpack.c.bf16 %v6082_v3, %v6074_v9  ;;  %v6088_v2 = vld [vmem:[#allocation6 + $0x780] sm:$0xff]  ;;  %v6098_v16 = vld [vmem:[#allocation6 + $0x7d0] sm:$0xff] }
 0xa87   :  { %v9264_v26 = vpack.c.bf16 %v6098_v16, %v6090_v14 }
 0xa89   :  { %9185 = vmatpush1.bf16.msra.mxu0 %v9184_v39  ;;  %9249 = vmatpush1.bf16.msra.mxu1 %v9248_v30  ;;  %v9200_v39 = vpack.c.bf16 %v6096_v10, %v6088_v2  ;;  %v5861_v30 = vld [vmem:[#allocation6 + $0x68] sm:$0xff] }
 0xa8a   :  { %9187 = vmatprep.subr.bf16.mxu0 %v9186_v35  ;;  %9251 = vmatprep.subr.bf16.mxu1 %v9250_v51  ;;  %v9266_v45 = vpack.c.bf16 %v5861_v30, %v5853_v37  ;;  %v9330_v35 = vpack.c.bf16 %v5863_v31, %v5855_v17 }
 0xa8d   :  { %9189 = vmatpush1.bf16.msra.mxu0 %v9188_v22  ;;  %9253 = vmatpush1.bf16.msra.mxu1 %v9252_v32  ;;  %v5197_v22 = vld [vmem:[%s10362_s5] sm:$0xff] }
 0xa8e   :  { %9191 = vmatprep.subr.bf16.mxu0 %v9190_v38  ;;  %9255 = vmatprep.subr.bf16.mxu1 %v9254_v42  ;;  %v10256_v46 = vrot.slane %v5197_v22, %v9874_v25  ;;  %v10259_v47 = vrot.slane %v5197_v22, %v9880_v27  ;;  %v10262_v32 = vrot.slane %v5197_v22, %v9883_v28 }
 0xa8f   :  { %v10265_v33 = vrot.slane %v5197_v22, %v9886_v1  ;;  %v10275_v50 = vrot.slane %v5197_v22, %v9927_v56  ;;  %v10278_v5 = vrot.slane %v5197_v22, %v9930_v57 }
 0xa91   :  { %9193 = vmatpush1.bf16.msra.mxu0 %v9192_v4  ;;  %9257 = vmatpush1.bf16.msra.mxu1 %v9256_v48  ;;  %v10272_v48 = vrot.slane %v5197_v22, %v9924_v55 }
 0xa92   :  { %9195 = vmatprep.subr.bf16.mxu0 %v9194_v15  ;;  %9259 = vmatprep.subr.bf16.mxu1 %v9258_v8  ;;  %v10281_v15 = vrot.slane %v5197_v22, %v9933_v58 }
 0xa95   :  { %9197 = vmatpush1.bf16.msra.mxu0 %v9196_v62  ;;  %9261 = vmatpush1.bf16.msra.mxu1 %v9260_v19 }
 0xa96   :  { %9199 = vmatprep.subr.bf16.mxu0 %v9198_v6  ;;  %9263 = vmatprep.subr.bf16.mxu1 %v9262_v11 }
 0xa99   :  { %9201 = vmatpush1.bf16.msra.mxu0 %v9200_v39  ;;  %9265 = vmatpush1.bf16.msra.mxu1 %v9264_v26 }
 0xa9a   :  { %9267 = vmatprep.subr.bf16.mxu0 %v9266_v45  ;;  %9331 = vmatprep.subr.bf16.mxu1 %v9330_v35  ;;  %v5860_v35 = vld [vmem:[#allocation6 + $0x60] sm:$0xff] }
 0xaef   :  { %v5520_v13 = vpop.f32.mrb[32].mxu0  ;;  %v5591_v41 = vpop.f32.mrb[32].mxu1 }
 0xaf0   :  { %v5522_v18 = vpop.f32.mrb[33].mxu0  ;;  %v5593_v51 = vpop.f32.mrb[33].mxu1  ;;  %v5779_v34 = vadd.f32 %v10256_v46, %v5520_v13  ;;  %v5781_v36 = vadd.f32 %v10259_v47, %v5591_v41  ;;  %v5854_v13 = vld [vmem:[#allocation6 + $0x30] sm:$0xff] }
 0xaf1   :  { %v5780_v38 = vadd.f32 %v10262_v32, %v5522_v18  ;;  %v5782_v44 = vadd.f32 %v10265_v33, %v5593_v51  ;;  %v5869_v51 = vld [vmem:[#allocation6 + $0xa8] sm:$0xff] }
 0xaf2   :  { %v6819_v40 = vmul.f32 -1.442695, %v5779_v34  ;;  %v6821_v25 = vmul.f32 -1.442695, %v5781_v36  ;;  %v5877_v34 = vld [vmem:[#allocation6 + $0xe8] sm:$0xff]  ;;  %v5871_v36 = vld [vmem:[#allocation6 + $0xb8] sm:$0xff] }
 0xaf3   :  { %v6820_v52 = vmul.f32 -1.442695, %v5780_v38  ;;  %v6822_v42 = vmul.f32 -1.442695, %v5782_v44  ;;  %v5879_v38 = vld [vmem:[#allocation6 + $0xf8] sm:$0xff] }
 0xaf4   :  { %9659 = vpow2.f32 %v6819_v40 }
 0xaf5   :  { %9661 = vpow2.f32 %v6821_v25 }
 0xaf6   :  { %9663 = vpow2.f32 %v6820_v52  ;;  %v5868_v52 = vld [vmem:[#allocation6 + $0xa0] sm:$0xff] }
 0xaf7   :  { %9665 = vpow2.f32 %v6822_v42  ;;  %v5876_v42 = vld [vmem:[#allocation6 + $0xe0] sm:$0xff] }
 0xafe   :  { %v9660_v27 = vpop.eup %9659 }
 0xaff   :  { %v9662_v28 = vpop.eup %9661  ;;  %v5793_v49 = vadd.f32 1.0, %v9660_v27  ;;  %v5870_v27 = vld [vmem:[#allocation6 + $0xb0] sm:$0xff] }
 0xb00   :  { %v9664_v1 = vpop.eup %9663  ;;  %v5805_v29 = vadd.f32 1.0, %v9662_v28  ;;  %v5878_v28 = vld [vmem:[#allocation6 + $0xf0] sm:$0xff] }
 0xb01   :  { %v9666_v4 = vpop.eup %9665  ;;  %v5794_v60 = vadd.f32 1.0, %v9664_v1  ;;  %9667 = vrcp.f32 %v5793_v49  ;;  %v5885_v1 = vld [vmem:[#allocation6 + $0x128] sm:$0xff]  ;;  %v9270_v49 = vpack.c.bf16 %v5877_v34, %v5869_v51  ;;  %v5918_v34 = vld [vmem:[#allocation6 + $0x230] sm:$0xff] }
 0xb02   :  { %v5806_v53 = vadd.f32 1.0, %v9666_v4  ;;  %9669 = vrcp.f32 %v5805_v29  ;;  %v9334_v29 = vpack.c.bf16 %v5879_v38, %v5871_v36  ;;  %v5926_v36 = vld [vmem:[#allocation6 + $0x270] sm:$0xff] }
 0xb03   :  { %9671 = vrcp.f32 %v5794_v60  ;;  %v5893_v60 = vld [vmem:[#allocation6 + $0x168] sm:$0xff] }
 0xb04   :  { %9673 = vrcp.f32 %v5806_v53  ;;  %v5887_v53 = vld [vmem:[#allocation6 + $0x138] sm:$0xff] }
 0xb0b   :  { %v9668_v0 = vpop.eup %9667 }
 0xb0c   :  { %v9670_v54 = vpop.eup %9669 }
 0xb0d   :  { %v9672_v19 = vpop.eup %9671  ;;  %v5825_v2 = vmul.f32 %v9670_v54, %v10235_v21  ;;  %v5852_v21 = vld [vmem:[#allocation6 + $0x20] sm:$0xff]  ;;  %v5903_v54 = vld [vmem:[#allocation6 + $0x1b8] sm:$0xff] }
 0xb0e   :  { %v9674_v6 = vpop.eup %9673  ;;  %v9268_v40 = vpack.c.bf16 %v5860_v35, %v5852_v21 }
 0xb0f   :  { %v5826_v14 = vmul.f32 %v9674_v6, %v10237_v43  ;;  %v5862_v43 = vld [vmem:[#allocation6 + $0x70] sm:$0xff] }
 0xb10   :  { %v9332_v25 = vpack.c.bf16 %v5862_v43, %v5854_v13  ;;  %v5916_v13 = vld [vmem:[#allocation6 + $0x220] sm:$0xff] }
 0xb2f   :  { %v5662_v8 = vpop.f32.mrb[34].mxu0  ;;  %v5733_v59 = vpop.f32.mrb[34].mxu1 }
 0xb30   :  { %v5783_v61 = vadd.f32 %v10272_v48, %v5662_v8  ;;  %v5785_v55 = vadd.f32 %v10275_v50, %v5733_v59  ;;  %v5664_v9 = vpop.f32.mrb[35].mxu0  ;;  %v5735_v62 = vpop.f32.mrb[35].mxu1  ;;  %v5895_v8 = vld [vmem:[#allocation6 + $0x178] sm:$0xff]  ;;  %v9272_v59 = vpack.c.bf16 %v5876_v42, %v5868_v52 }
 0xb31   :  { %v5784_v56 = vadd.f32 %v10278_v5, %v5664_v9  ;;  %v5786_v57 = vadd.f32 %v10281_v15, %v5735_v62  ;;  %v5892_v9 = vld [vmem:[#allocation6 + $0x160] sm:$0xff]  ;;  %v9274_v62 = vpack.c.bf16 %v5893_v60, %v5885_v1  ;;  %v5943_v52 = vld [vmem:[#allocation6 + $0x2f8] sm:$0xff]  ;;  %v5942_v60 = vld [vmem:[#allocation6 + $0x2f0] sm:$0xff] }
 0xb32   :  { %9675 = vtanh.f32 %v5783_v61  ;;  %v6823_v3 = vmul.f32 -1.442695, %v5785_v55  ;;  %v9336_v61 = vpack.c.bf16 %v5878_v28, %v5870_v27  ;;  %v5884_v55 = vld [vmem:[#allocation6 + $0x120] sm:$0xff]  ;;  %v9348_v27 = vpack.c.bf16 %v5926_v36, %v5918_v34 }
 0xb33   :  { %9677 = vtanh.f32 %v5784_v56  ;;  %v6824_v58 = vmul.f32 -1.442695, %v5786_v57  ;;  %v9338_v56 = vpack.c.bf16 %v5895_v8, %v5887_v53  ;;  %v5886_v57 = vld [vmem:[#allocation6 + $0x130] sm:$0xff]  ;;  %v9276_v6 = vpack.c.bf16 %v5892_v9, %v5884_v55  ;;  %v5932_v1 = vld [vmem:[#allocation6 + $0x2a0] sm:$0xff]  ;;  %v5949_v53 = vld [vmem:[#allocation6 + $0x328] sm:$0xff] }
 0xb34   :  { %9679 = vpow2.f32 %v6823_v3  ;;  %v5894_v3 = vld [vmem:[#allocation6 + $0x170] sm:$0xff]  ;;  %v5957_v55 = vld [vmem:[#allocation6 + $0x368] sm:$0xff]  ;;  %v5951_v9 = vld [vmem:[#allocation6 + $0x338] sm:$0xff] }
 0xb35   :  { %9681 = vpow2.f32 %v6824_v58  ;;  %v5901_v58 = vld [vmem:[#allocation6 + $0x1a8] sm:$0xff]  ;;  %v5980_v34 = vld [vmem:[#allocation6 + $0x420] sm:$0xff] }
 0xb36   :  { %v5988_v36 = vld [vmem:[#allocation6 + $0x460] sm:$0xff] }
 0xb3c   :  { %v9676_v7 = vpop.eup %9675 }
 0xb3d   :  { %v9678_v12 = vpop.eup %9677  ;;  %v5827_v11 = vmul.f32 %v9676_v7, %v9668_v0  ;;  %v5909_v0 = vld [vmem:[#allocation6 + $0x1e8] sm:$0xff]  ;;  %v9340_v7 = vpack.c.bf16 %v5894_v3, %v5886_v57 }
 0xb3e   :  { %v9680_v10 = vpop.eup %9679  ;;  %v5828_v16 = vmul.f32 %v9678_v12, %v9672_v19  ;;  %v5911_v19 = vld [vmem:[#allocation6 + $0x1f8] sm:$0xff]  ;;  %v5900_v12 = vld [vmem:[#allocation6 + $0x1a0] sm:$0xff] }
 0xb3f   :  { %v9682_v39 = vpop.eup %9681  ;;  %v10289_v26 = vadd.f32 %v5827_v11, %v5825_v2  ;;  %v5819_v37 = vadd.f32 1.0, %v9680_v10  ;;  %v5908_v2 = vld [vmem:[#allocation6 + $0x1e0] sm:$0xff]  ;;  %v9278_v11 = vpack.c.bf16 %v5909_v0, %v5901_v58  ;;  %v9342_v10 = vpack.c.bf16 %v5911_v19, %v5903_v54 }
 0xb40   :  { %v10291_v30 = vadd.f32 %v5828_v16, %v5826_v14  ;;  %v5820_v17 = vadd.f32 1.0, %v9682_v39  ;;  %v5902_v14 = vld [vmem:[#allocation6 + $0x1b0] sm:$0xff]  ;;  %v5917_v39 = vld [vmem:[#allocation6 + $0x228] sm:$0xff]  ;;  %v5948_v58 = vld [vmem:[#allocation6 + $0x320] sm:$0xff]  ;;  %v9290_v54 = vpack.c.bf16 %v5957_v55, %v5949_v53 }
 0xb41   :  { %9683 = vtanh.f32 %v10289_v26  ;;  %v5910_v16 = vld [vmem:[#allocation6 + $0x1f0] sm:$0xff]  ;;  %v5956_v0 = vld [vmem:[#allocation6 + $0x360] sm:$0xff]  ;;  %v6021_v55 = vld [vmem:[#allocation6 + $0x568] sm:$0xff] }
 0xb42   :  { %9685 = vrcp.f32 %v5819_v37  ;;  %v5925_v37 = vld [vmem:[#allocation6 + $0x268] sm:$0xff]  ;;  %v9344_v35 = vpack.c.bf16 %v5910_v16, %v5902_v14  ;;  %v9292_v14 = vpack.c.bf16 %v5956_v0, %v5948_v58  ;;  %v6012_v58 = vld [vmem:[#allocation6 + $0x520] sm:$0xff] }
 0xb43   :  { %9687 = vtanh.f32 %v10291_v30  ;;  %v6020_v0 = vld [vmem:[#allocation6 + $0x560] sm:$0xff] }
 0xb44   :  { %9689 = vrcp.f32 %v5820_v17  ;;  %v5919_v17 = vld [vmem:[#allocation6 + $0x238] sm:$0xff] }
 0xb4b   :  { %v9684_v45 = vpop.eup %9683 }
 0xb4c   :  { %v9686_v31 = vpop.eup %9685 }
 0xb4d   :  { %v9688_v41 = vpop.eup %9687  ;;  %v10295_v18 = vmul.f32 %v9686_v31, %v9684_v45  ;;  %v5927_v45 = vld [vmem:[#allocation6 + $0x278] sm:$0xff]  ;;  %v9280_v31 = vpack.c.bf16 %v5908_v2, %v5900_v12  ;;  %v5965_v12 = vld [vmem:[#allocation6 + $0x3a8] sm:$0xff] }
 0xb4e   :  { %v9690_v22 = vpop.eup %9689  ;;  %v9346_v51 = vpack.c.bf16 %v5927_v45, %v5919_v17  ;;  %v5973_v2 = vld [vmem:[#allocation6 + $0x3e8] sm:$0xff] }
 0xb4f   :  { %v5834_v44 = vmul.f32 %v9690_v22, %v9688_v41  ;;  %v9282_v41 = vpack.c.bf16 %v5925_v37, %v5917_v39  ;;  %v5924_v22 = vld [vmem:[#allocation6 + $0x260] sm:$0xff]  ;;  %v9294_v17 = vpack.c.bf16 %v5973_v2, %v5965_v12  ;;  %v6029_v12 = vld [vmem:[#allocation6 + $0x5a8] sm:$0xff] }
 0xb50   :  { %v9284_v42 = vpack.c.bf16 %v5924_v22, %v5916_v13  ;;  %v5964_v39 = vld [vmem:[#allocation6 + $0x3a0] sm:$0xff]  ;;  %v5989_v13 = vld [vmem:[#allocation6 + $0x468] sm:$0xff] }
 0xb51   :  { %6168 = vmatprep.mubr.f32.mxu0 %v5834_v44  ;;  %6239 = vmatprep.mubr.f32.mxu1 %v5834_v44  ;;  %v5837_v4 = vcombine.low %v10295_v18, %v5834_v44  ;;  %v5972_v37 = vld [vmem:[#allocation6 + $0x3e0] sm:$0xff]  ;;  %v6037_v2 = vld [vmem:[#allocation6 + $0x5e8] sm:$0xff] }
 0xb52   :  { %6169 = vmatmul.mubr.f32.vlgmr.msra.gmra.mrb[36].mxu0 %v10295_v18  ;;  %6240 = vmatmul.mubr.f32.vlgmr.msra.gmra.mrb[36].mxu1 %v10295_v18 }
 0xb53   :  { %6825 = vst.sshfl [vmem:[#allocation2 + $0x20] sm:$0x33 pattern:$0x76325410] %v5837_v4  ;;  %9269 = vmatpush1.bf16.msra.mxu0 %v9268_v40  ;;  %9333 = vmatpush1.bf16.msra.mxu1 %v9332_v25  ;;  %v5941_v40 = vld [vmem:[#allocation6 + $0x2e8] sm:$0xff]  ;;  %v5935_v25 = vld [vmem:[#allocation6 + $0x2b8] sm:$0xff] }
 0xb54   :  { %6310 = vmatprep.mubr.f32.mxu0 %v5834_v44  ;;  %6381 = vmatprep.mubr.f32.mxu1 %v5834_v44  ;;  %v5933_v44 = vld [vmem:[#allocation6 + $0x2a8] sm:$0xff]  ;;  %v5940_v4 = vld [vmem:[#allocation6 + $0x2e0] sm:$0xff] }
 0xb55   :  { %9271 = vmatprep.subr.bf16.mxu0 %v9270_v49  ;;  %9335 = vmatprep.subr.bf16.mxu1 %v9334_v29  ;;  %v9286_v49 = vpack.c.bf16 %v5941_v40, %v5933_v44  ;;  %v5934_v29 = vld [vmem:[#allocation6 + $0x2b0] sm:$0xff]  ;;  %v9288_v57 = vpack.c.bf16 %v5940_v4, %v5932_v1  ;;  %v9300_v1 = vpack.c.bf16 %v5988_v36, %v5980_v34  ;;  %v6044_v34 = vld [vmem:[#allocation6 + $0x620] sm:$0xff] }
 0xb56   :  { %v9352_v3 = vpack.c.bf16 %v5942_v60, %v5934_v29  ;;  %v5982_v40 = vld [vmem:[#allocation6 + $0x430] sm:$0xff]  ;;  %v6004_v29 = vld [vmem:[#allocation6 + $0x4e0] sm:$0xff] }
 0xb57   :  { %9273 = vmatpush1.bf16.msra.mxu0 %v9272_v59  ;;  %9337 = vmatpush1.bf16.msra.mxu1 %v9336_v61  ;;  %v9350_v61 = vpack.c.bf16 %v5943_v52, %v5935_v25  ;;  %v5990_v25 = vld [vmem:[#allocation6 + $0x470] sm:$0xff]  ;;  %v5997_v52 = vld [vmem:[#allocation6 + $0x4a8] sm:$0xff]  ;;  %v6052_v36 = vld [vmem:[#allocation6 + $0x660] sm:$0xff] }
 0xb58   :  { %9275 = vmatprep.subr.bf16.mxu0 %v9274_v62  ;;  %9339 = vmatprep.subr.bf16.mxu1 %v9338_v56  ;;  %v5959_v62 = vld [vmem:[#allocation6 + $0x378] sm:$0xff]  ;;  %v9364_v4 = vpack.c.bf16 %v5990_v25, %v5982_v40  ;;  %v6046_v40 = vld [vmem:[#allocation6 + $0x630] sm:$0xff] }
 0xb59   :  { %v9354_v19 = vpack.c.bf16 %v5959_v62, %v5951_v9  ;;  %v6015_v9 = vld [vmem:[#allocation6 + $0x538] sm:$0xff]  ;;  %v6054_v25 = vld [vmem:[#allocation6 + $0x670] sm:$0xff] }
 0xb5a   :  { %v6465_v21 = vld [vmem:[#allocation2 + $0x20] sm:$0xf] }
 0xb5b   :  { %9277 = vmatpush1.bf16.msra.mxu0 %v9276_v6  ;;  %9341 = vmatpush1.bf16.msra.mxu1 %v9340_v7  ;;  %v6494_v43 = vmul.f32 %v9987_v20, %v6465_v21  ;;  %v5950_v6 = vld [vmem:[#allocation6 + $0x330] sm:$0xff]  ;;  %v6023_v62 = vld [vmem:[#allocation6 + $0x578] sm:$0xff] }
 0xb5c   :  { %9279 = vmatprep.subr.bf16.mxu0 %v9278_v11  ;;  %9343 = vmatprep.subr.bf16.mxu1 %v9342_v10  ;;  %v5958_v7 = vld [vmem:[#allocation6 + $0x370] sm:$0xff]  ;;  %v5967_v11 = vld [vmem:[#allocation6 + $0x3b8] sm:$0xff] }
 0xb5d   :  { %v6576_v38 = vrot.slane %v6494_v43, %v9984_v63  ;;  %v5975_v10 = vld [vmem:[#allocation6 + $0x3f8] sm:$0xff]  ;;  %v9356_v16 = vpack.c.bf16 %v5958_v7, %v5950_v6  ;;  %v5966_v21 = vld [vmem:[#allocation6 + $0x3b0] sm:$0xff] }
 0xb5e   :  { %v9358_v45 = vpack.c.bf16 %v5975_v10, %v5967_v11  ;;  %v5983_v43 = vld [vmem:[#allocation6 + $0x438] sm:$0xff]  ;;  %v6014_v6 = vld [vmem:[#allocation6 + $0x530] sm:$0xff] }
 0xb5f   :  { %9281 = vmatpush1.bf16.msra.mxu0 %v9280_v31  ;;  %9345 = vmatpush1.bf16.msra.mxu1 %v9344_v35  ;;  %v6577_v28 = vcombine.high %v6576_v38, %v6576_v38  ;;  %v6647_v8 = vsel %vm6606_vm0, %v6576_v38, 0.0  ;;  %v5974_v31 = vld [vmem:[#allocation6 + $0x3f0] sm:$0xff]  ;;  %v5981_v35 = vld [vmem:[#allocation6 + $0x428] sm:$0xff]  ;;  %v6031_v11 = vld [vmem:[#allocation6 + $0x5b8] sm:$0xff] }
 0xb60   :  { %9283 = vmatprep.subr.bf16.mxu0 %v9282_v41  ;;  %9347 = vmatprep.subr.bf16.mxu1 %v9346_v51  ;;  %v5991_v41 = vld [vmem:[#allocation6 + $0x478] sm:$0xff]  ;;  %v9296_v51 = vpack.c.bf16 %v5972_v37, %v5964_v39  ;;  %v9360_v22 = vpack.c.bf16 %v5974_v31, %v5966_v21  ;;  %v9298_v38 = vpack.c.bf16 %v5989_v13, %v5981_v35  ;;  %v6022_v7 = vld [vmem:[#allocation6 + $0x570] sm:$0xff]  ;;  %v6028_v39 = vld [vmem:[#allocation6 + $0x5a0] sm:$0xff] }
 0xb61   :  { %v6648_v59 = vsel %vm6606_vm0, %v6577_v28, 0.0  ;;  %v9362_v44 = vpack.c.bf16 %v5991_v41, %v5983_v43  ;;  %v6007_v28 = vld [vmem:[#allocation6 + $0x4f8] sm:$0xff]  ;;  %v6036_v37 = vld [vmem:[#allocation6 + $0x5e0] sm:$0xff]  ;;  %v6030_v21 = vld [vmem:[#allocation6 + $0x5b0] sm:$0xff] }
 0xb62   :  { %v6649_v56 = vadd.f32 %v6648_v59, %v6647_v8  ;;  %v5998_v8 = vld [vmem:[#allocation6 + $0x4b0] sm:$0xff]  ;;  %v6039_v10 = vld [vmem:[#allocation6 + $0x5f8] sm:$0xff]  ;;  %v6045_v35 = vld [vmem:[#allocation6 + $0x628] sm:$0xff] }
 0xb63   :  { %9285 = vmatpush1.bf16.msra.mxu0 %v9284_v42  ;;  %9349 = vmatpush1.bf16.msra.mxu1 %v9348_v27  ;;  %v6005_v42 = vld [vmem:[#allocation6 + $0x4e8] sm:$0xff]  ;;  %v5999_v27 = vld [vmem:[#allocation6 + $0x4b8] sm:$0xff]  ;;  %v6006_v59 = vld [vmem:[#allocation6 + $0x4f0] sm:$0xff] }
 0xb64   :  { %6650 = vadd.xlane.f32.xlu1 %v6649_v56  ;;  %9287 = vmatprep.subr.bf16.mxu0 %v9286_v49  ;;  %v5996_v49 = vld [vmem:[#allocation6 + $0x4a0] sm:$0xff]  ;;  %v9302_v60 = vpack.c.bf16 %v6005_v42, %v5997_v52  ;;  %v9366_v53 = vpack.c.bf16 %v6007_v28, %v5999_v27  ;;  %v6833_v56 = vld [vmem:[#allocation3] ss:$0 sm:$0xff]  ;;  %v6038_v31 = vld [vmem:[#allocation6 + $0x5f0] sm:$0xff] }
 0xb65   :  { %9351 = vmatprep.subr.bf16.mxu1 %v9350_v61  ;;  %v6013_v61 = vld [vmem:[#allocation6 + $0x528] sm:$0xff]  ;;  %v6047_v43 = vld [vmem:[#allocation6 + $0x638] sm:$0xff] }
 0xb66   :  { %v6053_v13 = vld [vmem:[#allocation6 + $0x668] sm:$0xff]  ;;  %v6055_v41 = vld [vmem:[#allocation6 + $0x678] sm:$0xff] }
 0xb67   :  { %9289 = vmatpush1.bf16.msra.mxu0 %v9288_v57  ;;  %9353 = vmatpush1.bf16.msra.mxu1 %v9352_v3  ;;  %v9304_v57 = vpack.c.bf16 %v6004_v29, %v5996_v49  ;;  %v9368_v3 = vpack.c.bf16 %v6006_v59, %v5998_v8  ;;  %v6061_v52 = vld [vmem:[#allocation6 + $0x6a8] sm:$0xff]  ;;  %v6063_v27 = vld [vmem:[#allocation6 + $0x6b8] sm:$0xff]  ;;  %v6060_v49 = vld [vmem:[#allocation6 + $0x6a0] sm:$0xff] }
 0xb68   :  { %9291 = vmatprep.subr.bf16.mxu0 %v9290_v54  ;;  %9355 = vmatprep.subr.bf16.mxu1 %v9354_v19  ;;  %v9306_v54 = vpack.c.bf16 %v6021_v55, %v6013_v61  ;;  %v9370_v19 = vpack.c.bf16 %v6023_v62, %v6015_v9  ;;  %v6069_v42 = vld [vmem:[#allocation6 + $0x6e8] sm:$0xff]  ;;  %v6071_v28 = vld [vmem:[#allocation6 + $0x6f8] sm:$0xff]  ;;  %v6068_v29 = vld [vmem:[#allocation6 + $0x6e0] sm:$0xff] }
 0xb69   :  { %v6062_v8 = vld [vmem:[#allocation6 + $0x6b0] sm:$0xff]  ;;  %v6077_v61 = vld [vmem:[#allocation6 + $0x728] sm:$0xff]  ;;  %v6079_v9 = vld [vmem:[#allocation6 + $0x738] sm:$0xff] }
 0xb6a   :  { %v6070_v59 = vld [vmem:[#allocation6 + $0x6f0] sm:$0xff]  ;;  %v6085_v55 = vld [vmem:[#allocation6 + $0x768] sm:$0xff]  ;;  %v6087_v62 = vld [vmem:[#allocation6 + $0x778] sm:$0xff] }
 0xb6b   :  { %9293 = vmatpush1.bf16.msra.mxu0 %v9292_v14  ;;  %9357 = vmatpush1.bf16.msra.mxu1 %v9356_v16  ;;  %v9308_v14 = vpack.c.bf16 %v6020_v0, %v6012_v58  ;;  %v9372_v16 = vpack.c.bf16 %v6022_v7, %v6014_v6  ;;  %v6084_v58 = vld [vmem:[#allocation6 + $0x760] sm:$0xff]  ;;  %v9322_v0 = vpack.c.bf16 %v6085_v55, %v6077_v61  ;;  %v6086_v6 = vld [vmem:[#allocation6 + $0x770] sm:$0xff]  ;;  %v6093_v7 = vld [vmem:[#allocation6 + $0x7a8] sm:$0xff] }
 0xb6c   :  { %9295 = vmatprep.subr.bf16.mxu0 %v9294_v17  ;;  %9359 = vmatprep.subr.bf16.mxu1 %v9358_v45  ;;  %v9310_v17 = vpack.c.bf16 %v6037_v2, %v6029_v12  ;;  %v9374_v45 = vpack.c.bf16 %v6039_v10, %v6031_v11  ;;  %v6101_v12 = vld [vmem:[#allocation6 + $0x7e8] sm:$0xff]  ;;  %v6095_v2 = vld [vmem:[#allocation6 + $0x7b8] sm:$0xff] }
 0xb6d   :  { %v6103_v11 = vld [vmem:[#allocation6 + $0x7f8] sm:$0xff] }
 0xb6f   :  { %9297 = vmatpush1.bf16.msra.mxu0 %v9296_v51  ;;  %9361 = vmatpush1.bf16.msra.mxu1 %v9360_v22  ;;  %v9312_v51 = vpack.c.bf16 %v6036_v37, %v6028_v39  ;;  %v9376_v22 = vpack.c.bf16 %v6038_v31, %v6030_v21  ;;  %v9326_v39 = vpack.c.bf16 %v6101_v12, %v6093_v7  ;;  %v6102_v21 = vld [vmem:[#allocation6 + $0x7f0] sm:$0xff] }
 0xb70   :  { %9299 = vmatprep.subr.bf16.mxu0 %v9298_v38  ;;  %9363 = vmatprep.subr.bf16.mxu1 %v9362_v44  ;;  %v9314_v38 = vpack.c.bf16 %v6053_v13, %v6045_v35  ;;  %v9378_v44 = vpack.c.bf16 %v6055_v41, %v6047_v43  ;;  %v9390_v37 = vpack.c.bf16 %v6103_v11, %v6095_v2  ;;  %v6616_v13 = vpop.xlane.xlu1 %6615  ;;  %v6611_v41 = vpop.xlane.xlu0 %6610 }
 0xb73   :  { %9301 = vmatpush1.bf16.msra.mxu0 %v9300_v1  ;;  %9365 = vmatpush1.bf16.msra.mxu1 %v9364_v4  ;;  %v9316_v1 = vpack.c.bf16 %v6052_v36, %v6044_v34  ;;  %v9380_v4 = vpack.c.bf16 %v6054_v25, %v6046_v40  ;;  %v6688_v36 = vand.u32 127, %v68_v23 }
 0xb74   :  { %9303 = vmatprep.subr.bf16.mxu0 %v9302_v60  ;;  %9367 = vmatprep.subr.bf16.mxu1 %v9366_v53  ;;  %v9318_v60 = vpack.c.bf16 %v6069_v42, %v6061_v52  ;;  %v9382_v53 = vpack.c.bf16 %v6071_v28, %v6063_v27  ;;  %v6631_v43 = vpop.xlane.xlu1 %6630 }
 0xb75   :  { %6664 = vperm.xlu1 %9402, %v6833_v56   ;;  %v9320_v56 = vpack.c.bf16 %v6068_v29, %v6060_v49 }
 0xb77   :  { %9305 = vmatpush1.bf16.msra.mxu0 %v9304_v57  ;;  %9369 = vmatpush1.bf16.msra.mxu1 %v9368_v3  ;;  %v9384_v57 = vpack.c.bf16 %v6070_v59, %v6062_v8  ;;  %v6076_v3 = vld [vmem:[#allocation6 + $0x720] sm:$0xff] }
 0xb78   :  { %9307 = vmatprep.subr.bf16.mxu0 %v9306_v54  ;;  %9371 = vmatprep.subr.bf16.mxu1 %v9370_v19  ;;  %v9386_v54 = vpack.c.bf16 %v6087_v62, %v6079_v9  ;;  %v6078_v19 = vld [vmem:[#allocation6 + $0x730] sm:$0xff]  ;;  %v9324_v10 = vpack.c.bf16 %v6084_v58, %v6076_v3 }
 0xb7b   :  { %9309 = vmatpush1.bf16.msra.mxu0 %v9308_v14  ;;  %9373 = vmatpush1.bf16.msra.mxu1 %v9372_v16  ;;  %v9388_v14 = vpack.c.bf16 %v6086_v6, %v6078_v19  ;;  %v6092_v16 = vld [vmem:[#allocation6 + $0x7a0] sm:$0xff] }
 0xb7c   :  { %9311 = vmatprep.subr.bf16.mxu0 %v9310_v17  ;;  %9375 = vmatprep.subr.bf16.mxu1 %v9374_v45  ;;  %v6100_v17 = vld [vmem:[#allocation6 + $0x7e0] sm:$0xff]  ;;  %v6094_v45 = vld [vmem:[#allocation6 + $0x7b0] sm:$0xff] }
 0xb7d   :  { %v9328_v31 = vpack.c.bf16 %v6100_v17, %v6092_v16  ;;  %v9392_v35 = vpack.c.bf16 %v6102_v21, %v6094_v45 }
 0xb7f   :  { %9313 = vmatpush1.bf16.msra.mxu0 %v9312_v51  ;;  %9377 = vmatpush1.bf16.msra.mxu1 %v9376_v22  ;;  %v6641_v51 = vpop.xlane.xlu1 %6640  ;;  %v6621_v22 = vpop.xlane.xlu0 %6620 }
 0xb80   :  { %9315 = vmatprep.subr.bf16.mxu0 %v9314_v38  ;;  %9379 = vmatprep.subr.bf16.mxu1 %v9378_v44  ;;  %v10310_v44 = vsub.s32 %v6688_v36, %v9871_v24 }
 0xb83   :  { %9317 = vmatpush1.bf16.msra.mxu0 %v9316_v1  ;;  %9381 = vmatpush1.bf16.msra.mxu1 %v9380_v4  ;;  %v6626_v38 = vpop.xlane.xlu0 %6625 }
 0xb84   :  { %9319 = vmatprep.subr.bf16.mxu0 %v9318_v60  ;;  %9383 = vmatprep.subr.bf16.mxu1 %v9382_v53 }
 0xb87   :  { %9321 = vmatpush1.bf16.msra.mxu0 %v9320_v56  ;;  %9385 = vmatpush1.bf16.msra.mxu1 %v9384_v57  ;;  %v6636_v25 = vpop.xlane.xlu0 %6635 }
 0xb88   :  { %9323 = vmatprep.subr.bf16.mxu0 %v9322_v0  ;;  %9387 = vmatprep.subr.bf16.mxu1 %v9386_v54 }
 0xb8b   :  { %9325 = vmatpush1.bf16.msra.mxu0 %v9324_v10  ;;  %9389 = vmatpush1.bf16.msra.mxu1 %v9388_v14  ;;  %v6646_v49 = vpop.xlane.xlu0 %6645 }
 0xb8c   :  { %9327 = vmatprep.subr.bf16.mxu0 %v9326_v39  ;;  %9391 = vmatprep.subr.bf16.mxu1 %v9390_v37 }
 0xb8f   :  { %9329 = vmatpush1.bf16.msra.mxu0 %v9328_v31  ;;  %9393 = vmatpush1.bf16.msra.mxu1 %v9392_v35 }
 0xb92   :  { %6311 = vmatmul.mubr.f32.vlgmr.msra.gmra.mrb[38].mxu0 %v10295_v18  ;;  %6382 = vmatmul.mubr.f32.vlgmr.msra.gmra.mrb[38].mxu1 %v10295_v18 }
 0xbf1   :  { %v10306_v34 = vpop.xlane.xlu1 %6650 }
 0xbf5   :  { %v10312_v40 = vpop.permute.xlu1 %6664 }
 0xbf6   :  { %v6667_v52 = vadd.f32 %v10312_v40, %v6611_v41  ;;  %v6668_v18 = vadd.f32 %v10312_v40, %v6616_v13  ;;  %v6669_v42 = vadd.f32 %v10312_v40, %v6621_v22  ;;  %v6670_v27 = vadd.f32 %v10312_v40, %v6626_v38 }
 0xbf7   :  { %v6671_v28 = vadd.f32 %v10312_v40, %v6631_v43  ;;  %v6672_v23 = vadd.f32 %v10312_v40, %v6636_v25  ;;  %v6673_v29 = vadd.f32 %v10312_v40, %v6641_v51  ;;  %v6674_v60 = vadd.f32 %v10312_v40, %v6646_v49 }
 0xbf8   :  { %v6692_v24 = vrot.slane %v6667_v52, %v10310_v44  ;;  %v6696_v1 = vrot.slane %v6668_v18, %v10310_v44  ;;  %v6700_v4 = vrot.slane %v6669_v42, %v10310_v44  ;;  %v6704_v53 = vrot.slane %v6670_v27, %v10310_v44 }
 0xbf9   :  { %v6708_v59 = vrot.slane %v6671_v28, %v10310_v44  ;;  %v6712_v55 = vrot.slane %v6672_v23, %v10310_v44  ;;  %v6716_v62 = vrot.slane %v6673_v29, %v10310_v44  ;;  %v6720_v57 = vrot.slane %v6674_v60, %v10310_v44 }
 0xbfa   :  { %v6730_v8 = vsel %vm6729_vm1, %v6696_v1, %v6692_v24 }
 0xbfb   :  { %v6732_v61 = vsel %vm6731_vm2, %v6700_v4, %v6730_v8 }
 0xbfc   :  { %v6734_v9 = vsel %vm6733_vm3, %v6704_v53, %v6732_v61 }
 0xbfd   :  { %v6736_v56 = vsel %vm6735_vm4, %v6708_v59, %v6734_v9 }
 0xbfe   :  { %v6738_v3 = vsel %vm6737_vm5, %v6712_v55, %v6736_v56 }
 0xbff   :  { %v6740_v58 = vsel %vm6739_vm6, %v6716_v62, %v6738_v3 }
 0xc00   :  { %v6742_v0 = vsel %vm6741_vm7, %v6720_v57, %v6740_v58 }
 0xc01   :  { %6747 = vst.msk [vmem:[%s10365_s8] sm:$0xff] %vm6746_vm8, %v6742_v0 }
 0xc25   :  { %v6170_v54 = vpop.f32.mrb[36].mxu0  ;;  %v6241_v19 = vpop.f32.mrb[36].mxu1 }
 0xc26   :  { %v6172_v6 = vpop.f32.mrb[37].mxu0  ;;  %v6243_v7 = vpop.f32.mrb[37].mxu1  ;;  %v6388_v12 = vadd.f32 %v6170_v54, %v10256_v46  ;;  %v6390_v2 = vadd.f32 %v6241_v19, %v10259_v47  ;;  %v6675_v19 = vadd.f32 %v10312_v40, %v10306_v34 }
 0xc27   :  { %v6389_v11 = vadd.f32 %v6172_v6, %v10262_v32  ;;  %v6391_v10 = vadd.f32 %v6243_v7, %v10265_v33 }
 0xc28   :  { %v6826_v14 = vmul.f32 -1.442695, %v6388_v12  ;;  %v6828_v16 = vmul.f32 -1.442695, %v6390_v2  ;;  %v6724_v12 = vrot.slane %v6675_v19, %v10310_v44 }
 0xc29   :  { %v6827_v39 = vmul.f32 -1.442695, %v6389_v11  ;;  %v6829_v37 = vmul.f32 -1.442695, %v6391_v10 }
 0xc2a   :  { %9691 = vpow2.f32 %v6826_v14 }
 0xc2b   :  { %9693 = vpow2.f32 %v6828_v16 }
 0xc2c   :  { %9695 = vpow2.f32 %v6827_v39 }
 0xc2d   :  { %9697 = vpow2.f32 %v6829_v37 }
 0xc34   :  { %v9692_v17 = vpop.eup %9691 }
 0xc35   :  { %v9694_v45 = vpop.eup %9693  ;;  %v6402_v35 = vadd.f32 1.0, %v9692_v17 }
 0xc36   :  { %v9696_v21 = vpop.eup %9695  ;;  %v6414_v46 = vadd.f32 1.0, %v9694_v45 }
 0xc37   :  { %v9698_v31 = vpop.eup %9697  ;;  %v6403_v13 = vadd.f32 1.0, %v9696_v21  ;;  %9699 = vrcp.f32 %v6402_v35 }
 0xc38   :  { %v6415_v47 = vadd.f32 1.0, %v9698_v31  ;;  %9701 = vrcp.f32 %v6414_v46 }
 0xc39   :  { %9703 = vrcp.f32 %v6403_v13 }
 0xc3a   :  { %9705 = vrcp.f32 %v6415_v47 }
 0xc41   :  { %v9700_v18 = vpop.eup %9699 }
 0xc42   :  { %v9702_v42 = vpop.eup %9701 }
 0xc43   :  { %v9704_v27 = vpop.eup %9703 }
 0xc44   :  { %v9706_v28 = vpop.eup %9705 }
 0xc65   :  { %v6312_v32 = vpop.f32.mrb[38].mxu0  ;;  %v6383_v33 = vpop.f32.mrb[38].mxu1 }
 0xc66   :  { %v6392_v43 = vadd.f32 %v6312_v32, %v10272_v48  ;;  %v6394_v41 = vadd.f32 %v6383_v33, %v10275_v50  ;;  %v6314_v51 = vpop.f32.mrb[39].mxu0  ;;  %v6385_v22 = vpop.f32.mrb[39].mxu1  ;;  %v6434_v50 = vmul.f32 %v9702_v42, %v10289_v26 }
 0xc67   :  { %v6393_v36 = vadd.f32 %v6314_v51, %v10278_v5  ;;  %v6395_v38 = vadd.f32 %v6385_v22, %v10281_v15  ;;  %v6435_v5 = vmul.f32 %v9706_v28, %v10291_v30 }
 0xc68   :  { %9707 = vtanh.f32 %v6392_v43  ;;  %v6830_v25 = vmul.f32 -1.442695, %v6394_v41 }
 0xc69   :  { %9709 = vtanh.f32 %v6393_v36  ;;  %v6831_v52 = vmul.f32 -1.442695, %v6395_v38 }
 0xc6a   :  { %9711 = vpow2.f32 %v6830_v25 }
 0xc6b   :  { %9713 = vpow2.f32 %v6831_v52 }
 0xc72   :  { %v9708_v48 = vpop.eup %9707 }
 0xc73   :  { %v9710_v23 = vpop.eup %9709  ;;  %v6436_v24 = vmul.f32 %v9708_v48, %v9700_v18 }
 0xc74   :  { %v9712_v1 = vpop.eup %9711  ;;  %v6437_v4 = vmul.f32 %v9710_v23, %v9704_v27 }
 0xc75   :  { %v9714_v15 = vpop.eup %9713  ;;  %v6438_v49 = vadd.f32 %v6436_v24, %v6434_v50  ;;  %v6428_v29 = vadd.f32 1.0, %v9712_v1 }
 0xc76   :  { %v6439_v60 = vadd.f32 %v6437_v4, %v6435_v5  ;;  %v6429_v53 = vadd.f32 1.0, %v9714_v15 }
 0xc77   :  { %9715 = vtanh.f32 %v6438_v49 }
 0xc78   :  { %9717 = vrcp.f32 %v6428_v29 }
 0xc79   :  { %9719 = vtanh.f32 %v6439_v60 }
 0xc7a   :  { %9721 = vrcp.f32 %v6429_v53 }
 0xc81   :  { %v9716_v8 = vpop.eup %9715 }
 0xc82   :  { %v9718_v59 = vpop.eup %9717 }
 0xc83   :  { %v9720_v61 = vpop.eup %9719  ;;  %v6442_v55 = vmul.f32 %v9718_v59, %v9716_v8 }
 0xc84   :  { %v9722_v9 = vpop.eup %9721 }
 0xc85   :  { %v6443_v26 = vmul.f32 %v9722_v9, %v9720_v61 }
 0xc87   :  { %v6446_v62 = vcombine.low %v6442_v55, %v6443_v26 }
 0xc89   :  { %6832 = vst.sshfl [vmem:[#allocation2 + $0x24] sm:$0x33 pattern:$0x76325410] %v6446_v62 }
 0xc90   :  { %v6466_v56 = vld [vmem:[#allocation2 + $0x24] sm:$0xf] }
 0xc91   :  { %v6495_v30 = vmul.f32 %v9987_v20, %v6466_v56 }
 0xc93   :  { %v6584_v57 = vrot.slane %v6495_v30, %v9984_v63 }
 0xc95   :  { %v6585_v3 = vcombine.high %v6584_v57, %v6584_v57  ;;  %v6652_v58 = vsel %vm6606_vm0, %v6584_v57, 0.0 }
 0xc97   :  { %v6653_v0 = vsel %vm6606_vm0, %v6585_v3, 0.0 }
 0xc98   :  { %v6654_v54 = vadd.f32 %v6653_v0, %v6652_v58 }
 0xc9a   :  { %6655 = vadd.xlane.f32.xlu0 %v6654_v54 }
 0xd27   :  { %v6656_v6 = vpop.xlane.xlu0 %6655 }
 0xd28   :  { %v6676_v7 = vadd.f32 %v10312_v40, %v6656_v6 }
 0xd2a   :  { %v6728_v20 = vrot.slane %v6676_v7, %v10310_v44 }
 0xd2c   :  { %v6743_v63 = vsel %vm6729_vm1, %v6728_v20, %v6724_v12 }
 0xd2d   :  { %6749 = vst.msk [vmem:[%s10365_s8 + $0x8] sm:$0x3] %vm6748_vm9, %v6743_v63 }
 0xd2e   :  { %6754 = vsyncpa [#allocation5], 1 }
 0xd2f   :  { %6755 = vsyncpa [#allocation7], 1 }

</bundles_post_ra>
